<compile_context>
chip_gen: v6e
topology: v6e:2x2x1
jax: 0.10.0
libtpu: 0.0.40
codegen_flags: <defaults>
</compile_context>

<pallas_src>
import functools

import jax
import jax.numpy as jnp
from jax import lax
from jax.experimental import pallas as pl
from jax.experimental.pallas import tpu as pltpu

DIM = 32          # feature channels
ESA_F = 16        # ESA bottleneck channels
N_BLOCKS = 8
IN_NC = 3
OUT_NC = 3
UPSCALE = 4
HEAD_CIN = 8      # head input channels zero-padded 3 -> 8 (zero weights on pad)
ACT_DTYPE = jnp.bfloat16   # HBM storage dtype for activations


# ---------------------------------------------------------------------------
# "padded-flat" activation layout
#
#   (N, C, H, W)  ->  (N, C, L),  L = (H+2)*(W+2), flat index p = y*(W+2)+x of
#   the zero-padded frame.  The 1-pixel zero border ring is kept in the tensor
#   at all times, so a 3x3 / pad=1 conv is exactly
#       out[p] = sum_tap  W_tap @ in[p + s_tap],   s_tap = (dy-1)*(W+2)+(dx-1)
#   for interior p; border outputs are re-zeroed with `mask` to preserve the
#   invariant for the next layer.
# ---------------------------------------------------------------------------
def to_pf(x_nchw, dtype=ACT_DTYPE):
    n, c, h, w = x_nchw.shape
    xp = jnp.pad(x_nchw, ((0, 0), (0, 0), (1, 1), (1, 1)))
    return xp.reshape(n, c, (h + 2) * (w + 2)).astype(dtype)


def from_pf(x_pf, h, w, dtype=jnp.float32):
    n, c, _ = x_pf.shape
    x = x_pf.reshape(n, c, h + 2, w + 2)[:, :, 1:h + 1, 1:w + 1]
    return x.astype(dtype)


def interior_mask(h, w):
    m = jnp.zeros((h + 2, w + 2), jnp.float32).at[1:h + 1, 1:w + 1].set(1.0)
    return m.reshape(1, (h + 2) * (w + 2))


def _cparams(l):
    # Explicit VMEM budget (review: v7x has 64 MiB physical / 32 MiB scoped).
    est = 1600 * int(l) + (8 << 20)
    return pltpu.CompilerParams(
        dimension_semantics=("parallel",),
        vmem_limit_bytes=int(min(max(est, 32 << 20), 64 << 20)),
    )


# ---------------------------------------------------------------------------
# in-kernel helpers (operate on VMEM-resident values only)
# ---------------------------------------------------------------------------
def _tap_views(x, wp):
    """9 shifted views of x (C, L): view_t[:, p] == x_ext[:, p + s_tap]."""
    c, l = x.shape
    pad = wp + 1
    z = jnp.zeros((c, pad), x.dtype)
    xe = jnp.concatenate([z, x, z], axis=-1)     # (C, L + 2*pad), VMEM only
    views = []
    for dy in range(3):
        for dx in range(3):
            s = (dy - 1) * wp + (dx - 1)
            views.append(xe[:, pad + s:pad + s + l])
    return views


def _acc3x3(x, w_ref, wp):
    """3x3 conv on the padded-flat map: sum of 9 (Cout,Cin)@(Cin,L) matmuls."""
    acc = None
    for t, v in enumerate(_tap_views(x, wp)):
        p = jnp.dot(w_ref[t], v, preferred_element_type=jnp.float32)
        acc = p if acc is None else acc + p
    return acc


# ---------------------------------------------------------------------------
# Pallas kernels
# ---------------------------------------------------------------------------
def _conv3x3_kernel(x_ref, w_ref, b_ref, m_ref, o_ref, *, wp):
    x = x_ref[0].astype(jnp.float32)                       # (Cin, L)
    y = _acc3x3(x, w_ref, wp) + b_ref[...]
    o_ref[0] = (y * m_ref[...]).astype(o_ref.dtype)


def _eeb_front_kernel(x_ref, w1_ref, b1_ref, a1_ref, w2_ref, b2_ref,
                      wc_ref, bc_ref, m_ref, y_ref, c1_ref, *, wp):
    m = m_ref[...]
    x = x_ref[0].astype(jnp.float32)                       # (DIM, L)
    # eec1: 3x3 conv + per-channel PReLU
    y1 = _acc3x3(x, w1_ref, wp) + b1_ref[...]
    y1 = jnp.where(y1 >= 0.0, y1, y1 * a1_ref[...]) * m
    # eec2: 3x3 conv (linear) -- intermediate never leaves VMEM
    y2 = (_acc3x3(y1, w2_ref, wp) + b2_ref[...]) * m
    y_ref[0] = y2.astype(y_ref.dtype)
    # ESA conv1: 1x1  DIM -> ESA_F
    c1 = (jnp.dot(wc_ref[...], y2, preferred_element_type=jnp.float32)
          + bc_ref[...]) * m
    c1_ref[0] = c1.astype(c1_ref.dtype)


def _esa_gate_kernel(c3_ref, c1_ref, x_ref, w_ref, b_ref, m_ref, o_ref):
    # conv4(c3 + c1_) -> sigmoid -> x * gate   (all fused)
    a = c3_ref[0].astype(jnp.float32) + c1_ref[0].astype(jnp.float32)
    y = jnp.dot(w_ref[...], a.astype(w_ref.dtype),
                preferred_element_type=jnp.float32) + b_ref[...]
    g = jax.nn.sigmoid(y)
    o = x_ref[0].astype(jnp.float32) * g * m_ref[...]
    o_ref[0] = o.astype(o_ref.dtype)


def _conv1x1_res_kernel(x_ref, w_ref, b_ref, r_ref, m_ref, o_ref):
    y = jnp.dot(w_ref[...], x_ref[0],
                preferred_element_type=jnp.float32) + b_ref[...]
    o_ref[0] = ((y + r_ref[0].astype(jnp.float32)) * m_ref[...]).astype(o_ref.dtype)


# ---------------------------------------------------------------------------
# pallas_call wrappers
# ---------------------------------------------------------------------------
def conv3x3_pf(x_pf, w_taps, b, mask, wp, out_dtype=ACT_DTYPE):
    n, cin, l = x_pf.shape
    cout = w_taps.shape[1]
    return pl.pallas_call(
        functools.partial(_conv3x3_kernel, wp=wp),
        out_shape=jax.ShapeDtypeStruct((n, cout, l), out_dtype),
        grid=(n,),
        in_specs=[
            pl.BlockSpec((1, cin, l), lambda i: (i, 0, 0)),
            pl.BlockSpec((9, cout, cin), lambda i: (0, 0, 0)),
            pl.BlockSpec((cout, 1), lambda i: (0, 0)),
            pl.BlockSpec((1, l), lambda i: (0, 0)),
        ],
        out_specs=pl.BlockSpec((1, cout, l), lambda i: (i, 0, 0)),
        compiler_params=_cparams(l),
    )(x_pf, w_taps, b, mask)


def eeb_front(x_pf, bp, mask, wp):
    n, _, l = x_pf.shape
    y, c1 = pl.pallas_call(
        functools.partial(_eeb_front_kernel, wp=wp),
        out_shape=(jax.ShapeDtypeStruct((n, DIM, l), ACT_DTYPE),
                   jax.ShapeDtypeStruct((n, ESA_F, l), ACT_DTYPE)),
        grid=(n,),
        in_specs=[
            pl.BlockSpec((1, DIM, l), lambda i: (i, 0, 0)),
            pl.BlockSpec((9, DIM, DIM), lambda i: (0, 0, 0)),
            pl.BlockSpec((DIM, 1), lambda i: (0, 0)),
            pl.BlockSpec((DIM, 1), lambda i: (0, 0)),
            pl.BlockSpec((9, DIM, DIM), lambda i: (0, 0, 0)),
            pl.BlockSpec((DIM, 1), lambda i: (0, 0)),
            pl.BlockSpec((ESA_F, DIM), lambda i: (0, 0)),
            pl.BlockSpec((ESA_F, 1), lambda i: (0, 0)),
            pl.BlockSpec((1, l), lambda i: (0, 0)),
        ],
        out_specs=(pl.BlockSpec((1, DIM, l), lambda i: (i, 0, 0)),
                   pl.BlockSpec((1, ESA_F, l), lambda i: (i, 0, 0))),
        compiler_params=_cparams(l),
    )(x_pf, bp["w1t"], bp["b1"], bp["a1"], bp["w2t"], bp["b2"],
      bp["wc1"], bp["bc1"], mask)
    return y, c1


def esa_gate(c3_arg, c1_pf, x_pf, w4, b4, mask):
    n, c, l = x_pf.shape
    f = c1_pf.shape[1]
    lc = c3_arg.shape[2]        # L, or 1 for the broadcast (1x1 pooled) case
    return pl.pallas_call(
        _esa_gate_kernel,
        out_shape=jax.ShapeDtypeStruct((n, c, l), ACT_DTYPE),
        grid=(n,),
        in_specs=[
            pl.BlockSpec((1, f, lc), lambda i: (i, 0, 0)),
            pl.BlockSpec((1, f, l), lambda i: (i, 0, 0)),
            pl.BlockSpec((1, c, l), lambda i: (i, 0, 0)),
            pl.BlockSpec((c, f), lambda i: (0, 0)),
            pl.BlockSpec((c, 1), lambda i: (0, 0)),
            pl.BlockSpec((1, l), lambda i: (0, 0)),
        ],
        out_specs=pl.BlockSpec((1, c, l), lambda i: (i, 0, 0)),
        input_output_aliases={2: 0},   # gate operand buffer reused as output
        compiler_params=_cparams(l),
    )(c3_arg, c1_pf, x_pf, w4, b4, mask)


def conv1x1_residual(x_pf, w, b, res_pf, mask):
    n, c, l = x_pf.shape
    return pl.pallas_call(
        _conv1x1_res_kernel,
        out_shape=jax.ShapeDtypeStruct((n, c, l), ACT_DTYPE),
        grid=(n,),
        in_specs=[
            pl.BlockSpec((1, c, l), lambda i: (i, 0, 0)),
            pl.BlockSpec((c, c), lambda i: (0, 0)),
            pl.BlockSpec((c, 1), lambda i: (0, 0)),
            pl.BlockSpec((1, c, l), lambda i: (i, 0, 0)),
            pl.BlockSpec((1, l), lambda i: (0, 0)),
        ],
        out_specs=pl.BlockSpec((1, c, l), lambda i: (i, 0, 0)),
        input_output_aliases={3: 0},   # residual operand buffer reused as output
        compiler_params=_cparams(l),
    )(x_pf, w, b, res_pf, mask)


# ---------------------------------------------------------------------------
# tiny ESA spatial path + glue (plain XLA, per review)
# ---------------------------------------------------------------------------
def xla_conv_nhwc(x, w_pt, b, k, stride, pad):
    n, h, w, c = x.shape
    cout = w_pt.shape[0]
    xp = jnp.pad(x, ((0, 0), (pad, pad), (pad, pad), (0, 0)))
    ho = (h + 2 * pad - k) // stride + 1
    wo = (w + 2 * pad - k) // stride + 1
    cols = []
    for ky in range(k):
        for kx in range(k):
            cols.append(xp[:, ky:ky + stride * ho:stride, kx:kx + stride * wo:stride, :])
    a = jnp.concatenate(cols, axis=-1).reshape(n * ho * wo, k * k * c)
    wm = jnp.transpose(w_pt, (2, 3, 1, 0)).reshape(k * k * c, cout)
    return (a @ wm + b).reshape(n, ho, wo, cout)


def bilinear_resize(x, ho, wo):  # NHWC, matches F.interpolate(align_corners=False)
    n, h, w, c = x.shape
    if h == ho and w == wo:
        return x
    sy = h / ho
    sx = w / wo
    ys = jnp.maximum((jnp.arange(ho, dtype=jnp.float32) + 0.5) * sy - 0.5, 0.0)
    xs = jnp.maximum((jnp.arange(wo, dtype=jnp.float32) + 0.5) * sx - 0.5, 0.0)
    y0 = jnp.minimum(jnp.floor(ys).astype(jnp.int32), h - 1)
    x0 = jnp.minimum(jnp.floor(xs).astype(jnp.int32), w - 1)
    y1 = jnp.minimum(y0 + 1, h - 1)
    x1 = jnp.minimum(x0 + 1, w - 1)
    wy = (ys - y0.astype(jnp.float32)).reshape(1, ho, 1, 1)
    wx = (xs - x0.astype(jnp.float32)).reshape(1, 1, wo, 1)
    r0 = x[:, y0]
    r1 = x[:, y1]
    top = r0[:, :, x0] * (1.0 - wx) + r0[:, :, x1] * wx
    bot = r1[:, :, x0] * (1.0 - wx) + r1[:, :, x1] * wx
    return top * (1.0 - wy) + bot * wy


def pixel_shuffle_nchw(t, r):
    n, c, h, w = t.shape
    co = c // (r * r)
    t = t.reshape(n, co, r, r, h, w)
    t = jnp.transpose(t, (0, 1, 4, 2, 5, 3))
    return t.reshape(n, co, h * r, w * r)


# ---------------------------------------------------------------------------
# model forward
# ---------------------------------------------------------------------------
def eeb_forward(x_pf, bp, mask, wp, h, w):
    n = x_pf.shape[0]
    # eec1 -> eec2 -> ESA.conv1 fused in one Pallas kernel
    y_pf, c1_pf = eeb_front(x_pf, bp, mask, wp)
    # ESA small spatial path (stride-2 conv, 7x7/3 maxpool, 3x3 conv, resize)
    # runs in plain XLA: tiny tensors, not worth per-pallas_call overhead.
    c1_nhwc = jnp.transpose(from_pf(c1_pf, h, w), (0, 2, 3, 1))
    c2 = xla_conv_nhwc(c1_nhwc, bp["esa_w2"], bp["esa_b2"], 3, 2, 0)
    cpool = lax.reduce_window(c2, -jnp.inf, lax.max,
                              (1, 7, 7, 1), (1, 3, 3, 1), "VALID")
    c3 = xla_conv_nhwc(cpool, bp["esa_w3"], bp["esa_b3"], 3, 1, 1)
    if c3.shape[1] == 1 and c3.shape[2] == 1:
        # bilinear upsample of a 1x1 map == broadcast: feed the per-image value
        # directly to the gating kernel and broadcast inside VMEM.
        c3_arg = jnp.transpose(c3.reshape(n, 1, ESA_F), (0, 2, 1)).astype(ACT_DTYPE)
    else:
        c3r = bilinear_resize(c3, h, w)
        c3_arg = to_pf(jnp.transpose(c3r, (0, 3, 1, 2)))
    # ESA conv4 + sigmoid + (c3 + c1_) pre-add + gating multiply fused
    return esa_gate(c3_arg, c1_pf, y_pf, bp["esa_w4"], bp["esa_b4"], mask)


def eecnet_forward(x_nchw, params):
    n, _, h, w = x_nchw.shape
    wp = w + 2
    mask = interior_mask(h, w)

    x8 = jnp.pad(x_nchw.astype(jnp.float32),
                 ((0, 0), (0, HEAD_CIN - IN_NC), (0, 0), (0, 0)))
    x_pf = to_pf(x8)                                             # (N, 8, L) bf16

    fea = conv3x3_pf(x_pf, params["head_wt"], params["head_b"], mask, wp)
    out0 = fea
    for bp in params["blocks"]:
        fea = eeb_forward(fea, bp, mask, wp, h, w)
    out = conv1x1_residual(fea, params["c1x1_w"], params["c1x1_b"], out0, mask)
    tail = conv3x3_pf(out, params["tail_wt"], params["tail_b"], mask, wp,
                      out_dtype=jnp.float32)                     # (N, 48, L) f32
    return pixel_shuffle_nchw(from_pf(tail, h, w), UPSCALE)      # NCHW output


# ---------------------------------------------------------------------------
# deterministic parameter init (PyTorch-like uniform(-1/sqrt(fan_in), ...))
# ---------------------------------------------------------------------------
def prep_w3x3(w_pt, cin_pad=None):
    cout, cin = w_pt.shape[0], w_pt.shape[1]
    w = jnp.transpose(w_pt, (2, 3, 0, 1)).reshape(9, cout, cin)  # tap = dy*3+dx
    if cin_pad is not None and cin_pad > cin:
        w = jnp.pad(w, ((0, 0), (0, 0), (0, cin_pad - cin)))
    return w.astype(jnp.float32)


def prep_bias(b):
    return jnp.asarray(b, jnp.float32).reshape(-1, 1)


def _conv_init(key, cout, cin, k):
    k1, k2 = jax.random.split(key)
    bound = 1.0 / ((cin * k * k) ** 0.5)
    w = jax.random.uniform(k1, (cout, cin, k, k), jnp.float32, -bound, bound)
    b = jax.random.uniform(k2, (cout,), jnp.float32, -bound, bound)
    return w, b


def init_params(key):
    keys = iter(jax.random.split(key, 8 + 8 * N_BLOCKS))
    p = {}
    hw, hb = _conv_init(next(keys), DIM, IN_NC, 3)
    p["head_wt"], p["head_b"] = prep_w3x3(hw, cin_pad=HEAD_CIN), prep_bias(hb)
    blocks = []
    for _ in range(N_BLOCKS):
        bp = {}
        w1, b1 = _conv_init(next(keys), DIM, DIM, 3)
        bp["w1t"], bp["b1"] = prep_w3x3(w1), prep_bias(b1)
        bp["a1"] = jnp.full((DIM, 1), 0.25, jnp.float32)          # PReLU default
        w2, b2 = _conv_init(next(keys), DIM, DIM, 3)
        bp["w2t"], bp["b2"] = prep_w3x3(w2), prep_bias(b2)
        wc1, bc1 = _conv_init(next(keys), ESA_F, DIM, 1)
        bp["wc1"], bp["bc1"] = wc1[:, :, 0, 0].astype(jnp.float32), prep_bias(bc1)
        bp["esa_w2"], bp["esa_b2"] = _conv_init(next(keys), ESA_F, ESA_F, 3)
        bp["esa_w3"], bp["esa_b3"] = _conv_init(next(keys), ESA_F, ESA_F, 3)
        w4, b4 = _conv_init(next(keys), DIM, ESA_F, 1)
        bp["esa_w4"], bp["esa_b4"] = w4[:, :, 0, 0].astype(ACT_DTYPE), prep_bias(b4)
        blocks.append(bp)
    p["blocks"] = blocks
    cw, cb = _conv_init(next(keys), DIM, DIM, 1)
    p["c1x1_w"], p["c1x1_b"] = cw[:, :, 0, 0].astype(ACT_DTYPE), prep_bias(cb)
    tw, tb = _conv_init(next(keys), OUT_NC * UPSCALE * UPSCALE, DIM, 3)
    p["tail_wt"], p["tail_b"] = prep_w3x3(tw), prep_bias(tb)
    return p


# ---------------------------------------------------------------------------
if __name__ == "__main__":
    key = jax.random.PRNGKey(0)
    kx, kp = jax.random.split(key)
    # Small but valid size: ESA needs H, W >= 15 so the 7x7/3 pool is nonempty.
    x = jax.random.normal(kx, (2, IN_NC, 16, 16), jnp.float32)
    params = init_params(kp)

    fwd = jax.jit(eecnet_forward)
    y = jax.block_until_ready(fwd(x, params))

    assert y.shape == (2, OUT_NC, 16 * UPSCALE, 16 * UPSCALE), y.shape
    assert bool(jnp.all(jnp.isfinite(y)))
    print("KERNEL_OK")
</pallas_src>

<mosaic_0001>
module attributes {stable_mosaic.version = 11 : i64} {
  func.func @_eeb_front_kernel(%arg0: i32, %arg1: memref<1x32x324xbf16, #tpu.memory_space<vmem>>, %arg2: memref<9x32x32xf32, #tpu.memory_space<vmem>>, %arg3: memref<32x1xf32, #tpu.memory_space<vmem>>, %arg4: memref<32x1xf32, #tpu.memory_space<vmem>>, %arg5: memref<9x32x32xf32, #tpu.memory_space<vmem>>, %arg6: memref<32x1xf32, #tpu.memory_space<vmem>>, %arg7: memref<16x32xf32, #tpu.memory_space<vmem>>, %arg8: memref<16x1xf32, #tpu.memory_space<vmem>>, %arg9: memref<1x324xf32, #tpu.memory_space<vmem>>, %arg10: memref<1x32x324xbf16, #tpu.memory_space<vmem>>, %arg11: memref<1x16x324xbf16, #tpu.memory_space<vmem>>) attributes {dimension_semantics = [#tpu.dimension_semantics<parallel>], iteration_bounds = array<i64: 2>, scalar_prefetch = 0 : i64, scratch_operands = 0 : i64, tpu.core_type = #tpu.core_type<tc>, window_params = [{transform_indices = @transform_0, window_bounds = array<i64: 1, 32, 324>}, {pipeline_mode = #tpu.pipeline_mode<synchronous>, transform_indices = @transform_1, window_bounds = array<i64: 9, 32, 32>}, {pipeline_mode = #tpu.pipeline_mode<synchronous>, transform_indices = @transform_2, window_bounds = array<i64: 32, 1>}, {pipeline_mode = #tpu.pipeline_mode<synchronous>, transform_indices = @transform_3, window_bounds = array<i64: 32, 1>}, {pipeline_mode = #tpu.pipeline_mode<synchronous>, transform_indices = @transform_4, window_bounds = array<i64: 9, 32, 32>}, {pipeline_mode = #tpu.pipeline_mode<synchronous>, transform_indices = @transform_5, window_bounds = array<i64: 32, 1>}, {pipeline_mode = #tpu.pipeline_mode<synchronous>, transform_indices = @transform_6, window_bounds = array<i64: 16, 32>}, {pipeline_mode = #tpu.pipeline_mode<synchronous>, transform_indices = @transform_7, window_bounds = array<i64: 16, 1>}, {pipeline_mode = #tpu.pipeline_mode<synchronous>, transform_indices = @transform_8, window_bounds = array<i64: 1, 324>}, {transform_indices = @transform_9, window_bounds = array<i64: 1, 32, 324>}, {transform_indices = @transform_10, window_bounds = array<i64: 1, 16, 324>}]} {
    %c0 = arith.constant 0 : index
    %c0_0 = arith.constant 0 : index
    %0 = vector.load %arg9[%c0, %c0_0] : memref<1x324xf32, #tpu.memory_space<vmem>>, vector<1x324xf32>
    %c0_1 = arith.constant 0 : index
    %c0_2 = arith.constant 0 : index
    %c0_3 = arith.constant 0 : index
    %1 = vector.load %arg1[%c0_1, %c0_2, %c0_3] : memref<1x32x324xbf16, #tpu.memory_space<vmem>>, vector<1x32x324xbf16>
    %2 = vector.shape_cast %1 : vector<1x32x324xbf16> to vector<32x324xbf16>
    %3 = arith.extf %2 : vector<32x324xbf16> to vector<32x324xf32>
    %cst = arith.constant 0.000000e+00 : f32
    %4 = vector.broadcast %cst : f32 to vector<32x19xf32>
    %5 = tpu.concatenate %4, %3, %4 in 1 : vector<32x19xf32>, vector<32x324xf32>, vector<32x19xf32> -> vector<32x362xf32>
    %6 = vector.extract_strided_slice %5 {offsets = [0, 0], sizes = [32, 324], strides = [1, 1]} : vector<32x362xf32> to vector<32x324xf32>
    %7 = vector.extract_strided_slice %5 {offsets = [0, 1], sizes = [32, 324], strides = [1, 1]} : vector<32x362xf32> to vector<32x324xf32>
    %8 = vector.extract_strided_slice %5 {offsets = [0, 2], sizes = [32, 324], strides = [1, 1]} : vector<32x362xf32> to vector<32x324xf32>
    %9 = vector.extract_strided_slice %5 {offsets = [0, 18], sizes = [32, 324], strides = [1, 1]} : vector<32x362xf32> to vector<32x324xf32>
    %10 = vector.extract_strided_slice %5 {offsets = [0, 19], sizes = [32, 324], strides = [1, 1]} : vector<32x362xf32> to vector<32x324xf32>
    %11 = vector.extract_strided_slice %5 {offsets = [0, 20], sizes = [32, 324], strides = [1, 1]} : vector<32x362xf32> to vector<32x324xf32>
    %12 = vector.extract_strided_slice %5 {offsets = [0, 36], sizes = [32, 324], strides = [1, 1]} : vector<32x362xf32> to vector<32x324xf32>
    %13 = vector.extract_strided_slice %5 {offsets = [0, 37], sizes = [32, 324], strides = [1, 1]} : vector<32x362xf32> to vector<32x324xf32>
    %14 = vector.extract_strided_slice %5 {offsets = [0, 38], sizes = [32, 324], strides = [1, 1]} : vector<32x362xf32> to vector<32x324xf32>
    %c0_4 = arith.constant 0 : index
    %c0_5 = arith.constant 0 : index
    %c0_6 = arith.constant 0 : index
    %15 = vector.load %arg2[%c0_4, %c0_5, %c0_6] : memref<9x32x32xf32, #tpu.memory_space<vmem>>, vector<1x32x32xf32>
    %16 = vector.shape_cast %15 : vector<1x32x32xf32> to vector<32x32xf32>
    %cst_7 = arith.constant dense<0.000000e+00> : vector<32x324xf32>
    %17 = tpu.matmul %16, %6, %cst_7 {dimension_numbers = #tpu.dot_dimension_numbers<[1], [0], [0], [1], [0, 0, 1, 1], [], []>} : vector<32x32xf32>, vector<32x324xf32>, vector<32x324xf32> -> vector<32x324xf32>
    %c1 = arith.constant 1 : index
    %c0_8 = arith.constant 0 : index
    %c0_9 = arith.constant 0 : index
    %18 = vector.load %arg2[%c1, %c0_8, %c0_9] : memref<9x32x32xf32, #tpu.memory_space<vmem>>, vector<1x32x32xf32>
    %19 = vector.shape_cast %18 : vector<1x32x32xf32> to vector<32x32xf32>
    %cst_10 = arith.constant dense<0.000000e+00> : vector<32x324xf32>
    %20 = tpu.matmul %19, %7, %cst_10 {dimension_numbers = #tpu.dot_dimension_numbers<[1], [0], [0], [1], [0, 0, 1, 1], [], []>} : vector<32x32xf32>, vector<32x324xf32>, vector<32x324xf32> -> vector<32x324xf32>
    %21 = arith.addf %17, %20 : vector<32x324xf32>
    %c2 = arith.constant 2 : index
    %c0_11 = arith.constant 0 : index
    %c0_12 = arith.constant 0 : index
    %22 = vector.load %arg2[%c2, %c0_11, %c0_12] : memref<9x32x32xf32, #tpu.memory_space<vmem>>, vector<1x32x32xf32>
    %23 = vector.shape_cast %22 : vector<1x32x32xf32> to vector<32x32xf32>
    %cst_13 = arith.constant dense<0.000000e+00> : vector<32x324xf32>
    %24 = tpu.matmul %23, %8, %cst_13 {dimension_numbers = #tpu.dot_dimension_numbers<[1], [0], [0], [1], [0, 0, 1, 1], [], []>} : vector<32x32xf32>, vector<32x324xf32>, vector<32x324xf32> -> vector<32x324xf32>
    %25 = arith.addf %21, %24 : vector<32x324xf32>
    %c3 = arith.constant 3 : index
    %c0_14 = arith.constant 0 : index
    %c0_15 = arith.constant 0 : index
    %26 = vector.load %arg2[%c3, %c0_14, %c0_15] : memref<9x32x32xf32, #tpu.memory_space<vmem>>, vector<1x32x32xf32>
    %27 = vector.shape_cast %26 : vector<1x32x32xf32> to vector<32x32xf32>
    %cst_16 = arith.constant dense<0.000000e+00> : vector<32x324xf32>
    %28 = tpu.matmul %27, %9, %cst_16 {dimension_numbers = #tpu.dot_dimension_numbers<[1], [0], [0], [1], [0, 0, 1, 1], [], []>} : vector<32x32xf32>, vector<32x324xf32>, vector<32x324xf32> -> vector<32x324xf32>
    %29 = arith.addf %25, %28 : vector<32x324xf32>
    %c4 = arith.constant 4 : index
    %c0_17 = arith.constant 0 : index
    %c0_18 = arith.constant 0 : index
    %30 = vector.load %arg2[%c4, %c0_17, %c0_18] : memref<9x32x32xf32, #tpu.memory_space<vmem>>, vector<1x32x32xf32>
    %31 = vector.shape_cast %30 : vector<1x32x32xf32> to vector<32x32xf32>
    %cst_19 = arith.constant dense<0.000000e+00> : vector<32x324xf32>
    %32 = tpu.matmul %31, %10, %cst_19 {dimension_numbers = #tpu.dot_dimension_numbers<[1], [0], [0], [1], [0, 0, 1, 1], [], []>} : vector<32x32xf32>, vector<32x324xf32>, vector<32x324xf32> -> vector<32x324xf32>
    %33 = arith.addf %29, %32 : vector<32x324xf32>
    %c5 = arith.constant 5 : index
    %c0_20 = arith.constant 0 : index
    %c0_21 = arith.constant 0 : index
    %34 = vector.load %arg2[%c5, %c0_20, %c0_21] : memref<9x32x32xf32, #tpu.memory_space<vmem>>, vector<1x32x32xf32>
    %35 = vector.shape_cast %34 : vector<1x32x32xf32> to vector<32x32xf32>
    %cst_22 = arith.constant dense<0.000000e+00> : vector<32x324xf32>
    %36 = tpu.matmul %35, %11, %cst_22 {dimension_numbers = #tpu.dot_dimension_numbers<[1], [0], [0], [1], [0, 0, 1, 1], [], []>} : vector<32x32xf32>, vector<32x324xf32>, vector<32x324xf32> -> vector<32x324xf32>
    %37 = arith.addf %33, %36 : vector<32x324xf32>
    %c6 = arith.constant 6 : index
    %c0_23 = arith.constant 0 : index
    %c0_24 = arith.constant 0 : index
    %38 = vector.load %arg2[%c6, %c0_23, %c0_24] : memref<9x32x32xf32, #tpu.memory_space<vmem>>, vector<1x32x32xf32>
    %39 = vector.shape_cast %38 : vector<1x32x32xf32> to vector<32x32xf32>
    %cst_25 = arith.constant dense<0.000000e+00> : vector<32x324xf32>
    %40 = tpu.matmul %39, %12, %cst_25 {dimension_numbers = #tpu.dot_dimension_numbers<[1], [0], [0], [1], [0, 0, 1, 1], [], []>} : vector<32x32xf32>, vector<32x324xf32>, vector<32x324xf32> -> vector<32x324xf32>
    %41 = arith.addf %37, %40 : vector<32x324xf32>
    %c7 = arith.constant 7 : index
    %c0_26 = arith.constant 0 : index
    %c0_27 = arith.constant 0 : index
    %42 = vector.load %arg2[%c7, %c0_26, %c0_27] : memref<9x32x32xf32, #tpu.memory_space<vmem>>, vector<1x32x32xf32>
    %43 = vector.shape_cast %42 : vector<1x32x32xf32> to vector<32x32xf32>
    %cst_28 = arith.constant dense<0.000000e+00> : vector<32x324xf32>
    %44 = tpu.matmul %43, %13, %cst_28 {dimension_numbers = #tpu.dot_dimension_numbers<[1], [0], [0], [1], [0, 0, 1, 1], [], []>} : vector<32x32xf32>, vector<32x324xf32>, vector<32x324xf32> -> vector<32x324xf32>
    %45 = arith.addf %41, %44 : vector<32x324xf32>
    %c8 = arith.constant 8 : index
    %c0_29 = arith.constant 0 : index
    %c0_30 = arith.constant 0 : index
    %46 = vector.load %arg2[%c8, %c0_29, %c0_30] : memref<9x32x32xf32, #tpu.memory_space<vmem>>, vector<1x32x32xf32>
    %47 = vector.shape_cast %46 : vector<1x32x32xf32> to vector<32x32xf32>
    %cst_31 = arith.constant dense<0.000000e+00> : vector<32x324xf32>
    %48 = tpu.matmul %47, %14, %cst_31 {dimension_numbers = #tpu.dot_dimension_numbers<[1], [0], [0], [1], [0, 0, 1, 1], [], []>} : vector<32x32xf32>, vector<32x324xf32>, vector<32x324xf32> -> vector<32x324xf32>
    %49 = arith.addf %45, %48 : vector<32x324xf32>
    %c0_32 = arith.constant 0 : index
    %c0_33 = arith.constant 0 : index
    %50 = vector.load %arg3[%c0_32, %c0_33] : memref<32x1xf32, #tpu.memory_space<vmem>>, vector<32x1xf32>
    %51 = vector.broadcast %50 : vector<32x1xf32> to vector<32x324xf32>
    %52 = arith.addf %49, %51 : vector<32x324xf32>
    %cst_34 = arith.constant 0.000000e+00 : f32
    %53 = vector.broadcast %cst_34 : f32 to vector<32x324xf32>
    %54 = arith.cmpf oge, %52, %53 : vector<32x324xf32>
    %c0_35 = arith.constant 0 : index
    %c0_36 = arith.constant 0 : index
    %55 = vector.load %arg4[%c0_35, %c0_36] : memref<32x1xf32, #tpu.memory_space<vmem>>, vector<32x1xf32>
    %56 = vector.broadcast %55 : vector<32x1xf32> to vector<32x324xf32>
    %57 = arith.mulf %52, %56 : vector<32x324xf32>
    %58 = arith.select %54, %52, %57 : vector<32x324xi1>, vector<32x324xf32>
    %59 = vector.broadcast %0 : vector<1x324xf32> to vector<32x324xf32>
    %60 = arith.mulf %58, %59 : vector<32x324xf32>
    %cst_37 = arith.constant 0.000000e+00 : f32
    %61 = vector.broadcast %cst_37 : f32 to vector<32x19xf32>
    %62 = tpu.concatenate %61, %60, %61 in 1 : vector<32x19xf32>, vector<32x324xf32>, vector<32x19xf32> -> vector<32x362xf32>
    %63 = vector.extract_strided_slice %62 {offsets = [0, 0], sizes = [32, 324], strides = [1, 1]} : vector<32x362xf32> to vector<32x324xf32>
    %64 = vector.extract_strided_slice %62 {offsets = [0, 1], sizes = [32, 324], strides = [1, 1]} : vector<32x362xf32> to vector<32x324xf32>
    %65 = vector.extract_strided_slice %62 {offsets = [0, 2], sizes = [32, 324], strides = [1, 1]} : vector<32x362xf32> to vector<32x324xf32>
    %66 = vector.extract_strided_slice %62 {offsets = [0, 18], sizes = [32, 324], strides = [1, 1]} : vector<32x362xf32> to vector<32x324xf32>
    %67 = vector.extract_strided_slice %62 {offsets = [0, 19], sizes = [32, 324], strides = [1, 1]} : vector<32x362xf32> to vector<32x324xf32>
    %68 = vector.extract_strided_slice %62 {offsets = [0, 20], sizes = [32, 324], strides = [1, 1]} : vector<32x362xf32> to vector<32x324xf32>
    %69 = vector.extract_strided_slice %62 {offsets = [0, 36], sizes = [32, 324], strides = [1, 1]} : vector<32x362xf32> to vector<32x324xf32>
    %70 = vector.extract_strided_slice %62 {offsets = [0, 37], sizes = [32, 324], strides = [1, 1]} : vector<32x362xf32> to vector<32x324xf32>
    %71 = vector.extract_strided_slice %62 {offsets = [0, 38], sizes = [32, 324], strides = [1, 1]} : vector<32x362xf32> to vector<32x324xf32>
    %c0_38 = arith.constant 0 : index
    %c0_39 = arith.constant 0 : index
    %c0_40 = arith.constant 0 : index
    %72 = vector.load %arg5[%c0_38, %c0_39, %c0_40] : memref<9x32x32xf32, #tpu.memory_space<vmem>>, vector<1x32x32xf32>
    %73 = vector.shape_cast %72 : vector<1x32x32xf32> to vector<32x32xf32>
    %cst_41 = arith.constant dense<0.000000e+00> : vector<32x324xf32>
    %74 = tpu.matmul %73, %63, %cst_41 {dimension_numbers = #tpu.dot_dimension_numbers<[1], [0], [0], [1], [0, 0, 1, 1], [], []>} : vector<32x32xf32>, vector<32x324xf32>, vector<32x324xf32> -> vector<32x324xf32>
    %c1_42 = arith.constant 1 : index
    %c0_43 = arith.constant 0 : index
    %c0_44 = arith.constant 0 : index
    %75 = vector.load %arg5[%c1_42, %c0_43, %c0_44] : memref<9x32x32xf32, #tpu.memory_space<vmem>>, vector<1x32x32xf32>
    %76 = vector.shape_cast %75 : vector<1x32x32xf32> to vector<32x32xf32>
    %cst_45 = arith.constant dense<0.000000e+00> : vector<32x324xf32>
    %77 = tpu.matmul %76, %64, %cst_45 {dimension_numbers = #tpu.dot_dimension_numbers<[1], [0], [0], [1], [0, 0, 1, 1], [], []>} : vector<32x32xf32>, vector<32x324xf32>, vector<32x324xf32> -> vector<32x324xf32>
    %78 = arith.addf %74, %77 : vector<32x324xf32>
    %c2_46 = arith.constant 2 : index
    %c0_47 = arith.constant 0 : index
    %c0_48 = arith.constant 0 : index
    %79 = vector.load %arg5[%c2_46, %c0_47, %c0_48] : memref<9x32x32xf32, #tpu.memory_space<vmem>>, vector<1x32x32xf32>
    %80 = vector.shape_cast %79 : vector<1x32x32xf32> to vector<32x32xf32>
    %cst_49 = arith.constant dense<0.000000e+00> : vector<32x324xf32>
    %81 = tpu.matmul %80, %65, %cst_49 {dimension_numbers = #tpu.dot_dimension_numbers<[1], [0], [0], [1], [0, 0, 1, 1], [], []>} : vector<32x32xf32>, vector<32x324xf32>, vector<32x324xf32> -> vector<32x324xf32>
    %82 = arith.addf %78, %81 : vector<32x324xf32>
    %c3_50 = arith.constant 3 : index
    %c0_51 = arith.constant 0 : index
    %c0_52 = arith.constant 0 : index
    %83 = vector.load %arg5[%c3_50, %c0_51, %c0_52] : memref<9x32x32xf32, #tpu.memory_space<vmem>>, vector<1x32x32xf32>
    %84 = vector.shape_cast %83 : vector<1x32x32xf32> to vector<32x32xf32>
    %cst_53 = arith.constant dense<0.000000e+00> : vector<32x324xf32>
    %85 = tpu.matmul %84, %66, %cst_53 {dimension_numbers = #tpu.dot_dimension_numbers<[1], [0], [0], [1], [0, 0, 1, 1], [], []>} : vector<32x32xf32>, vector<32x324xf32>, vector<32x324xf32> -> vector<32x324xf32>
    %86 = arith.addf %82, %85 : vector<32x324xf32>
    %c4_54 = arith.constant 4 : index
    %c0_55 = arith.constant 0 : index
    %c0_56 = arith.constant 0 : index
    %87 = vector.load %arg5[%c4_54, %c0_55, %c0_56] : memref<9x32x32xf32, #tpu.memory_space<vmem>>, vector<1x32x32xf32>
    %88 = vector.shape_cast %87 : vector<1x32x32xf32> to vector<32x32xf32>
    %cst_57 = arith.constant dense<0.000000e+00> : vector<32x324xf32>
    %89 = tpu.matmul %88, %67, %cst_57 {dimension_numbers = #tpu.dot_dimension_numbers<[1], [0], [0], [1], [0, 0, 1, 1], [], []>} : vector<32x32xf32>, vector<32x324xf32>, vector<32x324xf32> -> vector<32x324xf32>
    %90 = arith.addf %86, %89 : vector<32x324xf32>
    %c5_58 = arith.constant 5 : index
    %c0_59 = arith.constant 0 : index
    %c0_60 = arith.constant 0 : index
    %91 = vector.load %arg5[%c5_58, %c0_59, %c0_60] : memref<9x32x32xf32, #tpu.memory_space<vmem>>, vector<1x32x32xf32>
    %92 = vector.shape_cast %91 : vector<1x32x32xf32> to vector<32x32xf32>
    %cst_61 = arith.constant dense<0.000000e+00> : vector<32x324xf32>
    %93 = tpu.matmul %92, %68, %cst_61 {dimension_numbers = #tpu.dot_dimension_numbers<[1], [0], [0], [1], [0, 0, 1, 1], [], []>} : vector<32x32xf32>, vector<32x324xf32>, vector<32x324xf32> -> vector<32x324xf32>
    %94 = arith.addf %90, %93 : vector<32x324xf32>
    %c6_62 = arith.constant 6 : index
    %c0_63 = arith.constant 0 : index
    %c0_64 = arith.constant 0 : index
    %95 = vector.load %arg5[%c6_62, %c0_63, %c0_64] : memref<9x32x32xf32, #tpu.memory_space<vmem>>, vector<1x32x32xf32>
    %96 = vector.shape_cast %95 : vector<1x32x32xf32> to vector<32x32xf32>
    %cst_65 = arith.constant dense<0.000000e+00> : vector<32x324xf32>
    %97 = tpu.matmul %96, %69, %cst_65 {dimension_numbers = #tpu.dot_dimension_numbers<[1], [0], [0], [1], [0, 0, 1, 1], [], []>} : vector<32x32xf32>, vector<32x324xf32>, vector<32x324xf32> -> vector<32x324xf32>
    %98 = arith.addf %94, %97 : vector<32x324xf32>
    %c7_66 = arith.constant 7 : index
    %c0_67 = arith.constant 0 : index
    %c0_68 = arith.constant 0 : index
    %99 = vector.load %arg5[%c7_66, %c0_67, %c0_68] : memref<9x32x32xf32, #tpu.memory_space<vmem>>, vector<1x32x32xf32>
    %100 = vector.shape_cast %99 : vector<1x32x32xf32> to vector<32x32xf32>
    %cst_69 = arith.constant dense<0.000000e+00> : vector<32x324xf32>
    %101 = tpu.matmul %100, %70, %cst_69 {dimension_numbers = #tpu.dot_dimension_numbers<[1], [0], [0], [1], [0, 0, 1, 1], [], []>} : vector<32x32xf32>, vector<32x324xf32>, vector<32x324xf32> -> vector<32x324xf32>
    %102 = arith.addf %98, %101 : vector<32x324xf32>
    %c8_70 = arith.constant 8 : index
    %c0_71 = arith.constant 0 : index
    %c0_72 = arith.constant 0 : index
    %103 = vector.load %arg5[%c8_70, %c0_71, %c0_72] : memref<9x32x32xf32, #tpu.memory_space<vmem>>, vector<1x32x32xf32>
    %104 = vector.shape_cast %103 : vector<1x32x32xf32> to vector<32x32xf32>
    %cst_73 = arith.constant dense<0.000000e+00> : vector<32x324xf32>
    %105 = tpu.matmul %104, %71, %cst_73 {dimension_numbers = #tpu.dot_dimension_numbers<[1], [0], [0], [1], [0, 0, 1, 1], [], []>} : vector<32x32xf32>, vector<32x324xf32>, vector<32x324xf32> -> vector<32x324xf32>
    %106 = arith.addf %102, %105 : vector<32x324xf32>
    %c0_74 = arith.constant 0 : index
    %c0_75 = arith.constant 0 : index
    %107 = vector.load %arg6[%c0_74, %c0_75] : memref<32x1xf32, #tpu.memory_space<vmem>>, vector<32x1xf32>
    %108 = vector.broadcast %107 : vector<32x1xf32> to vector<32x324xf32>
    %109 = arith.addf %106, %108 : vector<32x324xf32>
    %110 = vector.broadcast %0 : vector<1x324xf32> to vector<32x324xf32>
    %111 = arith.mulf %109, %110 : vector<32x324xf32>
    %112 = arith.truncf %111 : vector<32x324xf32> to vector<32x324xbf16>
    %c0_76 = arith.constant 0 : index
    %c0_77 = arith.constant 0 : index
    %c0_78 = arith.constant 0 : index
    %113 = vector.load %arg10[%c0_76, %c0_77, %c0_78] : memref<1x32x324xbf16, #tpu.memory_space<vmem>>, vector<1x32x324xbf16>
    %114 = vector.shape_cast %113 : vector<1x32x324xbf16> to vector<32x324xbf16>
    %115 = vector.shape_cast %112 : vector<32x324xbf16> to vector<1x32x324xbf16>
    tpu.vector_store %arg10[%c0_76, %c0_77, %c0_78], %115 {strides = array<i32>} : memref<1x32x324xbf16, #tpu.memory_space<vmem>>, vector<1x32x324xbf16>,
    %c0_79 = arith.constant 0 : index
    %c0_80 = arith.constant 0 : index
    %116 = vector.load %arg7[%c0_79, %c0_80] : memref<16x32xf32, #tpu.memory_space<vmem>>, vector<16x32xf32>
    %cst_81 = arith.constant dense<0.000000e+00> : vector<16x324xf32>
    %117 = tpu.matmul %116, %111, %cst_81 {dimension_numbers = #tpu.dot_dimension_numbers<[1], [0], [0], [1], [0, 0, 1, 1], [], []>} : vector<16x32xf32>, vector<32x324xf32>, vector<16x324xf32> -> vector<16x324xf32>
    %c0_82 = arith.constant 0 : index
    %c0_83 = arith.constant 0 : index
    %118 = vector.load %arg8[%c0_82, %c0_83] : memref<16x1xf32, #tpu.memory_space<vmem>>, vector<16x1xf32>
    %119 = vector.broadcast %118 : vector<16x1xf32> to vector<16x324xf32>
    %120 = arith.addf %117, %119 : vector<16x324xf32>
    %121 = vector.broadcast %0 : vector<1x324xf32> to vector<16x324xf32>
    %122 = arith.mulf %120, %121 : vector<16x324xf32>
    %123 = arith.truncf %122 : vector<16x324xf32> to vector<16x324xbf16>
    %c0_84 = arith.constant 0 : index
    %c0_85 = arith.constant 0 : index
    %c0_86 = arith.constant 0 : index
    %124 = vector.load %arg11[%c0_84, %c0_85, %c0_86] : memref<1x16x324xbf16, #tpu.memory_space<vmem>>, vector<1x16x324xbf16>
    %125 = vector.shape_cast %124 : vector<1x16x324xbf16> to vector<16x324xbf16>
    %126 = vector.shape_cast %123 : vector<16x324xbf16> to vector<1x16x324xbf16>
    tpu.vector_store %arg11[%c0_84, %c0_85, %c0_86], %126 {strides = array<i32>} : memref<1x16x324xbf16, #tpu.memory_space<vmem>>, vector<1x16x324xbf16>,
    return
  }
  func.func @transform_0(%arg0: i32) -> (i32, i32, i32) {
    %c0_i32 = arith.constant 0 : i32
    %c0_i32_0 = arith.constant 0 : i32
    %c0_i32_1 = arith.constant 0 : i32
    return %arg0, %c0_i32, %c0_i32_0 : i32, i32, i32
  }
  func.func @transform_1(%arg0: i32) -> (i32, i32, i32) {
    %c0_i32 = arith.constant 0 : i32
    %c0_i32_0 = arith.constant 0 : i32
    %c0_i32_1 = arith.constant 0 : i32
    %c0_i32_2 = arith.constant 0 : i32
    return %c0_i32, %c0_i32_0, %c0_i32_1 : i32, i32, i32
  }
  func.func @transform_2(%arg0: i32) -> (i32, i32) {
    %c0_i32 = arith.constant 0 : i32
    %c0_i32_0 = arith.constant 0 : i32
    %c0_i32_1 = arith.constant 0 : i32
    return %c0_i32, %c0_i32_0 : i32, i32
  }
  func.func @transform_3(%arg0: i32) -> (i32, i32) {
    %c0_i32 = arith.constant 0 : i32
    %c0_i32_0 = arith.constant 0 : i32
    %c0_i32_1 = arith.constant 0 : i32
    return %c0_i32, %c0_i32_0 : i32, i32
  }
  func.func @transform_4(%arg0: i32) -> (i32, i32, i32) {
    %c0_i32 = arith.constant 0 : i32
    %c0_i32_0 = arith.constant 0 : i32
    %c0_i32_1 = arith.constant 0 : i32
    %c0_i32_2 = arith.constant 0 : i32
    return %c0_i32, %c0_i32_0, %c0_i32_1 : i32, i32, i32
  }
  func.func @transform_5(%arg0: i32) -> (i32, i32) {
    %c0_i32 = arith.constant 0 : i32
    %c0_i32_0 = arith.constant 0 : i32
    %c0_i32_1 = arith.constant 0 : i32
    return %c0_i32, %c0_i32_0 : i32, i32
  }
  func.func @transform_6(%arg0: i32) -> (i32, i32) {
    %c0_i32 = arith.constant 0 : i32
    %c0_i32_0 = arith.constant 0 : i32
    %c0_i32_1 = arith.constant 0 : i32
    return %c0_i32, %c0_i32_0 : i32, i32
  }
  func.func @transform_7(%arg0: i32) -> (i32, i32) {
    %c0_i32 = arith.constant 0 : i32
    %c0_i32_0 = arith.constant 0 : i32
    %c0_i32_1 = arith.constant 0 : i32
    return %c0_i32, %c0_i32_0 : i32, i32
  }
  func.func @transform_8(%arg0: i32) -> (i32, i32) {
    %c0_i32 = arith.constant 0 : i32
    %c0_i32_0 = arith.constant 0 : i32
    %c0_i32_1 = arith.constant 0 : i32
    return %c0_i32, %c0_i32_0 : i32, i32
  }
  func.func @transform_9(%arg0: i32) -> (i32, i32, i32) {
    %c0_i32 = arith.constant 0 : i32
    %c0_i32_0 = arith.constant 0 : i32
    %c0_i32_1 = arith.constant 0 : i32
    return %arg0, %c0_i32, %c0_i32_0 : i32, i32, i32
  }
  func.func @transform_10(%arg0: i32) -> (i32, i32, i32) {
    %c0_i32 = arith.constant 0 : i32
    %c0_i32_0 = arith.constant 0 : i32
    %c0_i32_1 = arith.constant 0 : i32
    return %arg0, %c0_i32, %c0_i32_0 : i32, i32, i32
  }
}

module attributes {stable_mosaic.version = 11 : i64} {
  func.func @_conv3x3_kernel(%arg0: i32, %arg1: memref<1x8x324xbf16, #tpu.memory_space<vmem>>, %arg2: memref<9x32x8xf32, #tpu.memory_space<vmem>>, %arg3: memref<32x1xf32, #tpu.memory_space<vmem>>, %arg4: memref<1x324xf32, #tpu.memory_space<vmem>>, %arg5: memref<1x32x324xbf16, #tpu.memory_space<vmem>>) attributes {dimension_semantics = [#tpu.dimension_semantics<parallel>], iteration_bounds = array<i64: 2>, scalar_prefetch = 0 : i64, scratch_operands = 0 : i64, tpu.core_type = #tpu.core_type<tc>, window_params = [{transform_indices = @transform_0, window_bounds = array<i64: 1, 8, 324>}, {pipeline_mode = #tpu.pipeline_mode<synchronous>, transform_indices = @transform_1, window_bounds = array<i64: 9, 32, 8>}, {pipeline_mode = #tpu.pipeline_mode<synchronous>, transform_indices = @transform_2, window_bounds = array<i64: 32, 1>}, {pipeline_mode = #tpu.pipeline_mode<synchronous>, transform_indices = @transform_3, window_bounds = array<i64: 1, 324>}, {transform_indices = @transform_4, window_bounds = array<i64: 1, 32, 324>}]} {
    %c0 = arith.constant 0 : index
    %c0_0 = arith.constant 0 : index
    %c0_1 = arith.constant 0 : index
    %0 = vector.load %arg1[%c0, %c0_0, %c0_1] : memref<1x8x324xbf16, #tpu.memory_space<vmem>>, vector<1x8x324xbf16>
    %1 = vector.shape_cast %0 : vector<1x8x324xbf16> to vector<8x324xbf16>
    %2 = arith.extf %1 : vector<8x324xbf16> to vector<8x324xf32>
    %cst = arith.constant 0.000000e+00 : f32
    %3 = vector.broadcast %cst : f32 to vector<8x19xf32>
    %4 = tpu.concatenate %3, %2, %3 in 1 : vector<8x19xf32>, vector<8x324xf32>, vector<8x19xf32> -> vector<8x362xf32>
    %5 = vector.extract_strided_slice %4 {offsets = [0, 0], sizes = [8, 324], strides = [1, 1]} : vector<8x362xf32> to vector<8x324xf32>
    %6 = vector.extract_strided_slice %4 {offsets = [0, 1], sizes = [8, 324], strides = [1, 1]} : vector<8x362xf32> to vector<8x324xf32>
    %7 = vector.extract_strided_slice %4 {offsets = [0, 2], sizes = [8, 324], strides = [1, 1]} : vector<8x362xf32> to vector<8x324xf32>
    %8 = vector.extract_strided_slice %4 {offsets = [0, 18], sizes = [8, 324], strides = [1, 1]} : vector<8x362xf32> to vector<8x324xf32>
    %9 = vector.extract_strided_slice %4 {offsets = [0, 19], sizes = [8, 324], strides = [1, 1]} : vector<8x362xf32> to vector<8x324xf32>
    %10 = vector.extract_strided_slice %4 {offsets = [0, 20], sizes = [8, 324], strides = [1, 1]} : vector<8x362xf32> to vector<8x324xf32>
    %11 = vector.extract_strided_slice %4 {offsets = [0, 36], sizes = [8, 324], strides = [1, 1]} : vector<8x362xf32> to vector<8x324xf32>
    %12 = vector.extract_strided_slice %4 {offsets = [0, 37], sizes = [8, 324], strides = [1, 1]} : vector<8x362xf32> to vector<8x324xf32>
    %13 = vector.extract_strided_slice %4 {offsets = [0, 38], sizes = [8, 324], strides = [1, 1]} : vector<8x362xf32> to vector<8x324xf32>
    %c0_2 = arith.constant 0 : index
    %c0_3 = arith.constant 0 : index
    %c0_4 = arith.constant 0 : index
    %14 = vector.load %arg2[%c0_2, %c0_3, %c0_4] : memref<9x32x8xf32, #tpu.memory_space<vmem>>, vector<1x32x8xf32>
    %15 = vector.shape_cast %14 : vector<1x32x8xf32> to vector<32x8xf32>
    %cst_5 = arith.constant dense<0.000000e+00> : vector<32x324xf32>
    %16 = tpu.matmul %15, %5, %cst_5 {dimension_numbers = #tpu.dot_dimension_numbers<[1], [0], [0], [1], [0, 0, 1, 1], [], []>} : vector<32x8xf32>, vector<8x324xf32>, vector<32x324xf32> -> vector<32x324xf32>
    %c1 = arith.constant 1 : index
    %c0_6 = arith.constant 0 : index
    %c0_7 = arith.constant 0 : index
    %17 = vector.load %arg2[%c1, %c0_6, %c0_7] : memref<9x32x8xf32, #tpu.memory_space<vmem>>, vector<1x32x8xf32>
    %18 = vector.shape_cast %17 : vector<1x32x8xf32> to vector<32x8xf32>
    %cst_8 = arith.constant dense<0.000000e+00> : vector<32x324xf32>
    %19 = tpu.matmul %18, %6, %cst_8 {dimension_numbers = #tpu.dot_dimension_numbers<[1], [0], [0], [1], [0, 0, 1, 1], [], []>} : vector<32x8xf32>, vector<8x324xf32>, vector<32x324xf32> -> vector<32x324xf32>
    %20 = arith.addf %16, %19 : vector<32x324xf32>
    %c2 = arith.constant 2 : index
    %c0_9 = arith.constant 0 : index
    %c0_10 = arith.constant 0 : index
    %21 = vector.load %arg2[%c2, %c0_9, %c0_10] : memref<9x32x8xf32, #tpu.memory_space<vmem>>, vector<1x32x8xf32>
    %22 = vector.shape_cast %21 : vector<1x32x8xf32> to vector<32x8xf32>
    %cst_11 = arith.constant dense<0.000000e+00> : vector<32x324xf32>
    %23 = tpu.matmul %22, %7, %cst_11 {dimension_numbers = #tpu.dot_dimension_numbers<[1], [0], [0], [1], [0, 0, 1, 1], [], []>} : vector<32x8xf32>, vector<8x324xf32>, vector<32x324xf32> -> vector<32x324xf32>
    %24 = arith.addf %20, %23 : vector<32x324xf32>
    %c3 = arith.constant 3 : index
    %c0_12 = arith.constant 0 : index
    %c0_13 = arith.constant 0 : index
    %25 = vector.load %arg2[%c3, %c0_12, %c0_13] : memref<9x32x8xf32, #tpu.memory_space<vmem>>, vector<1x32x8xf32>
    %26 = vector.shape_cast %25 : vector<1x32x8xf32> to vector<32x8xf32>
    %cst_14 = arith.constant dense<0.000000e+00> : vector<32x324xf32>
    %27 = tpu.matmul %26, %8, %cst_14 {dimension_numbers = #tpu.dot_dimension_numbers<[1], [0], [0], [1], [0, 0, 1, 1], [], []>} : vector<32x8xf32>, vector<8x324xf32>, vector<32x324xf32> -> vector<32x324xf32>
    %28 = arith.addf %24, %27 : vector<32x324xf32>
    %c4 = arith.constant 4 : index
    %c0_15 = arith.constant 0 : index
    %c0_16 = arith.constant 0 : index
    %29 = vector.load %arg2[%c4, %c0_15, %c0_16] : memref<9x32x8xf32, #tpu.memory_space<vmem>>, vector<1x32x8xf32>
    %30 = vector.shape_cast %29 : vector<1x32x8xf32> to vector<32x8xf32>
    %cst_17 = arith.constant dense<0.000000e+00> : vector<32x324xf32>
    %31 = tpu.matmul %30, %9, %cst_17 {dimension_numbers = #tpu.dot_dimension_numbers<[1], [0], [0], [1], [0, 0, 1, 1], [], []>} : vector<32x8xf32>, vector<8x324xf32>, vector<32x324xf32> -> vector<32x324xf32>
    %32 = arith.addf %28, %31 : vector<32x324xf32>
    %c5 = arith.constant 5 : index
    %c0_18 = arith.constant 0 : index
    %c0_19 = arith.constant 0 : index
    %33 = vector.load %arg2[%c5, %c0_18, %c0_19] : memref<9x32x8xf32, #tpu.memory_space<vmem>>, vector<1x32x8xf32>
    %34 = vector.shape_cast %33 : vector<1x32x8xf32> to vector<32x8xf32>
    %cst_20 = arith.constant dense<0.000000e+00> : vector<32x324xf32>
    %35 = tpu.matmul %34, %10, %cst_20 {dimension_numbers = #tpu.dot_dimension_numbers<[1], [0], [0], [1], [0, 0, 1, 1], [], []>} : vector<32x8xf32>, vector<8x324xf32>, vector<32x324xf32> -> vector<32x324xf32>
    %36 = arith.addf %32, %35 : vector<32x324xf32>
    %c6 = arith.constant 6 : index
    %c0_21 = arith.constant 0 : index
    %c0_22 = arith.constant 0 : index
    %37 = vector.load %arg2[%c6, %c0_21, %c0_22] : memref<9x32x8xf32, #tpu.memory_space<vmem>>, vector<1x32x8xf32>
    %38 = vector.shape_cast %37 : vector<1x32x8xf32> to vector<32x8xf32>
    %cst_23 = arith.constant dense<0.000000e+00> : vector<32x324xf32>
    %39 = tpu.matmul %38, %11, %cst_23 {dimension_numbers = #tpu.dot_dimension_numbers<[1], [0], [0], [1], [0, 0, 1, 1], [], []>} : vector<32x8xf32>, vector<8x324xf32>, vector<32x324xf32> -> vector<32x324xf32>
    %40 = arith.addf %36, %39 : vector<32x324xf32>
    %c7 = arith.constant 7 : index
    %c0_24 = arith.constant 0 : index
    %c0_25 = arith.constant 0 : index
    %41 = vector.load %arg2[%c7, %c0_24, %c0_25] : memref<9x32x8xf32, #tpu.memory_space<vmem>>, vector<1x32x8xf32>
    %42 = vector.shape_cast %41 : vector<1x32x8xf32> to vector<32x8xf32>
    %cst_26 = arith.constant dense<0.000000e+00> : vector<32x324xf32>
    %43 = tpu.matmul %42, %12, %cst_26 {dimension_numbers = #tpu.dot_dimension_numbers<[1], [0], [0], [1], [0, 0, 1, 1], [], []>} : vector<32x8xf32>, vector<8x324xf32>, vector<32x324xf32> -> vector<32x324xf32>
    %44 = arith.addf %40, %43 : vector<32x324xf32>
    %c8 = arith.constant 8 : index
    %c0_27 = arith.constant 0 : index
    %c0_28 = arith.constant 0 : index
    %45 = vector.load %arg2[%c8, %c0_27, %c0_28] : memref<9x32x8xf32, #tpu.memory_space<vmem>>, vector<1x32x8xf32>
    %46 = vector.shape_cast %45 : vector<1x32x8xf32> to vector<32x8xf32>
    %cst_29 = arith.constant dense<0.000000e+00> : vector<32x324xf32>
    %47 = tpu.matmul %46, %13, %cst_29 {dimension_numbers = #tpu.dot_dimension_numbers<[1], [0], [0], [1], [0, 0, 1, 1], [], []>} : vector<32x8xf32>, vector<8x324xf32>, vector<32x324xf32> -> vector<32x324xf32>
    %48 = arith.addf %44, %47 : vector<32x324xf32>
    %c0_30 = arith.constant 0 : index
    %c0_31 = arith.constant 0 : index
    %49 = vector.load %arg3[%c0_30, %c0_31] : memref<32x1xf32, #tpu.memory_space<vmem>>, vector<32x1xf32>
    %50 = vector.broadcast %49 : vector<32x1xf32> to vector<32x324xf32>
    %51 = arith.addf %48, %50 : vector<32x324xf32>
    %c0_32 = arith.constant 0 : index
    %c0_33 = arith.constant 0 : index
    %52 = vector.load %arg4[%c0_32, %c0_33] : memref<1x324xf32, #tpu.memory_space<vmem>>, vector<1x324xf32>
    %53 = vector.broadcast %52 : vector<1x324xf32> to vector<32x324xf32>
    %54 = arith.mulf %51, %53 : vector<32x324xf32>
    %55 = arith.truncf %54 : vector<32x324xf32> to vector<32x324xbf16>
    %c0_34 = arith.constant 0 : index
    %c0_35 = arith.constant 0 : index
    %c0_36 = arith.constant 0 : index
    %56 = vector.load %arg5[%c0_34, %c0_35, %c0_36] : memref<1x32x324xbf16, #tpu.memory_space<vmem>>, vector<1x32x324xbf16>
    %57 = vector.shape_cast %56 : vector<1x32x324xbf16> to vector<32x324xbf16>
    %58 = vector.shape_cast %55 : vector<32x324xbf16> to vector<1x32x324xbf16>
    tpu.vector_store %arg5[%c0_34, %c0_35, %c0_36], %58 {strides = array<i32>} : memref<1x32x324xbf16, #tpu.memory_space<vmem>>, vector<1x32x324xbf16>,
    return
  }
  func.func @transform_0(%arg0: i32) -> (i32, i32, i32) {
    %c0_i32 = arith.constant 0 : i32
    %c0_i32_0 = arith.constant 0 : i32
    %c0_i32_1 = arith.constant 0 : i32
    return %arg0, %c0_i32, %c0_i32_0 : i32, i32, i32
  }
  func.func @transform_1(%arg0: i32) -> (i32, i32, i32) {
    %c0_i32 = arith.constant 0 : i32
    %c0_i32_0 = arith.constant 0 : i32
    %c0_i32_1 = arith.constant 0 : i32
    %c0_i32_2 = arith.constant 0 : i32
    return %c0_i32, %c0_i32_0, %c0_i32_1 : i32, i32, i32
  }
  func.func @transform_2(%arg0: i32) -> (i32, i32) {
    %c0_i32 = arith.constant 0 : i32
    %c0_i32_0 = arith.constant 0 : i32
    %c0_i32_1 = arith.constant 0 : i32
    return %c0_i32, %c0_i32_0 : i32, i32
  }
  func.func @transform_3(%arg0: i32) -> (i32, i32) {
    %c0_i32 = arith.constant 0 : i32
    %c0_i32_0 = arith.constant 0 : i32
    %c0_i32_1 = arith.constant 0 : i32
    return %c0_i32, %c0_i32_0 : i32, i32
  }
  func.func @transform_4(%arg0: i32) -> (i32, i32, i32) {
    %c0_i32 = arith.constant 0 : i32
    %c0_i32_0 = arith.constant 0 : i32
    %c0_i32_1 = arith.constant 0 : i32
    return %arg0, %c0_i32, %c0_i32_0 : i32, i32, i32
  }
}

module attributes {stable_mosaic.version = 11 : i64} {
  func.func @_conv1x1_res_kernel(%arg0: i32, %arg1: memref<1x32x324xbf16, #tpu.memory_space<vmem>>, %arg2: memref<32x32xbf16, #tpu.memory_space<vmem>>, %arg3: memref<32x1xf32, #tpu.memory_space<vmem>>, %arg4: memref<1x32x324xbf16, #tpu.memory_space<vmem>>, %arg5: memref<1x324xf32, #tpu.memory_space<vmem>>, %arg6: memref<1x32x324xbf16, #tpu.memory_space<vmem>>) attributes {dimension_semantics = [#tpu.dimension_semantics<parallel>], iteration_bounds = array<i64: 2>, scalar_prefetch = 0 : i64, scratch_operands = 0 : i64, tpu.core_type = #tpu.core_type<tc>, window_params = [{transform_indices = @transform_0, window_bounds = array<i64: 1, 32, 324>}, {pipeline_mode = #tpu.pipeline_mode<synchronous>, transform_indices = @transform_1, window_bounds = array<i64: 32, 32>}, {pipeline_mode = #tpu.pipeline_mode<synchronous>, transform_indices = @transform_2, window_bounds = array<i64: 32, 1>}, {transform_indices = @transform_3, window_bounds = array<i64: 1, 32, 324>}, {pipeline_mode = #tpu.pipeline_mode<synchronous>, transform_indices = @transform_4, window_bounds = array<i64: 1, 324>}, {transform_indices = @transform_5, window_bounds = array<i64: 1, 32, 324>}]} {
    %c0 = arith.constant 0 : index
    %c0_0 = arith.constant 0 : index
    %0 = vector.load %arg2[%c0, %c0_0] : memref<32x32xbf16, #tpu.memory_space<vmem>>, vector<32x32xbf16>
    %c0_1 = arith.constant 0 : index
    %c0_2 = arith.constant 0 : index
    %c0_3 = arith.constant 0 : index
    %1 = vector.load %arg1[%c0_1, %c0_2, %c0_3] : memref<1x32x324xbf16, #tpu.memory_space<vmem>>, vector<1x32x324xbf16>
    %2 = vector.shape_cast %1 : vector<1x32x324xbf16> to vector<32x324xbf16>
    %cst = arith.constant dense<0.000000e+00> : vector<32x324xf32>
    %3 = tpu.matmul %0, %2, %cst {dimension_numbers = #tpu.dot_dimension_numbers<[1], [0], [0], [1], [0, 0, 1, 1], [], []>} : vector<32x32xbf16>, vector<32x324xbf16>, vector<32x324xf32> -> vector<32x324xf32>
    %c0_4 = arith.constant 0 : index
    %c0_5 = arith.constant 0 : index
    %4 = vector.load %arg3[%c0_4, %c0_5] : memref<32x1xf32, #tpu.memory_space<vmem>>, vector<32x1xf32>
    %5 = vector.broadcast %4 : vector<32x1xf32> to vector<32x324xf32>
    %6 = arith.addf %3, %5 : vector<32x324xf32>
    %c0_6 = arith.constant 0 : index
    %c0_7 = arith.constant 0 : index
    %c0_8 = arith.constant 0 : index
    %7 = vector.load %arg4[%c0_6, %c0_7, %c0_8] : memref<1x32x324xbf16, #tpu.memory_space<vmem>>, vector<1x32x324xbf16>
    %8 = vector.shape_cast %7 : vector<1x32x324xbf16> to vector<32x324xbf16>
    %9 = arith.extf %8 : vector<32x324xbf16> to vector<32x324xf32>
    %10 = arith.addf %6, %9 : vector<32x324xf32>
    %c0_9 = arith.constant 0 : index
    %c0_10 = arith.constant 0 : index
    %11 = vector.load %arg5[%c0_9, %c0_10] : memref<1x324xf32, #tpu.memory_space<vmem>>, vector<1x324xf32>
    %12 = vector.broadcast %11 : vector<1x324xf32> to vector<32x324xf32>
    %13 = arith.mulf %10, %12 : vector<32x324xf32>
    %14 = arith.truncf %13 : vector<32x324xf32> to vector<32x324xbf16>
    %c0_11 = arith.constant 0 : index
    %c0_12 = arith.constant 0 : index
    %c0_13 = arith.constant 0 : index
    %15 = vector.load %arg6[%c0_11, %c0_12, %c0_13] : memref<1x32x324xbf16, #tpu.memory_space<vmem>>, vector<1x32x324xbf16>
    %16 = vector.shape_cast %15 : vector<1x32x324xbf16> to vector<32x324xbf16>
    %17 = vector.shape_cast %14 : vector<32x324xbf16> to vector<1x32x324xbf16>
    tpu.vector_store %arg6[%c0_11, %c0_12, %c0_13], %17 {strides = array<i32>} : memref<1x32x324xbf16, #tpu.memory_space<vmem>>, vector<1x32x324xbf16>,
    return
  }
  func.func @transform_0(%arg0: i32) -> (i32, i32, i32) {
    %c0_i32 = arith.constant 0 : i32
    %c0_i32_0 = arith.constant 0 : i32
    %c0_i32_1 = arith.constant 0 : i32
    return %arg0, %c0_i32, %c0_i32_0 : i32, i32, i32
  }
  func.func @transform_1(%arg0: i32) -> (i32, i32) {
    %c0_i32 = arith.constant 0 : i32
    %c0_i32_0 = arith.constant 0 : i32
    %c0_i32_1 = arith.constant 0 : i32
    return %c0_i32, %c0_i32_0 : i32, i32
  }
  func.func @transform_2(%arg0: i32) -> (i32, i32) {
    %c0_i32 = arith.constant 0 : i32
    %c0_i32_0 = arith.constant 0 : i32
    %c0_i32_1 = arith.constant 0 : i32
    return %c0_i32, %c0_i32_0 : i32, i32
  }
  func.func @transform_3(%arg0: i32) -> (i32, i32, i32) {
    %c0_i32 = arith.constant 0 : i32
    %c0_i32_0 = arith.constant 0 : i32
    %c0_i32_1 = arith.constant 0 : i32
    return %arg0, %c0_i32, %c0_i32_0 : i32, i32, i32
  }
  func.func @transform_4(%arg0: i32) -> (i32, i32) {
    %c0_i32 = arith.constant 0 : i32
    %c0_i32_0 = arith.constant 0 : i32
    %c0_i32_1 = arith.constant 0 : i32
    return %c0_i32, %c0_i32_0 : i32, i32
  }
  func.func @transform_5(%arg0: i32) -> (i32, i32, i32) {
    %c0_i32 = arith.constant 0 : i32
    %c0_i32_0 = arith.constant 0 : i32
    %c0_i32_1 = arith.constant 0 : i32
    return %arg0, %c0_i32, %c0_i32_0 : i32, i32, i32
  }
}

module attributes {stable_mosaic.version = 11 : i64} {
  func.func @_esa_gate_kernel(%arg0: i32, %arg1: memref<1x16x1xbf16, #tpu.memory_space<vmem>>, %arg2: memref<1x16x324xbf16, #tpu.memory_space<vmem>>, %arg3: memref<1x32x324xbf16, #tpu.memory_space<vmem>>, %arg4: memref<32x16xbf16, #tpu.memory_space<vmem>>, %arg5: memref<32x1xf32, #tpu.memory_space<vmem>>, %arg6: memref<1x324xf32, #tpu.memory_space<vmem>>, %arg7: memref<1x32x324xbf16, #tpu.memory_space<vmem>>) attributes {dimension_semantics = [#tpu.dimension_semantics<parallel>], iteration_bounds = array<i64: 2>, scalar_prefetch = 0 : i64, scratch_operands = 0 : i64, tpu.core_type = #tpu.core_type<tc>, window_params = [{transform_indices = @transform_0, window_bounds = array<i64: 1, 16, 1>}, {transform_indices = @transform_1, window_bounds = array<i64: 1, 16, 324>}, {transform_indices = @transform_2, window_bounds = array<i64: 1, 32, 324>}, {pipeline_mode = #tpu.pipeline_mode<synchronous>, transform_indices = @transform_3, window_bounds = array<i64: 32, 16>}, {pipeline_mode = #tpu.pipeline_mode<synchronous>, transform_indices = @transform_4, window_bounds = array<i64: 32, 1>}, {pipeline_mode = #tpu.pipeline_mode<synchronous>, transform_indices = @transform_5, window_bounds = array<i64: 1, 324>}, {transform_indices = @transform_6, window_bounds = array<i64: 1, 32, 324>}]} {
    %c0 = arith.constant 0 : index
    %c0_0 = arith.constant 0 : index
    %c0_1 = arith.constant 0 : index
    %0 = vector.load %arg1[%c0, %c0_0, %c0_1] : memref<1x16x1xbf16, #tpu.memory_space<vmem>>, vector<1x16x1xbf16>
    %1 = vector.shape_cast %0 : vector<1x16x1xbf16> to vector<16x1xbf16>
    %2 = arith.extf %1 : vector<16x1xbf16> to vector<16x1xf32>
    %c0_2 = arith.constant 0 : index
    %c0_3 = arith.constant 0 : index
    %c0_4 = arith.constant 0 : index
    %3 = vector.load %arg2[%c0_2, %c0_3, %c0_4] : memref<1x16x324xbf16, #tpu.memory_space<vmem>>, vector<1x16x324xbf16>
    %4 = vector.shape_cast %3 : vector<1x16x324xbf16> to vector<16x324xbf16>
    %5 = arith.extf %4 : vector<16x324xbf16> to vector<16x324xf32>
    %6 = vector.broadcast %2 : vector<16x1xf32> to vector<16x324xf32>
    %7 = arith.addf %6, %5 : vector<16x324xf32>
    %c0_5 = arith.constant 0 : index
    %c0_6 = arith.constant 0 : index
    %8 = vector.load %arg4[%c0_5, %c0_6] : memref<32x16xbf16, #tpu.memory_space<vmem>>, vector<32x16xbf16>
    %9 = arith.truncf %7 : vector<16x324xf32> to vector<16x324xbf16>
    %cst = arith.constant dense<0.000000e+00> : vector<32x324xf32>
    %10 = tpu.matmul %8, %9, %cst {dimension_numbers = #tpu.dot_dimension_numbers<[1], [0], [0], [1], [0, 0, 1, 1], [], []>} : vector<32x16xbf16>, vector<16x324xbf16>, vector<32x324xf32> -> vector<32x324xf32>
    %c0_7 = arith.constant 0 : index
    %c0_8 = arith.constant 0 : index
    %11 = vector.load %arg5[%c0_7, %c0_8] : memref<32x1xf32, #tpu.memory_space<vmem>>, vector<32x1xf32>
    %12 = vector.broadcast %11 : vector<32x1xf32> to vector<32x324xf32>
    %13 = arith.addf %10, %12 : vector<32x324xf32>
    %14 = arith.negf %13 : vector<32x324xf32>
    %15 = math.exp %14 : vector<32x324xf32>
    %cst_9 = arith.constant 1.000000e+00 : f32
    %16 = vector.broadcast %cst_9 : f32 to vector<32x324xf32>
    %17 = arith.addf %16, %15 : vector<32x324xf32>
    %18 = arith.divf %16, %17 : vector<32x324xf32>
    %c0_10 = arith.constant 0 : index
    %c0_11 = arith.constant 0 : index
    %c0_12 = arith.constant 0 : index
    %19 = vector.load %arg3[%c0_10, %c0_11, %c0_12] : memref<1x32x324xbf16, #tpu.memory_space<vmem>>, vector<1x32x324xbf16>
    %20 = vector.shape_cast %19 : vector<1x32x324xbf16> to vector<32x324xbf16>
    %21 = arith.extf %20 : vector<32x324xbf16> to vector<32x324xf32>
    %22 = arith.mulf %21, %18 : vector<32x324xf32>
    %c0_13 = arith.constant 0 : index
    %c0_14 = arith.constant 0 : index
    %23 = vector.load %arg6[%c0_13, %c0_14] : memref<1x324xf32, #tpu.memory_space<vmem>>, vector<1x324xf32>
    %24 = vector.broadcast %23 : vector<1x324xf32> to vector<32x324xf32>
    %25 = arith.mulf %22, %24 : vector<32x324xf32>
    %26 = arith.truncf %25 : vector<32x324xf32> to vector<32x324xbf16>
    %c0_15 = arith.constant 0 : index
    %c0_16 = arith.constant 0 : index
    %c0_17 = arith.constant 0 : index
    %27 = vector.load %arg7[%c0_15, %c0_16, %c0_17] : memref<1x32x324xbf16, #tpu.memory_space<vmem>>, vector<1x32x324xbf16>
    %28 = vector.shape_cast %27 : vector<1x32x324xbf16> to vector<32x324xbf16>
    %29 = vector.shape_cast %26 : vector<32x324xbf16> to vector<1x32x324xbf16>
    tpu.vector_store %arg7[%c0_15, %c0_16, %c0_17], %29 {strides = array<i32>} : memref<1x32x324xbf16, #tpu.memory_space<vmem>>, vector<1x32x324xbf16>,
    return
  }
  func.func @transform_0(%arg0: i32) -> (i32, i32, i32) {
    %c0_i32 = arith.constant 0 : i32
    %c0_i32_0 = arith.constant 0 : i32
    %c0_i32_1 = arith.constant 0 : i32
    return %arg0, %c0_i32, %c0_i32_0 : i32, i32, i32
  }
  func.func @transform_1(%arg0: i32) -> (i32, i32, i32) {
    %c0_i32 = arith.constant 0 : i32
    %c0_i32_0 = arith.constant 0 : i32
    %c0_i32_1 = arith.constant 0 : i32
    return %arg0, %c0_i32, %c0_i32_0 : i32, i32, i32
  }
  func.func @transform_2(%arg0: i32) -> (i32, i32, i32) {
    %c0_i32 = arith.constant 0 : i32
    %c0_i32_0 = arith.constant 0 : i32
    %c0_i32_1 = arith.constant 0 : i32
    return %arg0, %c0_i32, %c0_i32_0 : i32, i32, i32
  }
  func.func @transform_3(%arg0: i32) -> (i32, i32) {
    %c0_i32 = arith.constant 0 : i32
    %c0_i32_0 = arith.constant 0 : i32
    %c0_i32_1 = arith.constant 0 : i32
    return %c0_i32, %c0_i32_0 : i32, i32
  }
  func.func @transform_4(%arg0: i32) -> (i32, i32) {
    %c0_i32 = arith.constant 0 : i32
    %c0_i32_0 = arith.constant 0 : i32
    %c0_i32_1 = arith.constant 0 : i32
    return %c0_i32, %c0_i32_0 : i32, i32
  }
  func.func @transform_5(%arg0: i32) -> (i32, i32) {
    %c0_i32 = arith.constant 0 : i32
    %c0_i32_0 = arith.constant 0 : i32
    %c0_i32_1 = arith.constant 0 : i32
    return %c0_i32, %c0_i32_0 : i32, i32
  }
  func.func @transform_6(%arg0: i32) -> (i32, i32, i32) {
    %c0_i32 = arith.constant 0 : i32
    %c0_i32_0 = arith.constant 0 : i32
    %c0_i32_1 = arith.constant 0 : i32
    return %arg0, %c0_i32, %c0_i32_0 : i32, i32, i32
  }
}

module attributes {stable_mosaic.version = 11 : i64} {
  func.func @_conv3x3_kernel(%arg0: i32, %arg1: memref<1x32x324xbf16, #tpu.memory_space<vmem>>, %arg2: memref<9x48x32xf32, #tpu.memory_space<vmem>>, %arg3: memref<48x1xf32, #tpu.memory_space<vmem>>, %arg4: memref<1x324xf32, #tpu.memory_space<vmem>>, %arg5: memref<1x48x324xf32, #tpu.memory_space<vmem>>) attributes {dimension_semantics = [#tpu.dimension_semantics<parallel>], iteration_bounds = array<i64: 2>, scalar_prefetch = 0 : i64, scratch_operands = 0 : i64, tpu.core_type = #tpu.core_type<tc>, window_params = [{transform_indices = @transform_0, window_bounds = array<i64: 1, 32, 324>}, {pipeline_mode = #tpu.pipeline_mode<synchronous>, transform_indices = @transform_1, window_bounds = array<i64: 9, 48, 32>}, {pipeline_mode = #tpu.pipeline_mode<synchronous>, transform_indices = @transform_2, window_bounds = array<i64: 48, 1>}, {pipeline_mode = #tpu.pipeline_mode<synchronous>, transform_indices = @transform_3, window_bounds = array<i64: 1, 324>}, {transform_indices = @transform_4, window_bounds = array<i64: 1, 48, 324>}]} {
    %c0 = arith.constant 0 : index
    %c0_0 = arith.constant 0 : index
    %c0_1 = arith.constant 0 : index
    %0 = vector.load %arg1[%c0, %c0_0, %c0_1] : memref<1x32x324xbf16, #tpu.memory_space<vmem>>, vector<1x32x324xbf16>
    %1 = vector.shape_cast %0 : vector<1x32x324xbf16> to vector<32x324xbf16>
    %2 = arith.extf %1 : vector<32x324xbf16> to vector<32x324xf32>
    %cst = arith.constant 0.000000e+00 : f32
    %3 = vector.broadcast %cst : f32 to vector<32x19xf32>
    %4 = tpu.concatenate %3, %2, %3 in 1 : vector<32x19xf32>, vector<32x324xf32>, vector<32x19xf32> -> vector<32x362xf32>
    %5 = vector.extract_strided_slice %4 {offsets = [0, 0], sizes = [32, 324], strides = [1, 1]} : vector<32x362xf32> to vector<32x324xf32>
    %6 = vector.extract_strided_slice %4 {offsets = [0, 1], sizes = [32, 324], strides = [1, 1]} : vector<32x362xf32> to vector<32x324xf32>
    %7 = vector.extract_strided_slice %4 {offsets = [0, 2], sizes = [32, 324], strides = [1, 1]} : vector<32x362xf32> to vector<32x324xf32>
    %8 = vector.extract_strided_slice %4 {offsets = [0, 18], sizes = [32, 324], strides = [1, 1]} : vector<32x362xf32> to vector<32x324xf32>
    %9 = vector.extract_strided_slice %4 {offsets = [0, 19], sizes = [32, 324], strides = [1, 1]} : vector<32x362xf32> to vector<32x324xf32>
    %10 = vector.extract_strided_slice %4 {offsets = [0, 20], sizes = [32, 324], strides = [1, 1]} : vector<32x362xf32> to vector<32x324xf32>
    %11 = vector.extract_strided_slice %4 {offsets = [0, 36], sizes = [32, 324], strides = [1, 1]} : vector<32x362xf32> to vector<32x324xf32>
    %12 = vector.extract_strided_slice %4 {offsets = [0, 37], sizes = [32, 324], strides = [1, 1]} : vector<32x362xf32> to vector<32x324xf32>
    %13 = vector.extract_strided_slice %4 {offsets = [0, 38], sizes = [32, 324], strides = [1, 1]} : vector<32x362xf32> to vector<32x324xf32>
    %c0_2 = arith.constant 0 : index
    %c0_3 = arith.constant 0 : index
    %c0_4 = arith.constant 0 : index
    %14 = vector.load %arg2[%c0_2, %c0_3, %c0_4] : memref<9x48x32xf32, #tpu.memory_space<vmem>>, vector<1x48x32xf32>
    %15 = vector.shape_cast %14 : vector<1x48x32xf32> to vector<48x32xf32>
    %cst_5 = arith.constant dense<0.000000e+00> : vector<48x324xf32>
    %16 = tpu.matmul %15, %5, %cst_5 {dimension_numbers = #tpu.dot_dimension_numbers<[1], [0], [0], [1], [0, 0, 1, 1], [], []>} : vector<48x32xf32>, vector<32x324xf32>, vector<48x324xf32> -> vector<48x324xf32>
    %c1 = arith.constant 1 : index
    %c0_6 = arith.constant 0 : index
    %c0_7 = arith.constant 0 : index
    %17 = vector.load %arg2[%c1, %c0_6, %c0_7] : memref<9x48x32xf32, #tpu.memory_space<vmem>>, vector<1x48x32xf32>
    %18 = vector.shape_cast %17 : vector<1x48x32xf32> to vector<48x32xf32>
    %cst_8 = arith.constant dense<0.000000e+00> : vector<48x324xf32>
    %19 = tpu.matmul %18, %6, %cst_8 {dimension_numbers = #tpu.dot_dimension_numbers<[1], [0], [0], [1], [0, 0, 1, 1], [], []>} : vector<48x32xf32>, vector<32x324xf32>, vector<48x324xf32> -> vector<48x324xf32>
    %20 = arith.addf %16, %19 : vector<48x324xf32>
    %c2 = arith.constant 2 : index
    %c0_9 = arith.constant 0 : index
    %c0_10 = arith.constant 0 : index
    %21 = vector.load %arg2[%c2, %c0_9, %c0_10] : memref<9x48x32xf32, #tpu.memory_space<vmem>>, vector<1x48x32xf32>
    %22 = vector.shape_cast %21 : vector<1x48x32xf32> to vector<48x32xf32>
    %cst_11 = arith.constant dense<0.000000e+00> : vector<48x324xf32>
    %23 = tpu.matmul %22, %7, %cst_11 {dimension_numbers = #tpu.dot_dimension_numbers<[1], [0], [0], [1], [0, 0, 1, 1], [], []>} : vector<48x32xf32>, vector<32x324xf32>, vector<48x324xf32> -> vector<48x324xf32>
    %24 = arith.addf %20, %23 : vector<48x324xf32>
    %c3 = arith.constant 3 : index
    %c0_12 = arith.constant 0 : index
    %c0_13 = arith.constant 0 : index
    %25 = vector.load %arg2[%c3, %c0_12, %c0_13] : memref<9x48x32xf32, #tpu.memory_space<vmem>>, vector<1x48x32xf32>
    %26 = vector.shape_cast %25 : vector<1x48x32xf32> to vector<48x32xf32>
    %cst_14 = arith.constant dense<0.000000e+00> : vector<48x324xf32>
    %27 = tpu.matmul %26, %8, %cst_14 {dimension_numbers = #tpu.dot_dimension_numbers<[1], [0], [0], [1], [0, 0, 1, 1], [], []>} : vector<48x32xf32>, vector<32x324xf32>, vector<48x324xf32> -> vector<48x324xf32>
    %28 = arith.addf %24, %27 : vector<48x324xf32>
    %c4 = arith.constant 4 : index
    %c0_15 = arith.constant 0 : index
    %c0_16 = arith.constant 0 : index
    %29 = vector.load %arg2[%c4, %c0_15, %c0_16] : memref<9x48x32xf32, #tpu.memory_space<vmem>>, vector<1x48x32xf32>
    %30 = vector.shape_cast %29 : vector<1x48x32xf32> to vector<48x32xf32>
    %cst_17 = arith.constant dense<0.000000e+00> : vector<48x324xf32>
    %31 = tpu.matmul %30, %9, %cst_17 {dimension_numbers = #tpu.dot_dimension_numbers<[1], [0], [0], [1], [0, 0, 1, 1], [], []>} : vector<48x32xf32>, vector<32x324xf32>, vector<48x324xf32> -> vector<48x324xf32>
    %32 = arith.addf %28, %31 : vector<48x324xf32>
    %c5 = arith.constant 5 : index
    %c0_18 = arith.constant 0 : index
    %c0_19 = arith.constant 0 : index
    %33 = vector.load %arg2[%c5, %c0_18, %c0_19] : memref<9x48x32xf32, #tpu.memory_space<vmem>>, vector<1x48x32xf32>
    %34 = vector.shape_cast %33 : vector<1x48x32xf32> to vector<48x32xf32>
    %cst_20 = arith.constant dense<0.000000e+00> : vector<48x324xf32>
    %35 = tpu.matmul %34, %10, %cst_20 {dimension_numbers = #tpu.dot_dimension_numbers<[1], [0], [0], [1], [0, 0, 1, 1], [], []>} : vector<48x32xf32>, vector<32x324xf32>, vector<48x324xf32> -> vector<48x324xf32>
    %36 = arith.addf %32, %35 : vector<48x324xf32>
    %c6 = arith.constant 6 : index
    %c0_21 = arith.constant 0 : index
    %c0_22 = arith.constant 0 : index
    %37 = vector.load %arg2[%c6, %c0_21, %c0_22] : memref<9x48x32xf32, #tpu.memory_space<vmem>>, vector<1x48x32xf32>
    %38 = vector.shape_cast %37 : vector<1x48x32xf32> to vector<48x32xf32>
    %cst_23 = arith.constant dense<0.000000e+00> : vector<48x324xf32>
    %39 = tpu.matmul %38, %11, %cst_23 {dimension_numbers = #tpu.dot_dimension_numbers<[1], [0], [0], [1], [0, 0, 1, 1], [], []>} : vector<48x32xf32>, vector<32x324xf32>, vector<48x324xf32> -> vector<48x324xf32>
    %40 = arith.addf %36, %39 : vector<48x324xf32>
    %c7 = arith.constant 7 : index
    %c0_24 = arith.constant 0 : index
    %c0_25 = arith.constant 0 : index
    %41 = vector.load %arg2[%c7, %c0_24, %c0_25] : memref<9x48x32xf32, #tpu.memory_space<vmem>>, vector<1x48x32xf32>
    %42 = vector.shape_cast %41 : vector<1x48x32xf32> to vector<48x32xf32>
    %cst_26 = arith.constant dense<0.000000e+00> : vector<48x324xf32>
    %43 = tpu.matmul %42, %12, %cst_26 {dimension_numbers = #tpu.dot_dimension_numbers<[1], [0], [0], [1], [0, 0, 1, 1], [], []>} : vector<48x32xf32>, vector<32x324xf32>, vector<48x324xf32> -> vector<48x324xf32>
    %44 = arith.addf %40, %43 : vector<48x324xf32>
    %c8 = arith.constant 8 : index
    %c0_27 = arith.constant 0 : index
    %c0_28 = arith.constant 0 : index
    %45 = vector.load %arg2[%c8, %c0_27, %c0_28] : memref<9x48x32xf32, #tpu.memory_space<vmem>>, vector<1x48x32xf32>
    %46 = vector.shape_cast %45 : vector<1x48x32xf32> to vector<48x32xf32>
    %cst_29 = arith.constant dense<0.000000e+00> : vector<48x324xf32>
    %47 = tpu.matmul %46, %13, %cst_29 {dimension_numbers = #tpu.dot_dimension_numbers<[1], [0], [0], [1], [0, 0, 1, 1], [], []>} : vector<48x32xf32>, vector<32x324xf32>, vector<48x324xf32> -> vector<48x324xf32>
    %48 = arith.addf %44, %47 : vector<48x324xf32>
    %c0_30 = arith.constant 0 : index
    %c0_31 = arith.constant 0 : index
    %49 = vector.load %arg3[%c0_30, %c0_31] : memref<48x1xf32, #tpu.memory_space<vmem>>, vector<48x1xf32>
    %50 = vector.broadcast %49 : vector<48x1xf32> to vector<48x324xf32>
    %51 = arith.addf %48, %50 : vector<48x324xf32>
    %c0_32 = arith.constant 0 : index
    %c0_33 = arith.constant 0 : index
    %52 = vector.load %arg4[%c0_32, %c0_33] : memref<1x324xf32, #tpu.memory_space<vmem>>, vector<1x324xf32>
    %53 = vector.broadcast %52 : vector<1x324xf32> to vector<48x324xf32>
    %54 = arith.mulf %51, %53 : vector<48x324xf32>
    %c0_34 = arith.constant 0 : index
    %c0_35 = arith.constant 0 : index
    %c0_36 = arith.constant 0 : index
    %55 = vector.load %arg5[%c0_34, %c0_35, %c0_36] : memref<1x48x324xf32, #tpu.memory_space<vmem>>, vector<1x48x324xf32>
    %56 = vector.shape_cast %55 : vector<1x48x324xf32> to vector<48x324xf32>
    %57 = vector.shape_cast %54 : vector<48x324xf32> to vector<1x48x324xf32>
    tpu.vector_store %arg5[%c0_34, %c0_35, %c0_36], %57 {strides = array<i32>} : memref<1x48x324xf32, #tpu.memory_space<vmem>>, vector<1x48x324xf32>,
    return
  }
  func.func @transform_0(%arg0: i32) -> (i32, i32, i32) {
    %c0_i32 = arith.constant 0 : i32
    %c0_i32_0 = arith.constant 0 : i32
    %c0_i32_1 = arith.constant 0 : i32
    return %arg0, %c0_i32, %c0_i32_0 : i32, i32, i32
  }
  func.func @transform_1(%arg0: i32) -> (i32, i32, i32) {
    %c0_i32 = arith.constant 0 : i32
    %c0_i32_0 = arith.constant 0 : i32
    %c0_i32_1 = arith.constant 0 : i32
    %c0_i32_2 = arith.constant 0 : i32
    return %c0_i32, %c0_i32_0, %c0_i32_1 : i32, i32, i32
  }
  func.func @transform_2(%arg0: i32) -> (i32, i32) {
    %c0_i32 = arith.constant 0 : i32
    %c0_i32_0 = arith.constant 0 : i32
    %c0_i32_1 = arith.constant 0 : i32
    return %c0_i32, %c0_i32_0 : i32, i32
  }
  func.func @transform_3(%arg0: i32) -> (i32, i32) {
    %c0_i32 = arith.constant 0 : i32
    %c0_i32_0 = arith.constant 0 : i32
    %c0_i32_1 = arith.constant 0 : i32
    return %c0_i32, %c0_i32_0 : i32, i32
  }
  func.func @transform_4(%arg0: i32) -> (i32, i32, i32) {
    %c0_i32 = arith.constant 0 : i32
    %c0_i32_0 = arith.constant 0 : i32
    %c0_i32_1 = arith.constant 0 : i32
    return %arg0, %c0_i32, %c0_i32_0 : i32, i32, i32
  }
}

</mosaic_0001>

<bundles_post_ra>
// kernel: eecnet_forward.19
= control target key start
LH: loop header
LB: loop body
LE: loop exit
PB: predicated region body
PF: predicated region fallthrough
CT: control target
= control target key end

     0   :  { %s2654_s15 = smov 0   ;;  %s3197_s0 = inlined_call_operand.vmem [shape: bf16[2,8,324], index: 0, kind: input, shape index: {}]   ;;  %s3198_s1 = inlined_call_operand.vmem [shape: f32[9,32,8], index: 1, kind: input, shape index: {}]   ;;  %s3199_s2 = inlined_call_operand.vmem [shape: f32[32,1], index: 2, kind: input, shape index: {}]   ;;  %s3200_s3 = inlined_call_operand.vmem [shape: f32[1,324], index: 3, kind: input, shape index: {}]   ;;  %s3201_s4 = inlined_call_operand.vmem [shape: bf16[2,32,324], index: 4, kind: output, shape index: {}]  }
   0x1 LB: > { %s2291_s16 = sadd.s32 4294967295, %s2616_s15   ;;  %p2295_p0 = scmp.ge.s32.totalorder %s2616_s15, 1  ;;  %s2616_s15 = sphi %s2654_s15, %s14_s15  }
   0x2   : > { %p162_p1 = scmp.lt.s32.totalorder %s2616_s15, 3 }
   0x4   : > { %p163_p2 = pnand %p2295_p0, %p162_p1 }
   0x6   : > { %166 = sbr.rel (%p163_p2) target bundleno = 574 (0x23e), region = 36 }
   0xb   : > { %p188_p3 = scmp.lt.s32.totalorder %s2291_s16, 1  ;;  %s2618_s21 = smov 19   ;;  %vm212_vm0 = vcmask 154624   ;;  %vm219_vm1 = vcmask 711680   ;;  %v2619_v9 = vmov 0.0   ;;  %v2122_v16 = vld [vmem:[%s3199_s2] sm:$0xff] }
   0xc   : > { %321 = vmatprep.mubr.f32.mxu0 %v2619_v9  ;;  %339 = vmatprep.mubr.f32.mxu1 %v2619_v9  ;;  %s2620_s22 = smov 126   ;;  %s2621_s23 = smov 127   ;;  %v2123_v17 = vld [vmem:[%s3199_s2 + $0x8] sm:$0xff]  ;;  %v2628_v18 = vmov 0   ;;  %v2124_v19 = vld [vmem:[%s3199_s2 + $0x10] sm:$0xff]  ;;  %v2125_v20 = vld [vmem:[%s3199_s2 + $0x18] sm:$0xff] }
   0xd   : > { %s3241_s16 = smov (!%p188_p3, %s2291_s16), 1  ;;  %s2622_s24 = smov 110   ;;  %2608 = vset.pattern.permute.xlu0 %v2628_v18  ;;  %2609 = vset.pattern.permute.xlu1 %v2628_v18  ;;  %vm238_vm2 = vcmask 1039360   ;;  %v2298_v27 = vld [vmem:[%s3198_s1 + $0x20] sm:$0xff]  ;;  %vm244_vm3 = vcmask 64512   ;;  %v2301_v28 = vld [vmem:[%s3198_s1 + $0x38] sm:$0xff]  ;;  %vm2310_vm5 = vmneg %vm212_vm0 }
   0xe   : > { %s2542_s17 = smul.u32 12, %s3241_s16  ;;  %s2623_s25 = smov 109   ;;  %vm628_vm4 = vcmask 1031168   ;;  %v2299_v33 = vld [vmem:[%s3198_s1 + $0x28] sm:$0xff]  ;;  %v2300_v34 = vld [vmem:[%s3198_s1 + $0x30] sm:$0xff]  ;;  %v221_v36 = vld [vmem:[%s3198_s1] sm:$0xff] }
   0xf   : > { %s2624_s26 = smov 108   ;;  %s2625_s27 = smov 92   ;;  %v222_v40 = vld [vmem:[%s3198_s1 + $0x8] sm:$0xff]  ;;  %vm843_vm6 = vcmask 900096   ;;  %v223_v42 = vld [vmem:[%s3198_s1 + $0x10] sm:$0xff]  ;;  %v224_v44 = vld [vmem:[%s3198_s1 + $0x18] sm:$0xff] }
  0x10   : > { %s192_s20 = scalar_lea.vmem %s3197_s0, %s2542_s17  ;;  %s2626_s28 = smov 91   ;;  %v2321_v48 = vld [vmem:[%s3198_s1 + $0x40] sm:$0xff]  ;;  %vm1058_vm7 = vcmask 891904   ;;  %v2322_v50 = vld [vmem:[%s3198_s1 + $0x48] sm:$0xff]  ;;  %v2323_v52 = vld [vmem:[%s3198_s1 + $0x50] sm:$0xff]  ;;  %vm1273_vm8 = vcmask 883712  }
  0x11   : > { %v198_v0 = vld [vmem:[%s192_s20] sm:$0xff]  ;;  %v199_v1 = vld [vmem:[%s192_s20 + $0x8] sm:$0xf]  ;;  %s2627_s29 = smov 90   ;;  %v2324_v54 = vld [vmem:[%s3198_s1 + $0x58] sm:$0xff]  ;;  %vm1488_vm9 = vcmask 752640  }
  0x12   : > { %v201_v2 = vunpack.c.h.bf16 %v198_v0  ;;  %v202_v3 = vunpack.c.l.bf16 %v199_v1  ;;  %v200_v5 = vunpack.c.l.bf16 %v198_v0  ;;  %v2333_v56 = vld [vmem:[%s3198_s1 + $0x60] sm:$0xff]  ;;  %v2334_v60 = vld [vmem:[%s3198_s1 + $0x68] sm:$0xff]  ;;  %v2335_v62 = vld [vmem:[%s3198_s1 + $0x70] sm:$0xff]  ;;  %vm1703_vm10 = vcmask 744448   ;;  %s2543_s14 = smul.u32 48, %s3241_s16 }
  0x13   : > { %v2336_v0 = vld [vmem:[%s3198_s1 + $0x78] sm:$0xff]  ;;  %vm1918_vm11 = vcmask 736256   ;;  %vm2228_vm12 = vcmask 551936  }
  0x14   : > { %v2563_v4 = vpack.i.bf16 %v202_v3, %v201_v2  ;;  %s3161_s18 = scalar_lea.vmem %s3201_s4, %s2543_s14 }
  0x16   : > { %2564 = vrot.lane.b32.xlu0 %v2563_v4, %s2618_s21  ;;  %v2345_v4 = vld [vmem:[%s3198_s1 + $0x80] sm:$0xff] }
  0x1a   : > { %206 = vrot.lane.b32.xlu0 %v200_v5, %s2618_s21 }
  0x88   : > { %v2565_v6 = vpop.permute.xlu0 %2564 }
  0x89   : > { %v2567_v7 = vunpack.i.h.bf16 %v2565_v6  ;;  %v2566_v8 = vunpack.i.l.bf16 %v2565_v6  ;;  %v2346_v6 = vld [vmem:[%s3198_s1 + $0x88] sm:$0xff] }
  0x8b   : > { %v2671_v10 = vsel %vm212_vm0, %v2566_v8, %v2567_v7 }
  0x8c   : > { %v220_v11 = vsel %vm219_vm1, %v2671_v10, 0.0  ;;  %v2675_v12 = vpop.permute.xlu0 %206 }
  0x8d   : > { %v2679_v13 = vsel %vm212_vm0, %v2675_v12, %v2566_v8  ;;  %v218_v15 = vsel %vm212_vm0, 0.0, %v2675_v12  ;;  %v2347_v8 = vld [vmem:[%s3198_s1 + $0x90] sm:$0xff] }
  0x8e   : > { %v2573_v14 = vpack.i.bf16 %v220_v11, %v2679_v13  ;;  %v2348_v11 = vld [vmem:[%s3198_s1 + $0x98] sm:$0xff] }
  0x90   : > { %2574 = vrot.lane.b32.xlu0 %v2573_v14, %s2620_s22  ;;  %2569 = vrot.lane.b32.xlu1 %v2573_v14, %s2621_s23 }
  0x94   : > { %2579 = vrot.lane.b32.xlu0 %v2573_v14, %s2622_s24  ;;  %232 = vrot.lane.b32.xlu1 %v218_v15, %s2621_s23 }
  0x98   : > { %2584 = vrot.lane.b32.xlu0 %v2573_v14, %s2623_s25  ;;  %622 = vrot.lane.b32.xlu1 %v218_v15, %s2620_s22 }
  0x9c   : > { %2589 = vrot.lane.b32.xlu0 %v2573_v14, %s2624_s26  ;;  %837 = vrot.lane.b32.xlu1 %v218_v15, %s2622_s24 }
  0xa0   : > { %2594 = vrot.lane.b32.xlu0 %v2573_v14, %s2625_s27  ;;  %1052 = vrot.lane.b32.xlu1 %v218_v15, %s2623_s25 }
  0xa4   : > { %2599 = vrot.lane.b32.xlu0 %v2573_v14, %s2626_s28  ;;  %1267 = vrot.lane.b32.xlu1 %v218_v15, %s2624_s26 }
  0xa8   : > { %2604 = vrot.lane.b32.xlu0 %v2573_v14, %s2627_s29  ;;  %1482 = vrot.lane.b32.xlu1 %v218_v15, %s2625_s27 }
  0xac   : > { %1697 = vrot.lane.b32.xlu1 %v218_v15, %s2626_s28  ;;  %2128 = vperm.xlu0 %2608, %v2122_v16  }
  0xb0   : > { %1912 = vrot.lane.b32.xlu1 %v218_v15, %s2627_s29  ;;  %2143 = vperm.xlu0 %2608, %v2125_v20  }
  0xb4   : > { %2133 = vperm.xlu1 %2609, %v2123_v17   ;;  %v2358_v17 = vld [vmem:[%s3198_s1 + $0xa8] sm:$0xff] }
  0xb8   : > { %2138 = vperm.xlu1 %2609, %v2124_v19   ;;  %v2359_v19 = vld [vmem:[%s3198_s1 + $0xb0] sm:$0xff] }
 0x102   : > { %v2570_v21 = vpop.permute.xlu1 %2569  ;;  %v2575_v24 = vpop.permute.xlu0 %2574 }
 0x103   : > { %v2572_v22 = vunpack.i.h.bf16 %v2570_v21  ;;  %v2571_v23 = vunpack.i.l.bf16 %v2570_v21  ;;  %v2577_v29 = vunpack.i.h.bf16 %v2575_v24  ;;  %v2576_v30 = vunpack.i.l.bf16 %v2575_v24  ;;  %v2360_v21 = vld [vmem:[%s3198_s1 + $0xb8] sm:$0xff] }
 0x105   : > { %v240_v25 = vsel %vm238_vm2, %v2571_v23, %v2572_v22  ;;  %v630_v32 = vsel %vm628_vm4, %v2576_v30, %v2577_v29 }
 0x106   : > { %v233_v26 = vpop.permute.xlu1 %232  ;;  %287 = vmatprep.subr.mxu0 %v240_v25  ;;  %2540 = vmatprep.subr.mxu1 %v240_v25  ;;  %v2580_v35 = vpop.permute.xlu0 %2579  ;;  %v2369_v25 = vld [vmem:[%s3198_s1 + $0xc0] sm:$0xff] }
 0x107   : > { %v239_v31 = vsel %vm238_vm2, %v233_v26, %v2571_v23  ;;  %v2582_v37 = vunpack.i.h.bf16 %v2580_v35  ;;  %v2581_v38 = vunpack.i.l.bf16 %v2580_v35  ;;  %v2383_v35 = vld [vmem:[%s3198_s1 + $0xf0] sm:$0xff] }
 0x108   : > { %288 = vmatpush1.msra.mxu0 %v239_v31  ;;  %2541 = vmatpush1.msra.mxu1 %v239_v31  ;;  %v2372_v31 = vld [vmem:[%s3198_s1 + $0xd8] sm:$0xff] }
 0x109   : > { %2302 = vmatmul.mubr.msk.f32.vlgmr.msra.gmra.mxu0 %vm244_vm3, %v2298_v27  ;;  %2305 = vmatmul.mubr.msk.f32.vlgmr.msra.gmra.mxu1 %vm244_vm3, %v2301_v28  ;;  %v845_v43 = vsel %vm843_vm6, %v2581_v38, %v2582_v37 }
 0x10a   : > { %2468 = vmatprep.subr.mxu1 %v2572_v22  ;;  %2476 = vmatprep.subr.msk.mxu0 %vm219_vm1, %v2671_v10  ;;  %v623_v39 = vpop.permute.xlu1 %622  ;;  %v2585_v45 = vpop.permute.xlu0 %2584 }
 0x10b   : > { %2469 = vmatpush3.msra.mxu1 %v2572_v22  ;;  %2477 = vmatpush3.msk.msra.mxu0 %vm219_vm1, %v2671_v10  ;;  %v629_v41 = vsel %vm628_vm4, %v623_v39, %v2576_v30  ;;  %v2587_v46 = vunpack.i.h.bf16 %v2585_v45  ;;  %v2586_v47 = vunpack.i.l.bf16 %v2585_v45  ;;  %v2394_v39 = vld [vmem:[%s3198_s1 + $0x108] sm:$0xff] }
 0x10c   : > { %473 = vmatprep.subr.mxu1 %v2679_v13  ;;  %676 = vmatprep.subr.mxu0 %v630_v32  ;;  %v2357_v13 = vld [vmem:[%s3198_s1 + $0xa0] sm:$0xff] }
 0x10d   : > { %327 = vmatprep.mubr.f32.mxu0 %v2619_v9  ;;  %2470 = vmatprep.mubr.msk.f32.mxu1 %vm244_vm3, %v2298_v27  ;;  %v1060_v49 = vsel %vm1058_vm7, %v2586_v47, %v2587_v46  ;;  %v2370_v27 = vld [vmem:[%s3198_s1 + $0xc8] sm:$0xff]  ;;  %v2381_v32 = vld [vmem:[%s3198_s1 + $0xe0] sm:$0xff] }
 0x10e   : > { %2303 = vmatmul.mubr.msk.f32.gmra.mxu0 %vm244_vm3, %v2299_v33  ;;  %2471 = vmatmul.mubr.msk.f32.vlgmr.msra.gmra.mxu1 %vm244_vm3, %v2299_v33  ;;  %v838_v51 = vpop.permute.xlu1 %837  ;;  %v2590_v55 = vpop.permute.xlu0 %2589 }
 0x10f   : > { %2311 = vmatpush1.msk.msra.mxu1 %vm2310_vm5, %v2675_v12  ;;  %333 = vmatprep.mubr.f32.mxu0 %v2619_v9  ;;  %v844_v53 = vsel %vm843_vm6, %v838_v51, %v2581_v38  ;;  %v2592_v57 = vunpack.i.h.bf16 %v2590_v55  ;;  %v2591_v58 = vunpack.i.l.bf16 %v2590_v55  ;;  %v2393_v38 = vld [vmem:[%s3198_s1 + $0x100] sm:$0xff] }
 0x110   : > { %2484 = vmatprep.subr.mxu1 %v2577_v29  ;;  %2473 = vmatprep.mubr.msk.f32.mxu1 %vm244_vm3, %v2300_v34 }
 0x111   : > { %v1275_v63 = vsel %vm1273_vm8, %v2591_v58, %v2592_v57 }
 0x112   : > { %2304 = vmatmul.mubr.msk.f32.gmra.mxu0 %vm244_vm3, %v2300_v34  ;;  %2474 = vmatmul.mubr.msk.f32.gmra.mxu1 %vm244_vm3, %v2301_v28  ;;  %v1053_v59 = vpop.permute.xlu1 %1052  ;;  %v2595_v1 = vpop.permute.xlu0 %2594  ;;  %v2382_v34 = vld [vmem:[%s3198_s1 + $0xe8] sm:$0xff] }
 0x113   : > { %507 = vmatprep.mubr.f32.mxu1 %v2619_v9  ;;  %2478 = vmatprep.mubr.msk.f32.mxu0 %vm244_vm3, %v221_v36  ;;  %v1059_v61 = vsel %vm1058_vm7, %v1053_v59, %v2586_v47  ;;  %v2597_v2 = vunpack.i.h.bf16 %v2595_v1  ;;  %v2596_v3 = vunpack.i.l.bf16 %v2595_v1 }
 0x115   : > { %v1490_v5 = vsel %vm1488_vm9, %v2596_v3, %v2597_v2 }
 0x116   : > { %2312 = vmatmul.mubr.msk.f32.vlgmr.msra.gmra.mxu1 %vm244_vm3, %v221_v36  ;;  %2479 = vmatmul.mubr.msk.f32.vlgmr.msra.gmra.mxu0 %vm244_vm3, %v222_v40  ;;  %v1268_v7 = vpop.permute.xlu1 %1267  ;;  %v2600_v12 = vpop.permute.xlu0 %2599 }
 0x117   : > { %677 = vmatpush1.msra.mxu0 %v629_v41  ;;  %2485 = vmatpush3.msra.mxu1 %v2577_v29  ;;  %v1274_v10 = vsel %vm1273_vm8, %v1268_v7, %v2591_v58  ;;  %v2602_v14 = vunpack.i.h.bf16 %v2600_v12  ;;  %v2601_v15 = vunpack.i.l.bf16 %v2600_v12  ;;  %v2371_v29 = vld [vmem:[%s3198_s1 + $0xd0] sm:$0xff]  ;;  %v2396_v41 = vld [vmem:[%s3198_s1 + $0x118] sm:$0xff] }
 0x118   : > { %891 = vmatprep.subr.mxu1 %v845_v43  ;;  %2492 = vmatprep.subr.mxu0 %v2582_v37 }
 0x119   : > { %513 = vmatprep.mubr.f32.mxu1 %v2619_v9  ;;  %2481 = vmatprep.mubr.msk.f32.mxu0 %vm244_vm3, %v223_v42  ;;  %v1705_v20 = vsel %vm1703_vm10, %v2601_v15, %v2602_v14 }
 0x11a   : > { %2313 = vmatmul.mubr.msk.f32.gmra.mxu1 %vm244_vm3, %v222_v40  ;;  %2482 = vmatmul.mubr.msk.f32.gmra.mxu0 %vm244_vm3, %v224_v44  ;;  %v1483_v16 = vpop.permute.xlu1 %1482  ;;  %v2605_v22 = vpop.permute.xlu0 %2604  ;;  %v2395_v40 = vld [vmem:[%s3198_s1 + $0x110] sm:$0xff] }
 0x11b   : > { %519 = vmatprep.mubr.f32.mxu1 %v2619_v9  ;;  %710 = vmatprep.mubr.f32.mxu0 %v2619_v9  ;;  %v1489_v18 = vsel %vm1488_vm9, %v1483_v16, %v2596_v3  ;;  %v2607_v23 = vunpack.i.h.bf16 %v2605_v22  ;;  %v2606_v24 = vunpack.i.l.bf16 %v2605_v22 }
 0x11d   : > { %v1920_v26 = vsel %vm1918_vm11, %v2606_v24, %v2607_v23 }
 0x11e   : > { %2314 = vmatmul.mubr.msk.f32.gmra.mxu1 %vm244_vm3, %v223_v42  ;;  %2325 = vmatmul.mubr.msk.f32.vlgmr.msra.gmra.mxu0 %vm244_vm3, %v2321_v48  ;;  %v1698_v28 = vpop.permute.xlu1 %1697 }
 0x11f   : > { %2493 = vmatpush3.msra.mxu0 %v2582_v37  ;;  %525 = vmatprep.mubr.f32.mxu1 %v2619_v9  ;;  %v1704_v30 = vsel %vm1703_vm10, %v1698_v28, %v2601_v15  ;;  %v2384_v37 = vld [vmem:[%s3198_s1 + $0xf8] sm:$0xff] }
 0x120   : > { %1106 = vmatprep.subr.mxu0 %v1060_v49  ;;  %716 = vmatprep.mubr.f32.mxu0 %v2619_v9 }
 0x122   : > { %2315 = vmatmul.mubr.msk.f32.gmra.mxu1 %vm244_vm3, %v224_v44  ;;  %2326 = vmatmul.mubr.msk.f32.gmra.mxu0 %vm244_vm3, %v2322_v50  ;;  %v1913_v33 = vpop.permute.xlu1 %1912 }
 0x123   : > { %722 = vmatprep.mubr.f32.mxu0 %v2619_v9  ;;  %2486 = vmatprep.mubr.msk.f32.mxu1 %vm244_vm3, %v2321_v48  ;;  %v1919_v36 = vsel %vm1918_vm11, %v1913_v33, %v2606_v24 }
 0x126   : > { %2327 = vmatmul.mubr.msk.f32.gmra.mxu0 %vm244_vm3, %v2323_v52  ;;  %2487 = vmatmul.mubr.msk.f32.vlgmr.msra.gmra.mxu1 %vm244_vm3, %v2322_v50 }
 0x127   : > { %892 = vmatpush1.msra.mxu1 %v844_v53  ;;  %728 = vmatprep.mubr.f32.mxu0 %v2619_v9 }
 0x128   : > { %2500 = vmatprep.subr.mxu1 %v2587_v46  ;;  %2489 = vmatprep.mubr.msk.f32.mxu1 %vm244_vm3, %v2323_v52 }
 0x12a   : > { %2328 = vmatmul.mubr.msk.f32.gmra.mxu0 %vm244_vm3, %v2324_v54  ;;  %2490 = vmatmul.mubr.msk.f32.gmra.mxu1 %vm244_vm3, %v2324_v54 }
 0x12b   : > { %925 = vmatprep.mubr.f32.mxu1 %v2619_v9  ;;  %2494 = vmatprep.mubr.msk.f32.mxu0 %vm244_vm3, %v2333_v56 }
 0x12e   : > { %2337 = vmatmul.mubr.msk.f32.vlgmr.msra.gmra.mxu1 %vm244_vm3, %v2333_v56  ;;  %2495 = vmatmul.mubr.msk.f32.vlgmr.msra.gmra.mxu0 %vm244_vm3, %v2334_v60 }
 0x12f   : > { %1107 = vmatpush1.msra.mxu0 %v1059_v61  ;;  %2501 = vmatpush3.msra.mxu1 %v2587_v46 }
 0x130   : > { %1321 = vmatprep.subr.mxu1 %v1275_v63  ;;  %2508 = vmatprep.subr.mxu0 %v2592_v57 }
 0x131   : > { %931 = vmatprep.mubr.f32.mxu1 %v2619_v9  ;;  %2497 = vmatprep.mubr.msk.f32.mxu0 %vm244_vm3, %v2335_v62 }
 0x132   : > { %2338 = vmatmul.mubr.msk.f32.gmra.mxu1 %vm244_vm3, %v2334_v60  ;;  %2498 = vmatmul.mubr.msk.f32.gmra.mxu0 %vm244_vm3, %v2336_v0 }
 0x133   : > { %937 = vmatprep.mubr.f32.mxu1 %v2619_v9  ;;  %1140 = vmatprep.mubr.f32.mxu0 %v2619_v9 }
 0x136   : > { %2339 = vmatmul.mubr.msk.f32.gmra.mxu1 %vm244_vm3, %v2335_v62  ;;  %2349 = vmatmul.mubr.msk.f32.vlgmr.msra.gmra.mxu0 %vm244_vm3, %v2345_v4 }
 0x137   : > { %2509 = vmatpush3.msra.mxu0 %v2592_v57  ;;  %943 = vmatprep.mubr.f32.mxu1 %v2619_v9 }
 0x138   : > { %1536 = vmatprep.subr.mxu0 %v1490_v5  ;;  %1146 = vmatprep.mubr.f32.mxu0 %v2619_v9 }
 0x13a   : > { %2340 = vmatmul.mubr.msk.f32.gmra.mxu1 %vm244_vm3, %v2336_v0  ;;  %2350 = vmatmul.mubr.msk.f32.gmra.mxu0 %vm244_vm3, %v2346_v6 }
 0x13b   : > { %1152 = vmatprep.mubr.f32.mxu0 %v2619_v9  ;;  %2502 = vmatprep.mubr.msk.f32.mxu1 %vm244_vm3, %v2345_v4 }
 0x13e   : > { %2351 = vmatmul.mubr.msk.f32.gmra.mxu0 %vm244_vm3, %v2347_v8  ;;  %2503 = vmatmul.mubr.msk.f32.vlgmr.msra.gmra.mxu1 %vm244_vm3, %v2346_v6 }
 0x13f   : > { %1322 = vmatpush1.msra.mxu1 %v1274_v10  ;;  %1158 = vmatprep.mubr.f32.mxu0 %v2619_v9 }
 0x140   : > { %2516 = vmatprep.subr.mxu1 %v2597_v2  ;;  %2505 = vmatprep.mubr.msk.f32.mxu1 %vm244_vm3, %v2347_v8 }
 0x142   : > { %2352 = vmatmul.mubr.msk.f32.gmra.mxu0 %vm244_vm3, %v2348_v11  ;;  %2506 = vmatmul.mubr.msk.f32.gmra.mxu1 %vm244_vm3, %v2348_v11 }
 0x143   : > { %1355 = vmatprep.mubr.f32.mxu1 %v2619_v9  ;;  %2510 = vmatprep.mubr.msk.f32.mxu0 %vm244_vm3, %v2357_v13 }
 0x146   : > { %2361 = vmatmul.mubr.msk.f32.vlgmr.msra.gmra.mxu1 %vm244_vm3, %v2357_v13  ;;  %2511 = vmatmul.mubr.msk.f32.vlgmr.msra.gmra.mxu0 %vm244_vm3, %v2358_v17 }
 0x147   : > { %1537 = vmatpush1.msra.mxu0 %v1489_v18  ;;  %2517 = vmatpush3.msra.mxu1 %v2597_v2 }
 0x148   : > { %1751 = vmatprep.subr.mxu1 %v1705_v20  ;;  %2524 = vmatprep.subr.mxu0 %v2602_v14 }
 0x149   : > { %1361 = vmatprep.mubr.f32.mxu1 %v2619_v9  ;;  %2513 = vmatprep.mubr.msk.f32.mxu0 %vm244_vm3, %v2359_v19 }
 0x14a   : > { %2362 = vmatmul.mubr.msk.f32.gmra.mxu1 %vm244_vm3, %v2358_v17  ;;  %2514 = vmatmul.mubr.msk.f32.gmra.mxu0 %vm244_vm3, %v2360_v21 }
 0x14b   : > { %1367 = vmatprep.mubr.f32.mxu1 %v2619_v9  ;;  %1570 = vmatprep.mubr.f32.mxu0 %v2619_v9 }
 0x14e   : > { %2363 = vmatmul.mubr.msk.f32.gmra.mxu1 %vm244_vm3, %v2359_v19  ;;  %2373 = vmatmul.mubr.msk.f32.vlgmr.msra.gmra.mxu0 %vm244_vm3, %v2369_v25 }
 0x14f   : > { %2525 = vmatpush3.msra.mxu0 %v2602_v14  ;;  %1373 = vmatprep.mubr.f32.mxu1 %v2619_v9 }
 0x150   : > { %1966 = vmatprep.subr.mxu0 %v1920_v26  ;;  %1576 = vmatprep.mubr.f32.mxu0 %v2619_v9 }
 0x152   : > { %2364 = vmatmul.mubr.msk.f32.gmra.mxu1 %vm244_vm3, %v2360_v21  ;;  %2374 = vmatmul.mubr.msk.f32.gmra.mxu0 %vm244_vm3, %v2370_v27 }
 0x153   : > { %1582 = vmatprep.mubr.f32.mxu0 %v2619_v9  ;;  %2518 = vmatprep.mubr.msk.f32.mxu1 %vm244_vm3, %v2369_v25 }
 0x156   : > { %2375 = vmatmul.mubr.msk.f32.gmra.mxu0 %vm244_vm3, %v2371_v29  ;;  %2519 = vmatmul.mubr.msk.f32.vlgmr.msra.gmra.mxu1 %vm244_vm3, %v2370_v27 }
 0x157   : > { %1752 = vmatpush1.msra.mxu1 %v1704_v30  ;;  %1588 = vmatprep.mubr.f32.mxu0 %v2619_v9 }
 0x158   : > { %2532 = vmatprep.subr.mxu1 %v2607_v23  ;;  %2521 = vmatprep.mubr.msk.f32.mxu1 %vm244_vm3, %v2371_v29 }
 0x15a   : > { %2376 = vmatmul.mubr.msk.f32.gmra.mxu0 %vm244_vm3, %v2372_v31  ;;  %2522 = vmatmul.mubr.msk.f32.gmra.mxu1 %vm244_vm3, %v2372_v31 }
 0x15b   : > { %1785 = vmatprep.mubr.f32.mxu1 %v2619_v9  ;;  %2526 = vmatprep.mubr.msk.f32.mxu0 %vm244_vm3, %v2381_v32 }
 0x15e   : > { %2385 = vmatmul.mubr.msk.f32.vlgmr.msra.gmra.mxu1 %vm244_vm3, %v2381_v32  ;;  %2527 = vmatmul.mubr.msk.f32.vlgmr.msra.gmra.mxu0 %vm244_vm3, %v2382_v34 }
 0x15f   : > { %1967 = vmatpush1.msra.mxu0 %v1919_v36  ;;  %2533 = vmatpush3.msra.mxu1 %v2607_v23 }
 0x160   : > { %1791 = vmatprep.mubr.f32.mxu1 %v2619_v9  ;;  %2529 = vmatprep.mubr.msk.f32.mxu0 %vm244_vm3, %v2383_v35 }
 0x162   : > { %2386 = vmatmul.mubr.msk.f32.gmra.mxu1 %vm244_vm3, %v2382_v34  ;;  %2530 = vmatmul.mubr.msk.f32.gmra.mxu0 %vm244_vm3, %v2384_v37 }
 0x163   : > { %1797 = vmatprep.mubr.f32.mxu1 %v2619_v9  ;;  %2000 = vmatprep.mubr.f32.mxu0 %v2619_v9 }
 0x166   : > { %2387 = vmatmul.mubr.msk.f32.gmra.mxu1 %vm244_vm3, %v2383_v35  ;;  %2397 = vmatmul.mubr.msk.f32.vlgmr.msra.gmra.mxu0 %vm244_vm3, %v2393_v38 }
 0x167   : > { %1803 = vmatprep.mubr.f32.mxu1 %v2619_v9  ;;  %2006 = vmatprep.mubr.f32.mxu0 %v2619_v9 }
 0x16a   : > { %2388 = vmatmul.mubr.msk.f32.gmra.mxu1 %vm244_vm3, %v2384_v37  ;;  %2398 = vmatmul.mubr.msk.f32.gmra.mxu0 %vm244_vm3, %v2394_v39 }
 0x16b   : > { %2012 = vmatprep.mubr.f32.mxu0 %v2619_v9  ;;  %2534 = vmatprep.mubr.msk.f32.mxu1 %vm244_vm3, %v2393_v38 }
 0x16e   : > { %2399 = vmatmul.mubr.msk.f32.gmra.mxu0 %vm244_vm3, %v2395_v40  ;;  %2535 = vmatmul.mubr.msk.f32.vlgmr.msra.gmra.mxu1 %vm244_vm3, %v2394_v39 }
 0x16f   : > { %2018 = vmatprep.mubr.f32.mxu0 %v2619_v9  ;;  %2537 = vmatprep.mubr.msk.f32.mxu1 %vm244_vm3, %v2395_v40 }
 0x172   : > { %2400 = vmatmul.mubr.msk.f32.gmra.mxu0 %vm244_vm3, %v2396_v41  ;;  %2538 = vmatmul.mubr.msk.f32.gmra.mxu1 %vm244_vm3, %v2396_v41 }
 0x1c9   : > { %v323_v42 = vpop.f32.mrf.mxu0  ;;  %v341_v43 = vpop.f32.mrf.mxu1 }
 0x1cb   : > { %v325_v44 = vpop.f32.mrf.mxu0  ;;  %v343_v45 = vpop.f32.mrf.mxu1 }
 0x1ce   : > { %v329_v46 = vpop.f32.mrf.mxu0  ;;  %v2472_v47 = vpop.f32.mrf.mxu1 }
 0x1d0   : > { %v331_v48 = vpop.f32.mrf.mxu0  ;;  %v412_v49 = vpop.f32.mrf.mxu1 }
 0x1d2   : > { %v335_v50 = vpop.f32.mrf.mxu0  ;;  %v2475_v9 = vpop.f32.mrf.mxu1 }
 0x1d4   : > { %v337_v51 = vpop.f32.mrf.mxu0  ;;  %v422_v52 = vpop.f32.mrf.mxu1 }
 0x1d6   : > { %v509_v53 = vpop.f32.mrf.mxu1  ;;  %v2480_v54 = vpop.f32.mrf.mxu0 }
 0x1d7   : > { %v2931_v55 = vadd.f32 %v509_v53, %v323_v42  ;;  %v2933_v56 = vadd.f32 %v2480_v54, %v2472_v47 }
 0x1d8   : > { %v511_v57 = vpop.f32.mrf.mxu1  ;;  %v598_v58 = vpop.f32.mrf.mxu0 }
 0x1d9   : > { %v2935_v59 = vadd.f32 %v511_v57, %v325_v44  ;;  %v2937_v60 = vadd.f32 %v598_v58, %v412_v49 }
 0x1da   : > { %v515_v61 = vpop.f32.mrf.mxu1  ;;  %v2483_v62 = vpop.f32.mrf.mxu0 }
 0x1db   : > { %v2939_v63 = vadd.f32 %v515_v61, %v329_v46  ;;  %v2941_v0 = vadd.f32 %v2483_v62, %v2475_v9 }
 0x1dc   : > { %v517_v1 = vpop.f32.mrf.mxu1  ;;  %v608_v2 = vpop.f32.mrf.mxu0 }
 0x1dd   : > { %v2943_v3 = vadd.f32 %v517_v1, %v331_v48  ;;  %v2945_v4 = vadd.f32 %v608_v2, %v422_v52 }
 0x1de   : > { %v521_v5 = vpop.f32.mrf.mxu1  ;;  %v2947_v6 = vpop.f32.mrf.mxu0 }
 0x1df   : > { %v2949_v7 = vadd.f32 %v521_v5, %v335_v50  ;;  %v2160_v5 = vlaneseq }
 0x1e0   : > { %v523_v8 = vpop.f32.mrf.mxu1  ;;  %v2951_v10 = vpop.f32.mrf.mxu0 }
 0x1e1   : > { %v2953_v11 = vadd.f32 %v523_v8, %v337_v51 }
 0x1e2   : > { %v527_v12 = vpop.f32.mrf.mxu1  ;;  %v2955_v13 = vpop.f32.mrf.mxu0 }
 0x1e3   : > { %v2957_v14 = vadd.f32 %v527_v12, %v341_v43 }
 0x1e4   : > { %v529_v15 = vpop.f32.mrf.mxu1  ;;  %v2959_v16 = vpop.f32.mrf.mxu0 }
 0x1e5   : > { %v2961_v17 = vadd.f32 %v529_v15, %v343_v45 }
 0x1e6   : > { %v2963_v18 = vpop.f32.mrf.mxu0  ;;  %v2965_v19 = vpop.f32.mrf.mxu1 }
 0x1e8   : > { %v2967_v20 = vpop.f32.mrf.mxu0  ;;  %v2969_v21 = vpop.f32.mrf.mxu1 }
 0x1ea   : > { %v2971_v22 = vpop.f32.mrf.mxu0  ;;  %v2973_v23 = vpop.f32.mrf.mxu1 }
 0x1ec   : > { %v2975_v24 = vpop.f32.mrf.mxu0  ;;  %v2977_v25 = vpop.f32.mrf.mxu1 }
 0x1ee   : > { %v927_v26 = vpop.f32.mrf.mxu1  ;;  %v2979_v27 = vpop.f32.mrf.mxu0 }
 0x1f0   : > { %v2981_v28 = vpop.f32.mrf.mxu1  ;;  %v2983_v29 = vpop.f32.mrf.mxu0 }
 0x1f2   : > { %v2985_v30 = vpop.f32.mrf.mxu1  ;;  %v2987_v31 = vpop.f32.mrf.mxu0 }
 0x1f4   : > { %v2989_v32 = vpop.f32.mrf.mxu1  ;;  %v2991_v33 = vpop.f32.mrf.mxu0 }
 0x1f6   : > { %v2993_v34 = vpop.f32.mrf.mxu1  ;;  %v2995_v35 = vpop.f32.mrf.mxu0 }
 0x1f8   : > { %v2997_v36 = vpop.f32.mrf.mxu1  ;;  %v2999_v37 = vpop.f32.mrf.mxu0 }
 0x1fa   : > { %v3001_v38 = vpop.f32.mrf.mxu1  ;;  %v3003_v39 = vpop.f32.mrf.mxu0 }
 0x1fc   : > { %v3005_v40 = vpop.f32.mrf.mxu1  ;;  %v3007_v41 = vpop.f32.mrf.mxu0 }
 0x1fe   : > { %v3009_v42 = vpop.f32.mrf.mxu0  ;;  %v3011_v43 = vpop.f32.mrf.mxu1 }
 0x200   : > { %v3013_v44 = vpop.f32.mrf.mxu0  ;;  %v3015_v45 = vpop.f32.mrf.mxu1 }
 0x202   : > { %v3017_v46 = vpop.f32.mrf.mxu0  ;;  %v3019_v47 = vpop.f32.mrf.mxu1 }
 0x204   : > { %v3021_v48 = vpop.f32.mrf.mxu0  ;;  %v3023_v49 = vpop.f32.mrf.mxu1 }
 0x205   : > { %3202 = vst [vmem:[#allocation2_spill] sm:$0xff] %v3021_v48  ;;  %3203 = vst [vmem:[#allocation3_spill] sm:$0xff] %v3023_v49 }
 0x206   : > { %v1357_v50 = vpop.f32.mrf.mxu1  ;;  %v3025_v9 = vpop.f32.mrf.mxu0 }
 0x207   : > { %3204 = vst [vmem:[#allocation4_spill] sm:$0xff] %v3025_v9 }
 0x208   : > { %v3027_v51 = vpop.f32.mrf.mxu1  ;;  %v3029_v52 = vpop.f32.mrf.mxu0 }
 0x209   : > { %3205 = vst [vmem:[#allocation5_spill] sm:$0xff] %v3029_v52 }
 0x20a   : > { %v3031_v53 = vpop.f32.mrf.mxu1  ;;  %v3033_v54 = vpop.f32.mrf.mxu0 }
 0x20b   : > { %3206 = vst [vmem:[#allocation6_spill] sm:$0xff] %v3033_v54  ;;  %v2161_v54 = vshrl.u32 %v2160_v5, 7  ;;  %v820_v5 = vadd.f32 %v2947_v6, %v2931_v55  ;;  %v826_v55 = vadd.f32 %v2963_v18, %v2949_v7  ;;  %v825_v6 = vadd.f32 %v2965_v19, %v2933_v56 }
 0x20c   : > { %v3035_v57 = vpop.f32.mrf.mxu1  ;;  %v3037_v58 = vpop.f32.mrf.mxu0  ;;  %v830_v7 = vadd.f32 %v2975_v24, %v2961_v17 }
 0x20d   : > { %3207 = vst [vmem:[#allocation7_spill] sm:$0xff] %v3035_v57  ;;  %3208 = vst [vmem:[#allocation8_spill] sm:$0xff] %v3037_v58  ;;  %v2166_v49 = vsub.s32 1, %v2161_v54  ;;  %v2170_v48 = vsub.s32 2, %v2161_v54 }
 0x20e   : > { %v3039_v61 = vpop.f32.mrf.mxu1  ;;  %v1572_v62 = vpop.f32.mrf.mxu0 }
 0x20f   : > { %3209 = vst [vmem:[#allocation9_spill] sm:$0xff] %v3039_v61 }
 0x210   : > { %v3041_v1 = vpop.f32.mrf.mxu1  ;;  %v3043_v2 = vpop.f32.mrf.mxu0 }
 0x211   : > { %3210 = vst [vmem:[#allocation10_spill] sm:$0xff] %v3041_v1  ;;  %v2162_v1 = vsub.s32 0, %v2161_v54 }
 0x212   : > { %v3045_v8 = vpop.f32.mrf.mxu1  ;;  %v3047_v12 = vpop.f32.mrf.mxu0 }
 0x213   : > { %3211 = vst [vmem:[#allocation11_spill] sm:$0xff] %v3045_v8  ;;  %3212 = vst [vmem:[#allocation12_spill] sm:$0xff] %v3047_v12  ;;  %v2158_v8 = vld [vmem:[%s3200_s3] sm:$0x7] }
 0x214   : > { %v3049_v15 = vpop.f32.mrf.mxu1  ;;  %v3051_v52 = vpop.f32.mrf.mxu0  ;;  %v3078_v54 = vrot.slane %v2158_v8, %v2166_v49  ;;  %v829_v49 = vadd.f32 %v2971_v22, %v2957_v14 }
 0x215   : > { %3213 = vst [vmem:[#allocation13_spill] sm:$0xff] %v3049_v15  ;;  %3214 = vst [vmem:[#allocation14_spill] sm:$0xff] %v3051_v52  ;;  %v3080_v52 = vrot.slane %v2158_v8, %v2170_v48  ;;  %v822_v48 = vadd.f32 %v2969_v21, %v2937_v60  ;;  %v1040_v60 = vadd.f32 %v2979_v27, %v825_v6 }
 0x216   : > { %v3053_v9 = vpop.f32.mrf.mxu0  ;;  %v3055_v58 = vpop.f32.mrf.mxu1 }
 0x217   : > { %3215 = vst [vmem:[#allocation15_spill] sm:$0xff] %v3053_v9  ;;  %3216 = vst [vmem:[#allocation16_spill] sm:$0xff] %v3055_v58  ;;  %v821_v58 = vadd.f32 %v2951_v10, %v2935_v59  ;;  %v3076_v9 = vrot.slane %v2158_v8, %v2162_v1  ;;  %v1035_v59 = vadd.f32 %v927_v26, %v820_v5 }
 0x218   : > { %v3057_v61 = vpop.f32.mrf.mxu0  ;;  %v3059_v57 = vpop.f32.mrf.mxu1  ;;  %v827_v10 = vadd.f32 %v2967_v20, %v2953_v11  ;;  %v828_v11 = vadd.f32 %v2977_v25, %v2945_v4  ;;  %v1037_v14 = vadd.f32 %v2983_v29, %v822_v48  ;;  %v1041_v4 = vadd.f32 %v2993_v34, %v826_v55  ;;  %v3227_v48 = vld [vmem:[#allocation6_spill] sm:$0xff] }
 0x219   : > { %3217 = vst [vmem:[#allocation17_spill] sm:$0xff] %v3057_v61  ;;  %3218 = vst [vmem:[#allocation18_spill] sm:$0xff] %v3059_v57  ;;  %v1036_v56 = vadd.f32 %v2981_v28, %v821_v58  ;;  %v1044_v25 = vadd.f32 %v3001_v38, %v829_v49  ;;  %v1045_v29 = vadd.f32 %v3005_v40, %v830_v7  ;;  %v3221_v58 = vld [vmem:[#allocation2_spill] sm:$0xff]  ;;  %v2134_v55 = vpop.permute.xlu1 %2133  ;;  %v3228_v49 = vld [vmem:[#allocation9_spill] sm:$0xff] }
 0x21a   : > { %v3064_v12 = vpop.f32.mrf.mxu0  ;;  %v3066_v15 = vpop.f32.mrf.mxu1  ;;  %v1042_v24 = vadd.f32 %v2997_v36, %v827_v10  ;;  %v1255_v34 = vadd.f32 %v3011_v43, %v1040_v60  ;;  %v1252_v38 = vadd.f32 %v3015_v45, %v1037_v14  ;;  %v3226_v10 = vld [vmem:[#allocation5_spill] sm:$0xff] }
 0x21b   : > { %3219 = vst [vmem:[#allocation19_spill] sm:$0xff] %v3064_v12  ;;  %3220 = vst [vmem:[#allocation20_spill] sm:$0xff] %v3066_v15  ;;  %v823_v12 = vadd.f32 %v2955_v13, %v2939_v63  ;;  %v824_v15 = vadd.f32 %v2959_v16, %v2943_v3  ;;  %v831_v3 = vadd.f32 %v2973_v23, %v2941_v0 }
 0x21c   : > { %v3072_v61 = vpop.f32.mrf.mxu0  ;;  %v3074_v57 = vpop.f32.mrf.mxu1  ;;  %v1250_v16 = vadd.f32 %v2995_v35, %v1035_v59  ;;  %v1251_v21 = vadd.f32 %v2999_v37, %v1036_v56  ;;  %v1043_v23 = vadd.f32 %v2991_v33, %v828_v11  ;;  %v1256_v33 = vadd.f32 %v3009_v42, %v1041_v4  ;;  %v3225_v59 = vld [vmem:[#allocation4_spill] sm:$0xff]  ;;  %v3229_v56 = vld [vmem:[#allocation14_spill] sm:$0xff] }
 0x21d   : > { %v1038_v18 = vadd.f32 %v2985_v30, %v823_v12  ;;  %v1046_v0 = vadd.f32 %v2987_v31, %v831_v3  ;;  %v1039_v17 = vadd.f32 %v2989_v32, %v824_v15  ;;  %v1257_v35 = vadd.f32 %v3013_v44, %v1042_v24  ;;  %v3223_v12 = vld [vmem:[#allocation7_spill] sm:$0xff]  ;;  %v3224_v15 = vld [vmem:[#allocation12_spill] sm:$0xff] }
 0x21e   : > { %v1787_v63 = vpop.f32.mrf.mxu1  ;;  %v3096_v13 = vpop.f32.mrf.mxu0  ;;  %v1465_v22 = vadd.f32 %v1357_v50, %v1250_v16  ;;  %v1466_v30 = vadd.f32 %v3027_v51, %v1251_v21  ;;  %v1260_v43 = vadd.f32 %v3221_v58, %v1045_v29  ;;  %v1470_v6 = vadd.f32 %v3225_v59, %v1255_v34  ;;  %v3232_v21 = vld [vmem:[#allocation11_spill] sm:$0xff] }
 0x21f   : > { %v1253_v28 = vadd.f32 %v3003_v39, %v1038_v18  ;;  %v1254_v32 = vadd.f32 %v3007_v41, %v1039_v17  ;;  %v3132_v51 = vpop.permute.xlu0 %2128  ;;  %v1259_v41 = vadd.f32 %v3017_v46, %v1044_v25  ;;  %v1261_v42 = vadd.f32 %v3019_v47, %v1046_v0  ;;  %v3230_v18 = vld [vmem:[#allocation8_spill] sm:$0xff]  ;;  %v3231_v0 = vld [vmem:[#allocation10_spill] sm:$0xff] }
 0x220   : > { %v1789_v19 = vpop.f32.mrf.mxu1  ;;  %v3109_v20 = vpop.f32.mrf.mxu0  ;;  %v1680_v31 = vadd.f32 %v1572_v62, %v1465_v22  ;;  %v1681_v40 = vadd.f32 %v3043_v2, %v1466_v30  ;;  %v3222_v62 = vld [vmem:[#allocation3_spill] sm:$0xff]  ;;  %v1467_v46 = vadd.f32 %v3226_v10, %v1252_v38  ;;  %v1472_v17 = vadd.f32 %v3231_v0, %v1257_v35  ;;  %v3236_v34 = vld [vmem:[#allocation17_spill] sm:$0xff] }
 0x221   : > { %v1468_v39 = vadd.f32 %v3031_v53, %v1253_v28  ;;  %v1258_v44 = vadd.f32 %v3222_v62, %v1043_v23  ;;  %v1469_v45 = vadd.f32 %v3223_v12, %v1254_v32  ;;  %v1476_v47 = vadd.f32 %v3227_v48, %v1261_v42  ;;  %v3233_v23 = vld [vmem:[#allocation15_spill] sm:$0xff]  ;;  %v3234_v28 = vld [vmem:[#allocation13_spill] sm:$0xff]  ;;  %v3235_v32 = vld [vmem:[#allocation16_spill] sm:$0xff] }
 0x222   : > { %v1793_v26 = vpop.f32.mrf.mxu1  ;;  %v3118_v27 = vpop.f32.mrf.mxu0  ;;  %v1895_v50 = vadd.f32 %v1787_v63, %v1680_v31  ;;  %v1896_v5 = vadd.f32 %v1789_v19, %v1681_v40  ;;  %v1471_v63 = vadd.f32 %v3228_v49, %v1256_v33  ;;  %v1474_v22 = vadd.f32 %v3232_v21, %v1259_v41  ;;  %v3239_v12 = vld [vmem:[#allocation20_spill] sm:$0xff] }
 0x223   : > { %v1683_v53 = vadd.f32 %v3224_v15, %v1468_v39  ;;  %v1684_v16 = vadd.f32 %v3229_v56, %v1469_v45  ;;  %v1473_v19 = vadd.f32 %v3230_v18, %v1258_v44  ;;  %v1475_v29 = vadd.f32 %v3234_v28, %v1260_v43  ;;  %v3237_v39 = vld [vmem:[#allocation18_spill] sm:$0xff]  ;;  %v3238_v43 = vld [vmem:[#allocation19_spill] sm:$0xff] }
 0x224   : > { %v1795_v36 = vpop.f32.mrf.mxu1  ;;  %v3127_v37 = vpop.f32.mrf.mxu0  ;;  %v1686_v4 = vadd.f32 %v3233_v23, %v1471_v63  ;;  %v1685_v33 = vadd.f32 %v3235_v32, %v1470_v6  ;;  %v1687_v38 = vadd.f32 %v3236_v34, %v1472_v17  ;;  %v1682_v40 = vadd.f32 %v3237_v39, %v1467_v46 }
 0x225   : > { %v1898_v11 = vadd.f32 %v1793_v26, %v1683_v53  ;;  %v1899_v30 = vadd.f32 %v1795_v36, %v1684_v16  ;;  %v2139_v36 = vpop.permute.xlu1 %2138  ;;  %v1690_v46 = vadd.f32 %v3072_v61, %v1475_v29  ;;  %v1688_v48 = vadd.f32 %v3074_v57, %v1473_v19 }
 0x226   : > { %v1799_v1 = vpop.f32.mrf.mxu1  ;;  %v2002_v8 = vpop.f32.mrf.mxu0  ;;  %v1900_v45 = vadd.f32 %v3096_v13, %v1685_v33  ;;  %v1897_v15 = vadd.f32 %v3109_v20, %v1682_v40 }
 0x227   : > { %v2110_v2 = vadd.f32 %v2002_v8, %v1895_v50  ;;  %v1901_v50 = vadd.f32 %v1799_v1, %v1686_v4  ;;  %v1689_v8 = vadd.f32 %v3238_v43, %v1474_v22  ;;  %v1691_v1 = vadd.f32 %v3239_v12, %v1476_v47 }
 0x228   : > { %v1801_v3 = vpop.f32.mrf.mxu1  ;;  %v2004_v7 = vpop.f32.mrf.mxu0 }
 0x229   : > { %v2146_v60 = vadd.f32 %v3132_v51, %v2110_v2  ;;  %v2111_v14 = vadd.f32 %v2004_v7, %v1896_v5  ;;  %v1902_v2 = vadd.f32 %v1801_v3, %v1687_v38  ;;  %v1906_v3 = vadd.f32 %v3118_v27, %v1691_v1 }
 0x22a   : > { %v1805_v24 = vpop.f32.mrf.mxu1  ;;  %v2008_v25 = vpop.f32.mrf.mxu0 }
 0x22b   : > { %v2147_v31 = vadd.f32 %v3132_v51, %v2111_v14  ;;  %v2113_v26 = vadd.f32 %v2008_v25, %v1898_v11  ;;  %v2175_v41 = vmul.f32 %v3076_v9, %v2146_v60  ;;  %v1903_v11 = vadd.f32 %v3127_v37, %v1688_v48 }
 0x22c   : > { %v1807_v35 = vpop.f32.mrf.mxu1  ;;  %v2010_v42 = vpop.f32.mrf.mxu0  ;;  %v1904_v60 = vadd.f32 %v1805_v24, %v1689_v8 }
 0x22d   : > { %v2176_v58 = vmul.f32 %v3078_v54, %v2147_v31  ;;  %v2149_v62 = vadd.f32 %v2134_v55, %v2113_v26  ;;  %v2114_v44 = vadd.f32 %v2010_v42, %v1899_v30  ;;  %v1905_v18 = vadd.f32 %v1807_v35, %v1690_v46  ;;  %v2144_v24 = vpop.permute.xlu0 %2143 }
 0x22e   : > { %v2014_v53 = vpop.f32.mrf.mxu0  ;;  %v2536_v5 = vpop.f32.mrf.mxu1 }
 0x22f   : > { %v2415_v59 = vpack.c.bf16 %v2176_v58, %v2175_v41  ;;  %v2150_v6 = vadd.f32 %v2134_v55, %v2114_v44  ;;  %v2116_v10 = vadd.f32 %v2014_v53, %v1901_v50  ;;  %v2178_v49 = vmul.f32 %v3076_v9, %v2149_v62 }
 0x230   : > { %v2115_v63 = vadd.f32 %v2536_v5, %v1900_v45  ;;  %v2016_v7 = vpop.f32.mrf.mxu0  ;;  %v2091_v56 = vpop.f32.mrf.mxu1 }
 0x231   : > { %2227 = vst [vmem:[%s3161_s18] sm:$0xff] %v2415_v59  ;;  %v2179_v13 = vmul.f32 %v3078_v54, %v2150_v6  ;;  %v2152_v47 = vadd.f32 %v2139_v36, %v2116_v10  ;;  %v2117_v20 = vadd.f32 %v2016_v7, %v1902_v2  ;;  %v2112_v16 = vadd.f32 %v2091_v56, %v1897_v15 }
 0x232   : > { %v2151_v61 = vadd.f32 %v2134_v55, %v2115_v63  ;;  %v2020_v14 = vpop.f32.mrf.mxu0  ;;  %v2539_v57 = vpop.f32.mrf.mxu1 }
 0x233   : > { %v2417_v19 = vpack.c.bf16 %v2179_v13, %v2178_v49  ;;  %v2153_v0 = vadd.f32 %v2139_v36, %v2117_v20  ;;  %v2148_v17 = vadd.f32 %v3132_v51, %v2112_v16  ;;  %v2181_v22 = vmul.f32 %v3076_v9, %v2152_v47 }
 0x234   : > { %v2180_v21 = vmul.f32 %v3080_v52, %v2151_v61  ;;  %v2119_v23 = vadd.f32 %v2020_v14, %v1904_v60  ;;  %v2121_v4 = vadd.f32 %v2539_v57, %v1906_v3  ;;  %v2022_v27 = vpop.f32.mrf.mxu0  ;;  %v2101_v25 = vpop.f32.mrf.mxu1 }
 0x235   : > { %2230 = vst [vmem:[%s3161_s18 + $0xc] sm:$0xff] %v2417_v19  ;;  %v2182_v37 = vmul.f32 %v3078_v54, %v2153_v0  ;;  %v2177_v55 = vmul.f32 %v3080_v52, %v2148_v17  ;;  %v2120_v28 = vadd.f32 %v2022_v27, %v1905_v18  ;;  %v2118_v29 = vadd.f32 %v2101_v25, %v1903_v11 }
 0x236   : > { %v2418_v51 = vpack.c.bf16 %v2180_v21, %v2180_v21  ;;  %v2155_v30 = vadd.f32 %v2144_v24, %v2119_v23  ;;  %v2157_v31 = vadd.f32 %v2144_v24, %v2121_v4 }
 0x237   : > { %v2419_v26 = vpack.c.bf16 %v2182_v37, %v2181_v22  ;;  %v2416_v32 = vpack.c.bf16 %v2177_v55, %v2177_v55  ;;  %v2156_v33 = vadd.f32 %v2144_v24, %v2120_v28  ;;  %v2154_v34 = vadd.f32 %v2139_v36, %v2118_v29 }
 0x238   : > { %2231 = vst.msk [vmem:[%s3161_s18 + $0x14] sm:$0xf] %vm2228_vm12, %v2418_v51  ;;  %v2186_v38 = vmul.f32 %v3080_v52, %v2157_v31  ;;  %v2184_v39 = vmul.f32 %v3076_v9, %v2155_v30 }
 0x239   : > { %2232 = vst [vmem:[%s3161_s18 + $0x18] sm:$0xff] %v2419_v26  ;;  %2229 = vst.msk [vmem:[%s3161_s18 + $0x8] sm:$0xf] %vm2228_vm12, %v2416_v32  ;;  %v2185_v40 = vmul.f32 %v3078_v54, %v2156_v33  ;;  %v2183_v50 = vmul.f32 %v3080_v52, %v2154_v34 }
 0x23a   : > { %v2422_v35 = vpack.c.bf16 %v2186_v38, %v2186_v38 }
 0x23b   : > { %v2421_v42 = vpack.c.bf16 %v2185_v40, %v2184_v39  ;;  %v2420_v41 = vpack.c.bf16 %v2183_v50, %v2183_v50 }
 0x23c   : > { %2235 = vst.msk [vmem:[%s3161_s18 + $0x2c] sm:$0xf] %vm2228_vm12, %v2422_v35 }
 0x23d   : > { %2234 = vst [vmem:[%s3161_s18 + $0x24] sm:$0xff] %v2421_v42  ;;  %2233 = vst.msk [vmem:[%s3161_s18 + $0x20] sm:$0xf] %vm2228_vm12, %v2420_v41 }
 0x23e PF: > { %s14_s15 = sadd.s32 1, %s2616_s15  }
 0x23f   : > { %p11_p4 = scmp.ge.s32.totalorder %s14_s15, 4  }
 0x241   :  { %13 = sbr.rel (!%p11_p4) target bundleno = 1 (0x1), region = 74 }

// kernel: eecnet_forward.20
= control target key start
LH: loop header
LB: loop body
LE: loop exit
PB: predicated region body
PF: predicated region fallthrough
CT: control target
= control target key end

     0   :  { %s6418_s13 = smov 0   ;;  %s8527_s0 = inlined_call_operand.vmem [shape: bf16[2,32,324], index: 0, kind: input, shape index: {}]   ;;  %s8528_s1 = inlined_call_operand.vmem [shape: f32[9,32,32], index: 1, kind: input, shape index: {}]   ;;  %s8529_s2 = inlined_call_operand.vmem [shape: f32[32,1], index: 2, kind: input, shape index: {}]   ;;  %s8530_s3 = inlined_call_operand.vmem [shape: f32[32,1], index: 3, kind: input, shape index: {}]   ;;  %s8531_s4 = inlined_call_operand.vmem [shape: f32[9,32,32], index: 4, kind: input, shape index: {}]   ;;  %s8532_s5 = inlined_call_operand.vmem [shape: f32[32,1], index: 5, kind: input, shape index: {}]   ;;  %s8533_s6 = inlined_call_operand.vmem [shape: f32[16,32], index: 6, kind: input, shape index: {}]   ;;  %s8534_s7 = inlined_call_operand.vmem [shape: f32[16,1], index: 7, kind: input, shape index: {}]   ;;  %s8535_s8 = inlined_call_operand.vmem [shape: f32[1,324], index: 8, kind: input, shape index: {}]   ;;  %s8536_s9 = inlined_call_operand.vmem [shape: bf16[2,32,324], index: 9, kind: output, shape index: {0}]   ;;  %s8537_s10 = inlined_call_operand.vmem [shape: bf16[2,16,324], index: 10, kind: output, shape index: {1}]  }
   0x1 LB: > { %s5368_s14 = sadd.s32 4294967295, %s6350_s13   ;;  %p5372_p0 = scmp.ge.s32.totalorder %s6350_s13, 1  ;;  %s6350_s13 = sphi %s6418_s13, %s21_s13  }
   0x2   : > { %p315_p1 = scmp.lt.s32.totalorder %s6350_s13, 3 }
   0x4   : > { %p316_p2 = pnand %p5372_p0, %p315_p1 }
   0x6   : > { %319 = sbr.rel (%p316_p2) target bundleno = 1463 (0x5b7), region = 56 }
   0xb   : > { %p358_p3 = scmp.lt.s32.totalorder %s5368_s14, 1  ;;  %s6352_s19 = smov 19   ;;  %vm430_vm0 = vcmask 154624   ;;  %vm455_vm1 = vcmask 711680   ;;  %v6500_v58 = vld [vmem:[%s8528_s1 + $0x20] sm:$0xff]  ;;  %vm522_vm2 = vcmask 261120  }
   0xc   : > { %s6353_s20 = smov 127   ;;  %5796 = vmatprep.mubr.msk.f32.mxu1 %vm522_vm2, %v6500_v58  ;;  %s6355_s23 = smov 126   ;;  %vm501_vm3 = vcmask 1039360   ;;  %vm6599_vm4 = vmneg %vm430_vm0  ;;  %vm924_vm5 = vcmask 1031168   ;;  %vm1172_vm6 = vcmask 900096   ;;  %vm1420_vm7 = vcmask 891904  }
   0xd   : > { %s8644_s14 = smov (!%p358_p3, %s5368_s14), 1  ;;  %s6356_s24 = smov 110   ;;  %vm1668_vm8 = vcmask 883712   ;;  %vm1916_vm9 = vcmask 752640   ;;  %vm2164_vm10 = vcmask 744448   ;;  %vm8544_vm11 = vcmask 736256  }
   0xe   : > { %s6051_s15 = smul.u32 48, %s8644_s14  ;;  %s6357_s25 = smov 109  }
   0xf   : > { %s6358_s26 = smov 108   ;;  %s6359_s27 = smov 92  }
  0x10   : > { %s362_s18 = scalar_lea.vmem %s8527_s0, %s6051_s15  ;;  %s6360_s28 = smov 91  }
  0x11   : > { %v380_v0 = vld [vmem:[%s362_s18 + $0x24] sm:$0xff]  ;;  %v381_v1 = vld [vmem:[%s362_s18 + $0x20] ss:$12 sps:$4 sm:$0xff]   ;;  %v378_v2 = vld [vmem:[%s362_s18 + $0x18] sm:$0xff]  ;;  %s6361_s29 = smov 90  }
  0x12   : > { %v392_v3 = vunpack.c.h.bf16 %v380_v0  ;;  %v393_v4 = vunpack.c.h.bf16 %v381_v1  ;;  %v391_v5 = vunpack.c.l.bf16 %v380_v0  ;;  %v388_v6 = vunpack.c.l.bf16 %v378_v2  ;;  %v376_v7 = vld [vmem:[%s362_s18 + $0xc] sm:$0xff]  ;;  %v377_v8 = vld [vmem:[%s362_s18 + $0x8] ss:$12 sps:$4 sm:$0xff]   ;;  %v374_v13 = vld [vmem:[%s362_s18] sm:$0xff] }
  0x13   : > { %v389_v9 = vunpack.c.h.bf16 %v378_v2  ;;  %v390_v10 = vunpack.c.l.bf16 %v381_v1  ;;  %v386_v11 = vunpack.c.h.bf16 %v376_v7  ;;  %v387_v12 = vunpack.c.h.bf16 %v377_v8 }
  0x14   : > { %v6072_v14 = vpack.i.bf16 %v393_v4, %v392_v3  ;;  %v383_v17 = vunpack.c.h.bf16 %v374_v13  ;;  %v385_v18 = vunpack.c.l.bf16 %v376_v7  ;;  %v382_v20 = vunpack.c.l.bf16 %v374_v13 }
  0x15   : > { %v6082_v15 = vpack.i.bf16 %v388_v6, %v390_v10  ;;  %v6077_v16 = vpack.i.bf16 %v389_v9, %v391_v5  ;;  %v6087_v19 = vpack.i.bf16 %v387_v12, %v386_v11  ;;  %v384_v21 = vunpack.c.l.bf16 %v377_v8 }
  0x16   : > { %6073 = vrot.lane.b32.xlu0 %v6072_v14, %s6352_s19  ;;  %v6092_v22 = vpack.i.bf16 %v383_v17, %v385_v18  ;;  %v8538_v1 = vmov 0.0  }
  0x17   : > { %6083 = vrot.lane.b32.xlu1 %v6082_v15, %s6352_s19  ;;  %v6097_v23 = vpack.i.bf16 %v382_v20, %v384_v21  ;;  %599 = vmatprep.mubr.f32.mxu0 %v8538_v1 }
  0x1a   : > { %6078 = vrot.lane.b32.xlu0 %v6077_v16, %s6352_s19 }
  0x1b   : > { %6088 = vrot.lane.b32.xlu1 %v6087_v19, %s6352_s19 }
  0x1e   : > { %6093 = vrot.lane.b32.xlu0 %v6092_v22, %s6352_s19 }
  0x1f   : > { %6098 = vrot.lane.b32.xlu1 %v6097_v23, %s6352_s19 }
  0x88   : > { %v6074_v24 = vpop.permute.xlu0 %6073 }
  0x89   : > { %v6076_v25 = vunpack.i.h.bf16 %v6074_v24  ;;  %v6075_v26 = vunpack.i.l.bf16 %v6074_v24  ;;  %v6084_v27 = vpop.permute.xlu1 %6083 }
  0x8a   : > { %v6443_v29 = vunpack.i.h.bf16 %v6084_v27  ;;  %v6085_v30 = vunpack.i.l.bf16 %v6084_v27 }
  0x8b   : > { %v6441_v28 = vsel %vm430_vm0, %v6075_v26, %v6076_v25 }
  0x8c   : > { %v6079_v31 = vpop.permute.xlu0 %6078  ;;  %v459_v35 = vsel %vm455_vm1, %v6441_v28, 0.0  ;;  %v453_v52 = vsel %vm430_vm0, 0.0, %v6443_v29 }
  0x8d   : > { %v6081_v32 = vunpack.i.h.bf16 %v6079_v31  ;;  %v6445_v33 = vunpack.i.l.bf16 %v6079_v31  ;;  %v6089_v34 = vpop.permute.xlu1 %6088 }
  0x8e   : > { %v6091_v36 = vunpack.i.h.bf16 %v6089_v34  ;;  %v6090_v37 = vunpack.i.l.bf16 %v6089_v34  ;;  %v5377_v34 = vld [vmem:[%s8528_s1 + $0x28] sm:$0xff] }
  0x8f   : > { %v6451_v38 = vsel %vm430_vm0, %v6443_v29, %v6081_v32  ;;  %v6454_v39 = vsel %vm430_vm0, %v6081_v32, %v6085_v30  ;;  %v6458_v40 = vsel %vm430_vm0, %v6445_v33, %v6075_v26  ;;  %v454_v41 = vsel %vm430_vm0, 0.0, %v6445_v33 }
  0x90   : > { %v6463_v42 = vsel %vm430_vm0, %v6090_v37, %v6091_v36  ;;  %v6094_v43 = vpop.permute.xlu0 %6093  ;;  %v6466_v44 = vpack.i.bf16 %v459_v35, %v6458_v40  ;;  %v6469_v45 = vpack.i.bf16 %v6451_v38, %v454_v41  ;;  %v458_v46 = vsel %vm455_vm1, %v6454_v39, 0.0 }
  0x91   : > { %v6096_v47 = vunpack.i.h.bf16 %v6094_v43  ;;  %v6473_v48 = vunpack.i.l.bf16 %v6094_v43  ;;  %v6099_v49 = vpop.permute.xlu1 %6098  ;;  %v457_v53 = vsel %vm455_vm1, %v6463_v42, 0.0  ;;  %v6492_v56 = vpack.i.bf16 %v453_v52, %v458_v46 }
  0x92   : > { %v6475_v50 = vunpack.i.h.bf16 %v6099_v49  ;;  %v6100_v51 = vunpack.i.l.bf16 %v6099_v49  ;;  %6108 = vrot.lane.b32.xlu0 %v6466_v44, %s6353_s20  ;;  %6103 = vrot.lane.b32.xlu1 %v6469_v45, %s6353_s20  ;;  %v6297_v3 = vpack.i.bf16 %v454_v41, %v458_v46  ;;  %v6172_v4 = vpack.i.bf16 %v6458_v40, %v459_v35  ;;  %v5379_v46 = vld [vmem:[%s8528_s1 + $0x38] sm:$0xff] }
  0x93   : > { %v6487_v54 = vsel %vm430_vm0, %v6473_v48, %v6090_v37  ;;  %v452_v59 = vsel %vm430_vm0, 0.0, %v6473_v48  ;;  %v6187_v6 = vpack.i.bf16 %v457_v53, %v6451_v38  ;;  %v8553_v43 = vmov 0 }
  0x94   : > { %v6490_v55 = vsel %vm430_vm0, %v6096_v47, %v6100_v51  ;;  %v6495_v57 = vpack.i.bf16 %v457_v53, %v6487_v54  ;;  %v6506_v60 = vsel %vm430_vm0, %v6475_v50, %v6096_v47  ;;  %v451_v61 = vsel %vm430_vm0, 0.0, %v6475_v50  ;;  %v461_v53 = vld [vmem:[%s8528_s1 + $0x8] sm:$0xff] }
  0x95   : > { %v456_v62 = vsel %vm455_vm1, %v6490_v55, 0.0  ;;  %v6117_v63 = vpack.i.bf16 %v6506_v60, %v452_v59  ;;  %v6162_v5 = vpack.i.bf16 %v6487_v54, %v453_v52  ;;  %v6167_v7 = vpack.i.bf16 %v451_v61, %v6506_v60 }
  0x96   : > { %6113 = vrot.lane.b32.xlu0 %v6492_v56, %s6353_s20  ;;  %6123 = vrot.lane.b32.xlu1 %v6495_v57, %s6353_s20  ;;  %v6127_v0 = vpack.i.bf16 %v451_v61, %v456_v62  ;;  %v6312_v2 = vpack.i.bf16 %v452_v59, %v456_v62  ;;  %v8554_v43 = vsel %vm6599_vm4, 4294967295, %v8553_v43 }
  0x97   : > { %8555 = vst [vmem:[#allocation2_spill] sm:$0xff] %v8554_v43 }
  0x9a   : > { %6118 = vrot.lane.b32.xlu0 %v6117_v63, %s6353_s20  ;;  %6128 = vrot.lane.b32.xlu1 %v6127_v0, %s6353_s20 }
  0x9e   : > { %6138 = vrot.lane.b32.xlu0 %v6466_v44, %s6355_s23  ;;  %6133 = vrot.lane.b32.xlu1 %v6469_v45, %s6355_s23 }
  0xa2   : > { %6143 = vrot.lane.b32.xlu0 %v6492_v56, %s6355_s23  ;;  %6153 = vrot.lane.b32.xlu1 %v6495_v57, %s6355_s23 }
  0xa6   : > { %6148 = vrot.lane.b32.xlu0 %v6117_v63, %s6355_s23  ;;  %6158 = vrot.lane.b32.xlu1 %v6127_v0, %s6355_s23 }
  0xaa   : > { %6173 = vrot.lane.b32.xlu0 %v6172_v4, %s6356_s24  ;;  %6163 = vrot.lane.b32.xlu1 %v6162_v5, %s6356_s24 }
  0xae   : > { %6188 = vrot.lane.b32.xlu0 %v6187_v6, %s6356_s24  ;;  %6168 = vrot.lane.b32.xlu1 %v6167_v7, %s6356_s24 }
  0xb2   : > { %6193 = vrot.lane.b32.xlu0 %v6312_v2, %s6356_s24  ;;  %6178 = vrot.lane.b32.xlu1 %v6297_v3, %s6356_s24 }
  0xb6   : > { %6198 = vrot.lane.b32.xlu0 %v6466_v44, %s6357_s25  ;;  %6183 = vrot.lane.b32.xlu1 %v6469_v45, %s6357_s25 }
  0xba   : > { %6203 = vrot.lane.b32.xlu0 %v6492_v56, %s6357_s25  ;;  %6213 = vrot.lane.b32.xlu1 %v6495_v57, %s6357_s25 }
  0xbe   : > { %6208 = vrot.lane.b32.xlu0 %v6117_v63, %s6357_s25  ;;  %6218 = vrot.lane.b32.xlu1 %v6127_v0, %s6357_s25 }
  0xc2   : > { %6233 = vrot.lane.b32.xlu0 %v6172_v4, %s6358_s26  ;;  %6223 = vrot.lane.b32.xlu1 %v6162_v5, %s6358_s26 }
  0xc6   : > { %6248 = vrot.lane.b32.xlu0 %v6187_v6, %s6358_s26  ;;  %6228 = vrot.lane.b32.xlu1 %v6167_v7, %s6358_s26 }
  0xca   : > { %6253 = vrot.lane.b32.xlu0 %v6312_v2, %s6358_s26  ;;  %6238 = vrot.lane.b32.xlu1 %v6297_v3, %s6358_s26 }
  0xce   : > { %6258 = vrot.lane.b32.xlu0 %v6466_v44, %s6359_s27  ;;  %6243 = vrot.lane.b32.xlu1 %v6469_v45, %s6359_s27 }
  0xd2   : > { %6263 = vrot.lane.b32.xlu0 %v6492_v56, %s6359_s27  ;;  %6273 = vrot.lane.b32.xlu1 %v6495_v57, %s6359_s27 }
  0xd6   : > { %6268 = vrot.lane.b32.xlu0 %v6117_v63, %s6359_s27  ;;  %6278 = vrot.lane.b32.xlu1 %v6127_v0, %s6359_s27 }
  0xda   : > { %6293 = vrot.lane.b32.xlu0 %v6172_v4, %s6360_s28  ;;  %6283 = vrot.lane.b32.xlu1 %v6162_v5, %s6360_s28 }
  0xde   : > { %6308 = vrot.lane.b32.xlu0 %v6187_v6, %s6360_s28  ;;  %6288 = vrot.lane.b32.xlu1 %v6167_v7, %s6360_s28 }
  0xe2   : > { %6313 = vrot.lane.b32.xlu0 %v6312_v2, %s6360_s28  ;;  %6298 = vrot.lane.b32.xlu1 %v6297_v3, %s6360_s28  ;;  %v463_v3 = vld [vmem:[%s8528_s1 + $0x18] sm:$0xff] }
  0xe6   : > { %6318 = vrot.lane.b32.xlu0 %v6466_v44, %s6361_s29  ;;  %6303 = vrot.lane.b32.xlu1 %v6469_v45, %s6361_s29  ;;  %v5378_v45 = vld [vmem:[%s8528_s1 + $0x30] sm:$0xff] }
  0xea   : > { %6323 = vrot.lane.b32.xlu0 %v6492_v56, %s6361_s29  ;;  %6333 = vrot.lane.b32.xlu1 %v6495_v57, %s6361_s29 }
  0xee   : > { %6328 = vrot.lane.b32.xlu0 %v6117_v63, %s6361_s29  ;;  %6338 = vrot.lane.b32.xlu1 %v6127_v0, %s6361_s29 }
 0x104   : > { %v6109_v8 = vpop.permute.xlu0 %6108  ;;  %v6104_v9 = vpop.permute.xlu1 %6103 }
 0x105   : > { %v6111_v10 = vunpack.i.h.bf16 %v6109_v8  ;;  %v6110_v11 = vunpack.i.l.bf16 %v6109_v8  ;;  %v6105_v12 = vunpack.i.l.bf16 %v6104_v9  ;;  %v6106_v15 = vunpack.i.h.bf16 %v6104_v9  ;;  %v5408_v9 = vld [vmem:[%s8528_s1 + $0x40] sm:$0xff] }
 0x107   : > { %5788 = vmatprep.subr.mxu1 %v6111_v10  ;;  %v509_v13 = vsel %vm501_vm3, %v6110_v11, %v6111_v10  ;;  %v508_v14 = vsel %vm501_vm3, %v6105_v12, %v6110_v11 }
 0x108   : > { %v6114_v16 = vpop.permute.xlu0 %6113  ;;  %559 = vmatprep.subr.mxu0 %v509_v13  ;;  %5789 = vmatpush3.msra.mxu1 %v6111_v10  ;;  %v6124_v17 = vpop.permute.xlu1 %6123  ;;  %v6362_v10 = vmov 0  }
 0x109   : > { %v6116_v18 = vunpack.i.h.bf16 %v6114_v16  ;;  %v6115_v19 = vunpack.i.l.bf16 %v6114_v16  ;;  %v6126_v20 = vunpack.i.h.bf16 %v6124_v17  ;;  %v6125_v21 = vunpack.i.l.bf16 %v6124_v17  ;;  %560 = vmatpush1.msra.mxu0 %v508_v14  ;;  %6343 = vset.pattern.permute.xlu1 %v6362_v10  ;;  %v5409_v17 = vld [vmem:[%s8528_s1 + $0x48] sm:$0xff] }
 0x10a   : > { %6342 = vset.pattern.permute.xlu0 %v6362_v10 }
 0x10b   : > { %5790 = vmatprep.subr.mxu1 %v6115_v19  ;;  %v507_v22 = vsel %vm501_vm3, %v6106_v15, %v6115_v19  ;;  %v506_v23 = vsel %vm501_vm3, %v6116_v18, %v6106_v15  ;;  %v505_v26 = vsel %vm501_vm3, %v6125_v21, %v6126_v20 }
 0x10c   : > { %561 = vmatprep.subr.mxu0 %v507_v22  ;;  %5791 = vmatpush3.msra.mxu1 %v6115_v19  ;;  %v6119_v24 = vpop.permute.xlu0 %6118  ;;  %v6129_v25 = vpop.permute.xlu1 %6128 }
 0x10d   : > { %v6121_v27 = vunpack.i.h.bf16 %v6119_v24  ;;  %v6120_v30 = vunpack.i.l.bf16 %v6119_v24  ;;  %v6131_v31 = vunpack.i.h.bf16 %v6129_v25  ;;  %v6130_v32 = vunpack.i.l.bf16 %v6129_v25  ;;  %562 = vmatpush1.msra.mxu0 %v506_v23  ;;  %5792 = vmatprep.subr.mxu1 %v6126_v20 }
 0x10e   : > { %563 = vmatprep.subr.mxu0 %v505_v26  ;;  %5793 = vmatpush3.msra.mxu1 %v6126_v20 }
 0x10f   : > { %5794 = vmatprep.subr.mxu1 %v6130_v32  ;;  %v504_v35 = vsel %vm501_vm3, %v6120_v30, %v6125_v21  ;;  %v503_v36 = vsel %vm501_vm3, %v6121_v27, %v6130_v32  ;;  %v502_v44 = vsel %vm501_vm3, %v6131_v31, %v6121_v27  ;;  %v5410_v30 = vld [vmem:[%s8528_s1 + $0x50] sm:$0xff] }
 0x110   : > { %v6594_v37 = vpop.permute.xlu0 %6138  ;;  %564 = vmatpush1.msra.mxu0 %v504_v35  ;;  %v6596_v41 = vpop.permute.xlu1 %6133  ;;  %5795 = vmatpush3.msra.mxu1 %v6130_v32 }
 0x111   : > { %565 = vmatprep.subr.mxu0 %v503_v36  ;;  %5797 = vmatmul.mubr.msk.f32.vlgmr.msra.gmra.mxu1 %vm522_vm2, %v5377_v34  ;;  %v6136_v0 = vunpack.i.h.bf16 %v6596_v41 }
 0x112   : > { %745 = vmatprep.subr.mxu1 %v6458_v40  ;;  %566 = vmatpush1.msra.mxu0 %v502_v44 }
 0x113   : > { %5389 = vmatpush1.msk.msra.mxu1 %vm6599_vm4, %v6445_v33  ;;  %5380 = vmatmul.mubr.msk.f32.vlgmr.msra.gmra.mxu0 %vm522_vm2, %v6500_v58  ;;  %v462_v58 = vld [vmem:[%s8528_s1 + $0x10] sm:$0xff] }
 0x114   : > { %747 = vmatprep.subr.mxu1 %v6451_v38  ;;  %5802 = vmatprep.subr.msk.mxu0 %vm455_vm1, %v6441_v28  ;;  %v6620_v40 = vpop.permute.xlu0 %6143  ;;  %v6622_v47 = vpop.permute.xlu1 %6153 }
 0x115   : > { %5799 = vmatprep.mubr.msk.f32.mxu1 %vm522_vm2, %v5378_v45  ;;  %5391 = vmatpush1.msk.msra.mxu1 %vm6599_vm4, %v6443_v29  ;;  %v6141_v29 = vunpack.i.h.bf16 %v6594_v37  ;;  %v6145_v51 = vunpack.i.l.bf16 %v6620_v40  ;;  %v6146_v63 = vunpack.i.h.bf16 %v6620_v40  ;;  %v6155_v2 = vunpack.i.l.bf16 %v6622_v47 }
 0x116   : > { %5803 = vmatpush3.msk.msra.mxu0 %vm455_vm1, %v6441_v28  ;;  %5800 = vmatmul.mubr.msk.f32.gmra.mxu1 %vm522_vm2, %v5379_v46  ;;  %v460_v28 = vld [vmem:[%s8528_s1] sm:$0xff] }
 0x117   : > { %749 = vmatprep.subr.mxu1 %v6487_v54  ;;  %5804 = vmatprep.subr.msk.mxu0 %vm455_vm1, %v6454_v39  ;;  %v6156_v54 = vunpack.i.h.bf16 %v6622_v47  ;;  %v930_v12 = vsel %vm924_vm5, %v6136_v0, %v6145_v51  ;;  %v929_v14 = vsel %vm924_vm5, %v6146_v63, %v6136_v0  ;;  %v2633_v63 = vld [vmem:[%s8529_s2 + $0x10] sm:$0xff] }
 0x118   : > { %605 = vmatprep.mubr.f32.mxu0 %v8538_v1  ;;  %5393 = vmatpush1.msk.msra.mxu1 %vm6599_vm4, %v6473_v48  ;;  %v6638_v33 = vpop.permute.xlu0 %6148  ;;  %v6640_v38 = vpop.permute.xlu1 %6158  ;;  %v6140_v48 = vunpack.i.l.bf16 %v6594_v37 }
 0x119   : > { %5805 = vmatpush3.msk.msra.mxu0 %vm455_vm1, %v6454_v39  ;;  %751 = vmatprep.subr.mxu1 %v6506_v60  ;;  %v6160_v57 = vunpack.i.l.bf16 %v6640_v38  ;;  %v6135_v60 = vunpack.i.l.bf16 %v6596_v41  ;;  %v6150_v4 = vunpack.i.l.bf16 %v6638_v33  ;;  %v6151_v11 = vunpack.i.h.bf16 %v6638_v33  ;;  %v5411_v41 = vld [vmem:[%s8528_s1 + $0x58] sm:$0xff] }
 0x11a   : > { %5381 = vmatmul.mubr.msk.f32.gmra.mxu0 %vm522_vm2, %v5377_v34  ;;  %5806 = vmatprep.subr.msk.mxu0 %vm455_vm1, %v6463_v42  ;;  %v6161_v13 = vunpack.i.h.bf16 %v6640_v38  ;;  %v928_v16 = vsel %vm924_vm5, %v6155_v2, %v6156_v54 }
 0x11b   : > { %5395 = vmatpush1.msk.msra.mxu1 %vm6599_vm4, %v6475_v50  ;;  %785 = vmatprep.mubr.f32.mxu1 %v8538_v1  ;;  %v931_v5 = vsel %vm924_vm5, %v6135_v60, %v6140_v48  ;;  %v927_v19 = vsel %vm924_vm5, %v6150_v4, %v6155_v2  ;;  %v926_v23 = vsel %vm924_vm5, %v6151_v11, %v6160_v57  ;;  %v5422_v60 = vld [vmem:[%s8528_s1 + $0x70] sm:$0xff]  ;;  %v5423_v4 = vld [vmem:[%s8528_s1 + $0x78] sm:$0xff] }
 0x11c   : > { %5807 = vmatpush3.msk.msra.mxu0 %vm455_vm1, %v6463_v42  ;;  %5396 = vmatmul.mubr.msk.f32.vlgmr.msra.gmra.mxu1 %vm522_vm2, %v460_v28  ;;  %v6660_v39 = vpop.permute.xlu0 %6173  ;;  %v6662_v49 = vpop.permute.xlu1 %6163  ;;  %v932_v42 = vsel %vm924_vm5, %v6140_v48, %v6141_v29  ;;  %v925_v26 = vsel %vm924_vm5, %v6161_v13, %v6151_v11 }
 0x11d   : > { %5808 = vmatprep.subr.msk.mxu0 %vm455_vm1, %v6490_v55  ;;  %5816 = vmatprep.subr.mxu1 %v6141_v29  ;;  %v6176_v50 = vunpack.i.h.bf16 %v6660_v39  ;;  %v6674_v52 = vunpack.i.l.bf16 %v6660_v39  ;;  %v6165_v24 = vunpack.i.l.bf16 %v6662_v49  ;;  %v6166_v31 = vunpack.i.h.bf16 %v6662_v49  ;;  %v5420_v39 = vld [vmem:[%s8528_s1 + $0x60] sm:$0xff] }
 0x11e   : > { %611 = vmatprep.mubr.f32.mxu0 %v8538_v1  ;;  %5809 = vmatpush3.msk.msra.mxu0 %vm455_vm1, %v6490_v55 }
 0x11f   : > { %5817 = vmatpush3.msra.mxu1 %v6141_v29  ;;  %5382 = vmatmul.mubr.msk.f32.gmra.mxu0 %vm522_vm2, %v5378_v45  ;;  %v1180_v59 = vsel %vm1172_vm6, %v6176_v50, %v6674_v52 }
 0x120   : > { %981 = vmatprep.subr.mxu0 %v932_v42  ;;  %5818 = vmatprep.subr.mxu1 %v6145_v51  ;;  %v6680_v56 = vpop.permute.xlu0 %6188  ;;  %v6682_v55 = vpop.permute.xlu1 %6168 }
 0x121   : > { %791 = vmatprep.mubr.f32.mxu1 %v8538_v1  ;;  %5819 = vmatpush3.msra.mxu1 %v6145_v51  ;;  %v6190_v18 = vunpack.i.l.bf16 %v6680_v56  ;;  %v6191_v25 = vunpack.i.h.bf16 %v6680_v56  ;;  %v6171_v44 = vunpack.i.h.bf16 %v6682_v55  ;;  %v6170_v45 = vunpack.i.l.bf16 %v6682_v55  ;;  %v5421_v56 = vld [vmem:[%s8528_s1 + $0x68] sm:$0xff] }
 0x122   : > { %5397 = vmatmul.mubr.msk.f32.gmra.mxu1 %vm522_vm2, %v461_v53  ;;  %5820 = vmatprep.subr.mxu1 %v6156_v54 }
 0x123   : > { %617 = vmatprep.mubr.f32.mxu0 %v8538_v1  ;;  %5821 = vmatpush3.msra.mxu1 %v6156_v54  ;;  %v1177_v34 = vsel %vm1172_vm6, %v6165_v24, %v6190_v18 }
 0x124   : > { %5383 = vmatmul.mubr.msk.f32.gmra.mxu0 %vm522_vm2, %v5379_v46  ;;  %5822 = vmatprep.subr.mxu1 %v6160_v57  ;;  %v6695_v61 = vpop.permute.xlu0 %6193  ;;  %v6179_v62 = vpop.permute.xlu1 %6178  ;;  %v1176_v46 = vsel %vm1172_vm6, %v6166_v31, %v6191_v25 }
 0x125   : > { %797 = vmatprep.mubr.f32.mxu1 %v8538_v1  ;;  %5823 = vmatpush3.msra.mxu1 %v6160_v57  ;;  %v6181_v6 = vunpack.i.h.bf16 %v6179_v62  ;;  %v6180_v15 = vunpack.i.l.bf16 %v6179_v62  ;;  %v6196_v32 = vunpack.i.h.bf16 %v6695_v61  ;;  %v6195_v37 = vunpack.i.l.bf16 %v6695_v61 }
 0x126   : > { %5398 = vmatmul.mubr.msk.f32.gmra.mxu1 %vm522_vm2, %v462_v58  ;;  %1229 = vmatprep.subr.mxu1 %v1180_v59 }
 0x127   : > { %5810 = vmatprep.mubr.msk.f32.mxu0 %vm522_vm2, %v460_v28  ;;  %803 = vmatprep.mubr.f32.mxu1 %v8538_v1  ;;  %v1179_v20 = vsel %vm1172_vm6, %v6181_v6, %v6176_v50  ;;  %v1178_v27 = vsel %vm1172_vm6, %v6190_v18, %v6180_v15  ;;  %v1175_v40 = vsel %vm1172_vm6, %v6196_v32, %v6166_v31 }
 0x128   : > { %5811 = vmatmul.mubr.msk.f32.vlgmr.msra.gmra.mxu0 %vm522_vm2, %v461_v53  ;;  %v6710_v7 = vpop.permute.xlu0 %6198  ;;  %v6712_v8 = vpop.permute.xlu1 %6183  ;;  %v1174_v38 = vsel %vm1172_vm6, %v6170_v45, %v6195_v37  ;;  %v1173_v28 = vsel %vm1172_vm6, %v6171_v44, %v6170_v45  ;;  %2647 = vperm.xlu1 %6343, %v2633_v63  }
 0x129   : > { %982 = vmatpush1.msra.mxu0 %v931_v5  ;;  %5813 = vmatprep.mubr.msk.f32.mxu0 %vm522_vm2, %v462_v58  ;;  %v6201_v29 = vunpack.i.h.bf16 %v6710_v7  ;;  %v6200_v48 = vunpack.i.l.bf16 %v6710_v7  ;;  %v6185_v61 = vunpack.i.l.bf16 %v6712_v8  ;;  %v6186_v2 = vunpack.i.h.bf16 %v6712_v8  ;;  %v5432_v8 = vld [vmem:[%s8528_s1 + $0x80] sm:$0xff] }
 0x12a   : > { %983 = vmatprep.subr.mxu0 %v930_v12  ;;  %5399 = vmatmul.mubr.msk.f32.gmra.mxu1 %vm522_vm2, %v463_v3 }
 0x12b   : > { %984 = vmatpush1.msra.mxu0 %v929_v14  ;;  %5824 = vmatprep.mubr.msk.f32.mxu1 %vm522_vm2, %v5408_v9  ;;  %v1428_v50 = vsel %vm1420_vm7, %v6200_v48, %v6201_v29  ;;  %v1427_v7 = vsel %vm1420_vm7, %v6185_v61, %v6200_v48  ;;  %v2682_v61 = vld [vmem:[%s8530_s3 + $0x18] sm:$0xff] }
 0x12c   : > { %985 = vmatprep.subr.mxu0 %v928_v16  ;;  %5814 = vmatmul.mubr.msk.f32.gmra.mxu0 %vm522_vm2, %v463_v3  ;;  %v6733_v21 = vpop.permute.xlu0 %6203  ;;  %v6735_v22 = vpop.permute.xlu1 %6213 }
 0x12d   : > { %986 = vmatpush1.msra.mxu0 %v927_v19  ;;  %1021 = vmatprep.mubr.f32.mxu0 %v8538_v1  ;;  %v6205_v42 = vunpack.i.l.bf16 %v6733_v21  ;;  %v6206_v0 = vunpack.i.h.bf16 %v6733_v21  ;;  %v6215_v3 = vunpack.i.l.bf16 %v6735_v22 }
 0x12e   : > { %987 = vmatprep.subr.mxu0 %v926_v23  ;;  %5825 = vmatmul.mubr.msk.f32.vlgmr.msra.gmra.mxu1 %vm522_vm2, %v5409_v17 }
 0x12f   : > { %988 = vmatpush1.msra.mxu0 %v925_v26  ;;  %1230 = vmatpush1.msra.mxu1 %v1179_v20  ;;  %v1426_v12 = vsel %vm1420_vm7, %v6186_v2, %v6205_v42  ;;  %v1425_v14 = vsel %vm1420_vm7, %v6206_v0, %v6186_v2 }
 0x130   : > { %1231 = vmatprep.subr.mxu1 %v1178_v27  ;;  %5830 = vmatprep.subr.mxu0 %v6674_v52  ;;  %v6751_v35 = vpop.permute.xlu0 %6208  ;;  %v6753_v36 = vpop.permute.xlu1 %6218  ;;  %v5434_v27 = vld [vmem:[%s8528_s1 + $0x90] sm:$0xff] }
 0x131   : > { %5412 = vmatmul.mubr.msk.f32.vlgmr.msra.gmra.mxu0 %vm522_vm2, %v5408_v9  ;;  %1232 = vmatpush1.msra.mxu1 %v1177_v34  ;;  %v6220_v58 = vunpack.i.l.bf16 %v6753_v36  ;;  %v6210_v6 = vunpack.i.l.bf16 %v6751_v35  ;;  %v6211_v11 = vunpack.i.h.bf16 %v6751_v35  ;;  %v6221_v13 = vunpack.i.h.bf16 %v6753_v36  ;;  %v5435_v36 = vld [vmem:[%s8528_s1 + $0x98] sm:$0xff] }
 0x132   : > { %5831 = vmatpush3.msra.mxu0 %v6674_v52  ;;  %5827 = vmatprep.mubr.msk.f32.mxu1 %vm522_vm2, %v5410_v30  ;;  %v6216_v52 = vunpack.i.h.bf16 %v6735_v22 }
 0x133   : > { %1233 = vmatprep.subr.mxu1 %v1176_v46  ;;  %5832 = vmatprep.subr.mxu0 %v6180_v15  ;;  %v1423_v19 = vsel %vm1420_vm7, %v6210_v6, %v6215_v3  ;;  %v1422_v21 = vsel %vm1420_vm7, %v6211_v11, %v6220_v58 }
 0x134   : > { %5828 = vmatmul.mubr.msk.f32.gmra.mxu1 %vm522_vm2, %v5411_v41  ;;  %5833 = vmatpush3.msra.mxu0 %v6180_v15  ;;  %v6767_v47 = vpop.permute.xlu0 %6233  ;;  %v6769_v33 = vpop.permute.xlu1 %6223  ;;  %v1424_v10 = vsel %vm1420_vm7, %v6215_v3, %v6216_v52  ;;  %v5447_v3 = vld [vmem:[%s8528_s1 + $0xb8] sm:$0xff] }
 0x135   : > { %1234 = vmatpush1.msra.mxu1 %v1175_v40  ;;  %1027 = vmatprep.mubr.f32.mxu0 %v8538_v1  ;;  %v6236_v53 = vunpack.i.h.bf16 %v6767_v47  ;;  %v6792_v54 = vunpack.i.l.bf16 %v6767_v47  ;;  %v6225_v23 = vunpack.i.l.bf16 %v6769_v33 }
 0x136   : > { %1235 = vmatprep.subr.mxu1 %v1174_v38  ;;  %5834 = vmatprep.subr.mxu0 %v6191_v25 }
 0x137   : > { %5413 = vmatmul.mubr.msk.f32.gmra.mxu0 %vm522_vm2, %v5409_v17  ;;  %1236 = vmatpush1.msra.mxu1 %v1173_v28  ;;  %v1676_v59 = vsel %vm1668_vm8, %v6236_v53, %v6792_v54  ;;  %v5433_v17 = vld [vmem:[%s8528_s1 + $0x88] sm:$0xff] }
 0x138   : > { %5835 = vmatpush3.msra.mxu0 %v6191_v25  ;;  %1269 = vmatprep.mubr.f32.mxu1 %v8538_v1  ;;  %v6781_v49 = vpop.permute.xlu0 %6248  ;;  %v6783_v51 = vpop.permute.xlu1 %6228  ;;  %v1421_v25 = vsel %vm1420_vm7, %v6221_v13, %v6211_v11 }
 0x139   : > { %5836 = vmatprep.subr.mxu0 %v6195_v37  ;;  %5844 = vmatprep.subr.mxu1 %v6201_v29  ;;  %v6250_v18 = vunpack.i.l.bf16 %v6781_v49  ;;  %v6251_v24 = vunpack.i.h.bf16 %v6781_v49 }
 0x13a   : > { %5424 = vmatmul.mubr.msk.f32.vlgmr.msra.gmra.mxu1 %vm522_vm2, %v5420_v39  ;;  %5837 = vmatpush3.msra.mxu0 %v6195_v37  ;;  %v6231_v37 = vunpack.i.h.bf16 %v6783_v51 }
 0x13b   : > { %5845 = vmatpush3.msra.mxu1 %v6201_v29  ;;  %1033 = vmatprep.mubr.f32.mxu0 %v8538_v1  ;;  %v1673_v32 = vsel %vm1668_vm8, %v6225_v23, %v6250_v18  ;;  %v5444_v29 = vld [vmem:[%s8528_s1 + $0xa0] sm:$0xff]  ;;  %v5458_v23 = vld [vmem:[%s8528_s1 + $0xd0] sm:$0xff] }
 0x13c   : > { %1477 = vmatprep.subr.mxu0 %v1428_v50  ;;  %5846 = vmatprep.subr.mxu1 %v6205_v42  ;;  %v6239_v55 = vpop.permute.xlu1 %6238  ;;  %v6799_v57 = vpop.permute.xlu0 %6253 }
 0x13d   : > { %5414 = vmatmul.mubr.msk.f32.gmra.mxu0 %vm522_vm2, %v5410_v30  ;;  %5847 = vmatpush3.msra.mxu1 %v6205_v42  ;;  %v6241_v9 = vunpack.i.h.bf16 %v6239_v55  ;;  %v6240_v16 = vunpack.i.l.bf16 %v6239_v55  ;;  %v6226_v30 = vunpack.i.h.bf16 %v6769_v33  ;;  %v6256_v31 = vunpack.i.h.bf16 %v6799_v57  ;;  %v5446_v55 = vld [vmem:[%s8528_s1 + $0xb0] sm:$0xff] }
 0x13e   : > { %1275 = vmatprep.mubr.f32.mxu1 %v8538_v1  ;;  %5848 = vmatprep.subr.mxu1 %v6216_v52  ;;  %v6255_v35 = vunpack.i.l.bf16 %v6799_v57 }
 0x13f   : > { %5425 = vmatmul.mubr.msk.f32.gmra.mxu1 %vm522_vm2, %v5421_v56  ;;  %1039 = vmatprep.mubr.f32.mxu0 %v8538_v1  ;;  %v1675_v20 = vsel %vm1668_vm8, %v6241_v9, %v6236_v53  ;;  %v1674_v26 = vsel %vm1668_vm8, %v6250_v18, %v6240_v16  ;;  %v1672_v44 = vsel %vm1668_vm8, %v6226_v30, %v6251_v24 }
 0x140   : > { %5849 = vmatpush3.msra.mxu1 %v6216_v52  ;;  %1281 = vmatprep.mubr.f32.mxu1 %v8538_v1  ;;  %v6812_v62 = vpop.permute.xlu1 %6243  ;;  %v6826_v5 = vpop.permute.xlu0 %6258  ;;  %v1671_v46 = vsel %vm1668_vm8, %v6256_v31, %v6226_v30  ;;  %v5445_v52 = vld [vmem:[%s8528_s1 + $0xa8] sm:$0xff] }
 0x141   : > { %5850 = vmatprep.subr.mxu1 %v6220_v58  ;;  %5415 = vmatmul.mubr.msk.f32.gmra.mxu0 %vm522_vm2, %v5411_v41  ;;  %v6230_v41 = vunpack.i.l.bf16 %v6783_v51  ;;  %v6261_v38 = vunpack.i.h.bf16 %v6826_v5  ;;  %v6260_v28 = vunpack.i.l.bf16 %v6826_v5  ;;  %v6245_v57 = vunpack.i.l.bf16 %v6812_v62 }
 0x142   : > { %5851 = vmatpush3.msra.mxu1 %v6220_v58  ;;  %5838 = vmatprep.mubr.msk.f32.mxu0 %vm522_vm2, %v5420_v39  ;;  %v2634_v58 = vld [vmem:[%s8529_s2 + $0x18] sm:$0xff]  ;;  %v6246_v0 = vunpack.i.h.bf16 %v6812_v62  ;;  %v5456_v62 = vld [vmem:[%s8528_s1 + $0xc0] sm:$0xff] }
 0x143   : > { %1725 = vmatprep.subr.mxu1 %v1676_v59  ;;  %5426 = vmatmul.mubr.msk.f32.gmra.mxu1 %vm522_vm2, %v5422_v60  ;;  %v1670_v40 = vsel %vm1668_vm8, %v6230_v41, %v6255_v35  ;;  %v1669_v47 = vsel %vm1668_vm8, %v6231_v37, %v6230_v41  ;;  %v1924_v49 = vsel %vm1916_vm9, %v6260_v28, %v6261_v38 }
 0x144   : > { %1287 = vmatprep.mubr.f32.mxu1 %v8538_v1  ;;  %v6841_v15 = vpop.permute.xlu1 %6273  ;;  %v6854_v22 = vpop.permute.xlu0 %6263  ;;  %2652 = vperm.xlu0 %6342, %v2634_v58   ;;  %v1923_v5 = vsel %vm1916_vm9, %v6245_v57, %v6260_v28  ;;  %v5471_v57 = vld [vmem:[%s8528_s1 + $0xf8] sm:$0xff] }
 0x145   : > { %5839 = vmatmul.mubr.msk.f32.vlgmr.msra.gmra.mxu0 %vm522_vm2, %v5421_v56  ;;  %v6265_v39 = vunpack.i.l.bf16 %v6854_v22  ;;  %v6276_v51 = vunpack.i.h.bf16 %v6841_v15  ;;  %v6266_v63 = vunpack.i.h.bf16 %v6854_v22  ;;  %v6275_v2 = vunpack.i.l.bf16 %v6841_v15  ;;  %2700 = vperm.xlu1 %6343, %v2682_v61   ;;  %v5457_v15 = vld [vmem:[%s8528_s1 + $0xc8] sm:$0xff] }
 0x146   : > { %1478 = vmatpush1.msra.mxu0 %v1427_v7  ;;  %5841 = vmatprep.mubr.msk.f32.mxu0 %vm522_vm2, %v5422_v60 }
 0x147   : > { %1479 = vmatprep.subr.mxu0 %v1426_v12  ;;  %5427 = vmatmul.mubr.msk.f32.gmra.mxu1 %vm522_vm2, %v5423_v4  ;;  %v1922_v9 = vsel %vm1916_vm9, %v6246_v0, %v6265_v39  ;;  %v1921_v11 = vsel %vm1916_vm9, %v6266_v63, %v6246_v0 }
 0x148   : > { %1480 = vmatpush1.msra.mxu0 %v1425_v14  ;;  %5852 = vmatprep.mubr.msk.f32.mxu1 %vm522_vm2, %v5432_v8  ;;  %v6868_v34 = vpop.permute.xlu1 %6278  ;;  %v6880_v45 = vpop.permute.xlu0 %6268  ;;  %v1920_v14 = vsel %vm1916_vm9, %v6275_v2, %v6276_v51 }
 0x149   : > { %1481 = vmatprep.subr.mxu0 %v1424_v10  ;;  %5842 = vmatmul.mubr.msk.f32.gmra.mxu0 %vm522_vm2, %v5423_v4  ;;  %v6270_v4 = vunpack.i.l.bf16 %v6880_v45  ;;  %v6271_v7 = vunpack.i.h.bf16 %v6880_v45 }
 0x14a   : > { %1482 = vmatpush1.msra.mxu0 %v1423_v19  ;;  %1517 = vmatprep.mubr.f32.mxu0 %v8538_v1 }
 0x14b   : > { %1483 = vmatprep.subr.mxu0 %v1422_v21  ;;  %5853 = vmatmul.mubr.msk.f32.vlgmr.msra.gmra.mxu1 %vm522_vm2, %v5433_v17  ;;  %v1919_v10 = vsel %vm1916_vm9, %v6270_v4, %v6275_v2  ;;  %v5481_v4 = vld [vmem:[%s8528_s1 + $0x108] sm:$0xff] }
 0x14c   : > { %1484 = vmatpush1.msra.mxu0 %v1421_v25  ;;  %1726 = vmatpush1.msra.mxu1 %v1675_v20  ;;  %v6887_v33 = vpop.permute.xlu1 %6283  ;;  %v6896_v48 = vpop.permute.xlu0 %6293 }
 0x14d   : > { %1727 = vmatprep.subr.mxu1 %v1674_v26  ;;  %5858 = vmatprep.subr.mxu0 %v6792_v54  ;;  %v6296_v42 = vunpack.i.h.bf16 %v6896_v48  ;;  %v6905_v50 = vunpack.i.l.bf16 %v6896_v48  ;;  %v6285_v19 = vunpack.i.l.bf16 %v6887_v33 }
 0x14e   : > { %5436 = vmatmul.mubr.msk.f32.vlgmr.msra.gmra.mxu0 %vm522_vm2, %v5432_v8  ;;  %1728 = vmatpush1.msra.mxu1 %v1673_v32  ;;  %v6281_v8 = vunpack.i.h.bf16 %v6868_v34  ;;  %v5459_v32 = vld [vmem:[%s8528_s1 + $0xd8] sm:$0xff] }
 0x14f   : > { %5859 = vmatpush3.msra.mxu0 %v6792_v54  ;;  %5855 = vmatprep.mubr.msk.f32.mxu1 %vm522_vm2, %v5434_v27  ;;  %v6280_v54 = vunpack.i.l.bf16 %v6868_v34  ;;  %v2172_v56 = vsel %vm2164_vm10, %v6296_v42, %v6905_v50 }
 0x150   : > { %1729 = vmatprep.subr.mxu1 %v1672_v44  ;;  %5860 = vmatprep.subr.mxu0 %v6240_v16  ;;  %v6910_v53 = vpop.permute.xlu1 %6288  ;;  %v6309_v59 = vpop.permute.xlu0 %6308  ;;  %v1917_v21 = vsel %vm1916_vm9, %v6281_v8, %v6271_v7  ;;  %v2680_v8 = vld [vmem:[%s8530_s3 + $0x8] sm:$0xff] }
 0x151   : > { %5856 = vmatmul.mubr.msk.f32.gmra.mxu1 %vm522_vm2, %v5435_v36  ;;  %5861 = vmatpush3.msra.mxu0 %v6240_v16  ;;  %v6310_v16 = vunpack.i.l.bf16 %v6309_v59  ;;  %v1918_v18 = vsel %vm1916_vm9, %v6271_v7, %v6280_v54  ;;  %v6311_v20 = vunpack.i.h.bf16 %v6309_v59  ;;  %v6291_v34 = vunpack.i.h.bf16 %v6910_v53  ;;  %v2631_v7 = vld [vmem:[%s8529_s2] sm:$0xff] }
 0x152   : > { %1730 = vmatpush1.msra.mxu1 %v1671_v46  ;;  %1523 = vmatprep.mubr.f32.mxu0 %v8538_v1 }
 0x153   : > { %1731 = vmatprep.subr.mxu1 %v1670_v40  ;;  %5862 = vmatprep.subr.mxu0 %v6251_v24 }
 0x154   : > { %5437 = vmatmul.mubr.msk.f32.gmra.mxu0 %vm522_vm2, %v5433_v17  ;;  %1732 = vmatpush1.msra.mxu1 %v1669_v47  ;;  %v6299_v60 = vpop.permute.xlu1 %6298  ;;  %v6314_v12 = vpop.permute.xlu0 %6313 }
 0x155   : > { %5863 = vmatpush3.msra.mxu0 %v6251_v24  ;;  %1765 = vmatprep.mubr.f32.mxu1 %v8538_v1  ;;  %v6301_v6 = vunpack.i.h.bf16 %v6299_v60  ;;  %v6300_v13 = vunpack.i.l.bf16 %v6299_v60  ;;  %v6286_v24 = vunpack.i.h.bf16 %v6887_v33  ;;  %v6316_v25 = vunpack.i.h.bf16 %v6314_v12  ;;  %v5468_v33 = vld [vmem:[%s8528_s1 + $0xe0] sm:$0xff] }
 0x156   : > { %5864 = vmatprep.subr.mxu0 %v6255_v35  ;;  %5872 = vmatprep.subr.mxu1 %v6261_v38  ;;  %v6315_v30 = vunpack.i.l.bf16 %v6314_v12  ;;  %v5480_v60 = vld [vmem:[%s8528_s1 + $0x100] sm:$0xff] }
 0x157   : > { %5448 = vmatmul.mubr.msk.f32.vlgmr.msra.gmra.mxu1 %vm522_vm2, %v5444_v29  ;;  %5865 = vmatpush3.msra.mxu0 %v6255_v35  ;;  %v2171_v17 = vsel %vm2164_vm10, %v6301_v6, %v6296_v42  ;;  %v2170_v22 = vsel %vm2164_vm10, %v6310_v16, %v6300_v13  ;;  %v6290_v35 = vunpack.i.l.bf16 %v6910_v53  ;;  %v2167_v37 = vsel %vm2164_vm10, %v6316_v25, %v6286_v24  ;;  %v2632_v42 = vld [vmem:[%s8529_s2 + $0x8] sm:$0xff]  ;;  %v5482_v6 = vld [vmem:[%s8528_s1 + $0x110] sm:$0xff]  ;;  %v2679_v12 = vld [vmem:[%s8530_s3] sm:$0xff] }
 0x158   : > { %5873 = vmatpush3.msra.mxu1 %v6261_v38  ;;  %1529 = vmatprep.mubr.f32.mxu0 %v8538_v1  ;;  %v6970_v26 = vpop.permute.xlu1 %6303  ;;  %v6974_v31 = vpop.permute.xlu0 %6318 }
 0x159   : > { %1973 = vmatprep.subr.mxu0 %v1924_v49  ;;  %5874 = vmatprep.subr.mxu1 %v6265_v39  ;;  %v2166_v41 = vsel %vm2164_vm10, %v6290_v35, %v6315_v30  ;;  %v2165_v45 = vsel %vm2164_vm10, %v6291_v34, %v6290_v35  ;;  %v6321_v46 = vunpack.i.h.bf16 %v6974_v31  ;;  %v6320_v40 = vunpack.i.l.bf16 %v6974_v31 }
 0x15a   : > { %5438 = vmatmul.mubr.msk.f32.gmra.mxu0 %vm522_vm2, %v5434_v27  ;;  %5875 = vmatpush3.msra.mxu1 %v6265_v39  ;;  %v2169_v27 = vsel %vm2164_vm10, %v6285_v19, %v6310_v16  ;;  %v5469_v39 = vld [vmem:[%s8528_s1 + $0xe8] sm:$0xff] }
 0x15b   : > { %1771 = vmatprep.mubr.f32.mxu1 %v8538_v1  ;;  %5876 = vmatprep.subr.mxu1 %v6276_v51  ;;  %v2420_v28 = vsel %vm8544_vm11, %v6320_v40, %v6321_v46 }
 0x15c   : > { %5449 = vmatmul.mubr.msk.f32.gmra.mxu1 %vm522_vm2, %v5445_v52  ;;  %1535 = vmatprep.mubr.f32.mxu0 %v8538_v1  ;;  %v6989_v44 = vpop.permute.xlu1 %6333  ;;  %v6324_v47 = vpop.permute.xlu0 %6323 }
 0x15d   : > { %5877 = vmatpush3.msra.mxu1 %v6276_v51  ;;  %1777 = vmatprep.mubr.f32.mxu1 %v8538_v1  ;;  %v6325_v38 = vunpack.i.l.bf16 %v6324_v47  ;;  %v5470_v51 = vld [vmem:[%s8528_s1 + $0xf0] sm:$0xff] }
 0x15e   : > { %5878 = vmatprep.subr.mxu1 %v6280_v54  ;;  %5439 = vmatmul.mubr.msk.f32.gmra.mxu0 %vm522_vm2, %v5435_v36  ;;  %v2168_v36 = vsel %vm2164_vm10, %v6286_v24, %v6311_v20 }
 0x15f   : > { %5879 = vmatpush3.msra.mxu1 %v6280_v54  ;;  %5866 = vmatprep.mubr.msk.f32.mxu0 %vm522_vm2, %v5444_v29  ;;  %v6336_v29 = vunpack.i.h.bf16 %v6989_v44  ;;  %v6326_v54 = vunpack.i.h.bf16 %v6324_v47 }
 0x160   : > { %2221 = vmatprep.subr.mxu1 %v2172_v56  ;;  %5450 = vmatmul.mubr.msk.f32.gmra.mxu1 %vm522_vm2, %v5446_v55  ;;  %v6339_v48 = vpop.permute.xlu1 %6338  ;;  %v6329_v53 = vpop.permute.xlu0 %6328  ;;  %v6306_v56 = vunpack.i.h.bf16 %v6970_v26 }
 0x161   : > { %1783 = vmatprep.mubr.f32.mxu1 %v8538_v1  ;;  %v6340_v49 = vunpack.i.l.bf16 %v6339_v48  ;;  %2642 = vperm.xlu0 %6342, %v2632_v42   ;;  %v6330_v58 = vunpack.i.l.bf16 %v6329_v53  ;;  %v6331_v61 = vunpack.i.h.bf16 %v6329_v53  ;;  %v6341_v0 = vunpack.i.h.bf16 %v6339_v48 }
 0x162   : > { %5867 = vmatmul.mubr.msk.f32.vlgmr.msra.gmra.mxu0 %vm522_vm2, %v5445_v52  ;;  %v2681_v52 = vld [vmem:[%s8530_s3 + $0x10] sm:$0xff]  ;;  %v2418_v63 = vsel %vm8544_vm11, %v6306_v56, %v6325_v38  ;;  %v2417_v2 = vsel %vm8544_vm11, %v6326_v54, %v6306_v56 }
 0x163   : > { %1974 = vmatpush1.msra.mxu0 %v1923_v5  ;;  %5869 = vmatprep.mubr.msk.f32.mxu0 %vm522_vm2, %v5446_v55  ;;  %v6335_v55 = vunpack.i.l.bf16 %v6989_v44 }
 0x164   : > { %1975 = vmatprep.subr.mxu0 %v1922_v9  ;;  %5451 = vmatmul.mubr.msk.f32.gmra.mxu1 %vm522_vm2, %v5447_v3  ;;  %v2413_v9 = vsel %vm8544_vm11, %v6341_v0, %v6331_v61 }
 0x165   : > { %1976 = vmatpush1.msra.mxu0 %v1921_v11  ;;  %5880 = vmatprep.mubr.msk.f32.mxu1 %vm522_vm2, %v5456_v62  ;;  %v2415_v5 = vsel %vm8544_vm11, %v6330_v58, %v6335_v55  ;;  %v5483_v11 = vld [vmem:[%s8528_s1 + $0x118] sm:$0xff] }
 0x166   : > { %1977 = vmatprep.subr.mxu0 %v1920_v14  ;;  %5870 = vmatmul.mubr.msk.f32.gmra.mxu0 %vm522_vm2, %v5447_v3  ;;  %v2416_v3 = vsel %vm8544_vm11, %v6335_v55, %v6336_v29 }
 0x167   : > { %1978 = vmatpush1.msra.mxu0 %v1919_v10  ;;  %2013 = vmatprep.mubr.f32.mxu0 %v8538_v1 }
 0x168   : > { %1979 = vmatprep.subr.mxu0 %v1918_v18  ;;  %5881 = vmatmul.mubr.msk.f32.vlgmr.msra.gmra.mxu1 %vm522_vm2, %v5457_v15 }
 0x169   : > { %1980 = vmatpush1.msra.mxu0 %v1917_v21  ;;  %2222 = vmatpush1.msra.mxu1 %v2171_v17 }
 0x16a   : > { %2223 = vmatprep.subr.mxu1 %v2170_v22  ;;  %5886 = vmatprep.subr.mxu0 %v6905_v50 }
 0x16b   : > { %5460 = vmatmul.mubr.msk.f32.vlgmr.msra.gmra.mxu0 %vm522_vm2, %v5456_v62  ;;  %2224 = vmatpush1.msra.mxu1 %v2169_v27  ;;  %v2414_v62 = vsel %vm8544_vm11, %v6331_v61, %v6340_v49 }
 0x16c   : > { %5887 = vmatpush3.msra.mxu0 %v6905_v50  ;;  %5883 = vmatprep.mubr.msk.f32.mxu1 %vm522_vm2, %v5458_v23  ;;  %v6305_v50 = vunpack.i.l.bf16 %v6970_v26 }
 0x16d   : > { %2225 = vmatprep.subr.mxu1 %v2168_v36  ;;  %5888 = vmatprep.subr.mxu0 %v6300_v13 }
 0x16e   : > { %5884 = vmatmul.mubr.msk.f32.gmra.mxu1 %vm522_vm2, %v5459_v32  ;;  %5889 = vmatpush3.msra.mxu0 %v6300_v13  ;;  %v2419_v59 = vsel %vm8544_vm11, %v6305_v50, %v6320_v40 }
 0x16f   : > { %2226 = vmatpush1.msra.mxu1 %v2167_v37  ;;  %2019 = vmatprep.mubr.f32.mxu0 %v8538_v1 }
 0x170   : > { %2227 = vmatprep.subr.mxu1 %v2166_v41  ;;  %5890 = vmatprep.subr.mxu0 %v6311_v20 }
 0x171   : > { %5461 = vmatmul.mubr.msk.f32.gmra.mxu0 %vm522_vm2, %v5457_v15  ;;  %2228 = vmatpush1.msra.mxu1 %v2165_v45 }
 0x172   : > { %5891 = vmatpush3.msra.mxu0 %v6311_v20  ;;  %2261 = vmatprep.mubr.f32.mxu1 %v8538_v1 }
 0x173   : > { %5892 = vmatprep.subr.mxu0 %v6315_v30  ;;  %5900 = vmatprep.subr.mxu1 %v6321_v46 }
 0x174   : > { %5472 = vmatmul.mubr.msk.f32.vlgmr.msra.gmra.mxu1 %vm522_vm2, %v5468_v33  ;;  %5893 = vmatpush3.msra.mxu0 %v6315_v30 }
 0x175   : > { %5901 = vmatpush3.msra.mxu1 %v6321_v46  ;;  %2025 = vmatprep.mubr.f32.mxu0 %v8538_v1 }
 0x176   : > { %2469 = vmatprep.subr.mxu0 %v2420_v28  ;;  %5902 = vmatprep.subr.mxu1 %v6325_v38 }
 0x177   : > { %5462 = vmatmul.mubr.msk.f32.gmra.mxu0 %vm522_vm2, %v5458_v23  ;;  %5903 = vmatpush3.msra.mxu1 %v6325_v38 }
 0x178   : > { %2267 = vmatprep.mubr.f32.mxu1 %v8538_v1  ;;  %5904 = vmatprep.subr.mxu1 %v6336_v29 }
 0x179   : > { %5473 = vmatmul.mubr.msk.f32.gmra.mxu1 %vm522_vm2, %v5469_v39  ;;  %2031 = vmatprep.mubr.f32.mxu0 %v8538_v1 }
 0x17a   : > { %5905 = vmatpush3.msra.mxu1 %v6336_v29  ;;  %2273 = vmatprep.mubr.f32.mxu1 %v8538_v1 }
 0x17b   : > { %5906 = vmatprep.subr.mxu1 %v6340_v49  ;;  %5463 = vmatmul.mubr.msk.f32.gmra.mxu0 %vm522_vm2, %v5459_v32 }
 0x17c   : > { %5907 = vmatpush3.msra.mxu1 %v6340_v49  ;;  %5894 = vmatprep.mubr.msk.f32.mxu0 %vm522_vm2, %v5468_v33 }
 0x17d   : > { %5474 = vmatmul.mubr.msk.f32.gmra.mxu1 %vm522_vm2, %v5470_v51  ;;  %2695 = vperm.xlu1 %6343, %v2681_v52  }
 0x17e   : > { %2279 = vmatprep.mubr.f32.mxu1 %v8538_v1  ;;  %2637 = vperm.xlu0 %6342, %v2631_v7  }
 0x17f   : > { %5895 = vmatmul.mubr.msk.f32.vlgmr.msra.gmra.mxu0 %vm522_vm2, %v5469_v39 }
 0x180   : > { %2470 = vmatpush1.msra.mxu0 %v2419_v59  ;;  %5897 = vmatprep.mubr.msk.f32.mxu0 %vm522_vm2, %v5470_v51 }
 0x181   : > { %2471 = vmatprep.subr.mxu0 %v2418_v63  ;;  %5475 = vmatmul.mubr.msk.f32.gmra.mxu1 %vm522_vm2, %v5471_v57 }
 0x182   : > { %2472 = vmatpush1.msra.mxu0 %v2417_v2  ;;  %5908 = vmatprep.mubr.msk.f32.mxu1 %vm522_vm2, %v5480_v60 }
 0x183   : > { %2473 = vmatprep.subr.mxu0 %v2416_v3  ;;  %5898 = vmatmul.mubr.msk.f32.gmra.mxu0 %vm522_vm2, %v5471_v57 }
 0x184   : > { %2474 = vmatpush1.msra.mxu0 %v2415_v5  ;;  %2509 = vmatprep.mubr.f32.mxu0 %v8538_v1 }
 0x185   : > { %2475 = vmatprep.subr.mxu0 %v2414_v62  ;;  %5909 = vmatmul.mubr.msk.f32.vlgmr.msra.gmra.mxu1 %vm522_vm2, %v5481_v4 }
 0x186   : > { %2476 = vmatpush1.msra.mxu0 %v2413_v9  ;;  %5911 = vmatprep.mubr.msk.f32.mxu1 %vm522_vm2, %v5482_v6 }
 0x187   : > { %5484 = vmatmul.mubr.msk.f32.vlgmr.msra.gmra.mxu0 %vm522_vm2, %v5480_v60  ;;  %2690 = vperm.xlu1 %6343, %v2680_v8  }
 0x188   : > { %2515 = vmatprep.mubr.f32.mxu0 %v8538_v1  ;;  %2685 = vperm.xlu0 %6342, %v2679_v12  }
 0x189   : > { %5912 = vmatmul.mubr.msk.f32.gmra.mxu1 %vm522_vm2, %v5483_v11 }
 0x18a   : > { %2956 = vmatprep.mubr.f32.mxu1 %v8538_v1 }
 0x18b   : > { %5485 = vmatmul.mubr.msk.f32.gmra.mxu0 %vm522_vm2, %v5481_v4 }
 0x18c   : > { %2521 = vmatprep.mubr.f32.mxu0 %v8538_v1 }
 0x18f   : > { %5486 = vmatmul.mubr.msk.f32.gmra.mxu0 %vm522_vm2, %v5482_v6 }
 0x190   : > { %2527 = vmatprep.mubr.f32.mxu0 %v8538_v1 }
 0x193   : > { %5487 = vmatmul.mubr.msk.f32.gmra.mxu0 %vm522_vm2, %v5483_v11 }
 0x1a3   : > { %v7191_v1 = vpop.permute.xlu1 %2647 }
 0x1a4   : > { %8565 = vst [vmem:[#allocation12_spill] sm:$0xff] %v7191_v1 }
 0x1d1   : > { %v5798_v13 = vpop.f32.mrf.mxu1 }
 0x1d3   : > { %v601_v14 = vpop.f32.mrf.mxu0  ;;  %v690_v15 = vpop.f32.mrf.mxu1 }
 0x1d5   : > { %v603_v16 = vpop.f32.mrf.mxu0 }
 0x1d6   : > { %v5801_v10 = vpop.f32.mrf.mxu1 }
 0x1d8   : > { %v700_v17 = vpop.f32.mrf.mxu1 }
 0x1da   : > { %v607_v18 = vpop.f32.mrf.mxu0 }
 0x1dc   : > { %v609_v19 = vpop.f32.mrf.mxu0  ;;  %v787_v20 = vpop.f32.mrf.mxu1 }
 0x1dd   : > { %v7075_v21 = vadd.f32 %v787_v20, %v601_v14 }
 0x1de   : > { %v789_v22 = vpop.f32.mrf.mxu1 }
 0x1df   : > { %v613_v23 = vpop.f32.mrf.mxu0  ;;  %v790_v24 = vadd.f32 %v789_v22, %v603_v16 }
 0x1e1   : > { %v615_v25 = vpop.f32.mrf.mxu0 }
 0x1e2   : > { %v793_v26 = vpop.f32.mrf.mxu1 }
 0x1e3   : > { %v7077_v27 = vadd.f32 %v793_v26, %v607_v18 }
 0x1e4   : > { %v619_v30 = vpop.f32.mrf.mxu0  ;;  %v795_v31 = vpop.f32.mrf.mxu1 }
 0x1e5   : > { %v796_v32 = vadd.f32 %v795_v31, %v609_v19 }
 0x1e6   : > { %v621_v34 = vpop.f32.mrf.mxu0  ;;  %v799_v35 = vpop.f32.mrf.mxu1 }
 0x1e7   : > { %v800_v36 = vadd.f32 %v799_v35, %v613_v23 }
 0x1e8   : > { %v801_v37 = vpop.f32.mrf.mxu1  ;;  %v5812_v41 = vpop.f32.mrf.mxu0 }
 0x1e9   : > { %v802_v44 = vadd.f32 %v801_v37, %v615_v25  ;;  %v7079_v45 = vadd.f32 %v5812_v41, %v5798_v13 }
 0x1ea   : > { %v805_v46 = vpop.f32.mrf.mxu1  ;;  %v876_v40 = vpop.f32.mrf.mxu0 }
 0x1eb   : > { %v806_v47 = vadd.f32 %v805_v46, %v619_v30  ;;  %v7081_v33 = vadd.f32 %v876_v40, %v690_v15 }
 0x1ec   : > { %v807_v38 = vpop.f32.mrf.mxu1  ;;  %v5815_v28 = vpop.f32.mrf.mxu0 }
 0x1ed   : > { %v808_v29 = vadd.f32 %v807_v38, %v621_v34  ;;  %v892_v48 = vadd.f32 %v5815_v28, %v5801_v10 }
 0x1ee   : > { %v886_v39 = vpop.f32.mrf.mxu0  ;;  %v7083_v49 = vpop.f32.mrf.mxu1 }
 0x1ef   : > { %v887_v51 = vadd.f32 %v886_v39, %v700_v17  ;;  %v1136_v1 = vadd.f32 %v7083_v49, %v7079_v45  ;;  %v7223_v49 = vpop.permute.xlu1 %2700 }
 0x1f0   : > { %v7085_v42 = vpop.f32.mrf.mxu1 }
 0x1f1   : > { %v7087_v50 = vpop.f32.mrf.mxu0 }
 0x1f3   : > { %v1025_v52 = vpop.f32.mrf.mxu0 }
 0x1f4   : > { %v7089_v53 = vadd.f32 %v1025_v52, %v790_v24  ;;  %v5829_v54 = vpop.f32.mrf.mxu1 }
 0x1f5   : > { %v7091_v56 = vadd.f32 %v5829_v54, %v892_v48 }
 0x1f6   : > { %v1122_v55 = vpop.f32.mrf.mxu1 }
 0x1f7   : > { %v7093_v57 = vpop.f32.mrf.mxu0  ;;  %v7095_v58 = vadd.f32 %v1122_v55, %v887_v51 }
 0x1f9   : > { %v1031_v59 = vpop.f32.mrf.mxu0 }
 0x1fa   : > { %v7097_v60 = vadd.f32 %v1031_v59, %v796_v32  ;;  %v7099_v61 = vpop.f32.mrf.mxu1 }
 0x1fc   : > { %v7101_v63 = vpop.f32.mrf.mxu1 }
 0x1fd   : > { %v1035_v0 = vpop.f32.mrf.mxu0 }
 0x1fe   : > { %v7103_v2 = vadd.f32 %v1035_v0, %v800_v36  ;;  %v2728_v0 = vlaneseq }
 0x1ff   : > { %v1037_v3 = vpop.f32.mrf.mxu0  ;;  %v7105_v4 = vpop.f32.mrf.mxu1 }
 0x200   : > { %v1138_v5 = vadd.f32 %v1037_v3, %v802_v44 }
 0x201   : > { %v1041_v6 = vpop.f32.mrf.mxu0  ;;  %v7107_v62 = vpop.f32.mrf.mxu1 }
 0x202   : > { %v7109_v7 = vadd.f32 %v1041_v6, %v806_v47 }
 0x203   : > { %v1043_v9 = vpop.f32.mrf.mxu0  ;;  %v7111_v8 = vpop.f32.mrf.mxu1 }
 0x204   : > { %v7113_v11 = vadd.f32 %v1043_v9, %v808_v29  ;;  %v2729_v9 = vshrl.u32 %v2728_v0, 7 }
 0x205   : > { %v1285_v12 = vpop.f32.mrf.mxu1  ;;  %v5840_v13 = vpop.f32.mrf.mxu0 }
 0x206   : > { %v7115_v14 = vadd.f32 %v1285_v12, %v1138_v5  ;;  %v1384_v45 = vadd.f32 %v5840_v13, %v1136_v1 }
 0x207   : > { %v7117_v15 = vpop.f32.mrf.mxu1  ;;  %v7119_v16 = vpop.f32.mrf.mxu0 }
 0x209   : > { %v7121_v10 = vpop.f32.mrf.mxu1  ;;  %v7123_v17 = vpop.f32.mrf.mxu0 }
 0x20b   : > { %v7125_v18 = vpop.f32.mrf.mxu0  ;;  %v7127_v19 = vpop.f32.mrf.mxu1 }
 0x20d   : > { %v7129_v20 = vpop.f32.mrf.mxu1 }
 0x20e   : > { %v7131_v22 = vpop.f32.mrf.mxu0 }
 0x210   : > { %v7133_v23 = vpop.f32.mrf.mxu0 }
 0x211   : > { %v7135_v24 = vpop.f32.mrf.mxu1 }
 0x213   : > { %v7137_v25 = vpop.f32.mrf.mxu1 }
 0x214   : > { %v7139_v26 = vpop.f32.mrf.mxu0 }
 0x216   : > { %v7141_v30 = vpop.f32.mrf.mxu0 }
 0x217   : > { %v7143_v31 = vpop.f32.mrf.mxu1 }
 0x219   : > { %v7145_v32 = vpop.f32.mrf.mxu1 }
 0x21a   : > { %v7147_v34 = vpop.f32.mrf.mxu0 }
 0x21c   : > { %v7149_v35 = vpop.f32.mrf.mxu0  ;;  %v7151_v36 = vpop.f32.mrf.mxu1 }
 0x21e   : > { %v7153_v37 = vpop.f32.mrf.mxu0  ;;  %v7155_v41 = vpop.f32.mrf.mxu1 }
 0x220   : > { %v7157_v44 = vpop.f32.mrf.mxu0  ;;  %v7159_v46 = vpop.f32.mrf.mxu1 }
 0x222   : > { %v7161_v40 = vpop.f32.mrf.mxu1  ;;  %v5868_v47 = vpop.f32.mrf.mxu0 }
 0x224   : > { %v7163_v38 = vpop.f32.mrf.mxu1  ;;  %v7165_v28 = vpop.f32.mrf.mxu0 }
 0x226   : > { %v7167_v29 = vpop.f32.mrf.mxu1  ;;  %v7169_v48 = vpop.f32.mrf.mxu0 }
 0x227   : > { %8556 = vst [vmem:[#allocation3_spill] sm:$0xff] %v7167_v29  ;;  %8557 = vst [vmem:[#allocation4_spill] sm:$0xff] %v7169_v48  ;;  %v7197_v48 = vpop.permute.xlu0 %2652 }
 0x228   : > { %v7171_v39 = vpop.f32.mrf.mxu0  ;;  %v7173_v51 = vpop.f32.mrf.mxu1  ;;  %8568 = vst [vmem:[#allocation15_spill] sm:$0xff] %v7197_v48 }
 0x229   : > { %8558 = vst [vmem:[#allocation5_spill] sm:$0xff] %v7171_v39  ;;  %v2738_v39 = vsub.s32 2, %v2729_v9 }
 0x22a   : > { %v7175_v52 = vpop.f32.mrf.mxu1 }
 0x22b   : > { %v7177_v54 = vpop.f32.mrf.mxu0 }
 0x22d   : > { %v7179_v55 = vpop.f32.mrf.mxu0 }
 0x22e   : > { %8559 = vst [vmem:[#allocation6_spill] sm:$0xff] %v7179_v55  ;;  %v7181_v59 = vpop.f32.mrf.mxu1  ;;  %v2730_v55 = vsub.s32 0, %v2729_v9 }
 0x22f   : > { %8560 = vst [vmem:[#allocation7_spill] sm:$0xff] %v7181_v59 }
 0x230   : > { %v7183_v3 = vpop.f32.mrf.mxu1 }
 0x231   : > { %8561 = vst [vmem:[#allocation8_spill] sm:$0xff] %v7183_v3  ;;  %v7185_v5 = vpop.f32.mrf.mxu0  ;;  %v373_v3 = vld [vmem:[%s8535_s8] sm:$0x7] }
 0x232   : > { %8562 = vst [vmem:[#allocation9_spill] sm:$0xff] %v7185_v5  ;;  %v2734_v5 = vsub.s32 1, %v2729_v9  ;;  %v7218_v9 = vrot.slane %v373_v3, %v2730_v55 }
 0x233   : > { %v7187_v6 = vpop.f32.mrf.mxu0 }
 0x234   : > { %8563 = vst [vmem:[#allocation10_spill] sm:$0xff] %v7187_v6  ;;  %v7189_v12 = vpop.f32.mrf.mxu1  ;;  %8572 = vst [vmem:[#allocation19_spill] sm:$0xff] %v7218_v9 }
 0x235   : > { %8564 = vst [vmem:[#allocation11_spill] sm:$0xff] %v7189_v12  ;;  %v7216_v12 = vrot.slane %v373_v3, %v2738_v39  ;;  %v1385_v39 = vadd.f32 %v7111_v8, %v7103_v2 }
 0x236   : > { %v7193_v43 = vpop.f32.mrf.mxu1 }
 0x237   : > { %8566 = vst [vmem:[#allocation13_spill] sm:$0xff] %v7193_v43  ;;  %v7195_v29 = vpop.f32.mrf.mxu0  ;;  %v1131_v43 = vadd.f32 %v7087_v50, %v7075_v21  ;;  %8571 = vst [vmem:[#allocation18_spill] sm:$0xff] %v7216_v12  ;;  %v7225_v21 = vrot.slane %v373_v3, %v2734_v5 }
 0x238   : > { %8567 = vst [vmem:[#allocation14_spill] sm:$0xff] %v7195_v29  ;;  %v1134_v29 = vadd.f32 %v7093_v57, %v7077_v27  ;;  %v1380_v27 = vadd.f32 %v7101_v63, %v7089_v53  ;;  %v1383_v57 = vadd.f32 %v7107_v62, %v7097_v60  ;;  %v1632_v53 = vadd.f32 %v7127_v19, %v1384_v45 }
 0x239   : > { %v7202_v59 = vpop.f32.mrf.mxu0  ;;  %v7204_v0 = vpop.f32.mrf.mxu1  ;;  %8573 = vst [vmem:[#allocation20_spill] sm:$0xff] %v7225_v21  ;;  %v1388_v60 = vadd.f32 %v7117_v15, %v7109_v7  ;;  %v1389_v63 = vadd.f32 %v7121_v10, %v7113_v11  ;;  %v1633_v19 = vadd.f32 %v7147_v34, %v1385_v39  ;;  %v8579_v39 = vld [vmem:[#allocation7_spill] sm:$0xff] }
 0x23a   : > { %8569 = vst [vmem:[#allocation16_spill] sm:$0xff] %v7202_v59  ;;  %8570 = vst [vmem:[#allocation17_spill] sm:$0xff] %v7204_v0  ;;  %v1133_v59 = vadd.f32 %v7085_v42, %v7081_v33  ;;  %v1379_v0 = vadd.f32 %v7099_v61, %v1131_v43  ;;  %v1382_v50 = vadd.f32 %v7105_v4, %v1134_v29  ;;  %v7244_v61 = vpop.permute.xlu0 %2642 }
 0x23b   : > { %v7212_v6 = vpop.f32.mrf.mxu0  ;;  %v7214_v48 = vpop.f32.mrf.mxu1  ;;  %v1390_v43 = vadd.f32 %v7123_v17, %v7091_v56  ;;  %v1387_v42 = vadd.f32 %v7125_v18, %v7095_v58  ;;  %v1628_v4 = vadd.f32 %v7133_v23, %v1380_v27  ;;  %v1631_v7 = vadd.f32 %v7141_v30, %v1383_v57  ;;  %v8578_v57 = vld [vmem:[#allocation6_spill] sm:$0xff] }
 0x23c   : > { %v1381_v1 = vadd.f32 %v7119_v16, %v1133_v59  ;;  %v1627_v2 = vadd.f32 %v7131_v22, %v1379_v0  ;;  %v1880_v16 = vadd.f32 %v5868_v47, %v1632_v53  ;;  %v1630_v17 = vadd.f32 %v7139_v26, %v1382_v50  ;;  %v8576_v0 = vld [vmem:[#allocation3_spill] sm:$0xff] }
 0x23d   : > { %v7234_v55 = vpop.f32.mrf.mxu0  ;;  %v7236_v33 = vpop.f32.mrf.mxu1  ;;  %v1638_v58 = vadd.f32 %v7135_v24, %v1390_v43  ;;  %v1635_v13 = vadd.f32 %v7137_v25, %v1387_v42  ;;  %v1876_v15 = vadd.f32 %v7145_v32, %v1628_v4  ;;  %v1636_v26 = vadd.f32 %v7153_v37, %v1388_v60  ;;  %v8574_v37 = vld [vmem:[#allocation4_spill] sm:$0xff]  ;;  %v8577_v27 = vld [vmem:[#allocation11_spill] sm:$0xff]  ;;  %v8580_v43 = vld [vmem:[#allocation9_spill] sm:$0xff] }
 0x23e   : > { %v1629_v8 = vadd.f32 %v7129_v20, %v1381_v1  ;;  %v1875_v11 = vadd.f32 %v7143_v31, %v1627_v2  ;;  %v1634_v20 = vadd.f32 %v7149_v35, %v7115_v14  ;;  %v2128_v23 = vadd.f32 %v7173_v51, %v1880_v16  ;;  %v7268_v24 = vpop.permute.xlu1 %2695  ;;  %v8581_v42 = vld [vmem:[#allocation8_spill] sm:$0xff] }
 0x23f   : > { %v7252_v62 = vpop.f32.mrf.mxu1  ;;  %v5896_v56 = vpop.f32.mrf.mxu0  ;;  %v1878_v25 = vadd.f32 %v7151_v36, %v1630_v17  ;;  %v1879_v30 = vadd.f32 %v7155_v41, %v1631_v7  ;;  %v1637_v31 = vadd.f32 %v7157_v44, %v1389_v63  ;;  %v1881_v47 = vadd.f32 %v7159_v46, %v1633_v19  ;;  %v8575_v41 = vld [vmem:[#allocation5_spill] sm:$0xff]  ;;  %v8582_v63 = vld [vmem:[#allocation10_spill] sm:$0xff] }
 0x240   : > { %v1877_v22 = vadd.f32 %v7165_v28, %v1629_v8  ;;  %v2123_v14 = vadd.f32 %v7177_v54, %v1875_v11  ;;  %v2638_v28 = vpop.permute.xlu0 %2637  ;;  %v2376_v29 = vadd.f32 %v5896_v56, %v2128_v23  ;;  %v1882_v51 = vadd.f32 %v7161_v40, %v1634_v20  ;;  %v8584_v17 = vld [vmem:[#allocation13_spill] sm:$0xff] }
 0x241   : > { %v7261_v10 = vpop.f32.mrf.mxu1  ;;  %v2352_v18 = vpop.f32.mrf.mxu0  ;;  %v1884_v36 = vadd.f32 %v7163_v38, %v1636_v26  ;;  %v1886_v59 = vadd.f32 %v8574_v37, %v1638_v58  ;;  %v1883_v3 = vadd.f32 %v8575_v41, %v1635_v13  ;;  %v1885_v45 = vadd.f32 %v8576_v0, %v1637_v31  ;;  %v8583_v13 = vld [vmem:[#allocation14_spill] sm:$0xff]  ;;  %v8585_v11 = vld [vmem:[#allocation17_spill] sm:$0xff] }
 0x242   : > { %v2125_v35 = vadd.f32 %v7175_v52, %v1877_v22  ;;  %v2371_v46 = vadd.f32 %v8577_v27, %v2123_v14  ;;  %v2124_v52 = vadd.f32 %v8578_v57, %v1876_v15  ;;  %v2126_v40 = vadd.f32 %v8580_v43, %v1878_v25  ;;  %v7290_v4 = vpop.permute.xlu1 %2690  ;;  %v8587_v57 = vld [vmem:[#allocation15_spill] sm:$0xff] }
 0x243   : > { %v7274_v32 = vpop.f32.mrf.mxu1  ;;  %v5899_v34 = vpop.f32.mrf.mxu0  ;;  %v2134_v1 = vadd.f32 %v8579_v39, %v1886_v59  ;;  %v2131_v38 = vadd.f32 %v8581_v42, %v1883_v3  ;;  %v2127_v2 = vadd.f32 %v8582_v63, %v1879_v30  ;;  %v2129_v16 = vadd.f32 %v8583_v13, %v1881_v47 }
 0x244   : > { %v2373_v50 = vadd.f32 %v2352_v18, %v2125_v35  ;;  %v2372_v7 = vadd.f32 %v8584_v17, %v2124_v52  ;;  %v2374_v15 = vadd.f32 %v8585_v11, %v2126_v40  ;;  %v2132_v22 = vadd.f32 %v7212_v6, %v1884_v36  ;;  %v2686_v23 = vpop.permute.xlu0 %2685 }
 0x245   : > { %v2362_v44 = vpop.f32.mrf.mxu0  ;;  %v5910_v5 = vpop.f32.mrf.mxu1  ;;  %v2382_v18 = vadd.f32 %v5899_v34, %v2134_v1  ;;  %v2375_v37 = vadd.f32 %v7214_v48, %v2127_v2  ;;  %v8588_v1 = vld [vmem:[#allocation12_spill] sm:$0xff] }
 0x246   : > { %v2624_v54 = vadd.f32 %v5910_v5, %v2376_v29  ;;  %v2379_v31 = vadd.f32 %v2362_v44, %v2131_v38  ;;  %v8586_v5 = vld [vmem:[#allocation16_spill] sm:$0xff]  ;;  %v2380_v48 = vadd.f32 %v7261_v10, %v2132_v22 }
 0x247   : > { %v2511_v53 = vpop.f32.mrf.mxu0  ;;  %v2600_v60 = vpop.f32.mrf.mxu1  ;;  %v2130_v0 = vadd.f32 %v8586_v5, %v1882_v51 }
 0x248   : > { %v2660_v56 = vadd.f32 %v7244_v61, %v2624_v54  ;;  %v2619_v8 = vadd.f32 %v2511_v53, %v2371_v46  ;;  %v2621_v58 = vadd.f32 %v2600_v60, %v2373_v50  ;;  %v2133_v50 = vadd.f32 %v7234_v55, %v1885_v45 }
 0x249   : > { %v2513_v19 = vpop.f32.mrf.mxu0  ;;  %v5913_v20 = vpop.f32.mrf.mxu1  ;;  %v2377_v54 = vadd.f32 %v7236_v33, %v2129_v16  ;;  %v2378_v60 = vadd.f32 %v7252_v62, %v2130_v0 }
 0x24a   : > { %v2708_v25 = vmul.f32 %v7290_v4, %v2660_v56  ;;  %v2655_v26 = vadd.f32 %v2638_v28, %v2619_v8  ;;  %v2657_v30 = vadd.f32 %v2638_v28, %v2621_v58  ;;  %vm2672_vm12 = vcmp.ge.f32.partialorder %v2660_v56, 0.0 }
 0x24b   : > { %v2620_v14 = vadd.f32 %v2513_v19, %v2372_v7  ;;  %v2630_v35 = vadd.f32 %v5913_v20, %v2382_v18  ;;  %v2517_v29 = vpop.f32.mrf.mxu0  ;;  %v2610_v47 = vpop.f32.mrf.mxu1  ;;  %v2381_v63 = vadd.f32 %v7274_v32, %v2133_v50 }
 0x24c   : > { %v2703_v59 = vmul.f32 %v2686_v23, %v2655_v26  ;;  %vm2669_vm13 = vcmp.ge.f32.partialorder %v2657_v30, 0.0  ;;  %v2705_v34 = vmul.f32 %v2686_v23, %v2657_v30  ;;  %vm2667_vm14 = vcmp.ge.f32.partialorder %v2655_v26, 0.0 }
 0x24d   : > { %v2656_v41 = vadd.f32 %v2638_v28, %v2620_v14  ;;  %v2622_v3 = vadd.f32 %v2517_v29, %v2374_v15  ;;  %v2627_v6 = vadd.f32 %v2610_v47, %v2379_v31  ;;  %v2519_v36 = vpop.f32.mrf.mxu0  ;;  %v2720_v44 = vsel %vm2672_vm12, %v2660_v56, %v2708_v25 }
 0x24e   : > { %v2623_v27 = vadd.f32 %v2519_v36, %v2375_v37  ;;  %v2717_v46 = vsel %vm2669_vm13, %v2657_v30, %v2705_v34  ;;  %v2666_v52 = vadd.f32 %v8587_v57, %v2630_v35  ;;  %v2748_v40 = vmul.f32 %v7216_v12, %v2720_v44 }
 0x24f   : > { %v2523_v39 = vpop.f32.mrf.mxu0  ;;  %v2658_v28 = vadd.f32 %v7244_v61, %v2622_v3  ;;  %v2663_v43 = vadd.f32 %v8588_v1, %v2627_v6  ;;  %v2715_v51 = vsel %vm2667_vm14, %v2655_v26, %v2703_v59  ;;  %vm2668_vm15 = vcmp.ge.f32.partialorder %v2656_v41, 0.0 }
 0x250   : > { %v2704_v42 = vmul.f32 %v2686_v23, %v2656_v41  ;;  %v2625_v38 = vadd.f32 %v2523_v39, %v2377_v54  ;;  %v2745_v55 = vmul.f32 %v7216_v12, %v2717_v46  ;;  %v2659_v45 = vadd.f32 %v7244_v61, %v2623_v27  ;;  %2777 = vrot.lane.b32.xlu0 %v2748_v40, %s6352_s19 }
 0x251   : > { %v2525_v53 = vpop.f32.mrf.mxu0  ;;  %vm2670_vm12 = vcmp.ge.f32.partialorder %v2658_v28, 0.0  ;;  %v2706_v33 = vmul.f32 %v7290_v4, %v2658_v28  ;;  %v2711_v10 = vmul.f32 %v7268_v24, %v2663_v43  ;;  %vm2678_vm13 = vcmp.ge.f32.partialorder %v2666_v52, 0.0 }
 0x252   : > { %vm2675_vm14 = vcmp.ge.f32.partialorder %v2663_v43, 0.0  ;;  %2771 = vrot.lane.b32.xlu1 %v2745_v55, %s6352_s19  ;;  %v2714_v56 = vmul.f32 %v7223_v49, %v2666_v52  ;;  %v2743_v8 = vmul.f32 %v7218_v9, %v2715_v51  ;;  %v2661_v16 = vadd.f32 %v8588_v1, %v2625_v38 }
 0x253   : > { %v2529_v2 = vpop.f32.mrf.mxu0  ;;  %v2718_v13 = vsel %vm2670_vm12, %v2658_v28, %v2706_v33  ;;  %v2626_v61 = vadd.f32 %v2525_v53, %v2378_v60  ;;  %v2716_v62 = vsel %vm2668_vm15, %v2656_v41, %v2704_v42  ;;  %v2707_v32 = vmul.f32 %v7290_v4, %v2659_v45 }
 0x254   : > { %v2628_v58 = vadd.f32 %v2529_v2, %v2380_v48  ;;  %v2746_v7 = vmul.f32 %v7218_v9, %v2718_v13  ;;  %2767 = vrot.lane.b32.xlu0 %v2743_v8, %s6352_s19  ;;  %v2723_v18 = vsel %vm2675_vm14, %v2663_v43, %v2711_v10  ;;  %vm2671_vm11 = vcmp.ge.f32.partialorder %v2659_v45, 0.0 }
 0x255   : > { %v2531_v17 = vpop.f32.mrf.mxu0  ;;  %v2744_v19 = vmul.f32 %v7225_v21, %v2716_v62  ;;  %v2709_v20 = vmul.f32 %v7268_v24, %v2661_v16  ;;  %v2662_v22 = vadd.f32 %v8588_v1, %v2626_v61  ;;  %v2751_v23 = vmul.f32 %v7216_v12, %v2723_v18 }
 0x256   : > { %v2664_v11 = vadd.f32 %v8587_v57, %v2628_v58  ;;  %v2629_v15 = vadd.f32 %v2531_v17, %v2381_v63  ;;  %2773 = vrot.lane.b32.xlu1 %v2746_v7, %s6352_s19  ;;  %v2726_v4 = vsel %vm2678_vm13, %v2666_v52, %v2714_v56  ;;  %vm2673_vm15 = vcmp.ge.f32.partialorder %v2661_v16, 0.0  ;;  %v7492_v63 = vld [vmem:[%s8531_s4 + $0x20] sm:$0xff] }
 0x257   : > { %v2719_v30 = vsel %vm2671_vm11, %v2659_v45, %v2707_v32  ;;  %v2754_v31 = vmul.f32 %v7216_v12, %v2726_v4  ;;  %v2710_v14 = vmul.f32 %v7268_v24, %v2662_v22  ;;  %v2721_v29 = vsel %vm2673_vm15, %v2661_v16, %v2709_v20  ;;  %5922 = vmatprep.mubr.msk.f32.mxu0 %vm522_vm2, %v7492_v63 }
 0x258   : > { %v2712_v25 = vmul.f32 %v7223_v49, %v2664_v11  ;;  %v2665_v26 = vadd.f32 %v8587_v57, %v2629_v15  ;;  %2769 = vrot.lane.b32.xlu0 %v2744_v19, %s6352_s19  ;;  %vm2676_vm12 = vcmp.ge.f32.partialorder %v2664_v11, 0.0  ;;  %v2747_v35 = vmul.f32 %v7225_v21, %v2719_v30 }
 0x259   : > { %vm2674_vm14 = vcmp.ge.f32.partialorder %v2662_v22, 0.0  ;;  %v2749_v59 = vmul.f32 %v7218_v9, %v2721_v29 }
 0x25a   : > { %2783 = vrot.lane.b32.xlu1 %v2751_v23, %s6352_s19  ;;  %v2713_v47 = vmul.f32 %v7223_v49, %v2665_v26  ;;  %v2724_v37 = vsel %vm2676_vm12, %v2664_v11, %v2712_v25  ;;  %vm2677_vm13 = vcmp.ge.f32.partialorder %v2665_v26, 0.0  ;;  %v2722_v41 = vsel %vm2674_vm14, %v2662_v22, %v2710_v14 }
 0x25b   : > { %v2752_v34 = vmul.f32 %v7218_v9, %v2724_v37  ;;  %v2750_v3 = vmul.f32 %v7225_v21, %v2722_v41 }
 0x25c   : > { %2789 = vrot.lane.b32.xlu0 %v2754_v31, %s6352_s19  ;;  %v2725_v24 = vsel %vm2677_vm13, %v2665_v26, %v2713_v47 }
 0x25d   : > { %v2753_v49 = vmul.f32 %v7225_v21, %v2725_v24  ;;  %v5080_v21 = vld [vmem:[%s8534_s7] sm:$0xff] }
 0x25e   : > { %2775 = vrot.lane.b32.xlu1 %v2747_v35, %s6352_s19 }
 0x260   : > { %2779 = vrot.lane.b32.xlu0 %v2749_v59, %s6352_s19 }
 0x262   : > { %2785 = vrot.lane.b32.xlu1 %v2752_v34, %s6352_s19 }
 0x264   : > { %2781 = vrot.lane.b32.xlu0 %v2750_v3, %s6352_s19 }
 0x266   : > { %2787 = vrot.lane.b32.xlu1 %v2753_v49, %s6352_s19 }
 0x2c2   : > { %v2778_v6 = vpop.permute.xlu0 %2777 }
 0x2c4   : > { %v2772_v0 = vpop.permute.xlu1 %2771 }
 0x2c6   : > { %v7350_v36 = vpop.permute.xlu0 %2767 }
 0x2c7   : > { %v7354_v5 = vsel %vm430_vm0, 0.0, %v7350_v36 }
 0x2c8   : > { %2836 = vrot.lane.b32.xlu0 %v7354_v5, %s6353_s20  ;;  %v7373_v54 = vpop.permute.xlu1 %2773 }
 0x2c9   : > { %v7393_v52 = vsel %vm430_vm0, 0.0, %v7373_v54 }
 0x2ca   : > { %v2770_v27 = vpop.permute.xlu0 %2769 }
 0x2cb   : > { %v7360_v44 = vsel %vm430_vm0, %v7350_v36, %v2770_v27  ;;  %v7363_v46 = vsel %vm430_vm0, %v2770_v27, %v2772_v0 }
 0x2cc   : > { %3257 = vrot.lane.b32.xlu0 %v7354_v5, %s6355_s23  ;;  %3506 = vrot.lane.b32.xlu1 %v7360_v44, %s6356_s24  ;;  %v7371_v50 = vsel %vm455_vm1, %v7363_v46, 0.0  ;;  %v2784_v48 = vpop.permute.xlu1 %2783 }
 0x2ce   : > { %v2790_v1 = vpop.permute.xlu0 %2789 }
 0x2d0   : > { %3504 = vrot.lane.b32.xlu0 %v7354_v5, %s6356_s24  ;;  %2840 = vrot.lane.b32.xlu1 %v7371_v50, %s6353_s20  ;;  %v2776_v57 = vpop.permute.xlu1 %2775 }
 0x2d1   : > { %v7397_v39 = vsel %vm430_vm0, %v7373_v54, %v2776_v57  ;;  %v7404_v28 = vsel %vm430_vm0, %v2776_v57, %v2778_v6 }
 0x2d2   : > { %v7412_v43 = vsel %vm455_vm1, %v7404_v28, 0.0  ;;  %v7418_v40 = vpop.permute.xlu0 %2779 }
 0x2d3   : > { %v7426_v51 = vsel %vm430_vm0, 0.0, %v7418_v40 }
 0x2d4   : > { %2838 = vrot.lane.b32.xlu0 %v7360_v44, %s6353_s20  ;;  %3261 = vrot.lane.b32.xlu1 %v7371_v50, %s6355_s23  ;;  %v7467_v33 = vpop.permute.xlu1 %2785 }
 0x2d5   : > { %v7475_v10 = vsel %vm430_vm0, 0.0, %v7467_v33 }
 0x2d6   : > { %v2782_v42 = vpop.permute.xlu0 %2781 }
 0x2d7   : > { %v7446_v38 = vsel %vm430_vm0, %v7418_v40, %v2782_v42  ;;  %v7453_v53 = vsel %vm430_vm0, %v2782_v42, %v2784_v48 }
 0x2d8   : > { %3259 = vrot.lane.b32.xlu0 %v7360_v44, %s6355_s23  ;;  %3508 = vrot.lane.b32.xlu1 %v7371_v50, %s6356_s24  ;;  %v7461_v55 = vsel %vm455_vm1, %v7453_v53, 0.0  ;;  %v2788_v45 = vpop.permute.xlu1 %2787 }
 0x2d9   : > { %v7483_v60 = vsel %vm430_vm0, %v7467_v33, %v2788_v45  ;;  %v7495_v2 = vsel %vm430_vm0, %v2788_v45, %v2790_v1  ;;  %vm8591_vm0 = vcmask 736256  }
 0x2da   : > { %v7505_v56 = vsel %vm455_vm1, %v7495_v2, 0.0 }
 0x2dc   : > { %3753 = vrot.lane.b32.xlu0 %v7360_v44, %s6357_s25  ;;  %3755 = vrot.lane.b32.xlu1 %v7371_v50, %s6357_s25 }
 0x2e0   : > { %3512 = vrot.lane.b32.xlu0 %v7397_v39, %s6356_s24  ;;  %2842 = vrot.lane.b32.xlu1 %v7393_v52, %s6353_s20 }
 0x2e4   : > { %3759 = vrot.lane.b32.xlu0 %v7397_v39, %s6357_s25  ;;  %3263 = vrot.lane.b32.xlu1 %v7393_v52, %s6355_s23 }
 0x2e8   : > { %2846 = vrot.lane.b32.xlu0 %v7412_v43, %s6353_s20  ;;  %3510 = vrot.lane.b32.xlu1 %v7393_v52, %s6356_s24 }
 0x2ec   : > { %3267 = vrot.lane.b32.xlu0 %v7412_v43, %s6355_s23  ;;  %3757 = vrot.lane.b32.xlu1 %v7393_v52, %s6357_s25 }
 0x2f0   : > { %2848 = vrot.lane.b32.xlu0 %v7426_v51, %s6353_s20  ;;  %2844 = vrot.lane.b32.xlu1 %v7397_v39, %s6353_s20 }
 0x2f4   : > { %3269 = vrot.lane.b32.xlu0 %v7426_v51, %s6355_s23  ;;  %3265 = vrot.lane.b32.xlu1 %v7397_v39, %s6355_s23 }
 0x2f8   : > { %3516 = vrot.lane.b32.xlu0 %v7426_v51, %s6356_s24  ;;  %3514 = vrot.lane.b32.xlu1 %v7412_v43, %s6356_s24 }
 0x2fc   : > { %3763 = vrot.lane.b32.xlu0 %v7426_v51, %s6357_s25  ;;  %3761 = vrot.lane.b32.xlu1 %v7412_v43, %s6357_s25 }
 0x300   : > { %2850 = vrot.lane.b32.xlu0 %v7446_v38, %s6353_s20  ;;  %3518 = vrot.lane.b32.xlu1 %v7446_v38, %s6356_s24 }
 0x304   : > { %3271 = vrot.lane.b32.xlu0 %v7446_v38, %s6355_s23  ;;  %3765 = vrot.lane.b32.xlu1 %v7446_v38, %s6357_s25 }
 0x308   : > { %3520 = vrot.lane.b32.xlu0 %v7461_v55, %s6356_s24  ;;  %2852 = vrot.lane.b32.xlu1 %v7461_v55, %s6353_s20 }
 0x30c   : > { %3767 = vrot.lane.b32.xlu0 %v7461_v55, %s6357_s25  ;;  %3273 = vrot.lane.b32.xlu1 %v7461_v55, %s6355_s23 }
 0x310   : > { %3522 = vrot.lane.b32.xlu0 %v7475_v10, %s6356_s24  ;;  %2854 = vrot.lane.b32.xlu1 %v7475_v10, %s6353_s20 }
 0x314   : > { %3275 = vrot.lane.b32.xlu1 %v7475_v10, %s6355_s23  ;;  %3524 = vrot.lane.b32.xlu0 %v7483_v60, %s6356_s24 }
 0x318   : > { %3769 = vrot.lane.b32.xlu1 %v7475_v10, %s6357_s25  ;;  %3771 = vrot.lane.b32.xlu0 %v7483_v60, %s6357_s25 }
 0x31c   : > { %2858 = vrot.lane.b32.xlu0 %v7505_v56, %s6353_s20  ;;  %2856 = vrot.lane.b32.xlu1 %v7483_v60, %s6353_s20 }
 0x320   : > { %3751 = vrot.lane.b32.xlu0 %v7354_v5, %s6357_s25  ;;  %3277 = vrot.lane.b32.xlu1 %v7483_v60, %s6355_s23 }
 0x324   : > { %4014 = vrot.lane.b32.xlu0 %v7461_v55, %s6358_s26  ;;  %4008 = vrot.lane.b32.xlu1 %v7412_v43, %s6358_s26 }
 0x328   : > { %4018 = vrot.lane.b32.xlu0 %v7483_v60, %s6358_s26  ;;  %4002 = vrot.lane.b32.xlu1 %v7371_v50, %s6358_s26 }
 0x32c   : > { %4016 = vrot.lane.b32.xlu0 %v7475_v10, %s6358_s26  ;;  %4012 = vrot.lane.b32.xlu1 %v7446_v38, %s6358_s26 }
 0x330   : > { %4265 = vrot.lane.b32.xlu0 %v7483_v60, %s6359_s27  ;;  %4263 = vrot.lane.b32.xlu1 %v7475_v10, %s6359_s27 }
 0x334   : > { %3279 = vrot.lane.b32.xlu0 %v7505_v56, %s6355_s23  ;;  %4259 = vrot.lane.b32.xlu1 %v7446_v38, %s6359_s27  ;;  %s8470_s23 = scalar_lea.vmem %s8536_s9, %s6051_s15 }
 0x338   : > { %4010 = vrot.lane.b32.xlu0 %v7426_v51, %s6358_s26  ;;  %4004 = vrot.lane.b32.xlu1 %v7393_v52, %s6358_s26 }
 0x33a   : > { %v7539_v8 = vpop.permute.xlu0 %2836 }
 0x33c   : > { %4006 = vrot.lane.b32.xlu0 %v7397_v39, %s6358_s26  ;;  %4000 = vrot.lane.b32.xlu1 %v7360_v44, %s6358_s26 }
 0x33e   : > { %v7545_v58 = vpop.permute.xlu0 %3257  ;;  %v7547_v13 = vpop.permute.xlu1 %3506 }
 0x340   : > { %4261 = vrot.lane.b32.xlu0 %v7461_v55, %s6359_s27  ;;  %4255 = vrot.lane.b32.xlu1 %v7412_v43, %s6359_s27 }
 0x342   : > { %v7553_v16 = vpop.permute.xlu0 %3504  ;;  %v7555_v61 = vpop.permute.xlu1 %2840 }
 0x344   : > { %4257 = vrot.lane.b32.xlu0 %v7426_v51, %s6359_s27  ;;  %4251 = vrot.lane.b32.xlu1 %v7393_v52, %s6359_s27 }
 0x346   : > { %v7561_v17 = vpop.permute.xlu0 %2838  ;;  %v7563_v7 = vpop.permute.xlu1 %3261 }
 0x348   : > { %4253 = vrot.lane.b32.xlu0 %v7397_v39, %s6359_s27  ;;  %3526 = vrot.lane.b32.xlu1 %v7505_v56, %s6356_s24 }
 0x34a   : > { %v7569_v62 = vpop.permute.xlu0 %3259  ;;  %v7571_v32 = vpop.permute.xlu1 %3508 }
 0x34c   : > { %3998 = vrot.lane.b32.xlu0 %v7354_v5, %s6358_s26  ;;  %4249 = vrot.lane.b32.xlu1 %v7371_v50, %s6359_s27 }
 0x34e   : > { %v7577_v11 = vpop.permute.xlu0 %3753  ;;  %v7579_v15 = vpop.permute.xlu1 %3755 }
 0x350   : > { %4247 = vrot.lane.b32.xlu0 %v7360_v44, %s6359_s27  ;;  %3773 = vrot.lane.b32.xlu1 %v7505_v56, %s6357_s25  ;;  %s6052_s25 = smul.u32 24, %s8644_s14 }
 0x352   : > { %v7585_v18 = vpop.permute.xlu0 %3512  ;;  %v7587_v19 = vpop.permute.xlu1 %2842 }
 0x354   : > { %4245 = vrot.lane.b32.xlu0 %v7354_v5, %s6359_s27  ;;  %4502 = vrot.lane.b32.xlu1 %v7412_v43, %s6360_s28 }
 0x356   : > { %v7593_v20 = vpop.permute.xlu0 %3759  ;;  %v3264_v22 = vpop.permute.xlu1 %3263 }
 0x358   : > { %4508 = vrot.lane.b32.xlu0 %v7461_v55, %s6360_s28  ;;  %4496 = vrot.lane.b32.xlu1 %v7371_v50, %s6360_s28 }
 0x35a   : > { %v7599_v23 = vpop.permute.xlu0 %2846  ;;  %v3511_v4 = vpop.permute.xlu1 %3510 }
 0x35b   : > { %v7603_v25 = vsel %vm1172_vm6, %v3511_v4, %v7585_v18 }
 0x35c   : > { %4512 = vrot.lane.b32.xlu0 %v7483_v60, %s6360_s28  ;;  %4506 = vrot.lane.b32.xlu1 %v7446_v38, %s6360_s28 }
 0x35e   : > { %v7609_v26 = vpop.permute.xlu0 %3267  ;;  %v3758_v30 = vpop.permute.xlu1 %3757 }
 0x35f   : > { %v7613_v31 = vsel %vm1420_vm7, %v3758_v30, %v7593_v20  ;;  %v5081_v30 = vld [vmem:[%s8534_s7 + $0x8] sm:$0xff] }
 0x360   : > { %4510 = vrot.lane.b32.xlu0 %v7475_v10, %s6360_s28  ;;  %4020 = vrot.lane.b32.xlu1 %v7505_v56, %s6358_s26 }
 0x362   : > { %v7619_v14 = vpop.permute.xlu0 %2848  ;;  %v7621_v35 = vpop.permute.xlu1 %2844 }
 0x364   : > { %4759 = vrot.lane.b32.xlu0 %v7483_v60, %s6361_s29  ;;  %4757 = vrot.lane.b32.xlu1 %v7475_v10, %s6361_s29 }
 0x366   : > { %v7627_v29 = vpop.permute.xlu0 %3269  ;;  %v7629_v47 = vpop.permute.xlu1 %3265 }
 0x367   : > { %v7633_v37 = vsel %vm924_vm5, %v3264_v22, %v7629_v47 }
 0x368   : > { %4504 = vrot.lane.b32.xlu0 %v7426_v51, %s6360_s28  ;;  %4267 = vrot.lane.b32.xlu1 %v7505_v56, %s6359_s27 }
 0x36a   : > { %v3517_v59 = vpop.permute.xlu0 %3516  ;;  %v7639_v34 = vpop.permute.xlu1 %3514 }
 0x36c   : > { %4500 = vrot.lane.b32.xlu0 %v7397_v39, %s6360_s28  ;;  %4753 = vrot.lane.b32.xlu1 %v7446_v38, %s6361_s29 }
 0x36e   : > { %v3764_v41 = vpop.permute.xlu0 %3763  ;;  %v7645_v24 = vpop.permute.xlu1 %3761 }
 0x370   : > { %4755 = vrot.lane.b32.xlu0 %v7461_v55, %s6361_s29  ;;  %4498 = vrot.lane.b32.xlu1 %v7393_v52, %s6360_s28 }
 0x372   : > { %v2851_v3 = vpop.permute.xlu0 %2850  ;;  %v7651_v49 = vpop.permute.xlu1 %3518 }
 0x373   : > { %v7655_v6 = vsel %vm1172_vm6, %v3517_v59, %v7651_v49 }
 0x374   : > { %4751 = vrot.lane.b32.xlu0 %v7426_v51, %s6361_s29  ;;  %4494 = vrot.lane.b32.xlu1 %v7360_v44, %s6360_s28 }
 0x376   : > { %v7661_v0 = vpop.permute.xlu0 %3271  ;;  %v7663_v27 = vpop.permute.xlu1 %3765 }
 0x377   : > { %v7667_v48 = vsel %vm1420_vm7, %v3764_v41, %v7663_v27  ;;  %v4982_v41 = vld [vmem:[%s8532_s5 + $0x8] sm:$0xff] }
 0x378   : > { %4747 = vrot.lane.b32.xlu0 %v7397_v39, %s6361_s29  ;;  %4514 = vrot.lane.b32.xlu1 %v7505_v56, %s6360_s28 }
 0x37a   : > { %v7673_v57 = vpop.permute.xlu0 %3520  ;;  %v2853_v1 = vpop.permute.xlu1 %2852 }
 0x37c   : > { %4492 = vrot.lane.b32.xlu0 %v7354_v5, %s6360_s28  ;;  %4749 = vrot.lane.b32.xlu1 %v7412_v43, %s6361_s29  ;;  %v4983_v43 = vld [vmem:[%s8532_s5 + $0x10] sm:$0xff]  ;;  %s372_s28 = scalar_lea.vmem %s8537_s10, %s6052_s25 }
 0x37e   : > { %v7679_v51 = vpop.permute.xlu0 %3767  ;;  %v7681_v42 = vpop.permute.xlu1 %3273 }
 0x380   : > { %4741 = vrot.lane.b32.xlu0 %v7360_v44, %s6361_s29  ;;  %4761 = vrot.lane.b32.xlu1 %v7505_v56, %s6361_s29  ;;  %v4981_v56 = vld [vmem:[%s8532_s5] sm:$0xff] }
 0x382   : > { %v7687_v55 = vpop.permute.xlu0 %3522  ;;  %v2855_v10 = vpop.permute.xlu1 %2854 }
 0x384   : > { %4739 = vrot.lane.b32.xlu0 %v7354_v5, %s6361_s29  ;;  %4745 = vrot.lane.b32.xlu1 %v7393_v52, %s6361_s29  ;;  %v4984_v5 = vld [vmem:[%s8532_s5 + $0x18] sm:$0xff] }
 0x386   : > { %v7696_v45 = vpop.permute.xlu0 %3524  ;;  %v7698_v22 = vpop.permute.xlu1 %3275 }
 0x388   : > { %4997 = vperm.xlu0 %6342, %v4983_v43   ;;  %4743 = vrot.lane.b32.xlu1 %v7371_v50, %s6361_s29 }
 0x38a   : > { %v7708_v52 = vpop.permute.xlu0 %3771  ;;  %v7710_v4 = vpop.permute.xlu1 %3769 }
 0x38c   : > { %4987 = vperm.xlu0 %6342, %v4981_v56   ;;  %5002 = vperm.xlu1 %6343, %v4984_v5   ;;  %v2865_v5 = vsel %vm501_vm3, %v2851_v3, %v2853_v1 }
 0x38e   : > { %v2859_v59 = vpop.permute.xlu0 %2858  ;;  %v2857_v50 = vpop.permute.xlu1 %2856 }
 0x38f   : > { %v2866_v43 = vsel %vm501_vm3, %v2855_v10, %v2857_v50  ;;  %5914 = vmatprep.subr.mxu0 %v2859_v59  ;;  %v2867_v12 = vsel %vm501_vm3, %v2857_v50, %v2859_v59  ;;  %v2864_v10 = vsel %vm501_vm3, %v7619_v14, %v2851_v3  ;;  %v2861_v14 = vsel %vm501_vm3, %v7561_v17, %v7555_v61  ;;  %v2822_v50 = vld [vmem:[%s8531_s4 + $0x18] sm:$0xff] }
 0x390   : > { %5089 = vperm.xlu0 %6342, %v5081_v30   ;;  %5915 = vmatpush3.msra.mxu0 %v2859_v59  ;;  %v2862_v30 = vsel %vm501_vm3, %v7587_v19, %v7621_v35  ;;  %v5494_v19 = vld [vmem:[%s8531_s4 + $0x30] sm:$0xff] }
 0x391   : > { %4992 = vperm.xlu1 %6343, %v4982_v41   ;;  %2916 = vmatprep.subr.mxu1 %v2867_v12  ;;  %v2863_v12 = vsel %vm501_vm3, %v7621_v35, %v7599_v23 }
 0x392   : > { %2917 = vmatpush1.msra.mxu1 %v2866_v43  ;;  %5916 = vmatprep.subr.mxu0 %v2853_v1  ;;  %v7720_v56 = vpop.permute.xlu0 %3751  ;;  %v7723_v9 = vpop.permute.xlu1 %3277 }
 0x393   : > { %2918 = vmatprep.subr.mxu1 %v2865_v5  ;;  %5917 = vmatpush3.msra.mxu0 %v2853_v1  ;;  %v5493_v1 = vld [vmem:[%s8531_s4 + $0x28] sm:$0xff]  ;;  %v3287_v41 = vsel %vm924_vm5, %v7698_v22, %v7723_v9  ;;  %v3284_v22 = vsel %vm924_vm5, %v7629_v47, %v7609_v26  ;;  %v3281_v47 = vsel %vm924_vm5, %v7545_v58, %v7569_v62 }
 0x394   : > { %2919 = vmatpush1.msra.mxu1 %v2864_v10  ;;  %5918 = vmatprep.subr.mxu0 %v7599_v23  ;;  %v3286_v10 = vsel %vm924_vm5, %v7661_v0, %v7681_v42 }
 0x395   : > { %5084 = vperm.xlu1 %6343, %v5080_v21   ;;  %2920 = vmatprep.subr.mxu1 %v2863_v12  ;;  %v2860_v21 = vsel %vm501_vm3, %v7539_v8, %v7561_v17  ;;  %v3285_v12 = vsel %vm924_vm5, %v7627_v29, %v7661_v0  ;;  %v5525_v29 = vld [vmem:[%s8531_s4 + $0x48] sm:$0xff]  ;;  %vm8593_vm3 = vmmov %vm8591_vm0 }
 0x396   : > { %5919 = vmatpush3.msra.mxu0 %v7599_v23  ;;  %2921 = vmatpush1.msra.mxu1 %v2862_v30  ;;  %v7738_v59 = vpop.permute.xlu0 %4014  ;;  %v7743_v3 = vpop.permute.xlu1 %4008  ;;  %v3282_v30 = vsel %vm924_vm5, %v7569_v62, %v7563_v7 }
 0x397   : > { %5920 = vmatprep.subr.mxu0 %v7555_v61  ;;  %2922 = vmatprep.subr.mxu1 %v2861_v14 }
 0x398   : > { %5921 = vmatpush3.msra.mxu0 %v7555_v61  ;;  %2923 = vmatpush1.msra.mxu1 %v2860_v21  ;;  %v3534_v21 = vsel %vm1172_vm6, %v7687_v55, %v7696_v45  ;;  %v3531_v55 = vsel %vm1172_vm6, %v7585_v18, %v7639_v34  ;;  %v5537_v18 = vld [vmem:[%s8531_s4 + $0x68] sm:$0xff] }
 0x399   : > { %5923 = vmatmul.mubr.msk.f32.vlgmr.msra.gmra.mxu0 %vm522_vm2, %v5493_v1  ;;  %3102 = vmatprep.subr.mxu0 %v7483_v60  ;;  %v5495_v60 = vld [vmem:[%s8531_s4 + $0x38] sm:$0xff] }
 0x39a   : > { %5496 = vmatmul.mubr.msk.f32.vlgmr.msra.gmra.mxu1 %vm522_vm2, %v7492_v63  ;;  %5505 = vmatpush1.msk.msra.mxu0 %vm6599_vm4, %v7467_v33  ;;  %v7763_v8 = vpop.permute.xlu0 %4018  ;;  %v7765_v17 = vpop.permute.xlu1 %4002  ;;  %v8590_v33 = vmov 0.0  }
 0x39b   : > { %5928 = vmatprep.subr.msk.mxu1 %vm455_vm1, %v7495_v2  ;;  %3104 = vmatprep.subr.mxu0 %v7446_v38 }
 0x39c   : > { %5929 = vmatpush3.msk.msra.mxu1 %vm455_vm1, %v7495_v2  ;;  %5925 = vmatprep.mubr.msk.f32.mxu0 %vm522_vm2, %v5494_v19 }
 0x39d   : > { %5507 = vmatpush1.msk.msra.mxu0 %vm6599_vm4, %v7418_v40  ;;  %5930 = vmatprep.subr.msk.mxu1 %vm455_vm1, %v7453_v53  ;;  %v2819_v40 = vld [vmem:[%s8531_s4] sm:$0xff] }
 0x39e   : > { %2962 = vmatprep.mubr.f32.mxu1 %v8590_v33  ;;  %5926 = vmatmul.mubr.msk.f32.gmra.mxu0 %vm522_vm2, %v5495_v60  ;;  %v7783_v38 = vpop.permute.xlu0 %4016  ;;  %v7785_v63 = vpop.permute.xlu1 %4012 }
 0x39f   : > { %3106 = vmatprep.subr.mxu0 %v7397_v39  ;;  %5931 = vmatpush3.msk.msra.mxu1 %vm455_vm1, %v7453_v53 }
 0x3a0   : > { %5497 = vmatmul.mubr.msk.f32.gmra.mxu1 %vm522_vm2, %v5493_v1  ;;  %5509 = vmatpush1.msk.msra.mxu0 %vm6599_vm4, %v7373_v54 }
 0x3a1   : > { %5932 = vmatprep.subr.msk.mxu1 %vm455_vm1, %v7404_v28  ;;  %3108 = vmatprep.subr.mxu0 %v7360_v44 }
 0x3a2   : > { %5933 = vmatpush3.msk.msra.mxu1 %vm455_vm1, %v7404_v28  ;;  %5511 = vmatpush1.msk.msra.mxu0 %vm6599_vm4, %v7350_v36  ;;  %v7805_v39 = vpop.permute.xlu0 %4265  ;;  %v4264_v53 = vpop.permute.xlu1 %4263  ;;  %v2820_v36 = vld [vmem:[%s8531_s4 + $0x8] sm:$0xff]  ;;  %vm8594_vm4 = vmmov %vm8591_vm0 }
 0x3a3   : > { %3142 = vmatprep.mubr.f32.mxu0 %v8590_v33  ;;  %5934 = vmatprep.subr.msk.mxu1 %vm455_vm1, %v7363_v46  ;;  %v7812_v44 = vsel %vm1916_vm9, %v4264_v53, %v7805_v39  ;;  %v3781_v53 = vsel %vm1420_vm7, %v7710_v4, %v7708_v52 }
 0x3a4   : > { %2968 = vmatprep.mubr.f32.mxu1 %v8590_v33  ;;  %5512 = vmatmul.mubr.msk.f32.vlgmr.msra.gmra.mxu0 %vm522_vm2, %v2819_v40 }
 0x3a5   : > { %5935 = vmatpush3.msk.msra.mxu1 %vm455_vm1, %v7363_v46  ;;  %3148 = vmatprep.mubr.f32.mxu0 %v8590_v33  ;;  %v2821_v46 = vld [vmem:[%s8531_s4 + $0x10] sm:$0xff]  ;;  %vm8592_vm1 = vmmov %vm8591_vm0 }
 0x3a6   : > { %5498 = vmatmul.mubr.msk.f32.gmra.mxu1 %vm522_vm2, %v5494_v19  ;;  %v3280_v54 = vpop.permute.xlu0 %3279  ;;  %v7823_v28 = vpop.permute.xlu1 %4259  ;;  %v3533_v19 = vsel %vm1172_vm6, %v7651_v49, %v7673_v57  ;;  %v5536_v49 = vld [vmem:[%s8531_s4 + $0x60] sm:$0xff] }
 0x3a7   : > { %2974 = vmatprep.mubr.f32.mxu1 %v8590_v33  ;;  %5942 = vmatprep.subr.mxu0 %v3280_v54  ;;  %v3288_v2 = vsel %vm924_vm5, %v7723_v9, %v3280_v54  ;;  %v5524_v9 = vld [vmem:[%s8531_s4 + $0x40] sm:$0xff]  ;;  %vm8595_vm5 = vmmov %vm8591_vm0 }
 0x3a8   : > { %5513 = vmatmul.mubr.msk.f32.gmra.mxu0 %vm522_vm2, %v2820_v36  ;;  %3337 = vmatprep.subr.mxu1 %v3288_v2  ;;  %v3775_v2 = vsel %vm1420_vm7, %v7720_v56, %v7577_v11 }
 0x3a9   : > { %3154 = vmatprep.mubr.f32.mxu0 %v8590_v33  ;;  %5943 = vmatpush3.msra.mxu0 %v3280_v54  ;;  %v3778_v54 = vsel %vm1420_vm7, %v7593_v20, %v7645_v24 }
 0x3aa   : > { %5499 = vmatmul.mubr.msk.f32.gmra.mxu1 %vm522_vm2, %v5495_v60  ;;  %5944 = vmatprep.subr.mxu0 %v7681_v42  ;;  %v7835_v61 = vpop.permute.xlu0 %4010  ;;  %v7837_v35 = vpop.permute.xlu1 %4004 }
 0x3ab   : > { %5936 = vmatprep.mubr.msk.f32.mxu1 %vm522_vm2, %v2819_v40  ;;  %5945 = vmatpush3.msra.mxu0 %v7681_v42  ;;  %v5538_v40 = vld [vmem:[%s8531_s4 + $0x70] sm:$0xff] }
 0x3ac   : > { %5514 = vmatmul.mubr.msk.f32.gmra.mxu0 %vm522_vm2, %v2821_v46  ;;  %5946 = vmatprep.subr.mxu0 %v7609_v26 }
 0x3ad   : > { %3160 = vmatprep.mubr.f32.mxu0 %v8590_v33  ;;  %5947 = vmatpush3.msra.mxu0 %v7609_v26  ;;  %v5526_v26 = vld [vmem:[%s8531_s4 + $0x50] sm:$0xff] }
 0x3ae   : > { %5937 = vmatmul.mubr.msk.f32.vlgmr.msra.gmra.mxu1 %vm522_vm2, %v2820_v36  ;;  %5948 = vmatprep.subr.mxu0 %v7563_v7  ;;  %v7853_v43 = vpop.permute.xlu0 %4006  ;;  %v7855_v5 = vpop.permute.xlu1 %4000 }
 0x3af   : > { %3338 = vmatpush1.msra.mxu1 %v3287_v41  ;;  %5939 = vmatprep.mubr.msk.f32.mxu1 %vm522_vm2, %v2821_v46  ;;  %v4028_v41 = vsel %vm1668_vm8, %v7783_v38, %v7763_v8 }
 0x3b0   : > { %3339 = vmatprep.subr.mxu1 %v3286_v10  ;;  %5515 = vmatmul.mubr.msk.f32.gmra.mxu0 %vm522_vm2, %v2822_v50  ;;  %v5551_v10 = vld [vmem:[%s8531_s4 + $0x98] sm:$0xff] }
 0x3b1   : > { %3340 = vmatpush1.msra.mxu1 %v3285_v12  ;;  %5949 = vmatpush3.msra.mxu0 %v7563_v7  ;;  %v5527_v7 = vld [vmem:[%s8531_s4 + $0x58] sm:$0xff] }
 0x3b2   : > { %5940 = vmatmul.mubr.msk.f32.gmra.mxu1 %vm522_vm2, %v2822_v50  ;;  %3341 = vmatprep.subr.mxu1 %v3284_v22  ;;  %v7876_v0 = vpop.permute.xlu0 %4261  ;;  %v7878_v42 = vpop.permute.xlu1 %4255  ;;  %v4025_v22 = vsel %vm1668_vm8, %v7853_v43, %v7743_v3 }
 0x3b3   : > { %3342 = vmatpush1.msra.mxu1 %v7633_v37  ;;  %5950 = vmatprep.mubr.msk.f32.mxu0 %vm522_vm2, %v5524_v9 }
 0x3b4   : > { %3343 = vmatprep.subr.mxu1 %v3282_v30  ;;  %3377 = vmatprep.mubr.f32.mxu1 %v8590_v33 }
 0x3b5   : > { %3344 = vmatpush1.msra.mxu1 %v3281_v47  ;;  %5951 = vmatmul.mubr.msk.f32.vlgmr.msra.gmra.mxu0 %vm522_vm2, %v5525_v29 }
 0x3b6   : > { %5528 = vmatmul.mubr.msk.f32.vlgmr.msra.gmra.mxu1 %vm522_vm2, %v5524_v9  ;;  %5953 = vmatprep.mubr.msk.f32.mxu0 %vm522_vm2, %v5526_v26  ;;  %v7898_v37 = vpop.permute.xlu0 %4257  ;;  %v7900_v14 = vpop.permute.xlu1 %4251  ;;  %v4027_v9 = vsel %vm1668_vm8, %v7785_v63, %v7738_v59 }
 0x3b7   : > { %3383 = vmatprep.mubr.f32.mxu1 %v8590_v33  ;;  %v4273_v47 = vsel %vm1916_vm9, %v7898_v37, %v7823_v28  ;;  %v5572_v37 = vld [vmem:[%s8531_s4 + $0xc0] sm:$0xff] }
 0x3b9   : > { %5954 = vmatmul.mubr.msk.f32.gmra.mxu0 %vm522_vm2, %v5527_v7 }
 0x3ba   : > { %5529 = vmatmul.mubr.msk.f32.gmra.mxu1 %vm522_vm2, %v5525_v29  ;;  %v7905_v58 = vpop.permute.xlu0 %4253  ;;  %v3527_v62 = vpop.permute.xlu1 %3526  ;;  %3624 = vmatprep.mubr.f32.mxu0 %v8590_v33 }
 0x3bb   : > { %3389 = vmatprep.mubr.f32.mxu1 %v8590_v33  ;;  %5956 = vmatprep.subr.mxu1 %v3527_v62  ;;  %v3535_v1 = vsel %vm1172_vm6, %v7696_v45, %v3527_v62 }
 0x3bc   : > { %3584 = vmatprep.subr.mxu0 %v3535_v1  ;;  %5957 = vmatpush3.msra.mxu1 %v3527_v62 }
 0x3bd   : > { %3585 = vmatpush1.msra.mxu0 %v3534_v21  ;;  %5958 = vmatprep.subr.mxu1 %v7673_v57  ;;  %v5573_v21 = vld [vmem:[%s8531_s4 + $0xc8] sm:$0xff] }
 0x3be   : > { %5530 = vmatmul.mubr.msk.f32.gmra.mxu1 %vm522_vm2, %v5526_v26  ;;  %v7919_v23 = vpop.permute.xlu0 %3998  ;;  %3586 = vmatprep.subr.mxu0 %v3533_v19  ;;  %v7921_v60 = vpop.permute.xlu1 %4249  ;;  %v5563_v26 = vld [vmem:[%s8531_s4 + $0xb8] sm:$0xff] }
 0x3bf   : > { %3395 = vmatprep.mubr.f32.mxu1 %v8590_v33  ;;  %5959 = vmatpush3.msra.mxu1 %v7673_v57 }
 0x3c0   : > { %3587 = vmatpush1.msra.mxu0 %v7655_v6  ;;  %5960 = vmatprep.subr.mxu1 %v7639_v34  ;;  %v3529_v6 = vsel %vm1172_vm6, %v7547_v13, %v7571_v32 }
 0x3c1   : > { %3588 = vmatprep.subr.mxu0 %v3531_v55  ;;  %5961 = vmatpush3.msra.mxu1 %v7639_v34 }
 0x3c2   : > { %5531 = vmatmul.mubr.msk.f32.gmra.mxu1 %vm522_vm2, %v5527_v7  ;;  %3589 = vmatpush1.msra.mxu0 %v7603_v25  ;;  %v7936_v57 = vpop.permute.xlu0 %4247  ;;  %v3774_v45 = vpop.permute.xlu1 %3773  ;;  %v3528_v25 = vsel %vm1172_vm6, %v7553_v16, %v7547_v13  ;;  %v5539_v16 = vld [vmem:[%s8531_s4 + $0x78] sm:$0xff]  ;;  %v4272_v7 = vsel %vm1916_vm9, %v7905_v58, %v7878_v42  ;;  %vm8596_vm6 = vmmov %vm8591_vm0 }
 0x3c3   : > { %5962 = vmatprep.subr.mxu1 %v7571_v32  ;;  %3590 = vmatprep.subr.mxu0 %v3529_v6  ;;  %v3782_v34 = vsel %vm1420_vm7, %v7708_v52, %v3774_v45 }
 0x3c4   : > { %5963 = vmatpush3.msra.mxu1 %v7571_v32  ;;  %5964 = vmatprep.mubr.msk.f32.mxu1 %vm522_vm2, %v5536_v49  ;;  %v3780_v32 = vsel %vm1420_vm7, %v7663_v27, %v7679_v51  ;;  %v3776_v27 = vsel %vm1420_vm7, %v7577_v11, %v7579_v15  ;;  %vm8597_vm7 = vmmov %vm8591_vm0 }
 0x3c5   : > { %3591 = vmatpush1.msra.mxu0 %v3528_v25  ;;  %3831 = vmatprep.subr.mxu1 %v3782_v34 }
 0x3c6   : > { %5965 = vmatmul.mubr.msk.f32.vlgmr.msra.gmra.mxu1 %vm522_vm2, %v5537_v18  ;;  %5540 = vmatmul.mubr.msk.f32.vlgmr.msra.gmra.mxu0 %vm522_vm2, %v5536_v49  ;;  %v7960_v36 = vpop.permute.xlu0 %4245  ;;  %v7962_v13 = vpop.permute.xlu1 %4502  ;;  %v5575_v49 = vld [vmem:[%s8531_s4 + $0xd8] sm:$0xff] }
 0x3c7   : > { %5970 = vmatprep.subr.mxu0 %v3774_v45  ;;  %3832 = vmatpush1.msra.mxu1 %v3781_v53  ;;  %v5584_v53 = vld [vmem:[%s8531_s4 + $0xe0] sm:$0xff] }
 0x3c8   : > { %5971 = vmatpush3.msra.mxu0 %v3774_v45  ;;  %5967 = vmatprep.mubr.msk.f32.mxu1 %vm522_vm2, %v5538_v40 }
 0x3c9   : > { %3833 = vmatprep.subr.mxu1 %v3780_v32  ;;  %5972 = vmatprep.subr.mxu0 %v7679_v51 }
 0x3ca   : > { %3630 = vmatprep.mubr.f32.mxu0 %v8590_v33  ;;  %5968 = vmatmul.mubr.msk.f32.gmra.mxu1 %vm522_vm2, %v5539_v16  ;;  %v7974_v52 = vpop.permute.xlu0 %4508  ;;  %v7976_v4 = vpop.permute.xlu1 %4496 }
 0x3cb   : > { %3834 = vmatpush1.msra.mxu1 %v7667_v48  ;;  %5973 = vmatpush3.msra.mxu0 %v7679_v51  ;;  %v5548_v48 = vld [vmem:[%s8531_s4 + $0x80] sm:$0xff] }
 0x3cc   : > { %5541 = vmatmul.mubr.msk.f32.gmra.mxu0 %vm522_vm2, %v5537_v18  ;;  %3835 = vmatprep.subr.mxu1 %v3778_v54 }
 0x3cd   : > { %5974 = vmatprep.subr.mxu0 %v7645_v24  ;;  %3836 = vmatpush1.msra.mxu1 %v7613_v31  ;;  %v5549_v31 = vld [vmem:[%s8531_s4 + $0x88] sm:$0xff] }
 0x3ce   : > { %5975 = vmatpush3.msra.mxu0 %v7645_v24  ;;  %3837 = vmatprep.subr.mxu1 %v3776_v27  ;;  %v7993_v51 = vpop.permute.xlu0 %4512  ;;  %v7995_v20 = vpop.permute.xlu1 %4506  ;;  %v5586_v27 = vld [vmem:[%s8531_s4 + $0xf0] sm:$0xff] }
 0x3cf   : > { %5976 = vmatprep.subr.mxu0 %v7579_v15  ;;  %3636 = vmatprep.mubr.f32.mxu0 %v8590_v33  ;;  %v4521_v6 = vsel %vm2164_vm10, %v7995_v20, %v7974_v52 }
 0x3d0   : > { %3838 = vmatpush1.msra.mxu1 %v3775_v2  ;;  %3871 = vmatprep.mubr.f32.mxu1 %v8590_v33 }
 0x3d1   : > { %5977 = vmatpush3.msra.mxu0 %v7579_v15  ;;  %5552 = vmatmul.mubr.msk.f32.vlgmr.msra.gmra.mxu1 %vm522_vm2, %v5548_v48  ;;  %v5550_v15 = vld [vmem:[%s8531_s4 + $0x90] sm:$0xff] }
 0x3d2   : > { %5542 = vmatmul.mubr.msk.f32.gmra.mxu0 %vm522_vm2, %v5538_v40  ;;  %3877 = vmatprep.mubr.f32.mxu1 %v8590_v33  ;;  %v8010_v11 = vpop.permute.xlu0 %4510  ;;  %v4021_v24 = vpop.permute.xlu1 %4020 }
 0x3d3   : > { %3642 = vmatprep.mubr.f32.mxu0 %v8590_v33  ;;  %5984 = vmatprep.subr.mxu1 %v4021_v24  ;;  %v4029_v56 = vsel %vm1668_vm8, %v7763_v8, %v4021_v24  ;;  %v4026_v8 = vsel %vm1668_vm8, %v7835_v61, %v7785_v63  ;;  %v4023_v61 = vsel %vm1668_vm8, %v7855_v5, %v7765_v17 }
 0x3d4   : > { %4078 = vmatprep.subr.mxu0 %v4029_v56  ;;  %5985 = vmatpush3.msra.mxu1 %v4021_v24  ;;  %v4522_v55 = vsel %vm2164_vm10, %v8010_v11, %v7993_v51 }
 0x3d5   : > { %5553 = vmatmul.mubr.msk.f32.gmra.mxu1 %vm522_vm2, %v5549_v31  ;;  %5986 = vmatprep.subr.mxu1 %v7738_v59 }
 0x3d6   : > { %5543 = vmatmul.mubr.msk.f32.gmra.mxu0 %vm522_vm2, %v5539_v16  ;;  %3883 = vmatprep.mubr.f32.mxu1 %v8590_v33  ;;  %v8022_v46 = vpop.permute.xlu0 %4759  ;;  %v8024_v50 = vpop.permute.xlu1 %4757 }
 0x3d7   : > { %5978 = vmatprep.mubr.msk.f32.mxu0 %vm522_vm2, %v5548_v48  ;;  %5987 = vmatpush3.msra.mxu1 %v7738_v59  ;;  %v4024_v59 = vsel %vm1668_vm8, %v7837_v35, %v7853_v43  ;;  %v4022_v35 = vsel %vm1668_vm8, %v7919_v23, %v7855_v5  ;;  %v5561_v43 = vld [vmem:[%s8531_s4 + $0xa8] sm:$0xff]  ;;  %v5574_v23 = vld [vmem:[%s8531_s4 + $0xd0] sm:$0xff]  ;;  %v5587_v48 = vld [vmem:[%s8531_s4 + $0xf8] sm:$0xff] }
 0x3d8   : > { %5988 = vmatprep.subr.mxu1 %v7743_v3  ;;  %vm8598_vm8 = vmmov %vm8591_vm0 }
 0x3d9   : > { %5554 = vmatmul.mubr.msk.f32.gmra.mxu1 %vm522_vm2, %v5550_v15 }
 0x3da   : > { %5979 = vmatmul.mubr.msk.f32.vlgmr.msra.gmra.mxu0 %vm522_vm2, %v5549_v31  ;;  %3889 = vmatprep.mubr.f32.mxu1 %v8590_v33  ;;  %v4268_v12 = vpop.permute.xlu1 %4267  ;;  %v8046_v38 = vpop.permute.xlu0 %4504 }
 0x3db   : > { %4079 = vmatpush1.msra.mxu0 %v4028_v41  ;;  %5981 = vmatprep.mubr.msk.f32.mxu0 %vm522_vm2, %v5550_v15  ;;  %v4276_v29 = vsel %vm1916_vm9, %v7805_v39, %v4268_v12  ;;  %v5562_v39 = vld [vmem:[%s8531_s4 + $0xb0] sm:$0xff]  ;;  %v4520_v45 = vsel %vm2164_vm10, %v8046_v38, %v7995_v20  ;;  %v5596_v15 = vld [vmem:[%s8531_s4 + $0x100] sm:$0xff]  ;;  %v5599_v41 = vld [vmem:[%s8531_s4 + $0x118] sm:$0xff] }
 0x3dc   : > { %4080 = vmatprep.subr.mxu0 %v4027_v9  ;;  %5989 = vmatpush3.msra.mxu1 %v7743_v3  ;;  %v5560_v3 = vld [vmem:[%s8531_s4 + $0xa0] sm:$0xff] }
 0x3dd   : > { %4081 = vmatpush1.msra.mxu0 %v4026_v8  ;;  %5555 = vmatmul.mubr.msk.f32.gmra.mxu1 %vm522_vm2, %v5551_v10 }
 0x3de   : > { %5982 = vmatmul.mubr.msk.f32.gmra.mxu0 %vm522_vm2, %v5551_v10  ;;  %4082 = vmatprep.subr.mxu0 %v4025_v22  ;;  %v8056_v63 = vpop.permute.xlu1 %4753  ;;  %v8077_v30 = vpop.permute.xlu0 %4500 }
 0x3df   : > { %4083 = vmatpush1.msra.mxu0 %v4024_v59  ;;  %5990 = vmatprep.subr.mxu1 %v7765_v17  ;;  %v4519_v34 = vsel %vm2164_vm10, %v8077_v30, %v7962_v13 }
 0x3e0   : > { %4084 = vmatprep.subr.mxu0 %v4023_v61  ;;  %5991 = vmatpush3.msra.mxu1 %v7765_v17  ;;  %v4274_v17 = vsel %vm1916_vm9, %v7823_v28, %v7876_v0  ;;  %v4271_v28 = vsel %vm1916_vm9, %v7900_v14, %v7905_v58  ;;  %v4269_v14 = vsel %vm1916_vm9, %v7960_v36, %v7936_v57 }
 0x3e1   : > { %4085 = vmatpush1.msra.mxu0 %v4022_v35  ;;  %4118 = vmatprep.mubr.f32.mxu0 %v8590_v33 }
 0x3e2   : > { %5992 = vmatprep.mubr.msk.f32.mxu1 %vm522_vm2, %v5560_v3  ;;  %5564 = vmatmul.mubr.msk.f32.vlgmr.msra.gmra.mxu0 %vm522_vm2, %v5560_v3  ;;  %v8079_v5 = vpop.permute.xlu1 %4498  ;;  %v8105_v62 = vpop.permute.xlu0 %4755  ;;  %v8253_v3 = vld [vmem:[%s8533_s6] sm:$0xff] }
 0x3e3   : > { %5993 = vmatmul.mubr.msk.f32.vlgmr.msra.gmra.mxu1 %vm522_vm2, %v5561_v43  ;;  %4325 = vmatprep.subr.mxu1 %v4276_v29  ;;  %v4518_v25 = vsel %vm2164_vm10, %v8079_v5, %v8077_v30  ;;  %v4768_v54 = vsel %vm8593_vm3, %v8056_v63, %v8105_v62  ;;  %8599 = vst [vmem:[#allocation4_spill] sm:$0xff] %v8253_v3 }
 0x3e4   : > { %5998 = vmatprep.subr.mxu0 %v4268_v12  ;;  %4326 = vmatpush1.msra.mxu1 %v7812_v44 }
 0x3e5   : > { %5999 = vmatpush3.msra.mxu0 %v4268_v12  ;;  %4327 = vmatprep.subr.mxu1 %v4274_v17 }
 0x3e6   : > { %6000 = vmatprep.subr.mxu0 %v7876_v0  ;;  %4124 = vmatprep.mubr.f32.mxu0 %v8590_v33  ;;  %v8097_v44 = vpop.permute.xlu1 %4494 }
 0x3e7   : > { %5995 = vmatprep.mubr.msk.f32.mxu1 %vm522_vm2, %v5562_v39  ;;  %4328 = vmatpush1.msra.mxu1 %v4273_v47  ;;  %v4517_v40 = vsel %vm2164_vm10, %v8097_v44, %v7976_v4 }
 0x3e8   : > { %6001 = vmatpush3.msra.mxu0 %v7876_v0  ;;  %5996 = vmatmul.mubr.msk.f32.gmra.mxu1 %vm522_vm2, %v5563_v26  ;;  %v4270_v0 = vsel %vm1916_vm9, %v7936_v57, %v7921_v60  ;;  %vm5070_vm9 = vcmask 551936  }
 0x3e9   : > { %5565 = vmatmul.mubr.msk.f32.gmra.mxu0 %vm522_vm2, %v5561_v43  ;;  %4329 = vmatprep.subr.mxu1 %v4272_v7 }
 0x3ea   : > { %6002 = vmatprep.subr.mxu0 %v7878_v42  ;;  %4330 = vmatpush1.msra.mxu1 %v4271_v28  ;;  %v4515_v1 = vpop.permute.xlu1 %4514 }
 0x3eb   : > { %6003 = vmatpush3.msra.mxu0 %v7878_v42  ;;  %4331 = vmatprep.subr.mxu1 %v4270_v0  ;;  %v8127_v42 = vpop.permute.xlu0 %4751  ;;  %v4523_v58 = vsel %vm2164_vm10, %v7993_v51, %v4515_v1 }
 0x3ec   : > { %6004 = vmatprep.subr.mxu0 %v7921_v60  ;;  %4130 = vmatprep.mubr.f32.mxu0 %v8590_v33  ;;  %v4767_v51 = vsel %vm8594_vm4, %v8127_v42, %v8056_v63 }
 0x3ed   : > { %4332 = vmatpush1.msra.mxu1 %v4269_v14  ;;  %4365 = vmatprep.mubr.f32.mxu1 %v8590_v33 }
 0x3ee   : > { %6005 = vmatpush3.msra.mxu0 %v7921_v60  ;;  %5576 = vmatmul.mubr.msk.f32.vlgmr.msra.gmra.mxu1 %vm522_vm2, %v5572_v37  ;;  %v8137_v19 = vpop.permute.xlu1 %4749 }
 0x3ef   : > { %5566 = vmatmul.mubr.msk.f32.gmra.mxu0 %vm522_vm2, %v5562_v39  ;;  %4371 = vmatprep.mubr.f32.mxu1 %v8590_v33  ;;  %v4748_v60 = vpop.permute.xlu0 %4747 }
 0x3f0   : > { %4136 = vmatprep.mubr.f32.mxu0 %v8590_v33  ;;  %6012 = vmatprep.subr.mxu1 %v4515_v1  ;;  %v4766_v31 = vsel %vm8596_vm6, %v4748_v60, %v8137_v19 }
 0x3f1   : > { %4572 = vmatprep.subr.mxu0 %v4523_v58  ;;  %6013 = vmatpush3.msra.mxu1 %v4515_v1 }
 0x3f2   : > { %5577 = vmatmul.mubr.msk.f32.gmra.mxu1 %vm522_vm2, %v5573_v21  ;;  %6014 = vmatprep.subr.mxu1 %v7974_v52  ;;  %v4762_v57 = vpop.permute.xlu1 %4761 }
 0x3f3   : > { %5567 = vmatmul.mubr.msk.f32.gmra.mxu0 %vm522_vm2, %v5563_v26  ;;  %4377 = vmatprep.mubr.f32.mxu1 %v8590_v33  ;;  %v4493_v18 = vpop.permute.xlu0 %4492  ;;  %v4770_v16 = vsel %vm8591_vm0, %v8022_v46, %v4762_v57 }
 0x3f4   : > { %6006 = vmatprep.mubr.msk.f32.mxu0 %vm522_vm2, %v5572_v37  ;;  %6015 = vmatpush3.msra.mxu1 %v7974_v52  ;;  %v4516_v36 = vsel %vm2164_vm10, %v4493_v18, %v8097_v44  ;;  %v4769_v52 = vsel %vm8592_vm1, %v8024_v50, %v8022_v46  ;;  %v5597_v46 = vld [vmem:[%s8531_s4 + $0x108] sm:$0xff]  ;;  %v5598_v50 = vld [vmem:[%s8531_s4 + $0x110] sm:$0xff] }
 0x3f5   : > { %6016 = vmatprep.subr.mxu1 %v7962_v13 }
 0x3f6   : > { %5578 = vmatmul.mubr.msk.f32.gmra.mxu1 %vm522_vm2, %v5574_v23  ;;  %v4746_v32 = vpop.permute.xlu1 %4745 }
 0x3f7   : > { %6007 = vmatmul.mubr.msk.f32.vlgmr.msra.gmra.mxu0 %vm522_vm2, %v5573_v21  ;;  %4383 = vmatprep.mubr.f32.mxu1 %v8590_v33  ;;  %v4765_v2 = vsel %vm8595_vm5, %v4746_v32, %v4748_v60 }
 0x3f8   : > { %4573 = vmatpush1.msra.mxu0 %v4522_v55  ;;  %6009 = vmatprep.mubr.msk.f32.mxu0 %vm522_vm2, %v5574_v23 }
 0x3f9   : > { %4574 = vmatprep.subr.mxu0 %v4521_v6  ;;  %6017 = vmatpush3.msra.mxu1 %v7962_v13  ;;  %v5585_v13 = vld [vmem:[%s8531_s4 + $0xe8] sm:$0xff] }
 0x3fa   : > { %4575 = vmatpush1.msra.mxu0 %v4520_v45  ;;  %5579 = vmatmul.mubr.msk.f32.gmra.mxu1 %vm522_vm2, %v5575_v49  ;;  %v4744_v20 = vpop.permute.xlu1 %4743 }
 0x3fb   : > { %6010 = vmatmul.mubr.msk.f32.gmra.mxu0 %vm522_vm2, %v5575_v49  ;;  %4576 = vmatprep.subr.mxu0 %v4519_v34 }
 0x3fc   : > { %4577 = vmatpush1.msra.mxu0 %v4518_v25  ;;  %6018 = vmatprep.subr.mxu1 %v7976_v4 }
 0x3fd   : > { %4578 = vmatprep.subr.mxu0 %v4517_v40  ;;  %6019 = vmatpush3.msra.mxu1 %v7976_v4  ;;  %v4742_v4 = vpop.permute.xlu0 %4741 }
 0x3fe   : > { %4579 = vmatpush1.msra.mxu0 %v4516_v36  ;;  %4612 = vmatprep.mubr.f32.mxu0 %v8590_v33  ;;  %v4764_v24 = vsel %vm8597_vm7, %v4742_v4, %v4744_v20 }
 0x3ff   : > { %6020 = vmatprep.mubr.msk.f32.mxu1 %vm522_vm2, %v5584_v53  ;;  %5588 = vmatmul.mubr.msk.f32.vlgmr.msra.gmra.mxu0 %vm522_vm2, %v5584_v53 }
 0x400   : > { %6021 = vmatmul.mubr.msk.f32.vlgmr.msra.gmra.mxu1 %vm522_vm2, %v5585_v13  ;;  %4819 = vmatprep.subr.mxu1 %v4770_v16 }
 0x401   : > { %6026 = vmatprep.subr.mxu0 %v4762_v57  ;;  %4820 = vmatpush1.msra.mxu1 %v4769_v52  ;;  %v4740_v11 = vpop.permute.xlu0 %4739 }
 0x402   : > { %6027 = vmatpush3.msra.mxu0 %v4762_v57  ;;  %4821 = vmatprep.subr.mxu1 %v4768_v54  ;;  %v4763_v56 = vsel %vm8598_vm8, %v4740_v11, %v4742_v4 }
 0x403   : > { %6028 = vmatprep.subr.mxu0 %v8105_v62  ;;  %4618 = vmatprep.mubr.f32.mxu0 %v8590_v33 }
 0x404   : > { %6023 = vmatprep.mubr.msk.f32.mxu1 %vm522_vm2, %v5586_v27  ;;  %4822 = vmatpush1.msra.mxu1 %v4767_v51 }
 0x405   : > { %6029 = vmatpush3.msra.mxu0 %v8105_v62  ;;  %6024 = vmatmul.mubr.msk.f32.gmra.mxu1 %vm522_vm2, %v5587_v48 }
 0x406   : > { %5589 = vmatmul.mubr.msk.f32.gmra.mxu0 %vm522_vm2, %v5585_v13  ;;  %4823 = vmatprep.subr.mxu1 %v4766_v31 }
 0x407   : > { %6030 = vmatprep.subr.mxu0 %v8137_v19  ;;  %4824 = vmatpush1.msra.mxu1 %v4765_v2 }
 0x408   : > { %6031 = vmatpush3.msra.mxu0 %v8137_v19  ;;  %4624 = vmatprep.mubr.f32.mxu0 %v8590_v33 }
 0x409   : > { %6032 = vmatprep.subr.mxu0 %v4744_v20  ;;  %4825 = vmatprep.subr.mxu1 %v4764_v24 }
 0x40a   : > { %5590 = vmatmul.mubr.msk.f32.gmra.mxu0 %vm522_vm2, %v5586_v27  ;;  %4826 = vmatpush1.msra.mxu1 %v4763_v56 }
 0x40b   : > { %6033 = vmatpush3.msra.mxu0 %v4744_v20  ;;  %4859 = vmatprep.mubr.f32.mxu1 %v8590_v33 }
 0x40c   : > { %5600 = vmatmul.mubr.msk.f32.vlgmr.msra.gmra.mxu1 %vm522_vm2, %v5596_v15  ;;  %4630 = vmatprep.mubr.f32.mxu0 %v8590_v33 }
 0x40d   : > { %4865 = vmatprep.mubr.f32.mxu1 %v8590_v33 }
 0x40e   : > { %5591 = vmatmul.mubr.msk.f32.gmra.mxu0 %vm522_vm2, %v5587_v48 }
 0x40f   : > { %6034 = vmatprep.mubr.msk.f32.mxu0 %vm522_vm2, %v5596_v15 }
 0x410   : > { %5601 = vmatmul.mubr.msk.f32.gmra.mxu1 %vm522_vm2, %v5597_v46 }
 0x411   : > { %4871 = vmatprep.mubr.f32.mxu1 %v8590_v33 }
 0x412   : > { %6035 = vmatmul.mubr.msk.f32.vlgmr.msra.gmra.mxu0 %vm522_vm2, %v5597_v46 }
 0x413   : > { %6037 = vmatprep.mubr.msk.f32.mxu0 %vm522_vm2, %v5598_v50 }
 0x414   : > { %5602 = vmatmul.mubr.msk.f32.gmra.mxu1 %vm522_vm2, %v5598_v50 }
 0x415   : > { %4877 = vmatprep.mubr.f32.mxu1 %v8590_v33 }
 0x416   : > { %6038 = vmatmul.mubr.msk.f32.gmra.mxu0 %vm522_vm2, %v5599_v41 }
 0x417   : > { %5162 = vmatprep.mubr.f32.mxu0 %v8590_v33 }
 0x418   : > { %5603 = vmatmul.mubr.msk.f32.gmra.mxu1 %vm522_vm2, %v5599_v41 }
 0x419   : > { %6048 = vmatprep.mubr.msk.f32.mxu1 %vm522_vm2, %v8253_v3 }
 0x459   : > { %v5924_v10 = vpop.f32.mrf.mxu0 }
 0x45a   : > { %v2958_v12 = vpop.f32.mrf.mxu1 }
 0x45b   : > { %v3047_v9 = vpop.f32.mrf.mxu0 }
 0x45c   : > { %v2960_v8 = vpop.f32.mrf.mxu1 }
 0x45e   : > { %v5927_v38 = vpop.f32.mrf.mxu0 }
 0x460   : > { %v2964_v22 = vpop.f32.mrf.mxu1  ;;  %v3057_v59 = vpop.f32.mrf.mxu0 }
 0x462   : > { %v2966_v63 = vpop.f32.mrf.mxu1 }
 0x464   : > { %v3144_v61 = vpop.f32.mrf.mxu0 }
 0x465   : > { %v8255_v35 = vadd.f32 %v3144_v61, %v2958_v12 }
 0x466   : > { %v2970_v43 = vpop.f32.mrf.mxu1  ;;  %v3146_v29 = vpop.f32.mrf.mxu0 }
 0x467   : > { %v8259_v30 = vadd.f32 %v3146_v29, %v2960_v8 }
 0x468   : > { %v2972_v5 = vpop.f32.mrf.mxu1  ;;  %v3150_v17 = vpop.f32.mrf.mxu0 }
 0x469   : > { %v8261_v39 = vadd.f32 %v3150_v17, %v2964_v22 }
 0x46a   : > { %v2976_v26 = vpop.f32.mrf.mxu1  ;;  %v3152_v47 = vpop.f32.mrf.mxu0 }
 0x46b   : > { %v8263_v44 = vadd.f32 %v3152_v47, %v2966_v63 }
 0x46c   : > { %v2978_v7 = vpop.f32.mrf.mxu1  ;;  %v3156_v62 = vpop.f32.mrf.mxu0 }
 0x46d   : > { %v8265_v28 = vadd.f32 %v3156_v62, %v2970_v43 }
 0x46e   : > { %v5938_v0 = vpop.f32.mrf.mxu1  ;;  %v3158_v37 = vpop.f32.mrf.mxu0 }
 0x46f   : > { %v8267_v1 = vadd.f32 %v5938_v0, %v5924_v10  ;;  %v8269_v14 = vadd.f32 %v3158_v37, %v2972_v5 }
 0x470   : > { %v3233_v42 = vpop.f32.mrf.mxu1  ;;  %v3162_v58 = vpop.f32.mrf.mxu0 }
 0x471   : > { %v8271_v21 = vadd.f32 %v3233_v42, %v3047_v9  ;;  %v8273_v19 = vadd.f32 %v3162_v58, %v2976_v26 }
 0x472   : > { %v5941_v23 = vpop.f32.mrf.mxu1  ;;  %v3164_v60 = vpop.f32.mrf.mxu0 }
 0x473   : > { %v8275_v55 = vadd.f32 %v5941_v23, %v5927_v38  ;;  %v8277_v49 = vadd.f32 %v3164_v60, %v2978_v7 }
 0x474   : > { %v3243_v57 = vpop.f32.mrf.mxu1 }
 0x475   : > { %v8279_v6 = vadd.f32 %v3243_v57, %v3057_v59  ;;  %v5952_v18 = vpop.f32.mrf.mxu0 }
 0x476   : > { %v8281_v45 = vpop.f32.mrf.mxu1 }
 0x477   : > { %v3468_v40 = vpop.f32.mrf.mxu0 }
 0x478   : > { %v8283_v34 = vpop.f32.mrf.mxu1 }
 0x479   : > { %v5955_v13 = vpop.f32.mrf.mxu0 }
 0x47a   : > { %v8285_v25 = vpop.f32.mrf.mxu1 }
 0x47b   : > { %v3478_v52 = vpop.f32.mrf.mxu0 }
 0x47c   : > { %v8287_v53 = vpop.f32.mrf.mxu1 }
 0x47e   : > { %v8289_v36 = vpop.f32.mrf.mxu1 }
 0x480   : > { %v8291_v16 = vpop.f32.mrf.mxu1 }
 0x482   : > { %v8293_v32 = vpop.f32.mrf.mxu1 }
 0x484   : > { %v8295_v4 = vpop.f32.mrf.mxu1 }
 0x486   : > { %v8297_v54 = vpop.f32.mrf.mxu1  ;;  %v3626_v27 = vpop.f32.mrf.mxu0 }
 0x488   : > { %v8299_v48 = vpop.f32.mrf.mxu1  ;;  %v8301_v51 = vpop.f32.mrf.mxu0 }
 0x48a   : > { %v8303_v20 = vpop.f32.mrf.mxu1 }
 0x48c   : > { %v8305_v2 = vpop.f32.mrf.mxu0  ;;  %v8307_v31 = vpop.f32.mrf.mxu1 }
 0x48e   : > { %v8309_v11 = vpop.f32.mrf.mxu0 }
 0x491   : > { %v3873_v24 = vpop.f32.mrf.mxu1 }
 0x492   : > { %v8311_v56 = vpop.f32.mrf.mxu0 }
 0x493   : > { %v8313_v15 = vpop.f32.mrf.mxu1 }
 0x494   : > { %v8315_v46 = vpop.f32.mrf.mxu0 }
 0x495   : > { %v8317_v50 = vpop.f32.mrf.mxu1 }
 0x496   : > { %v8319_v41 = vpop.f32.mrf.mxu0 }
 0x497   : > { %v8321_v10 = vpop.f32.mrf.mxu1 }
 0x498   : > { %v8323_v12 = vpop.f32.mrf.mxu0 }
 0x499   : > { %v8325_v9 = vpop.f32.mrf.mxu1 }
 0x49a   : > { %v8327_v8 = vpop.f32.mrf.mxu0 }
 0x49b   : > { %v8329_v38 = vpop.f32.mrf.mxu1 }
 0x49c   : > { %v8331_v22 = vpop.f32.mrf.mxu0 }
 0x49d   : > { %v8333_v59 = vpop.f32.mrf.mxu1 }
 0x49e   : > { %v8335_v63 = vpop.f32.mrf.mxu0 }
 0x49f   : > { %v8337_v61 = vpop.f32.mrf.mxu1 }
 0x4a0   : > { %v8339_v43 = vpop.f32.mrf.mxu0 }
 0x4a2   : > { %v4120_v29 = vpop.f32.mrf.mxu0 }
 0x4a3   : > { %v8341_v5 = vpop.f32.mrf.mxu1 }
 0x4a4   : > { %8600 = vst [vmem:[#allocation5_spill] sm:$0xff] %v8341_v5  ;;  %v4122_v17 = vpop.f32.mrf.mxu0 }
 0x4a5   : > { %v8343_v26 = vpop.f32.mrf.mxu1 }
 0x4a6   : > { %8601 = vst [vmem:[#allocation3_spill] sm:$0xff] %v8343_v26 }
 0x4a8   : > { %v8345_v47 = vpop.f32.mrf.mxu1 }
 0x4a9   : > { %8602 = vst [vmem:[#allocation11_spill] sm:$0xff] %v8345_v47  ;;  %v8347_v7 = vpop.f32.mrf.mxu0 }
 0x4aa   : > { %v8349_v62 = vpop.f32.mrf.mxu1 }
 0x4ab   : > { %8603 = vst [vmem:[#allocation6_spill] sm:$0xff] %v8349_v62  ;;  %v8351_v0 = vpop.f32.mrf.mxu0 }
 0x4ac   : > { %8604 = vst [vmem:[#allocation7_spill] sm:$0xff] %v8351_v0 }
 0x4ae   : > { %v4367_v37 = vpop.f32.mrf.mxu1 }
 0x4af   : > { %v8353_v42 = vpop.f32.mrf.mxu0 }
 0x4b0   : > { %8605 = vst [vmem:[#allocation9_spill] sm:$0xff] %v8353_v42  ;;  %v8355_v58 = vpop.f32.mrf.mxu1 }
 0x4b1   : > { %v8357_v23 = vpop.f32.mrf.mxu0 }
 0x4b2   : > { %8606 = vst [vmem:[#allocation8_spill] sm:$0xff] %v8357_v23  ;;  %v8359_v60 = vpop.f32.mrf.mxu1 }
 0x4b3   : > { %8607 = vst [vmem:[#allocation10_spill] sm:$0xff] %v8359_v60  ;;  %v8361_v57 = vpop.f32.mrf.mxu0 }
 0x4b4   : > { %8608 = vst [vmem:[#allocation14_spill] sm:$0xff] %v8361_v57  ;;  %v8363_v33 = vpop.f32.mrf.mxu1 }
 0x4b5   : > { %8609 = vst [vmem:[#allocation13_spill] sm:$0xff] %v8363_v33  ;;  %v8365_v3 = vpop.f32.mrf.mxu0 }
 0x4b6   : > { %8610 = vst [vmem:[#allocation17_spill] sm:$0xff] %v8365_v3  ;;  %v8367_v47 = vpop.f32.mrf.mxu1  ;;  %v3492_v3 = vadd.f32 %v5952_v18, %v8267_v1  ;;  %v3491_v1 = vadd.f32 %v8287_v53, %v8263_v44 }
 0x4b7   : > { %8611 = vst [vmem:[#allocation16_spill] sm:$0xff] %v8367_v47  ;;  %v8369_v62 = vpop.f32.mrf.mxu0  ;;  %v3487_v47 = vadd.f32 %v8281_v45, %v8255_v35  ;;  %v3493_v35 = vadd.f32 %v8289_v36, %v8265_v28 }
 0x4b8   : > { %v8371_v0 = vpop.f32.mrf.mxu1  ;;  %v3739_v45 = vadd.f32 %v8297_v54, %v3492_v3  ;;  %v8424_v54 = vpop.permute.xlu0 %4997 }
 0x4b9   : > { %8612 = vst [vmem:[#allocation15_spill] sm:$0xff] %v8371_v0  ;;  %v8373_v26 = vpop.f32.mrf.mxu0  ;;  %v3489_v0 = vadd.f32 %v3468_v40, %v8271_v21  ;;  %v3734_v21 = vadd.f32 %v3626_v27, %v3487_v47  ;;  %v8623_v47 = vld [vmem:[#allocation6_spill] sm:$0xff] }
 0x4ba   : > { %8613 = vst [vmem:[#allocation12_spill] sm:$0xff] %v8373_v26  ;;  %v8375_v42 = vpop.f32.mrf.mxu1  ;;  %v3488_v26 = vadd.f32 %v8283_v34, %v8259_v30  ;;  %v3494_v30 = vadd.f32 %v8291_v16, %v8269_v14  ;;  %v3738_v14 = vadd.f32 %v8309_v11, %v3491_v1  ;;  %v3986_v27 = vadd.f32 %v8327_v8, %v3739_v45  ;;  %v8620_v8 = vld [vmem:[#allocation3_spill] sm:$0xff] }
 0x4bb   : > { %8614 = vst [vmem:[#allocation2_spill] sm:$0xff] %v8375_v42  ;;  %v8377_v5 = vpop.f32.mrf.mxu0  ;;  %v3498_v42 = vadd.f32 %v5955_v13, %v8275_v55  ;;  %v3496_v55 = vadd.f32 %v8293_v32, %v8273_v19  ;;  %v3981_v34 = vadd.f32 %v3873_v24, %v3734_v21  ;;  %v3740_v19 = vadd.f32 %v8311_v56, %v3493_v35  ;;  %v8627_v35 = vld [vmem:[#allocation14_spill] sm:$0xff] }
 0x4bc   : > { %8615 = vst [vmem:[#allocation21_spill] sm:$0xff] %v8377_v5  ;;  %v8379_v23 = vpop.f32.mrf.mxu1  ;;  %v3735_v18 = vadd.f32 %v8301_v51, %v3488_v26  ;;  %v3741_v3 = vadd.f32 %v8315_v46, %v3494_v30  ;;  %v8628_v30 = vld [vmem:[#allocation13_spill] sm:$0xff] }
 0x4bd   : > { %8616 = vst [vmem:[#allocation22_spill] sm:$0xff] %v8379_v23  ;;  %v8381_v60 = vpop.f32.mrf.mxu0  ;;  %v3490_v23 = vadd.f32 %v8285_v25, %v8261_v39  ;;  %v3497_v39 = vadd.f32 %v8295_v4, %v8277_v49  ;;  %v3745_v28 = vadd.f32 %v8303_v20, %v3498_v42  ;;  %v4228_v13 = vadd.f32 %v4120_v29, %v3981_v34 }
 0x4be   : > { %8617 = vst [vmem:[#allocation23_spill] sm:$0xff] %v8381_v60  ;;  %v3982_v49 = vadd.f32 %v8313_v15, %v3735_v18  ;;  %v3743_v16 = vadd.f32 %v8319_v41, %v3496_v55  ;;  %v8629_v18 = vld [vmem:[#allocation17_spill] sm:$0xff] }
 0x4bf   : > { %v4614_v57 = vpop.f32.mrf.mxu0  ;;  %v3737_v44 = vadd.f32 %v8305_v2, %v3490_v23  ;;  %v3744_v32 = vadd.f32 %v8323_v12, %v3497_v39  ;;  %v4475_v20 = vadd.f32 %v4367_v37, %v4228_v13  ;;  %v3992_v11 = vadd.f32 %v8335_v63, %v3745_v28  ;;  %v8619_v12 = vld [vmem:[#allocation5_spill] sm:$0xff] }
 0x4c0   : > { %v8383_v33 = vpop.f32.mrf.mxu1  ;;  %v4229_v51 = vadd.f32 %v4122_v17, %v3982_v49 }
 0x4c1   : > { %8618 = vst [vmem:[#allocation24_spill] sm:$0xff] %v8383_v33  ;;  %v4616_v5 = vpop.f32.mrf.mxu0  ;;  %v3495_v33 = vadd.f32 %v3478_v52, %v8279_v6  ;;  %v3736_v6 = vadd.f32 %v8299_v48, %v3489_v0  ;;  %v3984_v36 = vadd.f32 %v8317_v50, %v3737_v44  ;;  %v3987_v52 = vadd.f32 %v8325_v9, %v3740_v19  ;;  %v8631_v19 = vld [vmem:[#allocation15_spill] sm:$0xff]  ;;  %v8632_v49 = vld [vmem:[#allocation12_spill] sm:$0xff] }
 0x4c2   : > { %v8394_v60 = vpop.f32.mrf.mxu1  ;;  %v3988_v48 = vadd.f32 %v8329_v38, %v3741_v3  ;;  %v3991_v24 = vadd.f32 %v8337_v61, %v3744_v32  ;;  %v4476_v41 = vadd.f32 %v8355_v58, %v4229_v51  ;;  %v4233_v9 = vadd.f32 %v8619_v12, %v3986_v27  ;;  %v8439_v61 = vpop.permute.xlu1 %5002  ;;  %v8625_v58 = vld [vmem:[#allocation9_spill] sm:$0xff] }
 0x4c3   : > { %v3742_v25 = vadd.f32 %v8307_v31, %v3495_v33  ;;  %v3985_v33 = vadd.f32 %v8321_v10, %v3738_v14  ;;  %v3983_v2 = vadd.f32 %v8331_v22, %v3736_v6  ;;  %v3990_v31 = vadd.f32 %v8333_v59, %v3743_v16  ;;  %v8621_v22 = vld [vmem:[#allocation11_spill] sm:$0xff]  ;;  %v4988_v6 = vpop.permute.xlu0 %4987  ;;  %v8630_v14 = vld [vmem:[#allocation16_spill] sm:$0xff] }
 0x4c4   : > { %v4231_v50 = vadd.f32 %v8347_v7, %v3984_v36  ;;  %v4722_v10 = vadd.f32 %v4614_v57, %v4475_v20  ;;  %v4239_v29 = vadd.f32 %v8621_v22, %v3992_v11  ;;  %v8622_v59 = vld [vmem:[#allocation7_spill] sm:$0xff]  ;;  %v4723_v7 = vadd.f32 %v4616_v5, %v4476_v41  ;;  %v8626_v57 = vld [vmem:[#allocation8_spill] sm:$0xff]  ;;  %v8634_v20 = vld [vmem:[#allocation2_spill] sm:$0xff] }
 0x4c5   : > { %v8415_v53 = vpop.f32.mrf.mxu1  ;;  %v3989_v46 = vadd.f32 %v8339_v43, %v3742_v25  ;;  %v4230_v38 = vadd.f32 %v8620_v8, %v3983_v2  ;;  %v4232_v17 = vadd.f32 %v8622_v59, %v3985_v33  ;;  %v8624_v43 = vld [vmem:[#allocation10_spill] sm:$0xff]  ;;  %v4234_v23 = vadd.f32 %v8625_v58, %v3987_v52 }
 0x4c6   : > { %v4620_v40 = vpop.f32.mrf.mxu0  ;;  %v4478_v37 = vadd.f32 %v8624_v43, %v4231_v50  ;;  %v4235_v1 = vadd.f32 %v8626_v57, %v3988_v48  ;;  %v4237_v21 = vadd.f32 %v8627_v35, %v3990_v31  ;;  %v4238_v44 = vadd.f32 %v8629_v18, %v3991_v24  ;;  %v8636_v31 = vld [vmem:[#allocation22_spill] sm:$0xff]  ;;  %v8637_v24 = vld [vmem:[#allocation23_spill] sm:$0xff] }
 0x4c7   : > { %v4713_v56 = vpop.f32.mrf.mxu1  ;;  %v4236_v0 = vadd.f32 %v8623_v47, %v3989_v46  ;;  %v4479_v55 = vadd.f32 %v8628_v30, %v4232_v17  ;;  %v4480_v34 = vadd.f32 %v8369_v62, %v4233_v9  ;;  %v4481_v5 = vadd.f32 %v8630_v14, %v4234_v23  ;;  %v8635_v62 = vld [vmem:[#allocation21_spill] sm:$0xff]  ;;  %v8639_v17 = vld [vmem:[#allocation19_spill] sm:$0xff]  ;;  %v8640_v30 = vld [vmem:[#allocation18_spill] sm:$0xff] }
 0x4c8   : > { %v4622_v4 = vpop.f32.mrf.mxu0  ;;  %v4725_v28 = vadd.f32 %v4620_v40, %v4478_v37  ;;  %v4482_v3 = vadd.f32 %v8631_v19, %v4235_v1  ;;  %v4477_v36 = vadd.f32 %v8632_v49, %v4230_v38  ;;  %v8633_v33 = vld [vmem:[#allocation24_spill] sm:$0xff]  ;;  %v4484_v2 = vadd.f32 %v8634_v20, %v4237_v21 }
 0x4c9   : > { %v4727_v52 = vadd.f32 %v8633_v33, %v4480_v34  ;;  %v4726_v27 = vadd.f32 %v4622_v4, %v4479_v55  ;;  %v4486_v40 = vadd.f32 %v8635_v62, %v4239_v29  ;;  %v4485_v11 = vadd.f32 %v8636_v31, %v4238_v44  ;;  %v8638_v38 = vld [vmem:[#allocation20_spill] sm:$0xff] }
 0x4ca   : > { %v4626_v15 = vpop.f32.mrf.mxu0  ;;  %v4483_v46 = vadd.f32 %v8637_v24, %v4236_v0  ;;  %v4724_v22 = vadd.f32 %v8394_v60, %v4477_v36  ;;  %v8641_v31 = vld [vmem:[#allocation4_spill] sm:$0xff]  ;;  %v5090_v24 = vpop.permute.xlu0 %5089 }
 0x4cb   : > { %v4728_v12 = vadd.f32 %v4626_v15, %v4481_v5  ;;  %v4733_v59 = vadd.f32 %v8415_v53, %v4486_v40  ;;  %v5079_v40 = vld [vmem:[%s8533_s6 + $0x8] sm:$0xff] }
 0x4cc   : > { %v4628_v63 = vpop.f32.mrf.mxu0  ;;  %v4861_v26 = vpop.f32.mrf.mxu1 }
 0x4cd   : > { %v4969_v42 = vadd.f32 %v4861_v26, %v4722_v10  ;;  %v4993_v10 = vpop.permute.xlu1 %4992  ;;  %v4729_v15 = vadd.f32 %v4628_v63, %v4482_v3 }
 0x4ce   : > { %v4632_v39 = vpop.f32.mrf.mxu0  ;;  %v4863_v45 = vpop.f32.mrf.mxu1 }
 0x4cf   : > { %v4970_v25 = vadd.f32 %v4863_v45, %v4723_v7  ;;  %v5005_v13 = vadd.f32 %v4988_v6, %v4969_v42  ;;  %v4730_v42 = vadd.f32 %v4713_v56, %v4483_v46  ;;  %v4731_v60 = vadd.f32 %v4632_v39, %v4484_v2 }
 0x4d0   : > { %v4634_v16 = vpop.f32.mrf.mxu0  ;;  %v4867_v32 = vpop.f32.mrf.mxu1 }
 0x4d1   : > { %v5006_v48 = vadd.f32 %v4988_v6, %v4970_v25  ;;  %v4972_v51 = vadd.f32 %v4867_v32, %v4725_v28  ;;  %v8463_v29 = vmul.f32 %v5005_v13, %v8639_v17  ;;  %v4732_v45 = vadd.f32 %v4634_v16, %v4485_v11 }
 0x4d2   : > { %v4869_v50 = vpop.f32.mrf.mxu1  ;;  %v6036_v41 = vpop.f32.mrf.mxu0  ;;  %v8642_v11 = vmov 0.0  }
 0x4d3   : > { %v4973_v9 = vadd.f32 %v4869_v50, %v4726_v27  ;;  %v4974_v8 = vadd.f32 %v6036_v41, %v4727_v52  ;;  %v8458_v4 = vmul.f32 %v5006_v48, %v8638_v38  ;;  %v5008_v26 = vadd.f32 %v4993_v10, %v4972_v51  ;;  %v5085_v41 = vpop.permute.xlu1 %5084 }
 0x4d4   : > { %v4873_v47 = vpop.f32.mrf.mxu1  ;;  %v4950_v43 = vpop.f32.mrf.mxu0 }
 0x4d5   : > { %v5009_v0 = vadd.f32 %v4993_v10, %v4973_v9  ;;  %v5010_v37 = vadd.f32 %v4993_v10, %v4974_v8  ;;  %v4975_v7 = vadd.f32 %v4873_v47, %v4728_v12  ;;  %v4971_v53 = vadd.f32 %v4950_v43, %v4724_v22 }
 0x4d6   : > { %v4875_v58 = vpop.f32.mrf.mxu1  ;;  %v6039_v23 = vpop.f32.mrf.mxu0  ;;  %v5626_v57 = vpack.c.bf16 %v8458_v4, %v8463_v29  ;;  %v5020_v63 = vmul.f32 %v5008_v26, %v8639_v17 }
 0x4d7   : > { %v5011_v1 = vadd.f32 %v8424_v54, %v4975_v7  ;;  %v4976_v35 = vadd.f32 %v4875_v58, %v4729_v15  ;;  %v4980_v21 = vadd.f32 %v6039_v23, %v4733_v59  ;;  %v5022_v55 = vmul.f32 %v5010_v37, %v8640_v30 }
 0x4d8   : > { %v5007_v18 = vadd.f32 %v4988_v6, %v4971_v53  ;;  %v4879_v44 = vpop.f32.mrf.mxu1  ;;  %v4960_v56 = vpop.f32.mrf.mxu0  ;;  %v5021_v39 = vmul.f32 %v5009_v0, %v8638_v38  ;;  %5069 = vst [vmem:[%s8470_s23] sm:$0xff] %v5626_v57 }
 0x4d9   : > { %v5023_v34 = vmul.f32 %v5011_v1, %v8639_v17  ;;  %v5012_v28 = vadd.f32 %v8424_v54, %v4976_v35  ;;  %v5016_v25 = vadd.f32 %v8439_v61, %v4980_v21  ;;  %v4978_v14 = vadd.f32 %v4879_v44, %v4731_v60 }
 0x4da   : > { %v4977_v5 = vadd.f32 %v4960_v56, %v4730_v42  ;;  %v4881_v19 = vpop.f32.mrf.mxu1  ;;  %v5629_v3 = vpack.c.bf16 %v5022_v55, %v5022_v55  ;;  %v5019_v49 = vmul.f32 %v5007_v18, %v8640_v30  ;;  %v5628_v6 = vpack.c.bf16 %v5021_v39, %v5020_v63 }
 0x4db   : > { %v5014_v36 = vadd.f32 %v8439_v61, %v4978_v14  ;;  %v4979_v13 = vadd.f32 %v4881_v19, %v4732_v45  ;;  %v5028_v16 = vmul.f32 %v5016_v25, %v8640_v30  ;;  %v5024_v32 = vmul.f32 %v5012_v28, %v8638_v38 }
 0x4dc   : > { %v5013_v33 = vadd.f32 %v8424_v54, %v4977_v5  ;;  %5073 = vst.msk [vmem:[%s8470_s23 + $0x14] sm:$0xf] %vm5070_vm9, %v5629_v3  ;;  %v5627_v52 = vpack.c.bf16 %v5019_v49, %v5019_v49  ;;  %5072 = vst [vmem:[%s8470_s23 + $0xc] sm:$0xff] %v5628_v6 }
 0x4dd   : > { %v5015_v27 = vadd.f32 %v8439_v61, %v4979_v13  ;;  %v5633_v48 = vpack.c.bf16 %v5028_v16, %v5028_v16  ;;  %6040 = vmatprep.subr.mxu1 %v5028_v16  ;;  %v5630_v51 = vpack.c.bf16 %v5024_v32, %v5023_v34  ;;  %v5026_v2 = vmul.f32 %v5014_v36, %v8639_v17 }
 0x4de   : > { %6041 = vmatpush3.msra.mxu1 %v5028_v16  ;;  %v5025_v20 = vmul.f32 %v5013_v33, %v8640_v30  ;;  %5071 = vst.msk [vmem:[%s8470_s23 + $0x8] sm:$0xf] %vm5070_vm9, %v5627_v52 }
 0x4df   : > { %5077 = vst.msk [vmem:[%s8470_s23 + $0x2c] sm:$0xf] %vm5070_vm9, %v5633_v48  ;;  %v5027_v54 = vmul.f32 %v5015_v27, %v8638_v38  ;;  %5074 = vst [vmem:[%s8470_s23 + $0x18] sm:$0xff] %v5630_v51 }
 0x4e0   : > { %v5631_v62 = vpack.c.bf16 %v5025_v20, %v5025_v20  ;;  %6042 = vmatprep.subr.mxu1 %v5025_v20 }
 0x4e1   : > { %6043 = vmatpush3.msra.mxu1 %v5025_v20  ;;  %v5632_v61 = vpack.c.bf16 %v5027_v54, %v5026_v2  ;;  %5122 = vmatprep.subr.mxu0 %v5027_v54 }
 0x4e2   : > { %5075 = vst.msk [vmem:[%s8470_s23 + $0x20] sm:$0xf] %vm5070_vm9, %v5631_v62  ;;  %6044 = vmatprep.subr.mxu1 %v5022_v55  ;;  %5123 = vmatpush1.msra.mxu0 %v5026_v2 }
 0x4e3   : > { %5076 = vst [vmem:[%s8470_s23 + $0x24] sm:$0xff] %v5632_v61  ;;  %6045 = vmatpush3.msra.mxu1 %v5022_v55  ;;  %5124 = vmatprep.subr.mxu0 %v5024_v32 }
 0x4e4   : > { %6046 = vmatprep.subr.mxu1 %v5019_v49  ;;  %5125 = vmatpush1.msra.mxu0 %v5023_v34 }
 0x4e5   : > { %6047 = vmatpush3.msra.mxu1 %v5019_v49  ;;  %5126 = vmatprep.subr.mxu0 %v5021_v39 }
 0x4e6   : > { %6049 = vmatmul.mubr.msk.f32.vlgmr.msra.gmra.mxu1 %vm522_vm2, %v5079_v40  ;;  %5127 = vmatpush1.msra.mxu0 %v5020_v63 }
 0x4e7   : > { %5128 = vmatprep.subr.mxu0 %v8458_v4 }
 0x4e8   : > { %5129 = vmatpush1.msra.mxu0 %v8463_v29 }
 0x4e9   : > { %5616 = vmatmul.mubr.msk.f32.vlgmr.msra.gmra.mxu0 %vm522_vm2, %v8641_v31 }
 0x4ea   : > { %5168 = vmatprep.mubr.f32.mxu0 %v8642_v11 }
 0x4ed   : > { %5617 = vmatmul.mubr.msk.f32.gmra.mxu0 %vm522_vm2, %v5079_v40 }
 0x5a6   : > { %v6050_v46 = vpop.f32.mrf.mxu1 }
 0x5a7   : > { %v5247_v50 = vadd.f32 %v6050_v46, %v5090_v24 }
 0x5a8   : > { %v5241_v10 = vpop.f32.mrf.mxu1 }
 0x5a9   : > { %v5255_v12 = vmul.f32 %v5247_v50, %v8640_v30  ;;  %v5242_v9 = vadd.f32 %v5241_v10, %v5085_v41  ;;  %v5164_v8 = vpop.f32.mrf.mxu0 }
 0x5aa   : > { %v5165_v4 = vadd.f32 %v5164_v8, %v5085_v41 }
 0x5ab   : > { %v5637_v22 = vpack.c.bf16 %v5255_v12, %v5255_v12  ;;  %v5252_v59 = vmul.f32 %v5242_v9, %v8640_v30  ;;  %v5166_v29 = vpop.f32.mrf.mxu0 }
 0x5ac   : > { %v5167_v26 = vadd.f32 %v5166_v29, %v5085_v41  ;;  %v5250_v15 = vmul.f32 %v5165_v4, %v8639_v17 }
 0x5ad   : > { %5279 = vst.msk [vmem:[%s372_s28 + $0x14] sm:$0xf] %vm5070_vm9, %v5637_v22  ;;  %v5635_v47 = vpack.c.bf16 %v5252_v59, %v5252_v59  ;;  %v5170_v43 = vpop.f32.mrf.mxu0 }
 0x5ae   : > { %v5251_v0 = vmul.f32 %v5167_v26, %v8638_v38  ;;  %v5171_v37 = vadd.f32 %v5170_v43, %v5090_v24 }
 0x5af   : > { %5277 = vst.msk [vmem:[%s372_s28 + $0x8] sm:$0xf] %vm5070_vm9, %v5635_v47  ;;  %v5172_v7 = vpop.f32.mrf.mxu0 }
 0x5b0   : > { %v5634_v42 = vpack.c.bf16 %v5251_v0, %v5250_v15  ;;  %v5173_v60 = vadd.f32 %v5172_v7, %v5090_v24  ;;  %v5253_v53 = vmul.f32 %v5171_v37, %v8639_v17 }
 0x5b2   : > { %5276 = vst [vmem:[%s372_s28] sm:$0xff] %v5634_v42  ;;  %v5254_v58 = vmul.f32 %v5173_v60, %v8638_v38 }
 0x5b4   : > { %v5636_v23 = vpack.c.bf16 %v5254_v58, %v5253_v53 }
 0x5b6   : > { %5278 = vst [vmem:[%s372_s28 + $0xc] sm:$0xff] %v5636_v23 }
 0x5b7 PF: > { %s21_s13 = sadd.s32 1, %s6350_s13  }
 0x5b8   : > { %p18_p4 = scmp.ge.s32.totalorder %s21_s13, 4  }
 0x5ba   :  { %20 = sbr.rel (!%p18_p4) target bundleno = 1 (0x1), region = 114 }

// kernel: eecnet_forward.36
= control target key start
LH: loop header
LB: loop body
LE: loop exit
PB: predicated region body
PF: predicated region fallthrough
CT: control target
= control target key end

     0   :  { %s721_s18 = smov 0   ;;  %s805_s0 = inlined_call_operand.vmem [shape: bf16[2,32,324], index: 0, kind: input, shape index: {}]   ;;  %s806_s1 = inlined_call_operand.vmem [shape: bf16[32,32], index: 1, kind: input, shape index: {}]   ;;  %s807_s2 = inlined_call_operand.vmem [shape: f32[32,1], index: 2, kind: input, shape index: {}]   ;;  %s808_s3 = inlined_call_operand.vmem [shape: bf16[2,32,324], index: 3, kind: input, shape index: {}, may-alias: {3,5}]   ;;  %s809_s4 = inlined_call_operand.vmem [shape: f32[1,324], index: 4, kind: input, shape index: {}]   ;;  %s810_s5 = inlined_call_operand.vmem [shape: bf16[2,32,324], index: 5, kind: output, shape index: {}, may-alias: {3,5}]  }
   0x1 LB: > { %s610_s19 = sadd.s32 4294967295, %s688_s18   ;;  %p614_p0 = scmp.ge.s32.totalorder %s688_s18, 1  ;;  %s688_s18 = sphi %s721_s18, %s15_s18  }
   0x2   : > { %p197_p1 = scmp.lt.s32.totalorder %s688_s18, 3 }
   0x4   : > { %p198_p2 = pnand %p614_p0, %p197_p1 }
   0x5   : > { %p230_p3 = scmp.lt.s32.totalorder (!%p198_p2), %s610_s19, 1 }
   0x6   : > { %201 = sbr.rel (%p198_p2) target bundleno = 240 (0xf0), region = 40 }
   0xb   : > { %v690_v0 = vmov 0   ;;  %v680_v1 = vld [vmem:[%s806_s1] sm:$0xff]   ;;  %vm324_vm0 = vcmask 261120   ;;  %s812_s19 = smov (!%p230_p3, %s610_s19), 1  ;;  %v260_v3 = vld [vmem:[%s807_s2 + $0x10] sm:$0xff]  ;;  %v259_v4 = vld [vmem:[%s807_s2 + $0x8] sm:$0xff]  ;;  %v467_v13 = vlaneseq }
   0xc   : > { %363 = vmatprep.mubr.bf16.mxu0 %v690_v0  ;;  %670 = vset.pattern.permute.xlu0 %v690_v0  ;;  %v258_v2 = vld [vmem:[%s807_s2] sm:$0xff]  ;;  %s739_s26 = smul.u32 48, %s812_s19  ;;  %v261_v5 = vld [vmem:[%s807_s2 + $0x18] sm:$0xff]  ;;  %v681_v12 = vld [vmem:[%s806_s1 + $0x8] sm:$0xff]   ;;  %vm535_vm1 = vcmask 551936  }
   0xd   : > { %671 = vset.pattern.permute.xlu1 %v690_v0  ;;  %656 = vmatprep.mubr.msk.bf16.mxu1 %vm324_vm0, %v680_v1  ;;  %v468_v14 = vshrl.u32 %v467_v13, 7  ;;  %v465_v21 = vld [vmem:[%s809_s4] sm:$0x7] }
   0xe   : > { %264 = vperm.xlu0 %670, %v258_v2   ;;  %274 = vperm.xlu1 %671, %v260_v3   ;;  %s234_s8 = scalar_lea.vmem %s805_s0, %s739_s26  ;;  %s761_s13 = scalar_lea.vmem %s808_s3, %s739_s26 }
   0xf   : > { %v672_v6 = vld [vmem:[%s234_s8 + $0x1c] ss:$12 sps:$4 sm:$0xff]   ;;  %v674_v7 = vld [vmem:[%s234_s8 + $0x18] ss:$12 sps:$4 sm:$0xff]   ;;  %v675_v8 = vld [vmem:[%s234_s8 + $0x20] ss:$12 sps:$4 sm:$0xff]   ;;  %s781_s19 = scalar_lea.vmem %s810_s5, %s739_s26 }
  0x10   : > { %343 = vmatprep.subr.bf16.mxu0 %v672_v6  ;;  %v676_v9 = vld [vmem:[%s234_s8 + $0x4] ss:$12 sps:$4 sm:$0xff]   ;;  %v678_v10 = vld [vmem:[%s234_s8] ss:$12 sps:$4 sm:$0xff]   ;;  %652 = vmatprep.subr.bf16.mxu1 %v675_v8  ;;  %v679_v11 = vld [vmem:[%s234_s8 + $0x8] ss:$12 sps:$4 sm:$0xff]  }
  0x11   : > { %344 = vmatpush1.bf16.msra.mxu0 %v674_v7  ;;  %653 = vmatpush3.bf16.msra.mxu1 %v675_v8  ;;  %v433_v16 = vld [vmem:[%s761_s13] sm:$0xff]  ;;  %v469_v17 = vsub.s32 0, %v468_v14  ;;  %v473_v18 = vsub.s32 1, %v468_v14  ;;  %v477_v22 = vsub.s32 2, %v468_v14  ;;  %v435_v24 = vld [vmem:[%s761_s13 + $0xc] sm:$0xff]  ;;  %v437_v40 = vld [vmem:[%s761_s13 + $0x18] sm:$0xff] }
  0x12   : > { %269 = vperm.xlu0 %670, %v259_v4   ;;  %279 = vperm.xlu1 %671, %v261_v5   ;;  %v438_v19 = vld [vmem:[%s761_s13 + $0x8] ss:$24 sps:$4 sm:$0xff]   ;;  %v441_v20 = vunpack.c.l.bf16 %v433_v16  ;;  %v442_v27 = vunpack.c.h.bf16 %v433_v16  ;;  %v444_v34 = vunpack.c.l.bf16 %v435_v24  ;;  %v440_v39 = vld [vmem:[%s761_s13 + $0x14] ss:$24 sps:$4 sm:$0xff]   ;;  %v445_v47 = vunpack.c.h.bf16 %v435_v24 }
  0x13   : > { %345 = vmatprep.subr.bf16.mxu0 %v676_v9  ;;  %654 = vmatprep.subr.bf16.mxu1 %v679_v11  ;;  %v449_v28 = vunpack.c.h.bf16 %v438_v19  ;;  %v769_v30 = vrot.slane %v465_v21, %v469_v17  ;;  %v771_v32 = vrot.slane %v465_v21, %v473_v18  ;;  %v478_v37 = vrot.slane %v465_v21, %v477_v22 }
  0x14   : > { %v443_v43 = vunpack.c.l.bf16 %v438_v19  ;;  %v452_v53 = vunpack.c.h.bf16 %v440_v39  ;;  %v447_v54 = vunpack.c.l.bf16 %v437_v40  ;;  %v446_v63 = vunpack.c.l.bf16 %v440_v39 }
  0x15   : > { %346 = vmatpush1.bf16.msra.mxu0 %v678_v10  ;;  %655 = vmatpush3.bf16.msra.mxu1 %v679_v11  ;;  %v448_v4 = vunpack.c.h.bf16 %v437_v40 }
  0x18   : > { %626 = vmatmul.mubr.msk.bf16.vlgmr.msra.gmra.mxu0 %vm324_vm0, %v680_v1  ;;  %657 = vmatmul.mubr.msk.bf16.vlgmr.msra.gmra.mxu1 %vm324_vm0, %v681_v12 }
  0x19   : > { %373 = vmatprep.mubr.bf16.mxu0 %v690_v0  ;;  %v439_v0 = vld [vmem:[%s761_s13 + $0x24] sm:$0xff] }
  0x1a   : > { %v450_v13 = vunpack.c.l.bf16 %v439_v0  ;;  %v451_v22 = vunpack.c.h.bf16 %v439_v0 }
  0x20   : > { %627 = vmatmul.mubr.msk.bf16.gmra.mxu0 %vm324_vm0, %v681_v12 }
  0x89   : > { %v265_v15 = vpop.permute.xlu0 %264  ;;  %v275_v23 = vpop.permute.xlu1 %274 }
  0x8d   : > { %v270_v29 = vpop.permute.xlu0 %269  ;;  %v280_v48 = vpop.permute.xlu1 %279 }
  0xd8   : > { %v365_v25 = vpop.f32.mrf.mxu0  ;;  %v658_v33 = vpop.f32.mrf.mxu1 }
  0xd9   : > { %v366_v26 = vadd.f32 %v365_v25, %v265_v15  ;;  %v427_v38 = vadd.f32 %v658_v33, %v275_v23 }
  0xda   : > { %v367_v31 = vpop.f32.mrf.mxu0  ;;  %v418_v42 = vpop.f32.mrf.mxu1 }
  0xdb   : > { %v453_v35 = vadd.f32 %v441_v20, %v366_v26  ;;  %v368_v36 = vadd.f32 %v367_v31, %v265_v15  ;;  %v461_v45 = vadd.f32 %v449_v28, %v427_v38  ;;  %v419_v50 = vadd.f32 %v418_v42, %v265_v15 }
  0xdc   : > { %v369_v41 = vpop.f32.mrf.mxu0  ;;  %v659_v52 = vpop.f32.mrf.mxu1 }
  0xdd   : > { %v454_v44 = vadd.f32 %v442_v27, %v368_v36  ;;  %v370_v46 = vadd.f32 %v369_v41, %v270_v29  ;;  %v482_v49 = vmul.f32 %v769_v30, %v453_v35  ;;  %v490_v56 = vmul.f32 %v478_v37, %v461_v45 }
  0xde   : > { %v371_v51 = vpop.f32.mrf.mxu0  ;;  %v455_v59 = vadd.f32 %v443_v43, %v419_v50  ;;  %v430_v60 = vadd.f32 %v659_v52, %v280_v48  ;;  %v421_v62 = vpop.f32.mrf.mxu1 }
  0xdf   : > { %v483_v55 = vmul.f32 %v771_v32, %v454_v44  ;;  %v456_v57 = vadd.f32 %v444_v34, %v370_v46  ;;  %v372_v58 = vadd.f32 %v371_v51, %v270_v29  ;;  %v645_v2 = vpack.c.bf16 %v490_v56, %v490_v56 }
  0xe0   : > { %v375_v61 = vpop.f32.mrf.mxu0  ;;  %v484_v5 = vmul.f32 %v478_v37, %v455_v59  ;;  %v464_v6 = vadd.f32 %v452_v53, %v430_v60  ;;  %v422_v8 = vadd.f32 %v421_v62, %v270_v29 }
  0xe1   : > { %v640_v1 = vpack.c.bf16 %v483_v55, %v482_v49  ;;  %v457_v3 = vadd.f32 %v445_v47, %v372_v58  ;;  %v376_v7 = vadd.f32 %v375_v61, %v275_v23  ;;  %v485_v10 = vmul.f32 %v769_v30, %v456_v57  ;;  %540 = vst.msk [vmem:[%s781_s19 + $0x20] sm:$0xf] %vm535_vm1, %v645_v2 }
  0xe2   : > { %v377_v9 = vpop.f32.mrf.mxu0  ;;  %v641_v14 = vpack.c.bf16 %v484_v5, %v484_v5  ;;  %v493_v15 = vmul.f32 %v478_v37, %v464_v6  ;;  %v458_v17 = vadd.f32 %v446_v63, %v422_v8 }
  0xe3   : > { %v486_v11 = vmul.f32 %v771_v32, %v457_v3  ;;  %v378_v12 = vadd.f32 %v377_v9, %v275_v23  ;;  %534 = vst [vmem:[%s781_s19] sm:$0xff] %v640_v1  ;;  %v459_v16 = vadd.f32 %v447_v54, %v376_v7 }
  0xe4   : > { %v379_v18 = vpop.f32.mrf.mxu0  ;;  %v647_v24 = vpack.c.bf16 %v493_v15, %v493_v15  ;;  %v487_v25 = vmul.f32 %v478_v37, %v458_v17  ;;  %536 = vst.msk [vmem:[%s781_s19 + $0x8] sm:$0xf] %vm535_vm1, %v641_v14 }
  0xe5   : > { %v642_v19 = vpack.c.bf16 %v486_v11, %v485_v10  ;;  %v460_v20 = vadd.f32 %v448_v4, %v378_v12  ;;  %v380_v21 = vadd.f32 %v379_v18, %v280_v48  ;;  %v488_v26 = vmul.f32 %v769_v30, %v459_v16 }
  0xe6   : > { %v381_v23 = vpop.f32.mrf.mxu0  ;;  %v643_v31 = vpack.c.bf16 %v487_v25, %v487_v25  ;;  %542 = vst.msk [vmem:[%s781_s19 + $0x2c] sm:$0xf] %vm535_vm1, %v647_v24 }
  0xe7   : > { %v489_v27 = vmul.f32 %v771_v32, %v460_v20  ;;  %v462_v28 = vadd.f32 %v450_v13, %v380_v21  ;;  %537 = vst [vmem:[%s781_s19 + $0xc] sm:$0xff] %v642_v19  ;;  %v382_v29 = vadd.f32 %v381_v23, %v280_v48 }
  0xe8   : > { %538 = vst.msk [vmem:[%s781_s19 + $0x14] sm:$0xf] %vm535_vm1, %v643_v31 }
  0xe9   : > { %v644_v33 = vpack.c.bf16 %v489_v27, %v488_v26  ;;  %v463_v34 = vadd.f32 %v451_v22, %v382_v29  ;;  %v491_v35 = vmul.f32 %v769_v30, %v462_v28 }
  0xeb   : > { %539 = vst [vmem:[%s781_s19 + $0x18] sm:$0xff] %v644_v33  ;;  %v492_v36 = vmul.f32 %v771_v32, %v463_v34 }
  0xed   : > { %v646_v37 = vpack.c.bf16 %v492_v36, %v491_v35 }
  0xef   : > { %541 = vst [vmem:[%s781_s19 + $0x24] sm:$0xff] %v646_v37 }
  0xf0 PF: > { %s15_s18 = sadd.s32 1, %s688_s18  }
  0xf1   : > { %p12_p4 = scmp.ge.s32.totalorder %s15_s18, 4  }
  0xf3   :  { %14 = sbr.rel (!%p12_p4) target bundleno = 1 (0x1), region = 73 }

// kernel: eecnet_forward.21
= control target key start
LH: loop header
LB: loop body
LE: loop exit
PB: predicated region body
PF: predicated region fallthrough
CT: control target
= control target key end

     0   :  { %s906_s21 = smov 0   ;;  %s991_s0 = inlined_call_operand.vmem [shape: bf16[2,16,1], index: 0, kind: input, shape index: {}]   ;;  %s992_s1 = inlined_call_operand.vmem [shape: bf16[2,16,324], index: 1, kind: input, shape index: {}]   ;;  %s993_s2 = inlined_call_operand.vmem [shape: bf16[2,32,324], index: 2, kind: input, shape index: {}, may-alias: {2,6}]   ;;  %s994_s3 = inlined_call_operand.vmem [shape: bf16[32,16], index: 3, kind: input, shape index: {}]   ;;  %s995_s4 = inlined_call_operand.vmem [shape: f32[32,1], index: 4, kind: input, shape index: {}]   ;;  %s996_s5 = inlined_call_operand.vmem [shape: f32[1,324], index: 5, kind: input, shape index: {}]   ;;  %s997_s6 = inlined_call_operand.vmem [shape: bf16[2,32,324], index: 6, kind: output, shape index: {}, may-alias: {2,6}]  }
   0x1 LB: > { %s734_s22 = sadd.s32 4294967295, %s868_s21   ;;  %p738_p0 = scmp.ge.s32.totalorder %s868_s21, 1  ;;  %s868_s21 = sphi %s906_s21, %s16_s21  }
   0x2   : > { %p232_p1 = scmp.lt.s32.totalorder %s868_s21, 3 }
   0x4   : > { %p233_p2 = pnand %p738_p0, %p232_p1 }
   0x5   : > { %p272_p3 = scmp.lt.s32.totalorder (!%p233_p2), %s734_s22, 1 }
   0x6   : > { %236 = sbr.rel (%p233_p2) target bundleno = 401 (0x191), region = 44 }
   0xb   : > { %v870_v0 = vmov 0   ;;  %s999_s22 = smov (!%p272_p3, %s734_s22), 1  ;;  %v330_v5 = vld [vmem:[%s995_s4] sm:$0xff]  ;;  %vm364_vm0 = vcmask 130048   ;;  %v333_v7 = vld [vmem:[%s995_s4 + $0x18] sm:$0xff]  ;;  %v331_v8 = vld [vmem:[%s995_s4 + $0x8] sm:$0xff] }
   0xc   : > { %805 = vset.pattern.permute.xlu0 %v870_v0  ;;  %403 = vmatprep.mubr.bf16.mxu0 %v870_v0  ;;  %s772_s23 = sshll.u32 %s999_s22, 3  ;;  %v812_v6 = vld [vmem:[%s994_s3] sm:$0xff]   ;;  %v332_v9 = vld [vmem:[%s995_s4 + $0x10] sm:$0xff]  ;;  %s794_s13 = smul.u32 24, %s999_s22  ;;  %v813_v31 = vld [vmem:[%s994_s3 + $0x8] sm:$0xff]   ;;  %vm647_vm1 = vcmask 551936  }
   0xd   : > { %811 = vset.pattern.permute.xlu1 %v870_v0  ;;  %s276_s26 = scalar_lea.vmem %s991_s0, %s772_s23  ;;  %790 = vmatprep.mubr.msk.bf16.mxu1 %vm364_vm0, %v812_v6  ;;  %s795_s19 = smul.u32 48, %s999_s22 }
   0xe   : > { %v782_v1 = vld [vmem:[%s276_s26] sm:$0xff]   ;;  %341 = vperm.xlu1 %811, %v331_v8   ;;  %s281_s16 = scalar_lea.vmem %s992_s1, %s794_s13 }
   0xf   : > { %v783_v2 = vunpack.c.l.bf16 %v782_v1  ;;  %v784_v3 = vunpack.c.h.bf16 %v782_v1  ;;  %v297_v10 = vld [vmem:[%s281_s16] sm:$0xff]  ;;  %v299_v11 = vld [vmem:[%s281_s16 + $0xc] sm:$0xff]  ;;  %v298_v12 = vld [vmem:[%s281_s16 + $0x8] ss:$12 sps:$4 sm:$0xff]   ;;  %s952_s24 = scalar_lea.vmem %s993_s2, %s795_s19  ;;  %s970_s29 = scalar_lea.vmem %s997_s6, %s795_s19 }
  0x10   : > { %v302_v13 = vunpack.c.h.bf16 %v297_v10  ;;  %v305_v14 = vunpack.c.h.bf16 %v299_v11  ;;  %v303_v15 = vunpack.c.l.bf16 %v298_v12  ;;  %v306_v16 = vunpack.c.h.bf16 %v298_v12 }
  0x11   : > { %v806_v4 = vpack.i.bf16 %v784_v3, %v783_v2  ;;  %v301_v18 = vunpack.c.l.bf16 %v297_v10  ;;  %v304_v19 = vunpack.c.l.bf16 %v299_v11 }
  0x12   : > { %346 = vperm.xlu1 %811, %v332_v9  }
  0x13   : > { %807 = vperm.xlu0 %805, %v806_v4  }
  0x17   : > { %336 = vperm.xlu0 %805, %v330_v5  }
  0x1b   : > { %351 = vperm.xlu0 %805, %v333_v7  }
  0x89   : > { %v342_v32 = vpop.permute.xlu1 %341 }
  0x8d   : > { %v347_v33 = vpop.permute.xlu1 %346 }
  0x8e   : > { %v808_v17 = vpop.permute.xlu0 %807 }
  0x8f   : > { %v810_v20 = vunpack.i.h.bf16 %v808_v17  ;;  %v809_v21 = vunpack.i.l.bf16 %v808_v17 }
  0x91   : > { %v318_v22 = vadd.f32 %v809_v21, %v302_v13  ;;  %v321_v23 = vadd.f32 %v810_v20, %v305_v14  ;;  %v319_v24 = vadd.f32 %v809_v21, %v303_v15  ;;  %v322_v25 = vadd.f32 %v810_v20, %v306_v16 }
  0x92   : > { %v317_v26 = vadd.f32 %v809_v21, %v301_v18  ;;  %v320_v27 = vadd.f32 %v810_v20, %v304_v19  ;;  %v337_v34 = vpop.permute.xlu0 %336  ;;  %v579_v16 = vlaneseq }
  0x93   : > { %v328_v28 = vpack.c.bf16 %v321_v23, %v318_v22  ;;  %v329_v29 = vpack.c.bf16 %v322_v25, %v319_v24 }
  0x94   : > { %v327_v30 = vpack.c.bf16 %v320_v27, %v317_v26  ;;  %v580_v25 = vshrl.u32 %v579_v16, 7 }
  0x95   : > { %385 = vmatprep.subr.bf16.mxu0 %v328_v28  ;;  %788 = vmatprep.subr.bf16.mxu1 %v329_v29 }
  0x96   : > { %386 = vmatpush1.bf16.msra.mxu0 %v327_v30  ;;  %789 = vmatpush3.bf16.msra.mxu1 %v329_v29  ;;  %v352_v47 = vpop.permute.xlu0 %351  ;;  %v545_v29 = vld [vmem:[%s952_s24] sm:$0xff] }
  0x99   : > { %746 = vmatmul.mubr.msk.bf16.vlgmr.msra.gmra.mxu0 %vm364_vm0, %v812_v6  ;;  %791 = vmatmul.mubr.msk.bf16.vlgmr.msra.gmra.mxu1 %vm364_vm0, %v813_v31 }
  0x9a   : > { %413 = vmatprep.mubr.bf16.mxu0 %v870_v0 }
  0xa1   : > { %747 = vmatmul.mubr.msk.bf16.gmra.mxu0 %vm364_vm0, %v813_v31 }
 0x159   : > { %v405_v35 = vpop.f32.mrf.mxu0  ;;  %v792_v36 = vpop.f32.mrf.mxu1 }
 0x15a   : > { %v406_v37 = vadd.f32 %v405_v35, %v337_v34  ;;  %v467_v38 = vadd.f32 %v792_v36, %v347_v33  ;;  %v553_v35 = vunpack.c.l.bf16 %v545_v29  ;;  %v577_v36 = vld [vmem:[%s996_s5] sm:$0x7] }
 0x15b   : > { %v407_v39 = vpop.f32.mrf.mxu0  ;;  %v458_v40 = vpop.f32.mrf.mxu1 }
 0x15c   : > { %v750_v41 = vmul.f32 -1.442695, %v406_v37  ;;  %v408_v42 = vadd.f32 %v407_v39, %v337_v34  ;;  %v459_v43 = vadd.f32 %v458_v40, %v337_v34  ;;  %v758_v44 = vmul.f32 -1.442695, %v467_v38  ;;  %v550_v34 = vld [vmem:[%s952_s24 + $0x20] ss:$12 sps:$4 sm:$0xff]  }
 0x15d   : > { %v409_v45 = vpop.f32.mrf.mxu0  ;;  %v793_v46 = vpop.f32.mrf.mxu1  ;;  %v585_v37 = vsub.s32 1, %v580_v25  ;;  %v547_v40 = vld [vmem:[%s952_s24 + $0xc] sm:$0xff] }
 0x15e   : > { %814 = vpow2.f32 %v750_v41  ;;  %v751_v48 = vmul.f32 -1.442695, %v408_v42  ;;  %v752_v49 = vmul.f32 -1.442695, %v459_v43  ;;  %v410_v50 = vadd.f32 %v409_v45, %v342_v32 }
 0x15f   : > { %v470_v51 = vadd.f32 %v793_v46, %v352_v47  ;;  %v411_v52 = vpop.f32.mrf.mxu0  ;;  %816 = vpow2.f32 %v758_v44  ;;  %v461_v53 = vpop.f32.mrf.mxu1  ;;  %v589_v41 = vsub.s32 2, %v580_v25  ;;  %v561_v42 = vunpack.c.l.bf16 %v550_v34 }
 0x160   : > { %818 = vpow2.f32 %v751_v48  ;;  %v753_v54 = vmul.f32 -1.442695, %v410_v50  ;;  %v412_v55 = vadd.f32 %v411_v52, %v342_v32  ;;  %v462_v56 = vadd.f32 %v461_v53, %v342_v32  ;;  %v546_v32 = vld [vmem:[%s952_s24 + $0x8] ss:$12 sps:$4 sm:$0xff]   ;;  %v549_v53 = vld [vmem:[%s952_s24 + $0x18] sm:$0xff] }
 0x161   : > { %820 = vpow2.f32 %v752_v49  ;;  %v761_v57 = vmul.f32 -1.442695, %v470_v51  ;;  %v415_v58 = vpop.f32.mrf.mxu0  ;;  %v554_v43 = vunpack.c.h.bf16 %v545_v29  ;;  %v586_v50 = vrot.slane %v577_v36, %v585_v37 }
 0x162   : > { %822 = vpow2.f32 %v753_v54  ;;  %v754_v59 = vmul.f32 -1.442695, %v412_v55  ;;  %v416_v60 = vadd.f32 %v415_v58, %v347_v33  ;;  %v755_v61 = vmul.f32 -1.442695, %v462_v56 }
 0x163   : > { %824 = vpow2.f32 %v761_v57  ;;  %v417_v62 = vpop.f32.mrf.mxu0  ;;  %v556_v51 = vunpack.c.l.bf16 %v547_v40  ;;  %v590_v54 = vrot.slane %v577_v36, %v589_v41  ;;  %v564_v55 = vunpack.c.h.bf16 %v550_v34 }
 0x164   : > { %826 = vpow2.f32 %v754_v59  ;;  %v756_v63 = vmul.f32 -1.442695, %v416_v60  ;;  %v418_v0 = vadd.f32 %v417_v62, %v347_v33  ;;  %v581_v33 = vsub.s32 0, %v580_v25 }
 0x165   : > { %828 = vpow2.f32 %v755_v61  ;;  %v419_v1 = vpop.f32.mrf.mxu0  ;;  %v557_v59 = vunpack.c.h.bf16 %v547_v40 }
 0x166   : > { %830 = vpow2.f32 %v756_v63  ;;  %v757_v2 = vmul.f32 -1.442695, %v418_v0  ;;  %v420_v3 = vadd.f32 %v419_v1, %v352_v47  ;;  %v961_v46 = vrot.slane %v577_v36, %v581_v33 }
 0x167   : > { %v421_v4 = vpop.f32.mrf.mxu0  ;;  %v558_v63 = vunpack.c.h.bf16 %v546_v32 }
 0x168   : > { %832 = vpow2.f32 %v757_v2  ;;  %v759_v5 = vmul.f32 -1.442695, %v420_v3  ;;  %v422_v6 = vadd.f32 %v421_v4, %v352_v47  ;;  %v555_v47 = vunpack.c.l.bf16 %v546_v32 }
 0x169   : > { %v559_v4 = vunpack.c.l.bf16 %v549_v53 }
 0x16a   : > { %834 = vpow2.f32 %v759_v5  ;;  %v760_v7 = vmul.f32 -1.442695, %v422_v6  ;;  %v551_v6 = vld [vmem:[%s952_s24 + $0x24] sm:$0xff] }
 0x16b   : > { %v815_v8 = vpop.eup %814 }
 0x16c   : > { %v817_v9 = vpop.eup %816  ;;  %v509_v10 = vadd.f32 1.0, %v815_v8  ;;  %836 = vpow2.f32 %v760_v7 }
 0x16d   : > { %v819_v11 = vpop.eup %818  ;;  %v517_v12 = vadd.f32 1.0, %v817_v9 }
 0x16e   : > { %v821_v13 = vpop.eup %820  ;;  %838 = vrcp.f32 %v509_v10  ;;  %v510_v14 = vadd.f32 1.0, %v819_v11 }
 0x16f   : > { %v823_v15 = vpop.eup %822  ;;  %v511_v17 = vadd.f32 1.0, %v821_v13  ;;  %840 = vrcp.f32 %v517_v12  ;;  %v560_v13 = vunpack.c.h.bf16 %v549_v53 }
 0x170   : > { %v825_v18 = vpop.eup %824  ;;  %842 = vrcp.f32 %v510_v14  ;;  %v512_v19 = vadd.f32 1.0, %v823_v15 }
 0x171   : > { %v827_v20 = vpop.eup %826  ;;  %844 = vrcp.f32 %v511_v17  ;;  %v520_v21 = vadd.f32 1.0, %v825_v18 }
 0x172   : > { %v829_v22 = vpop.eup %828  ;;  %846 = vrcp.f32 %v512_v19  ;;  %v513_v23 = vadd.f32 1.0, %v827_v20 }
 0x173   : > { %v831_v24 = vpop.eup %830  ;;  %848 = vrcp.f32 %v520_v21  ;;  %v514_v26 = vadd.f32 1.0, %v829_v22  ;;  %v562_v21 = vunpack.c.l.bf16 %v551_v6 }
 0x174   : > { %850 = vrcp.f32 %v513_v23  ;;  %v515_v27 = vadd.f32 1.0, %v831_v24 }
 0x175   : > { %v833_v28 = vpop.eup %832  ;;  %852 = vrcp.f32 %v514_v26 }
 0x176   : > { %854 = vrcp.f32 %v515_v27  ;;  %v516_v30 = vadd.f32 1.0, %v833_v28  ;;  %v563_v27 = vunpack.c.h.bf16 %v551_v6 }
 0x177   : > { %v835_v31 = vpop.eup %834 }
 0x178   : > { %856 = vrcp.f32 %v516_v30  ;;  %v518_v38 = vadd.f32 1.0, %v835_v31 }
 0x179   : > { %v837_v39 = vpop.eup %836 }
 0x17a   : > { %858 = vrcp.f32 %v518_v38  ;;  %v519_v44 = vadd.f32 1.0, %v837_v39 }
 0x17b   : > { %v839_v45 = vpop.eup %838 }
 0x17c   : > { %v841_v48 = vpop.eup %840  ;;  %v565_v49 = vmul.f32 %v839_v45, %v553_v35  ;;  %860 = vrcp.f32 %v519_v44 }
 0x17d   : > { %v843_v52 = vpop.eup %842  ;;  %v573_v56 = vmul.f32 %v841_v48, %v561_v42 }
 0x17e   : > { %v845_v57 = vpop.eup %844  ;;  %v566_v58 = vmul.f32 %v843_v52, %v554_v43  ;;  %v594_v1 = vmul.f32 %v961_v46, %v565_v49 }
 0x17f   : > { %v847_v60 = vpop.eup %846  ;;  %v567_v61 = vmul.f32 %v845_v57, %v555_v47  ;;  %v602_v62 = vmul.f32 %v590_v54, %v573_v56 }
 0x180   : > { %v849_v0 = vpop.eup %848  ;;  %v595_v2 = vmul.f32 %v586_v50, %v566_v58  ;;  %v568_v3 = vmul.f32 %v847_v60, %v556_v51 }
 0x181   : > { %v851_v5 = vpop.eup %850  ;;  %v596_v7 = vmul.f32 %v590_v54, %v567_v61  ;;  %v576_v8 = vmul.f32 %v849_v0, %v564_v55  ;;  %v778_v9 = vpack.c.bf16 %v602_v62, %v602_v62 }
 0x182   : > { %v853_v10 = vpop.eup %852  ;;  %v773_v11 = vpack.c.bf16 %v595_v2, %v594_v1  ;;  %v569_v12 = vmul.f32 %v851_v5, %v557_v59  ;;  %v597_v18 = vmul.f32 %v961_v46, %v568_v3 }
 0x183   : > { %v855_v14 = vpop.eup %854  ;;  %v774_v15 = vpack.c.bf16 %v596_v7, %v596_v7  ;;  %v605_v16 = vmul.f32 %v590_v54, %v576_v8  ;;  %652 = vst.msk [vmem:[%s970_s29 + $0x20] sm:$0xf] %vm647_vm1, %v778_v9  ;;  %v570_v17 = vmul.f32 %v853_v10, %v558_v63 }
 0x184   : > { %646 = vst [vmem:[%s970_s29] sm:$0xff] %v773_v11  ;;  %v598_v19 = vmul.f32 %v586_v50, %v569_v12  ;;  %v571_v20 = vmul.f32 %v855_v14, %v559_v4 }
 0x185   : > { %v857_v22 = vpop.eup %856  ;;  %648 = vst.msk [vmem:[%s970_s29 + $0x8] sm:$0xf] %vm647_vm1, %v774_v15  ;;  %v780_v23 = vpack.c.bf16 %v605_v16, %v605_v16  ;;  %v599_v24 = vmul.f32 %v590_v54, %v570_v17 }
 0x186   : > { %v775_v25 = vpack.c.bf16 %v598_v19, %v597_v18  ;;  %v572_v26 = vmul.f32 %v857_v22, %v560_v13  ;;  %v600_v30 = vmul.f32 %v961_v46, %v571_v20 }
 0x187   : > { %v859_v28 = vpop.eup %858  ;;  %654 = vst.msk [vmem:[%s970_s29 + $0x2c] sm:$0xf] %vm647_vm1, %v780_v23  ;;  %v776_v29 = vpack.c.bf16 %v599_v24, %v599_v24 }
 0x188   : > { %649 = vst [vmem:[%s970_s29 + $0xc] sm:$0xff] %v775_v25  ;;  %v601_v31 = vmul.f32 %v586_v50, %v572_v26  ;;  %v574_v32 = vmul.f32 %v859_v28, %v562_v21 }
 0x189   : > { %v861_v33 = vpop.eup %860  ;;  %650 = vst.msk [vmem:[%s970_s29 + $0x14] sm:$0xf] %vm647_vm1, %v776_v29 }
 0x18a   : > { %v777_v34 = vpack.c.bf16 %v601_v31, %v600_v30  ;;  %v575_v35 = vmul.f32 %v861_v33, %v563_v27  ;;  %v603_v36 = vmul.f32 %v961_v46, %v574_v32 }
 0x18c   : > { %651 = vst [vmem:[%s970_s29 + $0x18] sm:$0xff] %v777_v34  ;;  %v604_v37 = vmul.f32 %v586_v50, %v575_v35 }
 0x18e   : > { %v779_v38 = vpack.c.bf16 %v604_v37, %v603_v36 }
 0x190   : > { %653 = vst [vmem:[%s970_s29 + $0x24] sm:$0xff] %v779_v38 }
 0x191 PF: > { %s16_s21 = sadd.s32 1, %s868_s21  }
 0x192   : > { %p13_p4 = scmp.ge.s32.totalorder %s16_s21, 4  }
 0x194   :  { %15 = sbr.rel (!%p13_p4) target bundleno = 1 (0x1), region = 80 }

// kernel: eecnet_forward.37
= control target key start
LH: loop header
LB: loop body
LE: loop exit
PB: predicated region body
PF: predicated region fallthrough
CT: control target
= control target key end

     0   :  { %s3695_s15 = smov 0   ;;  %s4638_s0 = inlined_call_operand.vmem [shape: bf16[2,32,324], index: 0, kind: input, shape index: {}]   ;;  %s4639_s1 = inlined_call_operand.vmem [shape: f32[9,48,32], index: 1, kind: input, shape index: {}]   ;;  %s4640_s2 = inlined_call_operand.vmem [shape: f32[48,1], index: 2, kind: input, shape index: {}]   ;;  %s4641_s3 = inlined_call_operand.vmem [shape: f32[1,324], index: 3, kind: input, shape index: {}]   ;;  %s4642_s4 = inlined_call_operand.vmem [shape: f32[2,48,324], index: 4, kind: output, shape index: {}]  }
   0x1 LB: > { %s2930_s16 = sadd.s32 4294967295, %s3657_s15   ;;  %p2934_p0 = scmp.ge.s32.totalorder %s3657_s15, 1  ;;  %s3657_s15 = sphi %s3695_s15, %s14_s15  }
   0x2   : > { %p162_p1 = scmp.lt.s32.totalorder %s3657_s15, 3 }
   0x4   : > { %p163_p2 = pnand %p2934_p0, %p162_p1 }
   0x6   : > { %166 = sbr.rel (%p163_p2) target bundleno = 651 (0x28b), region = 36 }
   0xb   : > { %p188_p3 = scmp.lt.s32.totalorder %s2930_s16, 1  ;;  %s3659_s21 = smov 19   ;;  %vm254_vm0 = vcmask 154624   ;;  %vm279_vm1 = vcmask 711680   ;;  %v3763_v58 = vld [vmem:[%s4639_s1 + $0x30] sm:$0xff]  ;;  %vm350_vm2 = vcmask 261120  }
   0xc   : > { %s3660_s22 = smov 127   ;;  %3205 = vmatprep.mubr.msk.f32.mxu1 %vm350_vm2, %v3763_v58  ;;  %s3662_s25 = smov 126   ;;  %vm329_vm3 = vcmask 1039360   ;;  %vm3804_vm4 = vmneg %vm254_vm0  ;;  %vm810_vm5 = vcmask 1031168   ;;  %vm1378_vm6 = vcmask 891904   ;;  %vm1094_vm7 = vcmask 900096  }
   0xd   : > { %s4676_s16 = smov (!%p188_p3, %s2930_s16), 1  ;;  %s3663_s26 = smov 110   ;;  %vm1662_vm8 = vcmask 883712   ;;  %vm1946_vm9 = vcmask 752640   ;;  %vm2230_vm10 = vcmask 744448   ;;  %vm2514_vm11 = vcmask 736256  }
   0xe   : > { %s3358_s17 = smul.u32 48, %s4676_s16  ;;  %s3664_s27 = smov 109   ;;  %vm2858_vm12 = vcmask 556032  }
   0xf   : > { %s3665_s28 = smov 108   ;;  %s3666_s29 = smov 92  }
  0x10   : > { %s192_s20 = scalar_lea.vmem %s4638_s0, %s3358_s17  ;;  %s3667_s30 = smov 91  }
  0x11   : > { %v204_v0 = vld [vmem:[%s192_s20 + $0x24] sm:$0xff]  ;;  %v205_v1 = vld [vmem:[%s192_s20 + $0x20] ss:$12 sps:$4 sm:$0xff]   ;;  %v202_v2 = vld [vmem:[%s192_s20 + $0x18] sm:$0xff]  ;;  %s3668_s5 = smov 90   ;;  %s3359_s6 = smul.u32 144, %s4676_s16 }
  0x12   : > { %v216_v3 = vunpack.c.h.bf16 %v204_v0  ;;  %v217_v4 = vunpack.c.h.bf16 %v205_v1  ;;  %v215_v5 = vunpack.c.l.bf16 %v204_v0  ;;  %v212_v6 = vunpack.c.l.bf16 %v202_v2  ;;  %v200_v7 = vld [vmem:[%s192_s20 + $0xc] sm:$0xff]  ;;  %v201_v8 = vld [vmem:[%s192_s20 + $0x8] ss:$12 sps:$4 sm:$0xff]   ;;  %v198_v13 = vld [vmem:[%s192_s20] sm:$0xff] }
  0x13   : > { %v213_v9 = vunpack.c.h.bf16 %v202_v2  ;;  %v214_v10 = vunpack.c.l.bf16 %v205_v1  ;;  %v210_v11 = vunpack.c.h.bf16 %v200_v7  ;;  %v211_v12 = vunpack.c.h.bf16 %v201_v8  ;;  %s4557_s8 = scalar_lea.vmem %s4642_s4, %s3359_s6 }
  0x14   : > { %v3379_v14 = vpack.i.bf16 %v217_v4, %v216_v3  ;;  %v207_v17 = vunpack.c.h.bf16 %v198_v13  ;;  %v209_v18 = vunpack.c.l.bf16 %v200_v7  ;;  %v206_v20 = vunpack.c.l.bf16 %v198_v13 }
  0x15   : > { %v3389_v15 = vpack.i.bf16 %v212_v6, %v214_v10  ;;  %v3384_v16 = vpack.i.bf16 %v213_v9, %v215_v5  ;;  %v3394_v19 = vpack.i.bf16 %v211_v12, %v210_v11  ;;  %v208_v21 = vunpack.c.l.bf16 %v201_v8 }
  0x16   : > { %3380 = vrot.lane.b32.xlu0 %v3379_v14, %s3659_s21  ;;  %v3399_v22 = vpack.i.bf16 %v207_v17, %v209_v18  ;;  %v3661_v1 = vmov 0.0  }
  0x17   : > { %3390 = vrot.lane.b32.xlu1 %v3389_v15, %s3659_s21  ;;  %v3404_v23 = vpack.i.bf16 %v206_v20, %v208_v21  ;;  %433 = vmatprep.mubr.f32.mxu0 %v3661_v1 }
  0x1a   : > { %3385 = vrot.lane.b32.xlu0 %v3384_v16, %s3659_s21 }
  0x1b   : > { %3395 = vrot.lane.b32.xlu1 %v3394_v19, %s3659_s21 }
  0x1e   : > { %3400 = vrot.lane.b32.xlu0 %v3399_v22, %s3659_s21 }
  0x1f   : > { %3405 = vrot.lane.b32.xlu1 %v3404_v23, %s3659_s21 }
  0x88   : > { %v3381_v24 = vpop.permute.xlu0 %3380 }
  0x89   : > { %v3383_v25 = vunpack.i.h.bf16 %v3381_v24  ;;  %v3382_v26 = vunpack.i.l.bf16 %v3381_v24  ;;  %v3391_v27 = vpop.permute.xlu1 %3390 }
  0x8a   : > { %v3712_v29 = vunpack.i.h.bf16 %v3391_v27  ;;  %v3392_v30 = vunpack.i.l.bf16 %v3391_v27 }
  0x8b   : > { %v3710_v28 = vsel %vm254_vm0, %v3382_v26, %v3383_v25  ;;  %v2938_v25 = vld [vmem:[%s4639_s1 + $0x38] sm:$0xff] }
  0x8c   : > { %v3386_v31 = vpop.permute.xlu0 %3385  ;;  %v283_v35 = vsel %vm279_vm1, %v3710_v28, 0.0  ;;  %v277_v42 = vsel %vm254_vm0, 0.0, %v3712_v29 }
  0x8d   : > { %v3388_v32 = vunpack.i.h.bf16 %v3386_v31  ;;  %v3714_v33 = vunpack.i.l.bf16 %v3386_v31  ;;  %v3396_v34 = vpop.permute.xlu1 %3395 }
  0x8e   : > { %v3398_v36 = vunpack.i.h.bf16 %v3396_v34  ;;  %v3397_v37 = vunpack.i.l.bf16 %v3396_v34  ;;  %v2940_v34 = vld [vmem:[%s4639_s1 + $0x48] sm:$0xff] }
  0x8f   : > { %v3720_v38 = vsel %vm254_vm0, %v3712_v29, %v3388_v32  ;;  %v3723_v39 = vsel %vm254_vm0, %v3388_v32, %v3392_v30  ;;  %v3727_v40 = vsel %vm254_vm0, %v3714_v33, %v3382_v26  ;;  %v278_v41 = vsel %vm254_vm0, 0.0, %v3714_v33  ;;  %v2939_v32 = vld [vmem:[%s4639_s1 + $0x40] sm:$0xff] }
  0x90   : > { %v3734_v43 = vsel %vm254_vm0, %v3397_v37, %v3398_v36  ;;  %v3401_v44 = vpop.permute.xlu0 %3400  ;;  %v3737_v45 = vpack.i.bf16 %v283_v35, %v3727_v40  ;;  %v3740_v46 = vpack.i.bf16 %v3720_v38, %v278_v41  ;;  %v282_v47 = vsel %vm279_vm1, %v3723_v39, 0.0 }
  0x91   : > { %v281_v48 = vsel %vm279_vm1, %v3734_v43, 0.0  ;;  %v3403_v49 = vunpack.i.h.bf16 %v3401_v44  ;;  %v3746_v50 = vunpack.i.l.bf16 %v3401_v44  ;;  %v3406_v51 = vpop.permute.xlu1 %3405  ;;  %v3419_v56 = vpack.i.bf16 %v277_v42, %v282_v47  ;;  %v284_v42 = vld [vmem:[%s4639_s1] sm:$0xff]  ;;  %v286_v47 = vld [vmem:[%s4639_s1 + $0x10] sm:$0xff] }
  0x92   : > { %v3748_v52 = vunpack.i.h.bf16 %v3406_v51  ;;  %v3407_v53 = vunpack.i.l.bf16 %v3406_v51  ;;  %3415 = vrot.lane.b32.xlu0 %v3737_v45, %s3660_s22  ;;  %3410 = vrot.lane.b32.xlu1 %v3740_v46, %s3660_s22 }
  0x93   : > { %v3754_v54 = vsel %vm254_vm0, %v3746_v50, %v3397_v37  ;;  %v276_v59 = vsel %vm254_vm0, 0.0, %v3746_v50 }
  0x94   : > { %v3757_v55 = vsel %vm254_vm0, %v3403_v49, %v3407_v53  ;;  %v3429_v57 = vpack.i.bf16 %v281_v48, %v3754_v54  ;;  %v3769_v60 = vsel %vm254_vm0, %v3748_v52, %v3403_v49  ;;  %v275_v61 = vsel %vm254_vm0, 0.0, %v3748_v52 }
  0x95   : > { %v280_v62 = vsel %vm279_vm1, %v3757_v55, 0.0  ;;  %v3424_v63 = vpack.i.bf16 %v3769_v60, %v276_v59 }
  0x96   : > { %3420 = vrot.lane.b32.xlu0 %v3419_v56, %s3660_s22  ;;  %3430 = vrot.lane.b32.xlu1 %v3429_v57, %s3660_s22  ;;  %v3434_v0 = vpack.i.bf16 %v275_v61, %v280_v62 }
  0x9a   : > { %3425 = vrot.lane.b32.xlu0 %v3424_v63, %s3660_s22  ;;  %3435 = vrot.lane.b32.xlu1 %v3434_v0, %s3660_s22 }
  0x9e   : > { %3445 = vrot.lane.b32.xlu0 %v3737_v45, %s3662_s25  ;;  %3440 = vrot.lane.b32.xlu1 %v3740_v46, %s3662_s25 }
  0xa2   : > { %3450 = vrot.lane.b32.xlu0 %v3419_v56, %s3662_s25  ;;  %3460 = vrot.lane.b32.xlu1 %v3429_v57, %s3662_s25 }
  0xa6   : > { %3455 = vrot.lane.b32.xlu0 %v3424_v63, %s3662_s25  ;;  %3465 = vrot.lane.b32.xlu1 %v3434_v0, %s3662_s25 }
  0xaa   : > { %3475 = vrot.lane.b32.xlu0 %v3737_v45, %s3663_s26  ;;  %3470 = vrot.lane.b32.xlu1 %v3740_v46, %s3663_s26 }
  0xae   : > { %3480 = vrot.lane.b32.xlu0 %v3419_v56, %s3663_s26  ;;  %3490 = vrot.lane.b32.xlu1 %v3429_v57, %s3663_s26 }
  0xb2   : > { %3485 = vrot.lane.b32.xlu0 %v3424_v63, %s3663_s26  ;;  %3495 = vrot.lane.b32.xlu1 %v3434_v0, %s3663_s26 }
  0xb6   : > { %3505 = vrot.lane.b32.xlu0 %v3737_v45, %s3664_s27  ;;  %3500 = vrot.lane.b32.xlu1 %v3740_v46, %s3664_s27 }
  0xba   : > { %3510 = vrot.lane.b32.xlu0 %v3419_v56, %s3664_s27  ;;  %3520 = vrot.lane.b32.xlu1 %v3429_v57, %s3664_s27 }
  0xbe   : > { %3515 = vrot.lane.b32.xlu0 %v3424_v63, %s3664_s27  ;;  %3525 = vrot.lane.b32.xlu1 %v3434_v0, %s3664_s27 }
  0xc2   : > { %3535 = vrot.lane.b32.xlu0 %v3737_v45, %s3665_s28  ;;  %3530 = vrot.lane.b32.xlu1 %v3740_v46, %s3665_s28 }
  0xc6   : > { %3540 = vrot.lane.b32.xlu0 %v3419_v56, %s3665_s28  ;;  %3550 = vrot.lane.b32.xlu1 %v3429_v57, %s3665_s28 }
  0xca   : > { %3545 = vrot.lane.b32.xlu0 %v3424_v63, %s3665_s28  ;;  %3555 = vrot.lane.b32.xlu1 %v3434_v0, %s3665_s28 }
  0xce   : > { %3565 = vrot.lane.b32.xlu0 %v3737_v45, %s3666_s29  ;;  %3560 = vrot.lane.b32.xlu1 %v3740_v46, %s3666_s29 }
  0xd2   : > { %3570 = vrot.lane.b32.xlu0 %v3419_v56, %s3666_s29  ;;  %3580 = vrot.lane.b32.xlu1 %v3429_v57, %s3666_s29 }
  0xd6   : > { %3575 = vrot.lane.b32.xlu0 %v3424_v63, %s3666_s29  ;;  %3585 = vrot.lane.b32.xlu1 %v3434_v0, %s3666_s29 }
  0xda   : > { %3595 = vrot.lane.b32.xlu0 %v3737_v45, %s3667_s30  ;;  %3590 = vrot.lane.b32.xlu1 %v3740_v46, %s3667_s30 }
  0xde   : > { %3600 = vrot.lane.b32.xlu0 %v3419_v56, %s3667_s30  ;;  %3610 = vrot.lane.b32.xlu1 %v3429_v57, %s3667_s30 }
  0xe2   : > { %3605 = vrot.lane.b32.xlu0 %v3424_v63, %s3667_s30  ;;  %3615 = vrot.lane.b32.xlu1 %v3434_v0, %s3667_s30 }
  0xe6   : > { %3625 = vrot.lane.b32.xlu0 %v3737_v45, %s3668_s5  ;;  %3620 = vrot.lane.b32.xlu1 %v3740_v46, %s3668_s5  ;;  %v285_v46 = vld [vmem:[%s4639_s1 + $0x8] sm:$0xff] }
  0xea   : > { %3630 = vrot.lane.b32.xlu0 %v3419_v56, %s3668_s5  ;;  %3640 = vrot.lane.b32.xlu1 %v3429_v57, %s3668_s5  ;;  %v288_v56 = vld [vmem:[%s4639_s1 + $0x20] sm:$0xff] }
  0xee   : > { %3635 = vrot.lane.b32.xlu0 %v3424_v63, %s3668_s5  ;;  %3645 = vrot.lane.b32.xlu1 %v3434_v0, %s3668_s5 }
 0x104   : > { %v3416_v2 = vpop.permute.xlu0 %3415  ;;  %v3411_v3 = vpop.permute.xlu1 %3410 }
 0x105   : > { %v3418_v4 = vunpack.i.h.bf16 %v3416_v2  ;;  %v3417_v5 = vunpack.i.l.bf16 %v3416_v2  ;;  %v3412_v6 = vunpack.i.l.bf16 %v3411_v3  ;;  %v3413_v9 = vunpack.i.h.bf16 %v3411_v3  ;;  %v289_v3 = vld [vmem:[%s4639_s1 + $0x28] sm:$0xff] }
 0x107   : > { %3197 = vmatprep.subr.mxu1 %v3418_v4  ;;  %v337_v7 = vsel %vm329_vm3, %v3417_v5, %v3418_v4  ;;  %v336_v8 = vsel %vm329_vm3, %v3412_v6, %v3417_v5 }
 0x108   : > { %v3421_v10 = vpop.permute.xlu0 %3420  ;;  %393 = vmatprep.subr.mxu0 %v337_v7  ;;  %3198 = vmatpush3.msra.mxu1 %v3418_v4  ;;  %v3431_v11 = vpop.permute.xlu1 %3430  ;;  %v2979_v7 = vld [vmem:[%s4639_s1 + $0x60] sm:$0xff] }
 0x109   : > { %v3423_v12 = vunpack.i.h.bf16 %v3421_v10  ;;  %v3422_v13 = vunpack.i.l.bf16 %v3421_v10  ;;  %v3433_v14 = vunpack.i.h.bf16 %v3431_v11  ;;  %v3432_v15 = vunpack.i.l.bf16 %v3431_v11  ;;  %394 = vmatpush1.msra.mxu0 %v336_v8 }
 0x10b   : > { %3199 = vmatprep.subr.mxu1 %v3422_v13  ;;  %v335_v16 = vsel %vm329_vm3, %v3413_v9, %v3422_v13  ;;  %v334_v17 = vsel %vm329_vm3, %v3423_v12, %v3413_v9  ;;  %v333_v20 = vsel %vm329_vm3, %v3432_v15, %v3433_v14 }
 0x10c   : > { %395 = vmatprep.subr.mxu0 %v335_v16  ;;  %3200 = vmatpush3.msra.mxu1 %v3422_v13  ;;  %v3426_v18 = vpop.permute.xlu0 %3425  ;;  %v3436_v19 = vpop.permute.xlu1 %3435 }
 0x10d   : > { %v3428_v21 = vunpack.i.h.bf16 %v3426_v18  ;;  %v3427_v22 = vunpack.i.l.bf16 %v3426_v18  ;;  %v3438_v23 = vunpack.i.h.bf16 %v3436_v19  ;;  %v3437_v24 = vunpack.i.l.bf16 %v3436_v19  ;;  %396 = vmatpush1.msra.mxu0 %v334_v17  ;;  %3201 = vmatprep.subr.mxu1 %v3433_v14  ;;  %v2981_v19 = vld [vmem:[%s4639_s1 + $0x70] sm:$0xff] }
 0x10e   : > { %397 = vmatprep.subr.mxu0 %v333_v20  ;;  %3202 = vmatpush3.msra.mxu1 %v3433_v14  ;;  %v2980_v14 = vld [vmem:[%s4639_s1 + $0x68] sm:$0xff] }
 0x10f   : > { %3203 = vmatprep.subr.mxu1 %v3437_v24  ;;  %v332_v26 = vsel %vm329_vm3, %v3427_v22, %v3432_v15  ;;  %v331_v27 = vsel %vm329_vm3, %v3428_v21, %v3437_v24  ;;  %v330_v31 = vsel %vm329_vm3, %v3438_v23, %v3428_v21 }
 0x110   : > { %398 = vmatpush1.msra.mxu0 %v332_v26  ;;  %3204 = vmatpush3.msra.mxu1 %v3437_v24  ;;  %v3822_v35 = vpop.permute.xlu0 %3445 }
 0x111   : > { %399 = vmatprep.subr.mxu0 %v331_v27  ;;  %3206 = vmatmul.mubr.msk.f32.vlgmr.msra.gmra.mxu1 %vm350_vm2, %v2938_v25  ;;  %v3851_v36 = vunpack.i.h.bf16 %v3822_v35  ;;  %v3447_v37 = vunpack.i.l.bf16 %v3822_v35  ;;  %v2982_v27 = vld [vmem:[%s4639_s1 + $0x78] sm:$0xff] }
 0x112   : > { %607 = vmatprep.subr.mxu1 %v3727_v40  ;;  %400 = vmatpush1.msra.mxu0 %v330_v31  ;;  %v3859_v40 = vpop.permute.xlu1 %3440 }
 0x113   : > { %2956 = vmatpush1.msk.msra.mxu1 %vm3804_vm4, %v3714_v33  ;;  %2943 = vmatmul.mubr.msk.f32.vlgmr.msra.gmra.mxu0 %vm350_vm2, %v3763_v58  ;;  %v2942_v33 = vld [vmem:[%s4639_s1 + $0x58] sm:$0xff]  ;;  %v818_v41 = vsel %vm810_vm5, %v3447_v37, %v3851_v36  ;;  %v3443_v53 = vunpack.i.h.bf16 %v3859_v40 }
 0x114   : > { %609 = vmatprep.subr.mxu1 %v3720_v38  ;;  %3214 = vmatprep.subr.msk.mxu0 %vm279_vm1, %v3710_v28  ;;  %v3854_v38 = vpop.permute.xlu0 %3450 }
 0x115   : > { %3208 = vmatprep.mubr.msk.f32.mxu1 %vm350_vm2, %v2939_v32  ;;  %2958 = vmatpush1.msk.msra.mxu1 %vm3804_vm4, %v3712_v29  ;;  %v2941_v29 = vld [vmem:[%s4639_s1 + $0x50] sm:$0xff]  ;;  %v3452_v49 = vunpack.i.l.bf16 %v3854_v38  ;;  %v3453_v51 = vunpack.i.h.bf16 %v3854_v38 }
 0x116   : > { %3215 = vmatpush3.msk.msra.mxu0 %vm279_vm1, %v3710_v28  ;;  %3209 = vmatmul.mubr.msk.f32.gmra.mxu1 %vm350_vm2, %v2940_v34  ;;  %v3461_v45 = vpop.permute.xlu1 %3460 }
 0x117   : > { %611 = vmatprep.subr.mxu1 %v3754_v54  ;;  %3216 = vmatprep.subr.msk.mxu0 %vm279_vm1, %v3723_v39  ;;  %v3463_v54 = vunpack.i.h.bf16 %v3461_v45  ;;  %v816_v61 = vsel %vm810_vm5, %v3443_v53, %v3452_v49  ;;  %v815_v63 = vsel %vm810_vm5, %v3453_v51, %v3443_v53 }
 0x118   : > { %439 = vmatprep.mubr.f32.mxu0 %v3661_v1  ;;  %2960 = vmatpush1.msk.msra.mxu1 %vm3804_vm4, %v3746_v50  ;;  %v3881_v44 = vpop.permute.xlu0 %3455 }
 0x119   : > { %3217 = vmatpush3.msk.msra.mxu0 %vm279_vm1, %v3723_v39  ;;  %613 = vmatprep.subr.mxu1 %v3769_v60  ;;  %v3457_v57 = vunpack.i.l.bf16 %v3881_v44  ;;  %v3458_v59 = vunpack.i.h.bf16 %v3881_v44 }
 0x11a   : > { %2944 = vmatmul.mubr.msk.f32.gmra.mxu0 %vm350_vm2, %v2938_v25  ;;  %3218 = vmatprep.subr.msk.mxu0 %vm279_vm1, %v3734_v43  ;;  %v3466_v48 = vpop.permute.xlu1 %3465 }
 0x11b   : > { %3211 = vmatprep.mubr.msk.f32.mxu1 %vm350_vm2, %v2941_v29  ;;  %2962 = vmatpush1.msk.msra.mxu1 %vm3804_vm4, %v3748_v52  ;;  %v3940_v60 = vunpack.i.l.bf16 %v3466_v48  ;;  %v3468_v62 = vunpack.i.h.bf16 %v3466_v48  ;;  %v2998_v48 = vld [vmem:[%s4639_s1 + $0x98] sm:$0xff] }
 0x11c   : > { %3219 = vmatpush3.msk.msra.mxu0 %vm279_vm1, %v3734_v43  ;;  %3212 = vmatmul.mubr.msk.f32.gmra.mxu1 %vm350_vm2, %v2942_v33 }
 0x11d   : > { %3350 = vmatprep.subr.msk.mxu1 %vm279_vm1, %v3710_v28  ;;  %3220 = vmatprep.subr.msk.mxu0 %vm279_vm1, %v3757_v55  ;;  %v812_v6 = vsel %vm810_vm5, %v3458_v59, %v3940_v60  ;;  %v811_v9 = vsel %vm810_vm5, %v3468_v62, %v3458_v59 }
 0x11e   : > { %445 = vmatprep.mubr.f32.mxu0 %v3661_v1  ;;  %3221 = vmatpush3.msk.msra.mxu0 %vm279_vm1, %v3757_v55  ;;  %v3928_v52 = vpop.permute.xlu1 %3470 }
 0x11f   : > { %2945 = vmatmul.mubr.msk.f32.gmra.mxu0 %vm350_vm2, %v2939_v32  ;;  %873 = vmatprep.subr.mxu0 %v818_v41  ;;  %v3472_v20 = vunpack.i.l.bf16 %v3928_v52  ;;  %v3473_v24 = vunpack.i.h.bf16 %v3928_v52 }
 0x120   : > { %647 = vmatprep.mubr.f32.mxu1 %v3661_v1  ;;  %451 = vmatprep.mubr.f32.mxu0 %v3661_v1 }
 0x121   : > { %2963 = vmatmul.mubr.msk.f32.vlgmr.msra.gmra.mxu1 %vm350_vm2, %v284_v42 }
 0x122   : > { %3354 = vmatpush3.msk.msra.mxu1 %vm279_vm1, %v3710_v28  ;;  %653 = vmatprep.mubr.f32.mxu1 %v3661_v1  ;;  %v3901_v28 = vpop.permute.xlu0 %3475  ;;  %v3953_v4 = vpop.permute.xlu1 %3490 }
 0x123   : > { %3351 = vmatprep.subr.msk.mxu1 %vm279_vm1, %v3723_v39  ;;  %2946 = vmatmul.mubr.msk.f32.gmra.mxu0 %vm350_vm2, %v2940_v34  ;;  %v3478_v8 = vunpack.i.h.bf16 %v3901_v28  ;;  %v3493_v12 = vunpack.i.h.bf16 %v3953_v4  ;;  %v3477_v18 = vunpack.i.l.bf16 %v3901_v28  ;;  %v3492_v25 = vunpack.i.l.bf16 %v3953_v4 }
 0x124   : > { %3355 = vmatpush3.msk.msra.mxu1 %vm279_vm1, %v3723_v39  ;;  %457 = vmatprep.mubr.f32.mxu0 %v3661_v1  ;;  %v287_v39 = vld [vmem:[%s4639_s1 + $0x18] sm:$0xff] }
 0x125   : > { %3352 = vmatprep.subr.msk.mxu1 %vm279_vm1, %v3734_v43  ;;  %2964 = vmatmul.mubr.msk.f32.gmra.mxu1 %vm350_vm2, %v285_v46  ;;  %v1102_v23 = vsel %vm1094_vm7, %v3477_v18, %v3478_v8  ;;  %v1101_v32 = vsel %vm1094_vm7, %v3472_v20, %v3477_v18 }
 0x126   : > { %3356 = vmatpush3.msk.msra.mxu1 %vm279_vm1, %v3734_v43  ;;  %659 = vmatprep.mubr.f32.mxu1 %v3661_v1  ;;  %v3442_v43 = vunpack.i.l.bf16 %v3859_v40  ;;  %v3924_v50 = vpop.permute.xlu0 %3480  ;;  %v3973_v13 = vpop.permute.xlu1 %3495 }
 0x127   : > { %3353 = vmatprep.subr.msk.mxu1 %vm279_vm1, %v3757_v55  ;;  %2947 = vmatmul.mubr.msk.f32.gmra.mxu0 %vm350_vm2, %v2941_v29  ;;  %v3482_v10 = vunpack.i.l.bf16 %v3924_v50  ;;  %v3497_v17 = vunpack.i.l.bf16 %v3973_v13  ;;  %v3483_v22 = vunpack.i.h.bf16 %v3924_v50  ;;  %v3498_v29 = vunpack.i.h.bf16 %v3973_v13 }
 0x128   : > { %3357 = vmatpush3.msk.msra.mxu1 %vm279_vm1, %v3757_v55  ;;  %463 = vmatprep.mubr.f32.mxu0 %v3661_v1  ;;  %v3462_v55 = vunpack.i.l.bf16 %v3461_v45  ;;  %v817_v58 = vsel %vm810_vm5, %v3442_v43, %v3447_v37  ;;  %v1098_v37 = vsel %vm1094_vm7, %v3492_v25, %v3493_v12 }
 0x129   : > { %3231 = vmatprep.subr.mxu1 %v3851_v36  ;;  %2965 = vmatmul.mubr.msk.f32.gmra.mxu1 %vm350_vm2, %v286_v47  ;;  %v1100_v35 = vsel %vm1094_vm7, %v3473_v24, %v3482_v10 }
 0x12a   : > { %665 = vmatprep.mubr.f32.mxu1 %v3661_v1  ;;  %v3946_v0 = vpop.permute.xlu0 %3485  ;;  %v814_v2 = vsel %vm810_vm5, %v3462_v55, %v3463_v54  ;;  %v813_v5 = vsel %vm810_vm5, %v3457_v57, %v3462_v55  ;;  %v4010_v31 = vpop.permute.xlu1 %3500 }
 0x12b   : > { %2948 = vmatmul.mubr.msk.f32.gmra.mxu0 %vm350_vm2, %v2942_v33  ;;  %v3487_v30 = vunpack.i.l.bf16 %v3946_v0  ;;  %v3488_v34 = vunpack.i.h.bf16 %v3946_v0  ;;  %v1099_v33 = vsel %vm1094_vm7, %v3483_v22, %v3473_v24  ;;  %v3502_v28 = vunpack.i.l.bf16 %v4010_v31  ;;  %v3017_v22 = vld [vmem:[%s4639_s1 + $0xd0] sm:$0xff] }
 0x12c   : > { %3222 = vmatprep.mubr.msk.f32.mxu0 %vm350_vm2, %v284_v42  ;;  %v2984_v42 = vld [vmem:[%s4639_s1 + $0x88] sm:$0xff]  ;;  %v3503_v50 = vunpack.i.h.bf16 %v4010_v31 }
 0x12d   : > { %2966 = vmatmul.mubr.msk.f32.gmra.mxu1 %vm350_vm2, %v287_v39  ;;  %v1097_v38 = vsel %vm1094_vm7, %v3487_v30, %v3492_v25  ;;  %v1096_v41 = vsel %vm1094_vm7, %v3488_v34, %v3497_v17  ;;  %v1095_v45 = vsel %vm1094_vm7, %v3498_v29, %v3488_v34 }
 0x12e   : > { %671 = vmatprep.mubr.f32.mxu1 %v3661_v1  ;;  %v3969_v11 = vpop.permute.xlu0 %3505  ;;  %v3521_v44 = vpop.permute.xlu1 %3520 }
 0x12f   : > { %3223 = vmatmul.mubr.msk.f32.vlgmr.msra.gmra.mxu0 %vm350_vm2, %v285_v46  ;;  %v3981_v15 = vunpack.i.h.bf16 %v3969_v11  ;;  %v3507_v16 = vunpack.i.l.bf16 %v3969_v11  ;;  %v2997_v46 = vld [vmem:[%s4639_s1 + $0x90] sm:$0xff]  ;;  %v3523_v51 = vunpack.i.h.bf16 %v3521_v44  ;;  %v3522_v52 = vunpack.i.l.bf16 %v3521_v44  ;;  %v3020_v44 = vld [vmem:[%s4639_s1 + $0xe8] sm:$0xff] }
 0x130   : > { %874 = vmatpush1.msra.mxu0 %v817_v58  ;;  %3225 = vmatprep.mubr.msk.f32.mxu0 %vm350_vm2, %v286_v47  ;;  %v2999_v58 = vld [vmem:[%s4639_s1 + $0xa0] sm:$0xff] }
 0x131   : > { %875 = vmatprep.subr.mxu0 %v816_v61  ;;  %2967 = vmatmul.mubr.msk.f32.gmra.mxu1 %vm350_vm2, %v288_v56  ;;  %v1386_v21 = vsel %vm1378_vm6, %v3507_v16, %v3981_v15  ;;  %v1385_v53 = vsel %vm1378_vm6, %v3502_v28, %v3507_v16  ;;  %v1382_v0 = vsel %vm1378_vm6, %v3522_v52, %v3523_v51  ;;  %v3016_v16 = vld [vmem:[%s4639_s1 + $0xc8] sm:$0xff] }
 0x132   : > { %876 = vmatpush1.msra.mxu0 %v815_v63  ;;  %677 = vmatprep.mubr.f32.mxu1 %v3661_v1  ;;  %v4003_v26 = vpop.permute.xlu0 %3510  ;;  %v3526_v43 = vpop.permute.xlu1 %3525 }
 0x133   : > { %877 = vmatprep.subr.mxu0 %v814_v2  ;;  %3226 = vmatmul.mubr.msk.f32.gmra.mxu0 %vm350_vm2, %v287_v39  ;;  %v3512_v39 = vunpack.i.l.bf16 %v4003_v26  ;;  %v3000_v2 = vld [vmem:[%s4639_s1 + $0xa8] sm:$0xff] }
 0x134   : > { %878 = vmatpush1.msra.mxu0 %v813_v5  ;;  %913 = vmatprep.mubr.f32.mxu0 %v3661_v1  ;;  %v3001_v5 = vld [vmem:[%s4639_s1 + $0xb0] sm:$0xff] }
 0x135   : > { %879 = vmatprep.subr.mxu0 %v812_v6  ;;  %2968 = vmatmul.mubr.msk.f32.gmra.mxu1 %vm350_vm2, %v289_v3  ;;  %v1384_v57 = vsel %vm1378_vm6, %v3503_v50, %v3512_v39 }
 0x136   : > { %880 = vmatpush1.msra.mxu0 %v811_v9  ;;  %3228 = vmatprep.mubr.msk.f32.mxu1 %vm350_vm2, %v288_v56  ;;  %v4028_v40 = vpop.permute.xlu0 %3515  ;;  %v4074_v63 = vpop.permute.xlu1 %3530 }
 0x137   : > { %3248 = vmatprep.subr.mxu0 %v3478_v8  ;;  %2985 = vmatmul.mubr.msk.f32.vlgmr.msra.gmra.mxu0 %vm350_vm2, %v2979_v7  ;;  %v3517_v59 = vunpack.i.l.bf16 %v4028_v40  ;;  %v3518_v62 = vunpack.i.h.bf16 %v4028_v40  ;;  %v3533_v25 = vunpack.i.h.bf16 %v4074_v63  ;;  %v3019_v40 = vld [vmem:[%s4639_s1 + $0xe0] sm:$0xff] }
 0x138   : > { %3249 = vmatpush3.msra.mxu0 %v3478_v8  ;;  %919 = vmatprep.mubr.f32.mxu0 %v3661_v1  ;;  %v3002_v8 = vld [vmem:[%s4639_s1 + $0xb8] sm:$0xff] }
 0x139   : > { %3250 = vmatprep.subr.mxu0 %v3482_v10  ;;  %3229 = vmatmul.mubr.msk.f32.vlgmr.msra.gmra.mxu1 %vm350_vm2, %v289_v3  ;;  %v3528_v3 = vunpack.i.h.bf16 %v3526_v43  ;;  %v1381_v6 = vsel %vm1378_vm6, %v3517_v59, %v3522_v52 }
 0x13a   : > { %3232 = vmatpush3.msra.mxu1 %v3851_v36  ;;  %3251 = vmatpush3.msra.mxu0 %v3482_v10  ;;  %v2983_v36 = vld [vmem:[%s4639_s1 + $0x80] sm:$0xff]  ;;  %v4046_v47 = vpop.permute.xlu0 %3535  ;;  %v4099_v11 = vpop.permute.xlu1 %3550 }
 0x13b   : > { %3233 = vmatprep.subr.mxu1 %v3452_v49  ;;  %3252 = vmatprep.subr.mxu0 %v3493_v12  ;;  %v3538_v55 = vunpack.i.h.bf16 %v4046_v47  ;;  %v3537_v56 = vunpack.i.l.bf16 %v4046_v47  ;;  %v1379_v10 = vsel %vm1378_vm6, %v3528_v3, %v3518_v62  ;;  %v2767_v47 = vld [vmem:[%s4640_s2] sm:$0xff] }
 0x13c   : > { %2986 = vmatmul.mubr.msk.f32.gmra.mxu0 %vm350_vm2, %v2980_v14  ;;  %3234 = vmatpush3.msra.mxu1 %v3452_v49  ;;  %v3513_v49 = vunpack.i.h.bf16 %v4003_v26  ;;  %v3552_v26 = vunpack.i.l.bf16 %v4099_v11 }
 0x13d   : > { %3253 = vmatpush3.msra.mxu0 %v3493_v12  ;;  %3235 = vmatprep.subr.mxu1 %v3463_v54  ;;  %v1670_v4 = vsel %vm1662_vm8, %v3537_v56, %v3538_v55  ;;  %v3015_v12 = vld [vmem:[%s4639_s1 + $0xc0] sm:$0xff] }
 0x13e   : > { %3254 = vmatprep.subr.mxu0 %v3497_v17  ;;  %3236 = vmatpush3.msra.mxu1 %v3463_v54  ;;  %v3527_v54 = vunpack.i.l.bf16 %v3526_v43  ;;  %v1383_v61 = vsel %vm1378_vm6, %v3513_v49, %v3503_v50  ;;  %v2770_v49 = vld [vmem:[%s4640_s2 + $0x18] sm:$0xff] }
 0x13f   : > { %3255 = vmatpush3.msra.mxu0 %v3497_v17  ;;  %925 = vmatprep.mubr.f32.mxu0 %v3661_v1  ;;  %v3553_v17 = vunpack.i.h.bf16 %v4099_v11  ;;  %v3037_v11 = vld [vmem:[%s4639_s1 + $0x110] sm:$0xff] }
 0x140   : > { %3237 = vmatprep.subr.mxu1 %v3940_v60  ;;  %1441 = vmatprep.subr.mxu0 %v1386_v21  ;;  %v3532_v21 = vunpack.i.l.bf16 %v4074_v63 }
 0x141   : > { %2987 = vmatmul.mubr.msk.f32.gmra.mxu0 %vm350_vm2, %v2981_v19  ;;  %3238 = vmatpush3.msra.mxu1 %v3940_v60  ;;  %v4070_v60 = vpop.permute.xlu0 %3540 }
 0x142   : > { %3239 = vmatprep.mubr.msk.f32.mxu1 %vm350_vm2, %v2979_v7  ;;  %1157 = vmatprep.subr.mxu1 %v1102_v23  ;;  %v1380_v7 = vsel %vm1378_vm6, %v3518_v62, %v3527_v54  ;;  %v3542_v13 = vunpack.i.l.bf16 %v4070_v60  ;;  %v3543_v23 = vunpack.i.h.bf16 %v4070_v60  ;;  %v1669_v31 = vsel %vm1662_vm8, %v3532_v21, %v3537_v56 }
 0x143   : > { %3240 = vmatmul.mubr.msk.f32.vlgmr.msra.gmra.mxu1 %vm350_vm2, %v2980_v14  ;;  %931 = vmatprep.mubr.f32.mxu0 %v3661_v1 }
 0x144   : > { %1158 = vmatpush1.msra.mxu1 %v1101_v32  ;;  %3242 = vmatprep.mubr.msk.f32.mxu1 %vm350_vm2, %v2981_v19  ;;  %v3018_v32 = vld [vmem:[%s4639_s1 + $0xd8] sm:$0xff]  ;;  %v1668_v29 = vsel %vm1662_vm8, %v3533_v25, %v3542_v13 }
 0x145   : > { %1159 = vmatprep.subr.mxu1 %v1100_v35  ;;  %2988 = vmatmul.mubr.msk.f32.gmra.mxu0 %vm350_vm2, %v2982_v27  ;;  %v4095_v9 = vpop.permute.xlu0 %3545 }
 0x146   : > { %1160 = vmatpush1.msra.mxu1 %v1099_v33  ;;  %937 = vmatprep.mubr.f32.mxu0 %v3661_v1  ;;  %v3548_v34 = vunpack.i.h.bf16 %v4095_v9 }
 0x147   : > { %3243 = vmatmul.mubr.msk.f32.gmra.mxu1 %vm350_vm2, %v2982_v27  ;;  %1161 = vmatprep.subr.mxu1 %v1098_v37  ;;  %v3547_v27 = vunpack.i.l.bf16 %v4095_v9  ;;  %v3669_v37 = vmov 0  }
 0x148   : > { %1162 = vmatpush1.msra.mxu1 %v1097_v38  ;;  %3245 = vmatprep.mubr.msk.f32.mxu1 %vm350_vm2, %v2983_v36  ;;  %v1666_v38 = vsel %vm1662_vm8, %v3552_v26, %v3553_v17 }
 0x149   : > { %1163 = vmatprep.subr.mxu1 %v1096_v41  ;;  %2989 = vmatmul.mubr.msk.f32.gmra.mxu0 %vm350_vm2, %v2983_v36  ;;  %v4110_v14 = vpop.permute.xlu0 %3565  ;;  %v1667_v36 = vsel %vm1662_vm8, %v3543_v23, %v3533_v25  ;;  %v1665_v41 = vsel %vm1662_vm8, %v3547_v27, %v3552_v26 }
 0x14a   : > { %1164 = vmatpush1.msra.mxu1 %v1095_v45  ;;  %943 = vmatprep.mubr.f32.mxu0 %v3661_v1  ;;  %v4120_v18 = vunpack.i.h.bf16 %v4110_v14  ;;  %v3567_v19 = vunpack.i.l.bf16 %v4110_v14  ;;  %v3038_v14 = vld [vmem:[%s4639_s1 + $0x118] sm:$0xff] }
 0x14b   : > { %3246 = vmatmul.mubr.msk.f32.gmra.mxu1 %vm350_vm2, %v2984_v42  ;;  %3265 = vmatprep.subr.mxu1 %v3981_v15 }
 0x14c   : > { %1197 = vmatprep.mubr.f32.mxu1 %v3661_v1  ;;  %v1954_v24 = vsel %vm1946_vm9, %v3567_v19, %v4120_v18  ;;  %3649 = vset.pattern.permute.xlu0 %v3669_v37 }
 0x14d   : > { %2990 = vmatmul.mubr.msk.f32.gmra.mxu0 %vm350_vm2, %v2984_v42  ;;  %v4141_v30 = vpop.permute.xlu0 %3570  ;;  %2775 = vperm.xlu0 %3649, %v2767_v47  }
 0x14e   : > { %3256 = vmatprep.mubr.msk.f32.mxu0 %vm350_vm2, %v2997_v46  ;;  %3650 = vset.pattern.permute.xlu1 %v3669_v37  ;;  %v3573_v50 = vunpack.i.h.bf16 %v4141_v30 }
 0x14f   : > { %3003 = vmatmul.mubr.msk.f32.vlgmr.msra.gmra.mxu1 %vm350_vm2, %v2997_v46 }
 0x150   : > { %3266 = vmatpush3.msra.mxu1 %v3981_v15  ;;  %1203 = vmatprep.mubr.f32.mxu1 %v3661_v1  ;;  %v3556_v15 = vpop.permute.xlu1 %3555 }
 0x151   : > { %3267 = vmatprep.subr.mxu1 %v3512_v39  ;;  %3257 = vmatmul.mubr.msk.f32.vlgmr.msra.gmra.mxu0 %vm350_vm2, %v2998_v48  ;;  %v3557_v20 = vunpack.i.l.bf16 %v3556_v15  ;;  %v3558_v33 = vunpack.i.h.bf16 %v3556_v15  ;;  %v4167_v45 = vpop.permute.xlu0 %3575  ;;  %v2769_v15 = vld [vmem:[%s4640_s2 + $0x10] sm:$0xff] }
 0x152   : > { %3268 = vmatpush3.msra.mxu1 %v3512_v39  ;;  %1442 = vmatpush1.msra.mxu0 %v1385_v53  ;;  %v3033_v39 = vld [vmem:[%s4639_s1 + $0xf0] sm:$0xff]  ;;  %v3034_v53 = vld [vmem:[%s4639_s1 + $0xf8] sm:$0xff]  ;;  %v3577_v62 = vunpack.i.l.bf16 %v4167_v45  ;;  %v3578_v3 = vunpack.i.h.bf16 %v4167_v45 }
 0x153   : > { %3269 = vmatprep.subr.mxu1 %v3523_v51  ;;  %3004 = vmatmul.mubr.msk.f32.gmra.mxu1 %vm350_vm2, %v2998_v48  ;;  %v1664_v42 = vsel %vm1662_vm8, %v3548_v34, %v3557_v20  ;;  %v1663_v46 = vsel %vm1662_vm8, %v3558_v33, %v3548_v34  ;;  %v2768_v48 = vld [vmem:[%s4640_s2 + $0x8] sm:$0xff] }
 0x154   : > { %1443 = vmatprep.subr.mxu0 %v1384_v57  ;;  %3270 = vmatpush3.msra.mxu1 %v3523_v51  ;;  %v3561_v35 = vpop.permute.xlu1 %3560  ;;  %v3572_v51 = vunpack.i.l.bf16 %v4141_v30 }
 0x155   : > { %1444 = vmatpush1.msra.mxu0 %v1383_v61  ;;  %3271 = vmatprep.subr.mxu1 %v3527_v54  ;;  %v3562_v43 = vunpack.i.l.bf16 %v3561_v35  ;;  %v4191_v52 = vpop.permute.xlu0 %3595  ;;  %v3035_v61 = vld [vmem:[%s4639_s1 + $0x100] sm:$0xff] }
 0x156   : > { %3259 = vmatprep.mubr.msk.f32.mxu0 %vm350_vm2, %v2999_v58  ;;  %1445 = vmatprep.subr.mxu0 %v1382_v0  ;;  %v3598_v0 = vunpack.i.h.bf16 %v4191_v52 }
 0x157   : > { %3272 = vmatpush3.msra.mxu1 %v3527_v54  ;;  %1209 = vmatprep.mubr.f32.mxu1 %v3661_v1 }
 0x158   : > { %3260 = vmatmul.mubr.msk.f32.gmra.mxu0 %vm350_vm2, %v3000_v2  ;;  %1725 = vmatprep.subr.mxu1 %v1670_v4  ;;  %v3581_v28 = vpop.permute.xlu1 %3580 }
 0x159   : > { %1446 = vmatpush1.msra.mxu0 %v1381_v6  ;;  %3005 = vmatmul.mubr.msk.f32.gmra.mxu1 %vm350_vm2, %v2999_v58  ;;  %v3583_v56 = vunpack.i.h.bf16 %v3581_v28  ;;  %v3582_v57 = vunpack.i.l.bf16 %v3581_v28  ;;  %v1953_v58 = vsel %vm1946_vm9, %v3562_v43, %v3567_v19  ;;  %v4214_v4 = vpop.permute.xlu0 %3600  ;;  %v3051_v19 = vld [vmem:[%s4639_s1 + $0x120] sm:$0xff] }
 0x15a   : > { %1447 = vmatprep.subr.mxu0 %v1380_v7  ;;  %3262 = vmatprep.mubr.msk.f32.mxu0 %vm350_vm2, %v3001_v5  ;;  %v3602_v21 = vunpack.i.l.bf16 %v4214_v4  ;;  %v3603_v34 = vunpack.i.h.bf16 %v4214_v4  ;;  %v3055_v28 = vld [vmem:[%s4639_s1 + $0x140] sm:$0xff] }
 0x15b   : > { %1448 = vmatpush1.msra.mxu0 %v1379_v10  ;;  %1215 = vmatprep.mubr.f32.mxu1 %v3661_v1  ;;  %v1949_v9 = vsel %vm1946_vm9, %v3577_v62, %v3582_v57 }
 0x15c   : > { %3282 = vmatprep.subr.mxu0 %v3538_v55  ;;  %3263 = vmatmul.mubr.msk.f32.gmra.mxu0 %vm350_vm2, %v3002_v8  ;;  %v3586_v54 = vpop.permute.xlu1 %3585 }
 0x15d   : > { %3006 = vmatmul.mubr.msk.f32.gmra.mxu1 %vm350_vm2, %v3000_v2  ;;  %1481 = vmatprep.mubr.f32.mxu0 %v3661_v1  ;;  %v3587_v63 = vunpack.i.l.bf16 %v3586_v54  ;;  %v3597_v2 = vunpack.i.l.bf16 %v4191_v52  ;;  %v3588_v6 = vunpack.i.h.bf16 %v3586_v54  ;;  %v3070_v54 = vld [vmem:[%s4639_s1 + $0x158] sm:$0xff] }
 0x15e   : > { %1221 = vmatprep.mubr.f32.mxu1 %v3661_v1  ;;  %2780 = vperm.xlu1 %3650, %v2768_v48  }
 0x15f   : > { %2790 = vperm.xlu0 %3649, %v2770_v49   ;;  %v2238_v10 = vsel %vm2230_vm10, %v3597_v2, %v3598_v0 }
 0x160   : > { %3021 = vmatmul.mubr.msk.f32.vlgmr.msra.gmra.mxu0 %vm350_vm2, %v3015_v12  ;;  %v4219_v7 = vpop.permute.xlu1 %3590 }
 0x161   : > { %3283 = vmatpush3.msra.mxu0 %v3538_v55  ;;  %3007 = vmatmul.mubr.msk.f32.gmra.mxu1 %vm350_vm2, %v3001_v5  ;;  %v3563_v55 = vunpack.i.h.bf16 %v3561_v35  ;;  %v3036_v5 = vld [vmem:[%s4639_s1 + $0x108] sm:$0xff] }
 0x162   : > { %3284 = vmatprep.subr.mxu0 %v3542_v13  ;;  %1487 = vmatprep.mubr.f32.mxu0 %v3661_v1 }
 0x163   : > { %3285 = vmatpush3.msra.mxu0 %v3542_v13  ;;  %1227 = vmatprep.mubr.f32.mxu1 %v3661_v1  ;;  %v1952_v59 = vsel %vm1946_vm9, %v3563_v55, %v3572_v51  ;;  %v1951_v60 = vsel %vm1946_vm9, %v3573_v50, %v3563_v55  ;;  %v1947_v13 = vsel %vm1946_vm9, %v3588_v6, %v3578_v3 }
 0x164   : > { %3286 = vmatprep.subr.mxu0 %v3553_v17  ;;  %3022 = vmatmul.mubr.msk.f32.gmra.mxu0 %vm350_vm2, %v3016_v16 }
 0x165   : > { %3287 = vmatpush3.msra.mxu0 %v3553_v17  ;;  %3008 = vmatmul.mubr.msk.f32.gmra.mxu1 %vm350_vm2, %v3002_v8  ;;  %v1950_v8 = vsel %vm1946_vm9, %v3582_v57, %v3583_v56  ;;  %v4244_v17 = vpop.permute.xlu1 %3610 }
 0x166   : > { %3288 = vmatprep.subr.mxu0 %v3557_v20  ;;  %1493 = vmatprep.mubr.f32.mxu0 %v3661_v1  ;;  %v3613_v25 = vunpack.i.h.bf16 %v4244_v17  ;;  %v3612_v33 = vunpack.i.l.bf16 %v4244_v17  ;;  %v3091_v17 = vld [vmem:[%s4639_s1 + $0x1a0] sm:$0xff] }
 0x167   : > { %3289 = vmatpush3.msra.mxu0 %v3557_v20  ;;  %3273 = vmatprep.mubr.msk.f32.mxu1 %vm350_vm2, %v3015_v12  ;;  %v1948_v12 = vsel %vm1946_vm9, %v3578_v3, %v3587_v63  ;;  %v2771_v20 = vld [vmem:[%s4640_s2 + $0x20] sm:$0xff] }
 0x168   : > { %2009 = vmatprep.subr.mxu0 %v1954_v24  ;;  %3023 = vmatmul.mubr.msk.f32.gmra.mxu0 %vm350_vm2, %v3017_v22  ;;  %v3052_v24 = vld [vmem:[%s4639_s1 + $0x128] sm:$0xff] }
 0x169   : > { %3274 = vmatmul.mubr.msk.f32.vlgmr.msra.gmra.mxu1 %vm350_vm2, %v3016_v16  ;;  %1499 = vmatprep.mubr.f32.mxu0 %v3661_v1  ;;  %v4241_v16 = vpop.permute.xlu0 %3605  ;;  %v3616_v23 = vpop.permute.xlu1 %3615 }
 0x16a   : > { %1726 = vmatpush1.msra.mxu1 %v1669_v31  ;;  %3276 = vmatprep.mubr.msk.f32.mxu1 %vm350_vm2, %v3017_v22  ;;  %v3617_v30 = vunpack.i.l.bf16 %v3616_v23  ;;  %v3592_v31 = vunpack.i.l.bf16 %v4219_v7 }
 0x16b   : > { %1727 = vmatprep.subr.mxu1 %v1668_v29  ;;  %2785 = vperm.xlu1 %3650, %v2769_v15   ;;  %v3593_v29 = vunpack.i.h.bf16 %v4219_v7  ;;  %v3089_v15 = vld [vmem:[%s4639_s1 + $0x190] sm:$0xff] }
 0x16c   : > { %1728 = vmatpush1.msra.mxu1 %v1667_v36  ;;  %3024 = vmatmul.mubr.msk.f32.gmra.mxu0 %vm350_vm2, %v3018_v32  ;;  %v3607_v36 = vunpack.i.l.bf16 %v4241_v16  ;;  %v2237_v37 = vsel %vm2230_vm10, %v3592_v31, %v3597_v2 }
 0x16d   : > { %1729 = vmatprep.subr.mxu1 %v1666_v38  ;;  %3277 = vmatmul.mubr.msk.f32.gmra.mxu1 %vm350_vm2, %v3018_v32  ;;  %v4261_v22 = vpop.permute.xlu0 %3625  ;;  %v3053_v32 = vld [vmem:[%s4639_s1 + $0x130] sm:$0xff]  ;;  %v3054_v38 = vld [vmem:[%s4639_s1 + $0x138] sm:$0xff]  ;;  %v2235_v45 = vsel %vm2230_vm10, %v3603_v34, %v3593_v29 }
 0x16e   : > { %1730 = vmatpush1.msra.mxu1 %v1665_v41  ;;  %1505 = vmatprep.mubr.f32.mxu0 %v3661_v1  ;;  %v4271_v26 = vunpack.i.h.bf16 %v4261_v22  ;;  %v3627_v27 = vunpack.i.l.bf16 %v4261_v22  ;;  %v2236_v41 = vsel %vm2230_vm10, %v3593_v29, %v3602_v21  ;;  %v2233_v47 = vsel %vm2230_vm10, %v3607_v36, %v3612_v33 }
 0x16f   : > { %1731 = vmatprep.subr.mxu1 %v1664_v42  ;;  %3279 = vmatprep.mubr.msk.f32.mxu1 %vm350_vm2, %v3019_v40  ;;  %v3618_v42 = vunpack.i.h.bf16 %v3616_v23 }
 0x170   : > { %1732 = vmatpush1.msra.mxu1 %v1663_v46  ;;  %3025 = vmatmul.mubr.msk.f32.gmra.mxu0 %vm350_vm2, %v3019_v40  ;;  %v2522_v35 = vsel %vm2514_vm11, %v3627_v27, %v4271_v26  ;;  %v3608_v40 = vunpack.i.h.bf16 %v4241_v16  ;;  %v2234_v46 = vsel %vm2230_vm10, %v3612_v33, %v3613_v25  ;;  %v3090_v16 = vld [vmem:[%s4639_s1 + $0x198] sm:$0xff] }
 0x171   : > { %3299 = vmatprep.subr.mxu1 %v4120_v18  ;;  %3280 = vmatmul.mubr.msk.f32.gmra.mxu1 %vm350_vm2, %v3020_v44  ;;  %v3631_v49 = vpop.permute.xlu0 %3630 }
 0x172   : > { %1511 = vmatprep.mubr.f32.mxu0 %v3661_v1  ;;  %1765 = vmatprep.mubr.f32.mxu1 %v3661_v1  ;;  %v2232_v48 = vsel %vm2230_vm10, %v3608_v40, %v3617_v30  ;;  %v2231_v43 = vsel %vm2230_vm10, %v3618_v42, %v3608_v40  ;;  %v3633_v55 = vunpack.i.h.bf16 %v3631_v49 }
 0x173   : > { %2795 = vperm.xlu1 %3650, %v2771_v20  }
 0x174   : > { %3026 = vmatmul.mubr.msk.f32.gmra.mxu0 %vm350_vm2, %v3020_v44  ;;  %v3621_v44 = vpop.permute.xlu1 %3620 }
 0x175   : > { %3039 = vmatmul.mubr.msk.f32.vlgmr.msra.gmra.mxu1 %vm350_vm2, %v3033_v39  ;;  %3290 = vmatprep.mubr.msk.f32.mxu0 %vm350_vm2, %v3033_v39  ;;  %v3056_v39 = vld [vmem:[%s4639_s1 + $0x148] sm:$0xff]  ;;  %v3622_v52 = vunpack.i.l.bf16 %v3621_v44 }
 0x176   : > { %3300 = vmatpush3.msra.mxu1 %v4120_v18  ;;  %1771 = vmatprep.mubr.f32.mxu1 %v3661_v1  ;;  %v2772_v18 = vld [vmem:[%s4640_s2 + $0x28] sm:$0xff] }
 0x177   : > { %3301 = vmatprep.subr.mxu1 %v3572_v51  ;;  %2800 = vperm.xlu0 %3649, %v2772_v18   ;;  %v3092_v18 = vld [vmem:[%s4639_s1 + $0x1a8] sm:$0xff] }
 0x178   : > { %3302 = vmatpush3.msra.mxu1 %v3572_v51  ;;  %3291 = vmatmul.mubr.msk.f32.vlgmr.msra.gmra.mxu0 %vm350_vm2, %v3034_v53  ;;  %v3641_v50 = vpop.permute.xlu1 %3640  ;;  %v3069_v51 = vld [vmem:[%s4639_s1 + $0x150] sm:$0xff] }
 0x179   : > { %2010 = vmatpush1.msra.mxu0 %v1953_v58  ;;  %3303 = vmatprep.subr.mxu1 %v3583_v56  ;;  %v3643_v57 = vunpack.i.h.bf16 %v3641_v50  ;;  %v3636_v58 = vpop.permute.xlu0 %3635 }
 0x17a   : > { %3040 = vmatmul.mubr.msk.f32.gmra.mxu1 %vm350_vm2, %v3034_v53  ;;  %2011 = vmatprep.subr.mxu0 %v1952_v59  ;;  %v3632_v53 = vunpack.i.l.bf16 %v3631_v49  ;;  %v3638_v4 = vunpack.i.h.bf16 %v3636_v58 }
 0x17b   : > { %3304 = vmatpush3.msra.mxu1 %v3583_v56  ;;  %2012 = vmatpush1.msra.mxu0 %v1951_v60  ;;  %v3623_v56 = vunpack.i.h.bf16 %v3621_v44  ;;  %v3642_v60 = vunpack.i.l.bf16 %v3641_v50 }
 0x17c   : > { %3305 = vmatprep.subr.mxu1 %v3587_v63  ;;  %3293 = vmatprep.mubr.msk.f32.mxu0 %vm350_vm2, %v3035_v61  ;;  %v3646_v59 = vpop.permute.xlu1 %3645 }
 0x17d   : > { %2013 = vmatprep.subr.mxu0 %v1950_v8  ;;  %3306 = vmatpush3.msra.mxu1 %v3587_v63  ;;  %v2520_v62 = vsel %vm2514_vm11, %v3623_v56, %v3632_v53  ;;  %v3071_v63 = vld [vmem:[%s4639_s1 + $0x160] sm:$0xff]  ;;  %v3647_v2 = vunpack.i.l.bf16 %v3646_v59  ;;  %v2519_v3 = vsel %vm2514_vm11, %v3633_v55, %v3623_v56  ;;  %v3648_v6 = vunpack.i.h.bf16 %v3646_v59  ;;  %v3073_v8 = vld [vmem:[%s4639_s1 + $0x170] sm:$0xff] }
 0x17e   : > { %1777 = vmatprep.mubr.f32.mxu1 %v3661_v1  ;;  %3294 = vmatmul.mubr.msk.f32.gmra.mxu0 %vm350_vm2, %v3036_v5  ;;  %v2518_v7 = vsel %vm2514_vm11, %v3642_v60, %v3643_v57 }
 0x17f   : > { %2014 = vmatpush1.msra.mxu0 %v1949_v9  ;;  %2293 = vmatprep.subr.mxu1 %v2238_v10  ;;  %v2516_v10 = vsel %vm2514_vm11, %v3638_v4, %v3647_v2 }
 0x180   : > { %3041 = vmatmul.mubr.msk.f32.gmra.mxu1 %vm350_vm2, %v3035_v61  ;;  %2015 = vmatprep.subr.mxu0 %v1948_v12  ;;  %v2521_v61 = vsel %vm2514_vm11, %v3622_v52, %v3627_v27  ;;  %v2515_v12 = vsel %vm2514_vm11, %v3648_v6, %v3638_v4 }
 0x181   : > { %2016 = vmatpush1.msra.mxu0 %v1947_v13  ;;  %3296 = vmatprep.mubr.msk.f32.mxu0 %vm350_vm2, %v3037_v11  ;;  %v3087_v13 = vld [vmem:[%s4639_s1 + $0x180] sm:$0xff] }
 0x182   : > { %3316 = vmatprep.subr.mxu0 %v3598_v0  ;;  %1783 = vmatprep.mubr.f32.mxu1 %v3661_v1 }
 0x183   : > { %3297 = vmatmul.mubr.msk.f32.gmra.mxu0 %vm350_vm2, %v3038_v14 }
 0x184   : > { %3042 = vmatmul.mubr.msk.f32.gmra.mxu1 %vm350_vm2, %v3036_v5  ;;  %2049 = vmatprep.mubr.f32.mxu0 %v3661_v1  ;;  %v3072_v5 = vld [vmem:[%s4639_s1 + $0x168] sm:$0xff] }
 0x185   : > { %1789 = vmatprep.mubr.f32.mxu1 %v3661_v1 }
 0x187   : > { %3057 = vmatmul.mubr.msk.f32.vlgmr.msra.gmra.mxu0 %vm350_vm2, %v3051_v19 }
 0x188   : > { %3317 = vmatpush3.msra.mxu0 %v3598_v0  ;;  %3043 = vmatmul.mubr.msk.f32.gmra.mxu1 %vm350_vm2, %v3037_v11  ;;  %v3637_v0 = vunpack.i.l.bf16 %v3636_v58  ;;  %v3074_v11 = vld [vmem:[%s4639_s1 + $0x178] sm:$0xff] }
 0x189   : > { %3318 = vmatprep.subr.mxu0 %v3602_v21  ;;  %2055 = vmatprep.mubr.f32.mxu0 %v3661_v1 }
 0x18a   : > { %3319 = vmatpush3.msra.mxu0 %v3602_v21  ;;  %1795 = vmatprep.mubr.f32.mxu1 %v3661_v1  ;;  %v2517_v9 = vsel %vm2514_vm11, %v3637_v0, %v3642_v60 }
 0x18b   : > { %3320 = vmatprep.subr.mxu0 %v3613_v25  ;;  %3058 = vmatmul.mubr.msk.f32.gmra.mxu0 %vm350_vm2, %v3052_v24 }
 0x18c   : > { %3321 = vmatpush3.msra.mxu0 %v3613_v25  ;;  %3044 = vmatmul.mubr.msk.f32.gmra.mxu1 %vm350_vm2, %v3038_v14  ;;  %v3088_v14 = vld [vmem:[%s4639_s1 + $0x188] sm:$0xff] }
 0x18d   : > { %3322 = vmatprep.subr.mxu0 %v3617_v30  ;;  %2061 = vmatprep.mubr.f32.mxu0 %v3661_v1 }
 0x18e   : > { %3323 = vmatpush3.msra.mxu0 %v3617_v30  ;;  %3307 = vmatprep.mubr.msk.f32.mxu1 %vm350_vm2, %v3051_v19 }
 0x18f   : > { %2577 = vmatprep.subr.mxu0 %v2522_v35  ;;  %3059 = vmatmul.mubr.msk.f32.gmra.mxu0 %vm350_vm2, %v3053_v32 }
 0x190   : > { %3308 = vmatmul.mubr.msk.f32.vlgmr.msra.gmra.mxu1 %vm350_vm2, %v3052_v24  ;;  %2067 = vmatprep.mubr.f32.mxu0 %v3661_v1 }
 0x191   : > { %2294 = vmatpush1.msra.mxu1 %v2237_v37  ;;  %3310 = vmatprep.mubr.msk.f32.mxu1 %vm350_vm2, %v3053_v32 }
 0x192   : > { %2295 = vmatprep.subr.mxu1 %v2236_v41 }
 0x193   : > { %2296 = vmatpush1.msra.mxu1 %v2235_v45  ;;  %3060 = vmatmul.mubr.msk.f32.gmra.mxu0 %vm350_vm2, %v3054_v38 }
 0x194   : > { %2297 = vmatprep.subr.mxu1 %v2234_v46  ;;  %3311 = vmatmul.mubr.msk.f32.gmra.mxu1 %vm350_vm2, %v3054_v38 }
 0x195   : > { %2298 = vmatpush1.msra.mxu1 %v2233_v47  ;;  %2073 = vmatprep.mubr.f32.mxu0 %v3661_v1 }
 0x196   : > { %2299 = vmatprep.subr.mxu1 %v2232_v48  ;;  %3313 = vmatprep.mubr.msk.f32.mxu1 %vm350_vm2, %v3055_v28 }
 0x197   : > { %2300 = vmatpush1.msra.mxu1 %v2231_v43  ;;  %3061 = vmatmul.mubr.msk.f32.gmra.mxu0 %vm350_vm2, %v3055_v28 }
 0x198   : > { %3333 = vmatprep.subr.mxu1 %v4271_v26  ;;  %3314 = vmatmul.mubr.msk.f32.gmra.mxu1 %vm350_vm2, %v3056_v39 }
 0x199   : > { %2079 = vmatprep.mubr.f32.mxu0 %v3661_v1  ;;  %2333 = vmatprep.mubr.f32.mxu1 %v3661_v1 }
 0x19b   : > { %3062 = vmatmul.mubr.msk.f32.gmra.mxu0 %vm350_vm2, %v3056_v39 }
 0x19c   : > { %3075 = vmatmul.mubr.msk.f32.vlgmr.msra.gmra.mxu1 %vm350_vm2, %v3069_v51  ;;  %3324 = vmatprep.mubr.msk.f32.mxu0 %vm350_vm2, %v3069_v51 }
 0x19d   : > { %3334 = vmatpush3.msra.mxu1 %v4271_v26  ;;  %2339 = vmatprep.mubr.f32.mxu1 %v3661_v1 }
 0x19e   : > { %3335 = vmatprep.subr.mxu1 %v3632_v53 }
 0x19f   : > { %3336 = vmatpush3.msra.mxu1 %v3632_v53  ;;  %3325 = vmatmul.mubr.msk.f32.vlgmr.msra.gmra.mxu0 %vm350_vm2, %v3070_v54 }
 0x1a0   : > { %2578 = vmatpush1.msra.mxu0 %v2521_v61  ;;  %3337 = vmatprep.subr.mxu1 %v3643_v57 }
 0x1a1   : > { %3076 = vmatmul.mubr.msk.f32.gmra.mxu1 %vm350_vm2, %v3070_v54  ;;  %2579 = vmatprep.subr.mxu0 %v2520_v62 }
 0x1a2   : > { %3338 = vmatpush3.msra.mxu1 %v3643_v57  ;;  %2580 = vmatpush1.msra.mxu0 %v2519_v3 }
 0x1a3   : > { %3339 = vmatprep.subr.mxu1 %v3647_v2  ;;  %3327 = vmatprep.mubr.msk.f32.mxu0 %vm350_vm2, %v3071_v63 }
 0x1a4   : > { %2581 = vmatprep.subr.mxu0 %v2518_v7  ;;  %3340 = vmatpush3.msra.mxu1 %v3647_v2 }
 0x1a5   : > { %2345 = vmatprep.mubr.f32.mxu1 %v3661_v1  ;;  %3328 = vmatmul.mubr.msk.f32.gmra.mxu0 %vm350_vm2, %v3072_v5 }
 0x1a6   : > { %2582 = vmatpush1.msra.mxu0 %v2517_v9  ;;  %3077 = vmatmul.mubr.msk.f32.gmra.mxu1 %vm350_vm2, %v3071_v63 }
 0x1a7   : > { %2583 = vmatprep.subr.mxu0 %v2516_v10  ;;  %3330 = vmatprep.mubr.msk.f32.mxu0 %vm350_vm2, %v3073_v8 }
 0x1a8   : > { %2584 = vmatpush1.msra.mxu0 %v2515_v12  ;;  %2351 = vmatprep.mubr.f32.mxu1 %v3661_v1 }
 0x1a9   : > { %3331 = vmatmul.mubr.msk.f32.gmra.mxu0 %vm350_vm2, %v3074_v11 }
 0x1aa   : > { %3078 = vmatmul.mubr.msk.f32.gmra.mxu1 %vm350_vm2, %v3072_v5  ;;  %2617 = vmatprep.mubr.f32.mxu0 %v3661_v1 }
 0x1ab   : > { %2357 = vmatprep.mubr.f32.mxu1 %v3661_v1 }
 0x1ad   : > { %3093 = vmatmul.mubr.msk.f32.vlgmr.msra.gmra.mxu0 %vm350_vm2, %v3087_v13 }
 0x1ae   : > { %3079 = vmatmul.mubr.msk.f32.gmra.mxu1 %vm350_vm2, %v3073_v8  ;;  %2623 = vmatprep.mubr.f32.mxu0 %v3661_v1 }
 0x1af   : > { %2363 = vmatprep.mubr.f32.mxu1 %v3661_v1 }
 0x1b1   : > { %3094 = vmatmul.mubr.msk.f32.gmra.mxu0 %vm350_vm2, %v3088_v14 }
 0x1b2   : > { %3080 = vmatmul.mubr.msk.f32.gmra.mxu1 %vm350_vm2, %v3074_v11  ;;  %2629 = vmatprep.mubr.f32.mxu0 %v3661_v1 }
 0x1b3   : > { %3341 = vmatprep.mubr.msk.f32.mxu1 %vm350_vm2, %v3087_v13 }
 0x1b5   : > { %3095 = vmatmul.mubr.msk.f32.gmra.mxu0 %vm350_vm2, %v3089_v15 }
 0x1b6   : > { %3342 = vmatmul.mubr.msk.f32.vlgmr.msra.gmra.mxu1 %vm350_vm2, %v3088_v14  ;;  %2635 = vmatprep.mubr.f32.mxu0 %v3661_v1 }
 0x1b7   : > { %3344 = vmatprep.mubr.msk.f32.mxu1 %vm350_vm2, %v3089_v15 }
 0x1b9   : > { %3096 = vmatmul.mubr.msk.f32.gmra.mxu0 %vm350_vm2, %v3090_v16 }
 0x1ba   : > { %3345 = vmatmul.mubr.msk.f32.gmra.mxu1 %vm350_vm2, %v3090_v16  ;;  %2641 = vmatprep.mubr.f32.mxu0 %v3661_v1 }
 0x1bb   : > { %3347 = vmatprep.mubr.msk.f32.mxu1 %vm350_vm2, %v3091_v17 }
 0x1bd   : > { %3097 = vmatmul.mubr.msk.f32.gmra.mxu0 %vm350_vm2, %v3091_v17 }
 0x1be   : > { %3348 = vmatmul.mubr.msk.f32.gmra.mxu1 %vm350_vm2, %v3092_v18  ;;  %2647 = vmatprep.mubr.f32.mxu0 %v3661_v1 }
 0x1c1   : > { %3098 = vmatmul.mubr.msk.f32.gmra.mxu0 %vm350_vm2, %v3092_v18 }
 0x1d1   : > { %v3207_v19 = vpop.f32.mrf.mxu1 }
 0x1d3   : > { %v435_v20 = vpop.f32.mrf.mxu0  ;;  %v536_v21 = vpop.f32.mrf.mxu1 }
 0x1d5   : > { %v437_v22 = vpop.f32.mrf.mxu0 }
 0x1d6   : > { %v3210_v23 = vpop.f32.mrf.mxu1 }
 0x1d8   : > { %v546_v24 = vpop.f32.mrf.mxu1 }
 0x1da   : > { %v441_v25 = vpop.f32.mrf.mxu0 }
 0x1dc   : > { %v443_v26 = vpop.f32.mrf.mxu0  ;;  %v3213_v27 = vpop.f32.mrf.mxu1 }
 0x1de   : > { %v556_v30 = vpop.f32.mrf.mxu1 }
 0x1df   : > { %v447_v31 = vpop.f32.mrf.mxu0 }
 0x1e1   : > { %v449_v32 = vpop.f32.mrf.mxu0  ;;  %v649_v34 = vpop.f32.mrf.mxu1 }
 0x1e2   : > { %v650_v35 = vadd.f32 %v649_v34, %v435_v20 }
 0x1e3   : > { %v453_v29 = vpop.f32.mrf.mxu0  ;;  %v651_v33 = vpop.f32.mrf.mxu1 }
 0x1e4   : > { %v652_v36 = vadd.f32 %v651_v33, %v437_v22 }
 0x1e5   : > { %v455_v1 = vpop.f32.mrf.mxu0  ;;  %v655_v37 = vpop.f32.mrf.mxu1 }
 0x1e6   : > { %v656_v38 = vadd.f32 %v655_v37, %v441_v25 }
 0x1e7   : > { %v459_v40 = vpop.f32.mrf.mxu0  ;;  %v657_v41 = vpop.f32.mrf.mxu1 }
 0x1e8   : > { %v658_v42 = vadd.f32 %v657_v41, %v443_v26 }
 0x1e9   : > { %v461_v44 = vpop.f32.mrf.mxu0  ;;  %v661_v45 = vpop.f32.mrf.mxu1 }
 0x1ea   : > { %v662_v46 = vadd.f32 %v661_v45, %v447_v31 }
 0x1eb   : > { %v465_v28 = vpop.f32.mrf.mxu0  ;;  %v663_v47 = vpop.f32.mrf.mxu1 }
 0x1ec   : > { %v664_v48 = vadd.f32 %v663_v47, %v449_v32 }
 0x1ed   : > { %v467_v39 = vpop.f32.mrf.mxu0  ;;  %v667_v43 = vpop.f32.mrf.mxu1 }
 0x1ee   : > { %v668_v49 = vadd.f32 %v667_v43, %v453_v29 }
 0x1ef   : > { %v669_v50 = vpop.f32.mrf.mxu1  ;;  %v3224_v51 = vpop.f32.mrf.mxu0 }
 0x1f0   : > { %v670_v52 = vadd.f32 %v669_v50, %v455_v1  ;;  %v756_v53 = vadd.f32 %v3224_v51, %v3207_v19 }
 0x1f1   : > { %v673_v54 = vpop.f32.mrf.mxu1  ;;  %v750_v55 = vpop.f32.mrf.mxu0 }
 0x1f2   : > { %v674_v56 = vadd.f32 %v673_v54, %v459_v40  ;;  %v751_v57 = vadd.f32 %v750_v55, %v536_v21 }
 0x1f3   : > { %v675_v58 = vpop.f32.mrf.mxu1  ;;  %v3227_v59 = vpop.f32.mrf.mxu0 }
 0x1f4   : > { %v676_v60 = vadd.f32 %v675_v58, %v461_v44  ;;  %v766_v61 = vadd.f32 %v3227_v59, %v3210_v23 }
 0x1f5   : > { %v679_v62 = vpop.f32.mrf.mxu1  ;;  %v760_v63 = vpop.f32.mrf.mxu0 }
 0x1f6   : > { %v680_v0 = vadd.f32 %v679_v62, %v465_v28  ;;  %v761_v2 = vadd.f32 %v760_v63, %v546_v24 }
 0x1f7   : > { %v681_v3 = vpop.f32.mrf.mxu1  ;;  %v915_v4 = vpop.f32.mrf.mxu0 }
 0x1f8   : > { %v682_v5 = vadd.f32 %v681_v3, %v467_v39  ;;  %v1045_v6 = vadd.f32 %v915_v4, %v650_v35 }
 0x1f9   : > { %v3230_v7 = vpop.f32.mrf.mxu1  ;;  %v917_v8 = vpop.f32.mrf.mxu0 }
 0x1fa   : > { %v776_v9 = vadd.f32 %v3230_v7, %v3213_v27  ;;  %v1046_v10 = vadd.f32 %v917_v8, %v652_v36 }
 0x1fb   : > { %v770_v11 = vpop.f32.mrf.mxu1 }
 0x1fc   : > { %v771_v12 = vadd.f32 %v770_v11, %v556_v30  ;;  %v921_v13 = vpop.f32.mrf.mxu0 }
 0x1fd   : > { %v1048_v14 = vadd.f32 %v921_v13, %v656_v38 }
 0x1fe   : > { %v923_v15 = vpop.f32.mrf.mxu0 }
 0x1ff   : > { %v1049_v16 = vadd.f32 %v923_v15, %v658_v42 }
 0x201   : > { %v927_v17 = vpop.f32.mrf.mxu0 }
 0x202   : > { %v1051_v18 = vadd.f32 %v927_v17, %v662_v46 }
 0x203   : > { %v3241_v19 = vpop.f32.mrf.mxu1  ;;  %v929_v20 = vpop.f32.mrf.mxu0 }
 0x204   : > { %v1050_v21 = vadd.f32 %v3241_v19, %v756_v53  ;;  %v1052_v22 = vadd.f32 %v929_v20, %v664_v48 }
 0x205   : > { %v1016_v23 = vpop.f32.mrf.mxu1  ;;  %v933_v24 = vpop.f32.mrf.mxu0 }
 0x206   : > { %v1047_v25 = vadd.f32 %v1016_v23, %v751_v57  ;;  %v1054_v26 = vadd.f32 %v933_v24, %v668_v49 }
 0x207   : > { %v3244_v31 = vpop.f32.mrf.mxu1  ;;  %v935_v32 = vpop.f32.mrf.mxu0 }
 0x208   : > { %v1056_v27 = vadd.f32 %v3244_v31, %v766_v61  ;;  %v1055_v34 = vadd.f32 %v935_v32, %v670_v52 }
 0x209   : > { %v1026_v35 = vpop.f32.mrf.mxu1  ;;  %v939_v30 = vpop.f32.mrf.mxu0 }
 0x20a   : > { %v1053_v29 = vadd.f32 %v1026_v35, %v761_v2  ;;  %v1057_v33 = vadd.f32 %v939_v30, %v674_v56 }
 0x20b   : > { %v3247_v36 = vpop.f32.mrf.mxu1  ;;  %v941_v1 = vpop.f32.mrf.mxu0 }
 0x20c   : > { %v1062_v37 = vadd.f32 %v3247_v36, %v776_v9  ;;  %v1058_v38 = vadd.f32 %v941_v1, %v676_v60 }
 0x20d   : > { %v1036_v40 = vpop.f32.mrf.mxu1  ;;  %v945_v41 = vpop.f32.mrf.mxu0 }
 0x20e   : > { %v1059_v42 = vadd.f32 %v1036_v40, %v771_v12  ;;  %v1060_v44 = vadd.f32 %v945_v41, %v680_v0 }
 0x20f   : > { %v1199_v45 = vpop.f32.mrf.mxu1  ;;  %v947_v46 = vpop.f32.mrf.mxu0 }
 0x210   : > { %v1329_v28 = vadd.f32 %v1199_v45, %v1045_v6  ;;  %v1061_v47 = vadd.f32 %v947_v46, %v682_v5 }
 0x211   : > { %v1201_v48 = vpop.f32.mrf.mxu1  ;;  %v3258_v39 = vpop.f32.mrf.mxu0 }
 0x212   : > { %v1330_v43 = vadd.f32 %v1201_v48, %v1046_v10  ;;  %v1334_v49 = vadd.f32 %v3258_v39, %v1050_v21 }
 0x213   : > { %v1205_v50 = vpop.f32.mrf.mxu1  ;;  %v1300_v51 = vpop.f32.mrf.mxu0 }
 0x214   : > { %v1332_v52 = vadd.f32 %v1205_v50, %v1048_v14  ;;  %v1331_v53 = vadd.f32 %v1300_v51, %v1047_v25 }
 0x215   : > { %v1207_v54 = vpop.f32.mrf.mxu1 }
 0x216   : > { %v1333_v55 = vadd.f32 %v1207_v54, %v1049_v16 }
 0x218   : > { %v3261_v56 = vpop.f32.mrf.mxu0 }
 0x219   : > { %v1340_v57 = vadd.f32 %v3261_v56, %v1056_v27  ;;  %v1211_v58 = vpop.f32.mrf.mxu1 }
 0x21a   : > { %v1335_v59 = vadd.f32 %v1211_v58, %v1051_v18  ;;  %v1310_v60 = vpop.f32.mrf.mxu0 }
 0x21b   : > { %v1337_v61 = vadd.f32 %v1310_v60, %v1053_v29  ;;  %v1213_v62 = vpop.f32.mrf.mxu1 }
 0x21c   : > { %v1336_v63 = vadd.f32 %v1213_v62, %v1052_v22  ;;  %v3264_v0 = vpop.f32.mrf.mxu0 }
 0x21d   : > { %v1346_v2 = vadd.f32 %v3264_v0, %v1062_v37  ;;  %v1217_v3 = vpop.f32.mrf.mxu1 }
 0x21e   : > { %v1338_v4 = vadd.f32 %v1217_v3, %v1054_v26  ;;  %v1320_v5 = vpop.f32.mrf.mxu0 }
 0x21f   : > { %v1343_v6 = vadd.f32 %v1320_v5, %v1059_v42  ;;  %v1219_v7 = vpop.f32.mrf.mxu1 }
 0x220   : > { %v1339_v8 = vadd.f32 %v1219_v7, %v1055_v34  ;;  %v1483_v9 = vpop.f32.mrf.mxu0 }
 0x221   : > { %v4405_v10 = vadd.f32 %v1483_v9, %v1329_v28  ;;  %v1223_v11 = vpop.f32.mrf.mxu1 }
 0x222   : > { %v1341_v12 = vadd.f32 %v1223_v11, %v1057_v33  ;;  %v1485_v13 = vpop.f32.mrf.mxu0 }
 0x223   : > { %v4407_v14 = vadd.f32 %v1485_v13, %v1330_v43  ;;  %v1225_v15 = vpop.f32.mrf.mxu1 }
 0x224   : > { %v1342_v16 = vadd.f32 %v1225_v15, %v1058_v38  ;;  %v1489_v17 = vpop.f32.mrf.mxu0 }
 0x225   : > { %v4409_v18 = vadd.f32 %v1489_v17, %v1332_v52  ;;  %v1229_v19 = vpop.f32.mrf.mxu1 }
 0x226   : > { %v1344_v20 = vadd.f32 %v1229_v19, %v1060_v44  ;;  %v1491_v21 = vpop.f32.mrf.mxu0 }
 0x227   : > { %v4411_v22 = vadd.f32 %v1491_v21, %v1333_v55  ;;  %v1231_v23 = vpop.f32.mrf.mxu1 }
 0x228   : > { %v1345_v24 = vadd.f32 %v1231_v23, %v1061_v47  ;;  %v1495_v25 = vpop.f32.mrf.mxu0 }
 0x229   : > { %v4413_v26 = vadd.f32 %v1495_v25, %v1335_v59  ;;  %v3275_v31 = vpop.f32.mrf.mxu1 }
 0x22a   : > { %v4415_v32 = vadd.f32 %v3275_v31, %v1334_v49  ;;  %v1497_v27 = vpop.f32.mrf.mxu0 }
 0x22b   : > { %v4417_v34 = vadd.f32 %v1497_v27, %v1336_v63  ;;  %v1584_v35 = vpop.f32.mrf.mxu1 }
 0x22c   : > { %v4419_v30 = vadd.f32 %v1584_v35, %v1331_v53  ;;  %v1501_v29 = vpop.f32.mrf.mxu0 }
 0x22d   : > { %v4421_v33 = vadd.f32 %v1501_v29, %v1338_v4  ;;  %v3278_v36 = vpop.f32.mrf.mxu1 }
 0x22e   : > { %v4423_v1 = vadd.f32 %v3278_v36, %v1340_v57  ;;  %v1503_v37 = vpop.f32.mrf.mxu0  ;;  %v2823_v36 = vlaneseq }
 0x22f   : > { %v4425_v38 = vadd.f32 %v1503_v37, %v1339_v8  ;;  %v1594_v40 = vpop.f32.mrf.mxu1 }
 0x230   : > { %v4427_v41 = vadd.f32 %v1594_v40, %v1337_v61  ;;  %v1507_v42 = vpop.f32.mrf.mxu0 }
 0x231   : > { %v4429_v44 = vadd.f32 %v1507_v42, %v1341_v12  ;;  %v3281_v45 = vpop.f32.mrf.mxu1 }
 0x232   : > { %v4431_v46 = vadd.f32 %v3281_v45, %v1346_v2  ;;  %v1509_v28 = vpop.f32.mrf.mxu0 }
 0x233   : > { %v4433_v47 = vadd.f32 %v1509_v28, %v1342_v16  ;;  %v1604_v48 = vpop.f32.mrf.mxu1  ;;  %v2824_v28 = vshrl.u32 %v2823_v36, 7 }
 0x234   : > { %v4435_v39 = vadd.f32 %v1604_v48, %v1343_v6  ;;  %v1513_v43 = vpop.f32.mrf.mxu0 }
 0x235   : > { %v4437_v49 = vadd.f32 %v1513_v43, %v1344_v20  ;;  %v1767_v50 = vpop.f32.mrf.mxu1 }
 0x236   : > { %v1515_v51 = vpop.f32.mrf.mxu0 }
 0x237   : > { %v4439_v52 = vadd.f32 %v1515_v51, %v1345_v24  ;;  %v1769_v53 = vpop.f32.mrf.mxu1  ;;  %v2825_v51 = vsub.s32 0, %v2824_v28 }
 0x238   : > { %v3292_v54 = vpop.f32.mrf.mxu0 }
 0x23a   : > { %v1773_v55 = vpop.f32.mrf.mxu1  ;;  %v1868_v56 = vpop.f32.mrf.mxu0 }
 0x23c   : > { %v1775_v57 = vpop.f32.mrf.mxu1 }
 0x23e   : > { %v3295_v58 = vpop.f32.mrf.mxu0 }
 0x240   : > { %v1779_v59 = vpop.f32.mrf.mxu1  ;;  %v1878_v60 = vpop.f32.mrf.mxu0 }
 0x242   : > { %v4441_v61 = vpop.f32.mrf.mxu1 }
 0x243   : > { %v4443_v62 = vpop.f32.mrf.mxu0 }
 0x244   : > { %v4445_v63 = vpop.f32.mrf.mxu1 }
 0x245   : > { %v4447_v0 = vpop.f32.mrf.mxu0 }
 0x246   : > { %v4449_v2 = vpop.f32.mrf.mxu1 }
 0x247   : > { %v2051_v3 = vpop.f32.mrf.mxu0 }
 0x248   : > { %v4451_v4 = vpop.f32.mrf.mxu1 }
 0x249   : > { %v2053_v5 = vpop.f32.mrf.mxu0 }
 0x24a   : > { %v4453_v6 = vpop.f32.mrf.mxu1 }
 0x24b   : > { %v2057_v7 = vpop.f32.mrf.mxu0 }
 0x24c   : > { %v4455_v8 = vpop.f32.mrf.mxu1 }
 0x24d   : > { %v4457_v9 = vpop.f32.mrf.mxu0 }
 0x24e   : > { %v4459_v11 = vpop.f32.mrf.mxu1 }
 0x24f   : > { %v4461_v12 = vpop.f32.mrf.mxu0 }
 0x250   : > { %v4463_v13 = vpop.f32.mrf.mxu1 }
 0x251   : > { %v4465_v15 = vpop.f32.mrf.mxu0 }
 0x252   : > { %v4467_v16 = vpop.f32.mrf.mxu1 }
 0x253   : > { %v4469_v17 = vpop.f32.mrf.mxu0 }
 0x254   : > { %v4471_v19 = vpop.f32.mrf.mxu1 }
 0x255   : > { %4645 = vst [vmem:[#allocation2_spill] sm:$0xff] %v4471_v19  ;;  %v4473_v20 = vpop.f32.mrf.mxu0 }
 0x256   : > { %4646 = vst [vmem:[#allocation3_spill] sm:$0xff] %v4473_v20  ;;  %v4475_v21 = vpop.f32.mrf.mxu1 }
 0x257   : > { %4647 = vst [vmem:[#allocation4_spill] sm:$0xff] %v4475_v21  ;;  %v4477_v23 = vpop.f32.mrf.mxu0  ;;  %v1902_v21 = vadd.f32 %v3292_v54, %v4415_v32 }
 0x258   : > { %4648 = vst [vmem:[#allocation5_spill] sm:$0xff] %v4477_v23  ;;  %v4479_v24 = vpop.f32.mrf.mxu1 }
 0x259   : > { %4649 = vst [vmem:[#allocation6_spill] sm:$0xff] %v4479_v24  ;;  %v4481_v25 = vpop.f32.mrf.mxu0 }
 0x25a   : > { %4650 = vst [vmem:[#allocation7_spill] sm:$0xff] %v4481_v25  ;;  %v4483_v31 = vpop.f32.mrf.mxu1  ;;  %v2829_v25 = vsub.s32 1, %v2824_v28 }
 0x25b   : > { %4651 = vst [vmem:[#allocation8_spill] sm:$0xff] %v4483_v31  ;;  %v4485_v27 = vpop.f32.mrf.mxu0 }
 0x25c   : > { %4652 = vst [vmem:[#allocation9_spill] sm:$0xff] %v4485_v27  ;;  %v2335_v35 = vpop.f32.mrf.mxu1  ;;  %v2821_v27 = vld [vmem:[%s4641_s3] sm:$0x7] }
 0x25d   : > { %v4487_v29 = vpop.f32.mrf.mxu0  ;;  %v4507_v36 = vrot.slane %v2821_v27, %v2825_v51  ;;  %v1908_v51 = vadd.f32 %v3295_v58, %v4423_v1  ;;  %v1911_v1 = vadd.f32 %v4447_v0, %v4435_v39 }
 0x25e   : > { %4653 = vst [vmem:[#allocation10_spill] sm:$0xff] %v4487_v29  ;;  %v2337_v37 = vpop.f32.mrf.mxu1  ;;  %v2833_v29 = vsub.s32 2, %v2824_v28 }
 0x25f   : > { %v4489_v40 = vpop.f32.mrf.mxu0 }
 0x260   : > { %4654 = vst [vmem:[#allocation11_spill] sm:$0xff] %v4489_v40  ;;  %v1897_v40 = vadd.f32 %v1767_v50, %v4405_v10  ;;  %v4515_v28 = vrot.slane %v2821_v27, %v2833_v29  ;;  %v1900_v10 = vadd.f32 %v1773_v55, %v4409_v18  ;;  %v1899_v50 = vadd.f32 %v1868_v56, %v4419_v30  ;;  %v4536_v55 = vpop.permute.xlu0 %2775 }
 0x261   : > { %v2341_v42 = vpop.f32.mrf.mxu1  ;;  %v4491_v45 = vpop.f32.mrf.mxu0  ;;  %v1904_v18 = vadd.f32 %v4441_v61, %v4417_v34  ;;  %v1914_v30 = vadd.f32 %v4443_v62, %v4431_v46  ;;  %v1909_v34 = vadd.f32 %v4451_v4, %v4429_v44  ;;  %v1912_v46 = vadd.f32 %v4455_v8, %v4437_v49 }
 0x262   : > { %4655 = vst [vmem:[#allocation12_spill] sm:$0xff] %v4491_v45  ;;  %v2181_v20 = vadd.f32 %v2051_v3, %v1897_v40  ;;  %v2184_v56 = vadd.f32 %v2057_v7, %v1900_v10  ;;  %v2781_v61 = vpop.permute.xlu1 %2780  ;;  %v4664_v40 = vld [vmem:[#allocation5_spill] sm:$0xff] }
 0x263   : > { %v2343_v48 = vpop.f32.mrf.mxu1  ;;  %v2188_v49 = vadd.f32 %v4465_v15, %v1904_v18 }
 0x264   : > { %v2468_v62 = vadd.f32 %v2341_v42, %v2184_v56  ;;  %v2193_v42 = vadd.f32 %v4664_v40, %v1909_v34  ;;  %v4668_v56 = vld [vmem:[#allocation8_spill] sm:$0xff] }
 0x265   : > { %v4493_v43 = vpop.f32.mrf.mxu0 }
 0x266   : > { %4656 = vst [vmem:[#allocation13_spill] sm:$0xff] %v4493_v43  ;;  %v4495_v24 = vpop.f32.mrf.mxu1  ;;  %v4509_v43 = vrot.slane %v2821_v27, %v2829_v25 }
 0x267   : > { %4657 = vst [vmem:[#allocation14_spill] sm:$0xff] %v4495_v24  ;;  %v4500_v31 = vpop.f32.mrf.mxu0  ;;  %v1898_v24 = vadd.f32 %v1769_v53, %v4407_v14  ;;  %v1905_v14 = vadd.f32 %v1878_v60, %v4427_v41  ;;  %v2465_v53 = vadd.f32 %v2335_v35, %v2181_v20  ;;  %v1907_v41 = vadd.f32 %v4449_v2, %v4425_v38 }
 0x268   : > { %4658 = vst [vmem:[#allocation15_spill] sm:$0xff] %v4500_v31  ;;  %v4503_v23 = vpop.f32.mrf.mxu1  ;;  %v1903_v31 = vadd.f32 %v1779_v59, %v4413_v26  ;;  %v1913_v38 = vadd.f32 %v4459_v11, %v4439_v52  ;;  %v2183_v52 = vadd.f32 %v4467_v16, %v1899_v50  ;;  %v4660_v11 = vld [vmem:[#allocation2_spill] sm:$0xff]  ;;  %v4667_v50 = vld [vmem:[#allocation11_spill] sm:$0xff] }
 0x269   : > { %v4505_v45 = vpop.f32.mrf.mxu0  ;;  %v2182_v32 = vadd.f32 %v2053_v5, %v1898_v24 }
 0x26a   : > { %4659 = vst [vmem:[#allocation16_spill] sm:$0xff] %v4505_v45  ;;  %v4513_v19 = vpop.f32.mrf.mxu1  ;;  %v1901_v45 = vadd.f32 %v1775_v57, %v4411_v22  ;;  %v1906_v22 = vadd.f32 %v4445_v63, %v4421_v33  ;;  %v1910_v33 = vadd.f32 %v4453_v6, %v4433_v47  ;;  %v2187_v44 = vadd.f32 %v4461_v12, %v1903_v31 }
 0x26b   : > { %v4521_v25 = vpop.f32.mrf.mxu0  ;;  %v2466_v57 = vadd.f32 %v2337_v37, %v2182_v32  ;;  %v2186_v47 = vadd.f32 %v4463_v13, %v1902_v21  ;;  %v2192_v12 = vadd.f32 %v4660_v11, %v1908_v51  ;;  %v4661_v13 = vld [vmem:[#allocation3_spill] sm:$0xff]  ;;  %v4662_v21 = vld [vmem:[#allocation4_spill] sm:$0xff]  ;;  %v2786_v32 = vpop.permute.xlu1 %2785 }
 0x26c   : > { %v4525_v54 = vpop.f32.mrf.mxu1  ;;  %v2185_v39 = vadd.f32 %v4457_v9, %v1901_v45  ;;  %v2190_v9 = vadd.f32 %v4469_v17, %v1906_v22  ;;  %v2191_v20 = vadd.f32 %v4661_v13, %v1907_v41  ;;  %v2189_v15 = vadd.f32 %v4662_v21, %v1905_v14  ;;  %v4665_v17 = vld [vmem:[#allocation6_spill] sm:$0xff] }
 0x26d   : > { %v2619_v26 = vpop.f32.mrf.mxu0  ;;  %v2198_v45 = vadd.f32 %v4665_v17, %v1914_v30  ;;  %v2470_v51 = vadd.f32 %v4667_v50, %v2186_v47  ;;  %v4670_v30 = vld [vmem:[#allocation12_spill] sm:$0xff]  ;;  %v4671_v47 = vld [vmem:[#allocation10_spill] sm:$0xff] }
 0x26e   : > { %v2749_v58 = vadd.f32 %v2619_v26, %v2465_v53  ;;  %v4540_v59 = vpop.f32.mrf.mxu1  ;;  %v2469_v4 = vadd.f32 %v2343_v48, %v2185_v39  ;;  %v4663_v24 = vld [vmem:[#allocation14_spill] sm:$0xff]  ;;  %v4666_v48 = vld [vmem:[#allocation7_spill] sm:$0xff]  ;;  %v2472_v53 = vadd.f32 %v4503_v23, %v2188_v49  ;;  %v2197_v49 = vadd.f32 %v4671_v47, %v1913_v38 }
 0x26f   : > { %v2621_v60 = vpop.f32.mrf.mxu0  ;;  %v2471_v31 = vadd.f32 %v4663_v24, %v2187_v44  ;;  %v2194_v10 = vadd.f32 %v4666_v48, %v1910_v33  ;;  %v2467_v33 = vadd.f32 %v4670_v30, %v2183_v52  ;;  %v2475_v52 = vadd.f32 %v4525_v54, %v2191_v20  ;;  %v4673_v13 = vld [vmem:[#allocation15_spill] sm:$0xff] }
 0x270   : > { %v2803_v63 = vadd.f32 %v4536_v55, %v2749_v58  ;;  %v2750_v0 = vadd.f32 %v2621_v60, %v2466_v57  ;;  %v4552_v2 = vpop.f32.mrf.mxu1  ;;  %v2195_v57 = vadd.f32 %v4668_v56, %v1911_v1  ;;  %v4669_v58 = vld [vmem:[#allocation9_spill] sm:$0xff]  ;;  %v2473_v21 = vadd.f32 %v4673_v13, %v2189_v15 }
 0x271   : > { %v2625_v3 = vpop.f32.mrf.mxu0  ;;  %v2196_v34 = vadd.f32 %v4669_v58, %v1912_v46  ;;  %v2477_v24 = vadd.f32 %v4540_v59, %v2193_v42  ;;  %v2478_v48 = vadd.f32 %v4552_v2, %v2194_v10 }
 0x272   : > { %v2838_v5 = vmul.f32 %v4507_v36, %v2803_v63  ;;  %v2804_v6 = vadd.f32 %v4536_v55, %v2750_v0  ;;  %v2752_v7 = vadd.f32 %v2625_v3, %v2468_v62  ;;  %v4565_v8 = vpop.f32.mrf.mxu1  ;;  %v2474_v62 = vadd.f32 %v4513_v19, %v2190_v9  ;;  %v4672_v3 = vld [vmem:[#allocation13_spill] sm:$0xff]  ;;  %v2791_v9 = vpop.permute.xlu0 %2790 }
 0x273   : > { %v2627_v16 = vpop.f32.mrf.mxu0  ;;  %v2480_v2 = vadd.f32 %v4565_v8, %v2196_v34 }
 0x274   : > { %2856 = vst [vmem:[%s4557_s8] sm:$0xff] %v2838_v5  ;;  %v2839_v27 = vmul.f32 %v4509_v43, %v2804_v6  ;;  %v2806_v35 = vadd.f32 %v2781_v61, %v2752_v7  ;;  %v2753_v29 = vadd.f32 %v2627_v16, %v2469_v4  ;;  %v4574_v37 = vpop.f32.mrf.mxu1  ;;  %v2476_v4 = vadd.f32 %v4672_v3, %v2192_v12 }
 0x275   : > { %v2631_v14 = vpop.f32.mrf.mxu0  ;;  %v2481_v8 = vadd.f32 %v4574_v37, %v2197_v49 }
 0x276   : > { %2857 = vst [vmem:[%s4557_s8 + $0x8] sm:$0xff] %v2839_v27  ;;  %v2841_v18 = vmul.f32 %v4507_v36, %v2806_v35  ;;  %v2807_v22 = vadd.f32 %v2781_v61, %v2753_v29  ;;  %v2755_v26 = vadd.f32 %v2631_v14, %v2471_v31  ;;  %v3343_v41 = vpop.f32.mrf.mxu1  ;;  %v4674_v35 = vld [vmem:[#allocation16_spill] sm:$0xff]  ;;  %v2479_v14 = vadd.f32 %v4521_v25, %v2195_v57 }
 0x277   : > { %v2754_v39 = vadd.f32 %v3343_v41, %v2470_v51  ;;  %v2633_v60 = vpop.f32.mrf.mxu0  ;;  %v2482_v29 = vadd.f32 %v4674_v35, %v2198_v45  ;;  %v2801_v41 = vpop.permute.xlu0 %2800 }
 0x278   : > { %2860 = vst [vmem:[%s4557_s8 + $0x18] sm:$0xff] %v2841_v18  ;;  %v2842_v23 = vmul.f32 %v4509_v43, %v2807_v22  ;;  %v2809_v63 = vadd.f32 %v2786_v32, %v2755_v26  ;;  %v2756_v0 = vadd.f32 %v2633_v60, %v2472_v53  ;;  %v2720_v44 = vpop.f32.mrf.mxu1  ;;  %v2796_v18 = vpop.permute.xlu1 %2795 }
 0x279   : > { %v2808_v1 = vadd.f32 %v2781_v61, %v2754_v39  ;;  %v2751_v46 = vadd.f32 %v2720_v44, %v2467_v33  ;;  %v2637_v5 = vpop.f32.mrf.mxu0 }
 0x27a   : > { %2861 = vst [vmem:[%s4557_s8 + $0x20] sm:$0xff] %v2842_v23  ;;  %v2844_v6 = vmul.f32 %v4507_v36, %v2809_v63  ;;  %v2810_v19 = vadd.f32 %v2786_v32, %v2756_v0  ;;  %v2758_v7 = vadd.f32 %v2637_v5, %v2474_v62  ;;  %v3346_v11 = vpop.f32.mrf.mxu1 }
 0x27b   : > { %v2843_v38 = vmul.f32 %v4515_v28, %v2808_v1  ;;  %v2805_v12 = vadd.f32 %v4536_v55, %v2751_v46  ;;  %v2760_v61 = vadd.f32 %v3346_v11, %v2476_v4  ;;  %v2639_v16 = vpop.f32.mrf.mxu0 }
 0x27c   : > { %2863 = vst [vmem:[%s4557_s8 + $0x30] sm:$0xff] %v2844_v6  ;;  %v2845_v54 = vmul.f32 %v4509_v43, %v2810_v19  ;;  %v2812_v20 = vadd.f32 %v2791_v9, %v2758_v7  ;;  %v2759_v31 = vadd.f32 %v2639_v16, %v2475_v52  ;;  %v2730_v27 = vpop.f32.mrf.mxu1 }
 0x27d   : > { %2862 = vst.msk [vmem:[%s4557_s8 + $0x28] sm:$0xff] %vm2858_vm12, %v2843_v38  ;;  %v2840_v15 = vmul.f32 %v4515_v28, %v2805_v12  ;;  %v2814_v40 = vadd.f32 %v2791_v9, %v2760_v61  ;;  %v2757_v55 = vadd.f32 %v2730_v27, %v2473_v21  ;;  %v2643_v17 = vpop.f32.mrf.mxu0 }
 0x27e   : > { %2864 = vst [vmem:[%s4557_s8 + $0x38] sm:$0xff] %v2845_v54  ;;  %v2847_v59 = vmul.f32 %v4507_v36, %v2812_v20  ;;  %v2813_v42 = vadd.f32 %v2791_v9, %v2759_v31  ;;  %v2761_v50 = vadd.f32 %v2643_v17, %v2477_v24  ;;  %v3349_v51 = vpop.f32.mrf.mxu1 }
 0x27f   : > { %2859 = vst.msk [vmem:[%s4557_s8 + $0x10] sm:$0xff] %vm2858_vm12, %v2840_v15  ;;  %v2849_v45 = vmul.f32 %v4515_v28, %v2814_v40  ;;  %v2811_v53 = vadd.f32 %v2786_v32, %v2757_v55  ;;  %v2766_v22 = vadd.f32 %v3349_v51, %v2482_v29  ;;  %v2645_v26 = vpop.f32.mrf.mxu0 }
 0x280   : > { %2866 = vst [vmem:[%s4557_s8 + $0x48] sm:$0xff] %v2847_v59  ;;  %v2848_v10 = vmul.f32 %v4509_v43, %v2813_v42  ;;  %v2815_v56 = vadd.f32 %v2796_v18, %v2761_v50  ;;  %v2762_v58 = vadd.f32 %v2645_v26, %v2478_v48  ;;  %v2740_v25 = vpop.f32.mrf.mxu1 }
 0x281   : > { %2868 = vst.msk [vmem:[%s4557_s8 + $0x58] sm:$0xff] %vm2858_vm12, %v2849_v45  ;;  %v2846_v57 = vmul.f32 %v4515_v28, %v2811_v53  ;;  %v2820_v32 = vadd.f32 %v2801_v41, %v2766_v22  ;;  %v2763_v30 = vadd.f32 %v2740_v25, %v2479_v14  ;;  %v2649_v33 = vpop.f32.mrf.mxu0 }
 0x282   : > { %2867 = vst [vmem:[%s4557_s8 + $0x50] sm:$0xff] %v2848_v10  ;;  %v2850_v34 = vmul.f32 %v4507_v36, %v2815_v56  ;;  %v2816_v39 = vadd.f32 %v2796_v18, %v2762_v58  ;;  %v2764_v60 = vadd.f32 %v2649_v33, %v2480_v2 }
 0x283   : > { %2865 = vst.msk [vmem:[%s4557_s8 + $0x40] sm:$0xff] %vm2858_vm12, %v2846_v57  ;;  %v2855_v62 = vmul.f32 %v4515_v28, %v2820_v32  ;;  %v2817_v23 = vadd.f32 %v2796_v18, %v2763_v30  ;;  %v2651_v63 = vpop.f32.mrf.mxu0 }
 0x284   : > { %2869 = vst [vmem:[%s4557_s8 + $0x60] sm:$0xff] %v2850_v34  ;;  %v2851_v0 = vmul.f32 %v4509_v43, %v2816_v39  ;;  %v2818_v44 = vadd.f32 %v2801_v41, %v2764_v60  ;;  %v2765_v47 = vadd.f32 %v2651_v63, %v2481_v8 }
 0x285   : > { %2874 = vst.msk [vmem:[%s4557_s8 + $0x88] sm:$0xff] %vm2858_vm12, %v2855_v62  ;;  %v2852_v37 = vmul.f32 %v4515_v28, %v2817_v23 }
 0x286   : > { %2870 = vst [vmem:[%s4557_s8 + $0x68] sm:$0xff] %v2851_v0  ;;  %v2853_v49 = vmul.f32 %v4507_v36, %v2818_v44  ;;  %v2819_v3 = vadd.f32 %v2801_v41, %v2765_v47 }
 0x287   : > { %2871 = vst.msk [vmem:[%s4557_s8 + $0x70] sm:$0xff] %vm2858_vm12, %v2852_v37 }
 0x288   : > { %2872 = vst [vmem:[%s4557_s8 + $0x78] sm:$0xff] %v2853_v49  ;;  %v2854_v4 = vmul.f32 %v4509_v43, %v2819_v3 }
 0x28a   : > { %2873 = vst [vmem:[%s4557_s8 + $0x80] sm:$0xff] %v2854_v4 }
 0x28b PF: > { %s14_s15 = sadd.s32 1, %s3657_s15  }
 0x28c   : > { %p11_p4 = scmp.ge.s32.totalorder %s14_s15, 4  }
 0x28e   :  { %13 = sbr.rel (!%p11_p4) target bundleno = 1 (0x1), region = 74 }

</bundles_post_ra>
